<compile_context>
chip_gen: v7x
topology: tpu7x:2x2x1
jax: 0.10.0
libtpu: 0.0.40
codegen_flags: <defaults>
</compile_context>

<pallas_src>
import functools

import numpy as np
import jax
import jax.numpy as jnp
from jax import lax
from jax.experimental import pallas as pl
from jax.experimental.pallas import tpu as pltpu


CONV_CHANNELS = (32, 64, 128)
FC_DIMS = (128, 64, 1)


# ---------------------------------------------------------------------------
# Static geometry of the flattened-padded layout
# ---------------------------------------------------------------------------
def _plan(batch, input_channels, seq_len, n_feat):
    chans = (input_channels,) + CONV_CHANNELS
    stages = []
    h, w = seq_len, n_feat
    for s in range(3):
        hp, wp = h + 2, w + 2
        g = batch * hp * wp              # rows of the flattened padded input
        l = g - (2 * wp + 2)             # rows of the conv output (tap-sliced length)
        lp = l - wp - 1                  # rows of the pooled-candidate array
        stages.append(dict(cin=chans[s], cout=chans[s + 1],
                           H=h, W=w, Hp=hp, Wp=wp, Hc=h // 2, Wc=w // 2,
                           G=g, L=l, Lp=lp))
        h, w = h // 2, w // 2
    return stages


def _selection_matrices(batch, stages):
    """0/1 matrices that pick pooled windows out of the flattened conv output and
    scatter them into the next stage's zero-padded flattened layout (or into
    (spatial, batch)-blocked feature rows for the MLP head)."""
    mats = []
    for s, st in enumerate(stages):
        hp, wp, hc, wc = st["Hp"], st["Wp"], st["Hc"], st["Wc"]
        if s + 1 < len(stages):
            nhp, nwp = stages[s + 1]["Hp"], stages[s + 1]["Wp"]
            sel = np.zeros((batch * nhp * nwp, st["Lp"]), np.float32)
            for n in range(batch):
                for i in range(hc):
                    for j in range(wc):
                        src = n * hp * wp + 2 * i * wp + 2 * j
                        dst = n * nhp * nwp + (i + 1) * nwp + (j + 1)
                        sel[dst, src] = 1.0
        else:
            sel = np.zeros((hc * wc * batch, st["Lp"]), np.float32)
            for n in range(batch):
                for i in range(hc):
                    for j in range(wc):
                        src = n * hp * wp + 2 * i * wp + 2 * j
                        dst = (i * wc + j) * batch + n
                        sel[dst, src] = 1.0
        mats.append(sel)
    return mats


# ---------------------------------------------------------------------------
# Fused whole-network kernel
# ---------------------------------------------------------------------------
def _make_kernel(batch, stages):
    s1, s2, s3 = stages
    n_sp3 = s3["Hc"] * s3["Wc"]

    def conv_relu(p_ref, w_ref, b_ref, st):
        """3x3 'same' conv + bias + ReLU on a flattened padded image.

        Each tap (kh, kw) is a sublane-offset slice of length L; rows that fall in
        the padding ring become garbage but are dropped by the selection matmul."""
        L, Wp, cin, cout = st["L"], st["Wp"], st["cin"], st["cout"]
        acc = jnp.zeros((L, cout), jnp.float32)
        for t in range(9):
            off = (t // 3) * Wp + (t % 3)
            patch = p_ref[off:off + L, :]                      # (L, cin)
            if cin == 1:
                # rank-1 update: VPU broadcast multiply-add (don't waste the MXU)
                acc = acc + patch * w_ref[t:t + 1, :]
            else:
                acc = acc + jnp.dot(patch, w_ref[t * cin:(t + 1) * cin, :],
                                    preferred_element_type=jnp.float32)
        return jnp.maximum(acc + b_ref[...], 0.0)

    def pool2x2(r_ref, st):
        """2x2 floor max-pool on the flattened conv output: window (i, j) covers
        rows {g, g+1, g+Wp, g+Wp+1} with g = 2i*Wp + 2j."""
        Lp, Wp = st["Lp"], st["Wp"]
        a = jnp.maximum(r_ref[0:Lp, :], r_ref[1:Lp + 1, :])
        b = jnp.maximum(r_ref[Wp:Wp + Lp, :], r_ref[Wp + 1:Wp + 1 + Lp, :])
        return jnp.maximum(a, b)

    def kernel(xp_ref, sel12_ref, sel23_ref, sel3f_ref,
               w1c_ref, b1c_ref, w2c_ref, b2c_ref, w3c_ref, b3c_ref,
               w1f_ref, b1f_ref, w2f_ref, b2f_ref, w3f_ref, b3f_ref,
               o_ref,
               r1_ref, p2_ref, r2_ref, p3_ref, r3_ref, f_ref):
        # ---- stage 1: conv(Cin -> 32) + ReLU + pool, routed into stage-2 layout
        r1_ref[...] = conv_relu(xp_ref, w1c_ref, b1c_ref, s1)
        p2_ref[...] = jnp.dot(sel12_ref[...], pool2x2(r1_ref, s1),
                              preferred_element_type=jnp.float32)
        # ---- stage 2: conv(32 -> 64) + ReLU + pool
        r2_ref[...] = conv_relu(p2_ref, w2c_ref, b2c_ref, s2)
        p3_ref[...] = jnp.dot(sel23_ref[...], pool2x2(r2_ref, s2),
                              preferred_element_type=jnp.float32)
        # ---- stage 3: conv(64 -> 128) + ReLU + pool, routed into (spatial, batch)
        r3_ref[...] = conv_relu(p3_ref, w3c_ref, b3c_ref, s3)
        f_ref[...] = jnp.dot(sel3f_ref[...], pool2x2(r3_ref, s3),
                             preferred_element_type=jnp.float32)

        # ---- fc1 (+ReLU): sum over stage-3 spatial positions of (B, C3) @ (C3, 128)
        c3 = s3["cout"]
        h1 = jnp.zeros((batch, w1f_ref.shape[1]), jnp.float32)
        for s in range(n_sp3):
            h1 = h1 + jnp.dot(f_ref[s * batch:(s + 1) * batch, :],
                              w1f_ref[s * c3:(s + 1) * c3, :],
                              preferred_element_type=jnp.float32)
        h1 = jnp.maximum(h1 + b1f_ref[...], 0.0)
        # ---- fc2 (+ReLU)
        h2 = jnp.maximum(jnp.dot(h1, w2f_ref[...],
                                 preferred_element_type=jnp.float32)
                         + b2f_ref[...], 0.0)
        # ---- fc3 (single output unit): lane reduction instead of an N=1 matmul
        z = jnp.sum(h2 * w3f_ref[...], axis=-1, keepdims=True) + b3f_ref[...]
        # ---- numerically stable sigmoid
        ez = jnp.exp(-jnp.abs(z))
        o_ref[...] = jnp.where(z >= 0.0, 1.0 / (1.0 + ez), ez / (1.0 + ez))

    scratch = [
        pltpu.VMEM((s1["L"], s1["cout"]), jnp.float32),        # r1: conv1 output
        pltpu.VMEM((s2["G"], s1["cout"]), jnp.float32),        # p2: padded stage-2 input
        pltpu.VMEM((s2["L"], s2["cout"]), jnp.float32),        # r2
        pltpu.VMEM((s3["G"], s2["cout"]), jnp.float32),        # p3
        pltpu.VMEM((s3["L"], s3["cout"]), jnp.float32),        # r3
        pltpu.VMEM((n_sp3 * batch, s3["cout"]), jnp.float32),  # flattened features
    ]
    return kernel, scratch


@functools.lru_cache(maxsize=None)
def _build(batch, input_channels, seq_len, n_feat):
    stages = _plan(batch, input_channels, seq_len, n_feat)
    sels = tuple(jnp.asarray(m) for m in _selection_matrices(batch, stages))
    kernel, scratch = _make_kernel(batch, stages)
    fwd = pl.pallas_call(
        kernel,
        out_shape=jax.ShapeDtypeStruct((batch, 1), jnp.float32),
        scratch_shapes=scratch,
    )
    return fwd, sels, stages


# ---------------------------------------------------------------------------
# Public forward (PyTorch-layout params, NCHW input) + parameter init
# ---------------------------------------------------------------------------
def stock_cnn_forward(x_nchw, params):
    """Matches StockCNN.forward (dropout = identity / eval semantics)."""
    batch, cin, h0, w0 = x_nchw.shape
    fwd, sels, stages = _build(batch, cin, h0, w0)
    s1, _, s3 = stages
    c3 = s3["cout"]
    n_sp3 = s3["Hc"] * s3["Wc"]

    # conv weights -> (9*Cin, Cout), rows ordered (kh, kw, cin); biases -> (1, Cout)
    cw, cb = [], []
    for i in (1, 2, 3):
        w = params[f"conv{i}_w"]                               # (Cout, Cin, 3, 3)
        cw.append(jnp.transpose(w, (2, 3, 1, 0)).reshape(9 * w.shape[1], w.shape[0]))
        cb.append(params[f"conv{i}_b"].reshape(1, -1))

    # fc1 rows permuted from PyTorch's NCHW-flatten order to (spatial, channel) order
    w1 = params["fc1_w"]                                       # (128, C3 * n_sp3)
    w1f = jnp.transpose(w1.T.reshape(c3, n_sp3, w1.shape[0]), (1, 0, 2))
    w1f = w1f.reshape(n_sp3 * c3, w1.shape[0])
    w2f = params["fc2_w"].T                                    # (128, 64)
    w3f = params["fc3_w"]                                      # (1, 64), used as a row
    b1f = params["fc1_b"].reshape(1, -1)
    b2f = params["fc2_b"].reshape(1, -1)
    b3f = params["fc3_b"].reshape(1, 1)

    # zero-pad the input once and flatten to (batch*Hp*Wp, Cin), channels-last
    x = jnp.transpose(x_nchw.astype(jnp.float32), (0, 2, 3, 1))
    xp = jnp.pad(x, ((0, 0), (1, 1), (1, 1), (0, 0))).reshape(s1["G"], s1["cin"])

    return fwd(xp, *sels,
               cw[0], cb[0], cw[1], cb[1], cw[2], cb[2],
               w1f, b1f, w2f, b2f, w3f, b3f)


def init_params(key, input_channels=1, sequence_length=20, n_features=11):
    """Synthetic parameters in PyTorch layouts (Conv2d: (Cout,Cin,3,3); Linear: (out,in))."""
    params = {}
    keys = jax.random.split(key, 12)
    conv_dims = [(input_channels, CONV_CHANNELS[0]),
                 (CONV_CHANNELS[0], CONV_CHANNELS[1]),
                 (CONV_CHANNELS[1], CONV_CHANNELS[2])]
    k = 0
    for i, (cin, cout) in enumerate(conv_dims, start=1):
        scale = float(1.0 / np.sqrt(9.0 * cin))
        params[f"conv{i}_w"] = scale * jax.random.normal(keys[k], (cout, cin, 3, 3), jnp.float32)
        params[f"conv{i}_b"] = 0.01 * jax.random.normal(keys[k + 1], (cout,), jnp.float32)
        k += 2
    h, w = sequence_length, n_features
    for _ in range(3):
        h, w = h // 2, w // 2
    flatten = CONV_CHANNELS[2] * h * w
    fc_dims = [(flatten, FC_DIMS[0]), (FC_DIMS[0], FC_DIMS[1]), (FC_DIMS[1], FC_DIMS[2])]
    for i, (fin, fout) in enumerate(fc_dims, start=1):
        scale = float(1.0 / np.sqrt(float(fin)))
        params[f"fc{i}_w"] = scale * jax.random.normal(keys[k], (fout, fin), jnp.float32)
        params[f"fc{i}_b"] = 0.01 * jax.random.normal(keys[k + 1], (fout,), jnp.float32)
        k += 2
    return params


# ---------------------------------------------------------------------------
# Pure-XLA reference (for an in-script correctness check)
# ---------------------------------------------------------------------------
def reference_forward(x_nchw, params):
    out = x_nchw.astype(jnp.float32)
    for i in (1, 2, 3):
        out = lax.conv_general_dilated(
            out, params[f"conv{i}_w"], window_strides=(1, 1),
            padding=((1, 1), (1, 1)),
            dimension_numbers=("NCHW", "OIHW", "NCHW"),
            precision=lax.Precision.HIGHEST)
        out = jnp.maximum(out + params[f"conv{i}_b"][None, :, None, None], 0.0)
        out = lax.reduce_window(out, -jnp.inf, lax.max,
                                (1, 1, 2, 2), (1, 1, 2, 2), "VALID")
    feat = out.reshape(out.shape[0], -1)                       # NCHW flatten
    h1 = jnp.maximum(jnp.dot(feat, params["fc1_w"].T,
                             precision=lax.Precision.HIGHEST) + params["fc1_b"], 0.0)
    h2 = jnp.maximum(jnp.dot(h1, params["fc2_w"].T,
                             precision=lax.Precision.HIGHEST) + params["fc2_b"], 0.0)
    z = jnp.dot(h2, params["fc3_w"].T,
                precision=lax.Precision.HIGHEST) + params["fc3_b"]
    return jax.nn.sigmoid(z)


if __name__ == "__main__":
    key = jax.random.PRNGKey(0)
    k_x, k_p = jax.random.split(key)

    batch, in_ch, seq_len, n_feat = 2, 1, 20, 11
    x = jax.random.normal(k_x, (batch, in_ch, seq_len, n_feat), jnp.float32)
    params = init_params(k_p, in_ch, seq_len, n_feat)

    fwd = jax.jit(stock_cnn_forward)
    out = jax.block_until_ready(fwd(x, params))
    ref = jax.block_until_ready(reference_forward(x, params))

    assert out.shape == (batch, 1), out.shape
    assert bool(jnp.all(jnp.isfinite(out)))
    assert bool(jnp.all((out > 0.0) & (out < 1.0)))            # sigmoid range
    assert bool(jnp.allclose(out, ref, rtol=1e-3, atol=1e-3)), (out, ref)
    print("KERNEL_OK")
</pallas_src>

<mosaic_0001>
module attributes {stable_mosaic.version = 11 : i64} {
  func.func @kernel(%arg0: memref<572x1xf32, #tpu.memory_space<vmem>>, %arg1: memref<168x530xf32, #tpu.memory_space<vmem>>, %arg2: memref<56x144xf32, #tpu.memory_space<vmem>>, %arg3: memref<4x41xf32, #tpu.memory_space<vmem>>, %arg4: memref<9x32xf32, #tpu.memory_space<vmem>>, %arg5: memref<1x32xf32, #tpu.memory_space<vmem>>, %arg6: memref<288x64xf32, #tpu.memory_space<vmem>>, %arg7: memref<1x64xf32, #tpu.memory_space<vmem>>, %arg8: memref<576x128xf32, #tpu.memory_space<vmem>>, %arg9: memref<1x128xf32, #tpu.memory_space<vmem>>, %arg10: memref<256x128xf32, #tpu.memory_space<vmem>>, %arg11: memref<1x128xf32, #tpu.memory_space<vmem>>, %arg12: memref<128x64xf32, #tpu.memory_space<vmem>>, %arg13: memref<1x64xf32, #tpu.memory_space<vmem>>, %arg14: memref<1x64xf32, #tpu.memory_space<vmem>>, %arg15: memref<1x1xf32, #tpu.memory_space<vmem>>, %arg16: memref<2x1xf32, #tpu.memory_space<vmem>>, %arg17: memref<544x32xf32, #tpu.memory_space<vmem>>, %arg18: memref<168x32xf32, #tpu.memory_space<vmem>>, %arg19: memref<152x64xf32, #tpu.memory_space<vmem>>, %arg20: memref<56x64xf32, #tpu.memory_space<vmem>>, %arg21: memref<46x128xf32, #tpu.memory_space<vmem>>, %arg22: memref<4x128xf32, #tpu.memory_space<vmem>>) attributes {dimension_semantics = [], scalar_prefetch = 0 : i64, scratch_operands = 6 : i64, tpu.core_type = #tpu.core_type<tc>} {
    %cst = arith.constant 0.000000e+00 : f32
    %0 = vector.broadcast %cst : f32 to vector<544x32xf32>
    %c0 = arith.constant 0 : index
    %c0_0 = arith.constant 0 : index
    %1 = vector.load %arg0[%c0, %c0_0] : memref<572x1xf32, #tpu.memory_space<vmem>>, vector<544x1xf32>
    %c0_1 = arith.constant 0 : index
    %c0_2 = arith.constant 0 : index
    %2 = vector.load %arg4[%c0_1, %c0_2] : memref<9x32xf32, #tpu.memory_space<vmem>>, vector<1x32xf32>
    %3 = vector.broadcast %1 : vector<544x1xf32> to vector<544x32xf32>
    %4 = vector.broadcast %2 : vector<1x32xf32> to vector<544x32xf32>
    %5 = arith.mulf %3, %4 : vector<544x32xf32>
    %6 = arith.addf %0, %5 : vector<544x32xf32>
    %c1 = arith.constant 1 : index
    %c0_3 = arith.constant 0 : index
    %7 = vector.load %arg0[%c1, %c0_3] : memref<572x1xf32, #tpu.memory_space<vmem>>, vector<544x1xf32>
    %c1_4 = arith.constant 1 : index
    %c0_5 = arith.constant 0 : index
    %8 = vector.load %arg4[%c1_4, %c0_5] : memref<9x32xf32, #tpu.memory_space<vmem>>, vector<1x32xf32>
    %9 = vector.broadcast %7 : vector<544x1xf32> to vector<544x32xf32>
    %10 = vector.broadcast %8 : vector<1x32xf32> to vector<544x32xf32>
    %11 = arith.mulf %9, %10 : vector<544x32xf32>
    %12 = arith.addf %6, %11 : vector<544x32xf32>
    %c2 = arith.constant 2 : index
    %c0_6 = arith.constant 0 : index
    %13 = vector.load %arg0[%c2, %c0_6] : memref<572x1xf32, #tpu.memory_space<vmem>>, vector<544x1xf32>
    %c2_7 = arith.constant 2 : index
    %c0_8 = arith.constant 0 : index
    %14 = vector.load %arg4[%c2_7, %c0_8] : memref<9x32xf32, #tpu.memory_space<vmem>>, vector<1x32xf32>
    %15 = vector.broadcast %13 : vector<544x1xf32> to vector<544x32xf32>
    %16 = vector.broadcast %14 : vector<1x32xf32> to vector<544x32xf32>
    %17 = arith.mulf %15, %16 : vector<544x32xf32>
    %18 = arith.addf %12, %17 : vector<544x32xf32>
    %c13 = arith.constant 13 : index
    %c0_9 = arith.constant 0 : index
    %19 = vector.load %arg0[%c13, %c0_9] : memref<572x1xf32, #tpu.memory_space<vmem>>, vector<544x1xf32>
    %c3 = arith.constant 3 : index
    %c0_10 = arith.constant 0 : index
    %20 = vector.load %arg4[%c3, %c0_10] : memref<9x32xf32, #tpu.memory_space<vmem>>, vector<1x32xf32>
    %21 = vector.broadcast %19 : vector<544x1xf32> to vector<544x32xf32>
    %22 = vector.broadcast %20 : vector<1x32xf32> to vector<544x32xf32>
    %23 = arith.mulf %21, %22 : vector<544x32xf32>
    %24 = arith.addf %18, %23 : vector<544x32xf32>
    %c14 = arith.constant 14 : index
    %c0_11 = arith.constant 0 : index
    %25 = vector.load %arg0[%c14, %c0_11] : memref<572x1xf32, #tpu.memory_space<vmem>>, vector<544x1xf32>
    %c4 = arith.constant 4 : index
    %c0_12 = arith.constant 0 : index
    %26 = vector.load %arg4[%c4, %c0_12] : memref<9x32xf32, #tpu.memory_space<vmem>>, vector<1x32xf32>
    %27 = vector.broadcast %25 : vector<544x1xf32> to vector<544x32xf32>
    %28 = vector.broadcast %26 : vector<1x32xf32> to vector<544x32xf32>
    %29 = arith.mulf %27, %28 : vector<544x32xf32>
    %30 = arith.addf %24, %29 : vector<544x32xf32>
    %c15 = arith.constant 15 : index
    %c0_13 = arith.constant 0 : index
    %31 = vector.load %arg0[%c15, %c0_13] : memref<572x1xf32, #tpu.memory_space<vmem>>, vector<544x1xf32>
    %c5 = arith.constant 5 : index
    %c0_14 = arith.constant 0 : index
    %32 = vector.load %arg4[%c5, %c0_14] : memref<9x32xf32, #tpu.memory_space<vmem>>, vector<1x32xf32>
    %33 = vector.broadcast %31 : vector<544x1xf32> to vector<544x32xf32>
    %34 = vector.broadcast %32 : vector<1x32xf32> to vector<544x32xf32>
    %35 = arith.mulf %33, %34 : vector<544x32xf32>
    %36 = arith.addf %30, %35 : vector<544x32xf32>
    %c26 = arith.constant 26 : index
    %c0_15 = arith.constant 0 : index
    %37 = vector.load %arg0[%c26, %c0_15] : memref<572x1xf32, #tpu.memory_space<vmem>>, vector<544x1xf32>
    %c6 = arith.constant 6 : index
    %c0_16 = arith.constant 0 : index
    %38 = vector.load %arg4[%c6, %c0_16] : memref<9x32xf32, #tpu.memory_space<vmem>>, vector<1x32xf32>
    %39 = vector.broadcast %37 : vector<544x1xf32> to vector<544x32xf32>
    %40 = vector.broadcast %38 : vector<1x32xf32> to vector<544x32xf32>
    %41 = arith.mulf %39, %40 : vector<544x32xf32>
    %42 = arith.addf %36, %41 : vector<544x32xf32>
    %c27 = arith.constant 27 : index
    %c0_17 = arith.constant 0 : index
    %43 = vector.load %arg0[%c27, %c0_17] : memref<572x1xf32, #tpu.memory_space<vmem>>, vector<544x1xf32>
    %c7 = arith.constant 7 : index
    %c0_18 = arith.constant 0 : index
    %44 = vector.load %arg4[%c7, %c0_18] : memref<9x32xf32, #tpu.memory_space<vmem>>, vector<1x32xf32>
    %45 = vector.broadcast %43 : vector<544x1xf32> to vector<544x32xf32>
    %46 = vector.broadcast %44 : vector<1x32xf32> to vector<544x32xf32>
    %47 = arith.mulf %45, %46 : vector<544x32xf32>
    %48 = arith.addf %42, %47 : vector<544x32xf32>
    %c28 = arith.constant 28 : index
    %c0_19 = arith.constant 0 : index
    %49 = vector.load %arg0[%c28, %c0_19] : memref<572x1xf32, #tpu.memory_space<vmem>>, vector<544x1xf32>
    %c8 = arith.constant 8 : index
    %c0_20 = arith.constant 0 : index
    %50 = vector.load %arg4[%c8, %c0_20] : memref<9x32xf32, #tpu.memory_space<vmem>>, vector<1x32xf32>
    %51 = vector.broadcast %49 : vector<544x1xf32> to vector<544x32xf32>
    %52 = vector.broadcast %50 : vector<1x32xf32> to vector<544x32xf32>
    %53 = arith.mulf %51, %52 : vector<544x32xf32>
    %54 = arith.addf %48, %53 : vector<544x32xf32>
    %c0_21 = arith.constant 0 : index
    %c0_22 = arith.constant 0 : index
    %55 = vector.load %arg5[%c0_21, %c0_22] : memref<1x32xf32, #tpu.memory_space<vmem>>, vector<1x32xf32>
    %56 = vector.broadcast %55 : vector<1x32xf32> to vector<544x32xf32>
    %57 = arith.addf %54, %56 : vector<544x32xf32>
    %cst_23 = arith.constant 0.000000e+00 : f32
    %58 = vector.broadcast %cst_23 : f32 to vector<544x32xf32>
    %59 = arith.maximumf %57, %58 : vector<544x32xf32>
    %c0_24 = arith.constant 0 : index
    %c0_25 = arith.constant 0 : index
    %60 = vector.load %arg17[%c0_24, %c0_25] : memref<544x32xf32, #tpu.memory_space<vmem>>, vector<544x32xf32>
    tpu.vector_store %arg17[%c0_24, %c0_25], %59 {strides = array<i32>} : memref<544x32xf32, #tpu.memory_space<vmem>>, vector<544x32xf32>,
    %c0_26 = arith.constant 0 : index
    %c0_27 = arith.constant 0 : index
    %61 = vector.load %arg1[%c0_26, %c0_27] : memref<168x530xf32, #tpu.memory_space<vmem>>, vector<168x530xf32>
    %c0_28 = arith.constant 0 : index
    %c0_29 = arith.constant 0 : index
    %62 = vector.load %arg17[%c0_28, %c0_29] : memref<544x32xf32, #tpu.memory_space<vmem>>, vector<530x32xf32>
    %c1_30 = arith.constant 1 : index
    %c0_31 = arith.constant 0 : index
    %63 = vector.load %arg17[%c1_30, %c0_31] : memref<544x32xf32, #tpu.memory_space<vmem>>, vector<530x32xf32>
    %64 = arith.maximumf %62, %63 : vector<530x32xf32>
    %c13_32 = arith.constant 13 : index
    %c0_33 = arith.constant 0 : index
    %65 = vector.load %arg17[%c13_32, %c0_33] : memref<544x32xf32, #tpu.memory_space<vmem>>, vector<530x32xf32>
    %c14_34 = arith.constant 14 : index
    %c0_35 = arith.constant 0 : index
    %66 = vector.load %arg17[%c14_34, %c0_35] : memref<544x32xf32, #tpu.memory_space<vmem>>, vector<530x32xf32>
    %67 = arith.maximumf %65, %66 : vector<530x32xf32>
    %68 = arith.maximumf %64, %67 : vector<530x32xf32>
    %cst_36 = arith.constant dense<0.000000e+00> : vector<168x32xf32>
    %69 = tpu.matmul %61, %68, %cst_36 {dimension_numbers = #tpu.dot_dimension_numbers<[1], [0], [0], [1], [0, 0, 1, 1], [], []>} : vector<168x530xf32>, vector<530x32xf32>, vector<168x32xf32> -> vector<168x32xf32>
    %c0_37 = arith.constant 0 : index
    %c0_38 = arith.constant 0 : index
    %70 = vector.load %arg18[%c0_37, %c0_38] : memref<168x32xf32, #tpu.memory_space<vmem>>, vector<168x32xf32>
    tpu.vector_store %arg18[%c0_37, %c0_38], %69 {strides = array<i32>} : memref<168x32xf32, #tpu.memory_space<vmem>>, vector<168x32xf32>,
    %cst_39 = arith.constant 0.000000e+00 : f32
    %71 = vector.broadcast %cst_39 : f32 to vector<152x64xf32>
    %c0_40 = arith.constant 0 : index
    %c0_41 = arith.constant 0 : index
    %72 = vector.load %arg18[%c0_40, %c0_41] : memref<168x32xf32, #tpu.memory_space<vmem>>, vector<152x32xf32>
    %c0_42 = arith.constant 0 : index
    %c0_43 = arith.constant 0 : index
    %73 = vector.load %arg6[%c0_42, %c0_43] : memref<288x64xf32, #tpu.memory_space<vmem>>, vector<32x64xf32>
    %cst_44 = arith.constant dense<0.000000e+00> : vector<152x64xf32>
    %74 = tpu.matmul %72, %73, %cst_44 {dimension_numbers = #tpu.dot_dimension_numbers<[1], [0], [0], [1], [0, 0, 1, 1], [], []>} : vector<152x32xf32>, vector<32x64xf32>, vector<152x64xf32> -> vector<152x64xf32>
    %75 = arith.addf %71, %74 : vector<152x64xf32>
    %c1_45 = arith.constant 1 : index
    %c0_46 = arith.constant 0 : index
    %76 = vector.load %arg18[%c1_45, %c0_46] : memref<168x32xf32, #tpu.memory_space<vmem>>, vector<152x32xf32>
    %c32 = arith.constant 32 : index
    %c0_47 = arith.constant 0 : index
    %77 = vector.load %arg6[%c32, %c0_47] : memref<288x64xf32, #tpu.memory_space<vmem>>, vector<32x64xf32>
    %cst_48 = arith.constant dense<0.000000e+00> : vector<152x64xf32>
    %78 = tpu.matmul %76, %77, %cst_48 {dimension_numbers = #tpu.dot_dimension_numbers<[1], [0], [0], [1], [0, 0, 1, 1], [], []>} : vector<152x32xf32>, vector<32x64xf32>, vector<152x64xf32> -> vector<152x64xf32>
    %79 = arith.addf %75, %78 : vector<152x64xf32>
    %c2_49 = arith.constant 2 : index
    %c0_50 = arith.constant 0 : index
    %80 = vector.load %arg18[%c2_49, %c0_50] : memref<168x32xf32, #tpu.memory_space<vmem>>, vector<152x32xf32>
    %c64 = arith.constant 64 : index
    %c0_51 = arith.constant 0 : index
    %81 = vector.load %arg6[%c64, %c0_51] : memref<288x64xf32, #tpu.memory_space<vmem>>, vector<32x64xf32>
    %cst_52 = arith.constant dense<0.000000e+00> : vector<152x64xf32>
    %82 = tpu.matmul %80, %81, %cst_52 {dimension_numbers = #tpu.dot_dimension_numbers<[1], [0], [0], [1], [0, 0, 1, 1], [], []>} : vector<152x32xf32>, vector<32x64xf32>, vector<152x64xf32> -> vector<152x64xf32>
    %83 = arith.addf %79, %82 : vector<152x64xf32>
    %c7_53 = arith.constant 7 : index
    %c0_54 = arith.constant 0 : index
    %84 = vector.load %arg18[%c7_53, %c0_54] : memref<168x32xf32, #tpu.memory_space<vmem>>, vector<152x32xf32>
    %c96 = arith.constant 96 : index
    %c0_55 = arith.constant 0 : index
    %85 = vector.load %arg6[%c96, %c0_55] : memref<288x64xf32, #tpu.memory_space<vmem>>, vector<32x64xf32>
    %cst_56 = arith.constant dense<0.000000e+00> : vector<152x64xf32>
    %86 = tpu.matmul %84, %85, %cst_56 {dimension_numbers = #tpu.dot_dimension_numbers<[1], [0], [0], [1], [0, 0, 1, 1], [], []>} : vector<152x32xf32>, vector<32x64xf32>, vector<152x64xf32> -> vector<152x64xf32>
    %87 = arith.addf %83, %86 : vector<152x64xf32>
    %c8_57 = arith.constant 8 : index
    %c0_58 = arith.constant 0 : index
    %88 = vector.load %arg18[%c8_57, %c0_58] : memref<168x32xf32, #tpu.memory_space<vmem>>, vector<152x32xf32>
    %c128 = arith.constant 128 : index
    %c0_59 = arith.constant 0 : index
    %89 = vector.load %arg6[%c128, %c0_59] : memref<288x64xf32, #tpu.memory_space<vmem>>, vector<32x64xf32>
    %cst_60 = arith.constant dense<0.000000e+00> : vector<152x64xf32>
    %90 = tpu.matmul %88, %89, %cst_60 {dimension_numbers = #tpu.dot_dimension_numbers<[1], [0], [0], [1], [0, 0, 1, 1], [], []>} : vector<152x32xf32>, vector<32x64xf32>, vector<152x64xf32> -> vector<152x64xf32>
    %91 = arith.addf %87, %90 : vector<152x64xf32>
    %c9 = arith.constant 9 : index
    %c0_61 = arith.constant 0 : index
    %92 = vector.load %arg18[%c9, %c0_61] : memref<168x32xf32, #tpu.memory_space<vmem>>, vector<152x32xf32>
    %c160 = arith.constant 160 : index
    %c0_62 = arith.constant 0 : index
    %93 = vector.load %arg6[%c160, %c0_62] : memref<288x64xf32, #tpu.memory_space<vmem>>, vector<32x64xf32>
    %cst_63 = arith.constant dense<0.000000e+00> : vector<152x64xf32>
    %94 = tpu.matmul %92, %93, %cst_63 {dimension_numbers = #tpu.dot_dimension_numbers<[1], [0], [0], [1], [0, 0, 1, 1], [], []>} : vector<152x32xf32>, vector<32x64xf32>, vector<152x64xf32> -> vector<152x64xf32>
    %95 = arith.addf %91, %94 : vector<152x64xf32>
    %c14_64 = arith.constant 14 : index
    %c0_65 = arith.constant 0 : index
    %96 = vector.load %arg18[%c14_64, %c0_65] : memref<168x32xf32, #tpu.memory_space<vmem>>, vector<152x32xf32>
    %c192 = arith.constant 192 : index
    %c0_66 = arith.constant 0 : index
    %97 = vector.load %arg6[%c192, %c0_66] : memref<288x64xf32, #tpu.memory_space<vmem>>, vector<32x64xf32>
    %cst_67 = arith.constant dense<0.000000e+00> : vector<152x64xf32>
    %98 = tpu.matmul %96, %97, %cst_67 {dimension_numbers = #tpu.dot_dimension_numbers<[1], [0], [0], [1], [0, 0, 1, 1], [], []>} : vector<152x32xf32>, vector<32x64xf32>, vector<152x64xf32> -> vector<152x64xf32>
    %99 = arith.addf %95, %98 : vector<152x64xf32>
    %c15_68 = arith.constant 15 : index
    %c0_69 = arith.constant 0 : index
    %100 = vector.load %arg18[%c15_68, %c0_69] : memref<168x32xf32, #tpu.memory_space<vmem>>, vector<152x32xf32>
    %c224 = arith.constant 224 : index
    %c0_70 = arith.constant 0 : index
    %101 = vector.load %arg6[%c224, %c0_70] : memref<288x64xf32, #tpu.memory_space<vmem>>, vector<32x64xf32>
    %cst_71 = arith.constant dense<0.000000e+00> : vector<152x64xf32>
    %102 = tpu.matmul %100, %101, %cst_71 {dimension_numbers = #tpu.dot_dimension_numbers<[1], [0], [0], [1], [0, 0, 1, 1], [], []>} : vector<152x32xf32>, vector<32x64xf32>, vector<152x64xf32> -> vector<152x64xf32>
    %103 = arith.addf %99, %102 : vector<152x64xf32>
    %c16 = arith.constant 16 : index
    %c0_72 = arith.constant 0 : index
    %104 = vector.load %arg18[%c16, %c0_72] : memref<168x32xf32, #tpu.memory_space<vmem>>, vector<152x32xf32>
    %c256 = arith.constant 256 : index
    %c0_73 = arith.constant 0 : index
    %105 = vector.load %arg6[%c256, %c0_73] : memref<288x64xf32, #tpu.memory_space<vmem>>, vector<32x64xf32>
    %cst_74 = arith.constant dense<0.000000e+00> : vector<152x64xf32>
    %106 = tpu.matmul %104, %105, %cst_74 {dimension_numbers = #tpu.dot_dimension_numbers<[1], [0], [0], [1], [0, 0, 1, 1], [], []>} : vector<152x32xf32>, vector<32x64xf32>, vector<152x64xf32> -> vector<152x64xf32>
    %107 = arith.addf %103, %106 : vector<152x64xf32>
    %c0_75 = arith.constant 0 : index
    %c0_76 = arith.constant 0 : index
    %108 = vector.load %arg7[%c0_75, %c0_76] : memref<1x64xf32, #tpu.memory_space<vmem>>, vector<1x64xf32>
    %109 = vector.broadcast %108 : vector<1x64xf32> to vector<152x64xf32>
    %110 = arith.addf %107, %109 : vector<152x64xf32>
    %cst_77 = arith.constant 0.000000e+00 : f32
    %111 = vector.broadcast %cst_77 : f32 to vector<152x64xf32>
    %112 = arith.maximumf %110, %111 : vector<152x64xf32>
    %c0_78 = arith.constant 0 : index
    %c0_79 = arith.constant 0 : index
    %113 = vector.load %arg19[%c0_78, %c0_79] : memref<152x64xf32, #tpu.memory_space<vmem>>, vector<152x64xf32>
    tpu.vector_store %arg19[%c0_78, %c0_79], %112 {strides = array<i32>} : memref<152x64xf32, #tpu.memory_space<vmem>>, vector<152x64xf32>,
    %c0_80 = arith.constant 0 : index
    %c0_81 = arith.constant 0 : index
    %114 = vector.load %arg2[%c0_80, %c0_81] : memref<56x144xf32, #tpu.memory_space<vmem>>, vector<56x144xf32>
    %c0_82 = arith.constant 0 : index
    %c0_83 = arith.constant 0 : index
    %115 = vector.load %arg19[%c0_82, %c0_83] : memref<152x64xf32, #tpu.memory_space<vmem>>, vector<144x64xf32>
    %c1_84 = arith.constant 1 : index
    %c0_85 = arith.constant 0 : index
    %116 = vector.load %arg19[%c1_84, %c0_85] : memref<152x64xf32, #tpu.memory_space<vmem>>, vector<144x64xf32>
    %117 = arith.maximumf %115, %116 : vector<144x64xf32>
    %c7_86 = arith.constant 7 : index
    %c0_87 = arith.constant 0 : index
    %118 = vector.load %arg19[%c7_86, %c0_87] : memref<152x64xf32, #tpu.memory_space<vmem>>, vector<144x64xf32>
    %c8_88 = arith.constant 8 : index
    %c0_89 = arith.constant 0 : index
    %119 = vector.load %arg19[%c8_88, %c0_89] : memref<152x64xf32, #tpu.memory_space<vmem>>, vector<144x64xf32>
    %120 = arith.maximumf %118, %119 : vector<144x64xf32>
    %121 = arith.maximumf %117, %120 : vector<144x64xf32>
    %cst_90 = arith.constant dense<0.000000e+00> : vector<56x64xf32>
    %122 = tpu.matmul %114, %121, %cst_90 {dimension_numbers = #tpu.dot_dimension_numbers<[1], [0], [0], [1], [0, 0, 1, 1], [], []>} : vector<56x144xf32>, vector<144x64xf32>, vector<56x64xf32> -> vector<56x64xf32>
    %c0_91 = arith.constant 0 : index
    %c0_92 = arith.constant 0 : index
    %123 = vector.load %arg20[%c0_91, %c0_92] : memref<56x64xf32, #tpu.memory_space<vmem>>, vector<56x64xf32>
    tpu.vector_store %arg20[%c0_91, %c0_92], %122 {strides = array<i32>} : memref<56x64xf32, #tpu.memory_space<vmem>>, vector<56x64xf32>,
    %cst_93 = arith.constant 0.000000e+00 : f32
    %124 = vector.broadcast %cst_93 : f32 to vector<46x128xf32>
    %c0_94 = arith.constant 0 : index
    %c0_95 = arith.constant 0 : index
    %125 = vector.load %arg20[%c0_94, %c0_95] : memref<56x64xf32, #tpu.memory_space<vmem>>, vector<46x64xf32>
    %c0_96 = arith.constant 0 : index
    %c0_97 = arith.constant 0 : index
    %126 = vector.load %arg8[%c0_96, %c0_97] : memref<576x128xf32, #tpu.memory_space<vmem>>, vector<64x128xf32>
    %cst_98 = arith.constant dense<0.000000e+00> : vector<46x128xf32>
    %127 = tpu.matmul %125, %126, %cst_98 {dimension_numbers = #tpu.dot_dimension_numbers<[1], [0], [0], [1], [0, 0, 1, 1], [], []>} : vector<46x64xf32>, vector<64x128xf32>, vector<46x128xf32> -> vector<46x128xf32>
    %128 = arith.addf %124, %127 : vector<46x128xf32>
    %c1_99 = arith.constant 1 : index
    %c0_100 = arith.constant 0 : index
    %129 = vector.load %arg20[%c1_99, %c0_100] : memref<56x64xf32, #tpu.memory_space<vmem>>, vector<46x64xf32>
    %c64_101 = arith.constant 64 : index
    %c0_102 = arith.constant 0 : index
    %130 = vector.load %arg8[%c64_101, %c0_102] : memref<576x128xf32, #tpu.memory_space<vmem>>, vector<64x128xf32>
    %cst_103 = arith.constant dense<0.000000e+00> : vector<46x128xf32>
    %131 = tpu.matmul %129, %130, %cst_103 {dimension_numbers = #tpu.dot_dimension_numbers<[1], [0], [0], [1], [0, 0, 1, 1], [], []>} : vector<46x64xf32>, vector<64x128xf32>, vector<46x128xf32> -> vector<46x128xf32>
    %132 = arith.addf %128, %131 : vector<46x128xf32>
    %c2_104 = arith.constant 2 : index
    %c0_105 = arith.constant 0 : index
    %133 = vector.load %arg20[%c2_104, %c0_105] : memref<56x64xf32, #tpu.memory_space<vmem>>, vector<46x64xf32>
    %c128_106 = arith.constant 128 : index
    %c0_107 = arith.constant 0 : index
    %134 = vector.load %arg8[%c128_106, %c0_107] : memref<576x128xf32, #tpu.memory_space<vmem>>, vector<64x128xf32>
    %cst_108 = arith.constant dense<0.000000e+00> : vector<46x128xf32>
    %135 = tpu.matmul %133, %134, %cst_108 {dimension_numbers = #tpu.dot_dimension_numbers<[1], [0], [0], [1], [0, 0, 1, 1], [], []>} : vector<46x64xf32>, vector<64x128xf32>, vector<46x128xf32> -> vector<46x128xf32>
    %136 = arith.addf %132, %135 : vector<46x128xf32>
    %c4_109 = arith.constant 4 : index
    %c0_110 = arith.constant 0 : index
    %137 = vector.load %arg20[%c4_109, %c0_110] : memref<56x64xf32, #tpu.memory_space<vmem>>, vector<46x64xf32>
    %c192_111 = arith.constant 192 : index
    %c0_112 = arith.constant 0 : index
    %138 = vector.load %arg8[%c192_111, %c0_112] : memref<576x128xf32, #tpu.memory_space<vmem>>, vector<64x128xf32>
    %cst_113 = arith.constant dense<0.000000e+00> : vector<46x128xf32>
    %139 = tpu.matmul %137, %138, %cst_113 {dimension_numbers = #tpu.dot_dimension_numbers<[1], [0], [0], [1], [0, 0, 1, 1], [], []>} : vector<46x64xf32>, vector<64x128xf32>, vector<46x128xf32> -> vector<46x128xf32>
    %140 = arith.addf %136, %139 : vector<46x128xf32>
    %c5_114 = arith.constant 5 : index
    %c0_115 = arith.constant 0 : index
    %141 = vector.load %arg20[%c5_114, %c0_115] : memref<56x64xf32, #tpu.memory_space<vmem>>, vector<46x64xf32>
    %c256_116 = arith.constant 256 : index
    %c0_117 = arith.constant 0 : index
    %142 = vector.load %arg8[%c256_116, %c0_117] : memref<576x128xf32, #tpu.memory_space<vmem>>, vector<64x128xf32>
    %cst_118 = arith.constant dense<0.000000e+00> : vector<46x128xf32>
    %143 = tpu.matmul %141, %142, %cst_118 {dimension_numbers = #tpu.dot_dimension_numbers<[1], [0], [0], [1], [0, 0, 1, 1], [], []>} : vector<46x64xf32>, vector<64x128xf32>, vector<46x128xf32> -> vector<46x128xf32>
    %144 = arith.addf %140, %143 : vector<46x128xf32>
    %c6_119 = arith.constant 6 : index
    %c0_120 = arith.constant 0 : index
    %145 = vector.load %arg20[%c6_119, %c0_120] : memref<56x64xf32, #tpu.memory_space<vmem>>, vector<46x64xf32>
    %c320 = arith.constant 320 : index
    %c0_121 = arith.constant 0 : index
    %146 = vector.load %arg8[%c320, %c0_121] : memref<576x128xf32, #tpu.memory_space<vmem>>, vector<64x128xf32>
    %cst_122 = arith.constant dense<0.000000e+00> : vector<46x128xf32>
    %147 = tpu.matmul %145, %146, %cst_122 {dimension_numbers = #tpu.dot_dimension_numbers<[1], [0], [0], [1], [0, 0, 1, 1], [], []>} : vector<46x64xf32>, vector<64x128xf32>, vector<46x128xf32> -> vector<46x128xf32>
    %148 = arith.addf %144, %147 : vector<46x128xf32>
    %c8_123 = arith.constant 8 : index
    %c0_124 = arith.constant 0 : index
    %149 = vector.load %arg20[%c8_123, %c0_124] : memref<56x64xf32, #tpu.memory_space<vmem>>, vector<46x64xf32>
    %c384 = arith.constant 384 : index
    %c0_125 = arith.constant 0 : index
    %150 = vector.load %arg8[%c384, %c0_125] : memref<576x128xf32, #tpu.memory_space<vmem>>, vector<64x128xf32>
    %cst_126 = arith.constant dense<0.000000e+00> : vector<46x128xf32>
    %151 = tpu.matmul %149, %150, %cst_126 {dimension_numbers = #tpu.dot_dimension_numbers<[1], [0], [0], [1], [0, 0, 1, 1], [], []>} : vector<46x64xf32>, vector<64x128xf32>, vector<46x128xf32> -> vector<46x128xf32>
    %152 = arith.addf %148, %151 : vector<46x128xf32>
    %c9_127 = arith.constant 9 : index
    %c0_128 = arith.constant 0 : index
    %153 = vector.load %arg20[%c9_127, %c0_128] : memref<56x64xf32, #tpu.memory_space<vmem>>, vector<46x64xf32>
    %c448 = arith.constant 448 : index
    %c0_129 = arith.constant 0 : index
    %154 = vector.load %arg8[%c448, %c0_129] : memref<576x128xf32, #tpu.memory_space<vmem>>, vector<64x128xf32>
    %cst_130 = arith.constant dense<0.000000e+00> : vector<46x128xf32>
    %155 = tpu.matmul %153, %154, %cst_130 {dimension_numbers = #tpu.dot_dimension_numbers<[1], [0], [0], [1], [0, 0, 1, 1], [], []>} : vector<46x64xf32>, vector<64x128xf32>, vector<46x128xf32> -> vector<46x128xf32>
    %156 = arith.addf %152, %155 : vector<46x128xf32>
    %c10 = arith.constant 10 : index
    %c0_131 = arith.constant 0 : index
    %157 = vector.load %arg20[%c10, %c0_131] : memref<56x64xf32, #tpu.memory_space<vmem>>, vector<46x64xf32>
    %c512 = arith.constant 512 : index
    %c0_132 = arith.constant 0 : index
    %158 = vector.load %arg8[%c512, %c0_132] : memref<576x128xf32, #tpu.memory_space<vmem>>, vector<64x128xf32>
    %cst_133 = arith.constant dense<0.000000e+00> : vector<46x128xf32>
    %159 = tpu.matmul %157, %158, %cst_133 {dimension_numbers = #tpu.dot_dimension_numbers<[1], [0], [0], [1], [0, 0, 1, 1], [], []>} : vector<46x64xf32>, vector<64x128xf32>, vector<46x128xf32> -> vector<46x128xf32>
    %160 = arith.addf %156, %159 : vector<46x128xf32>
    %c0_134 = arith.constant 0 : index
    %c0_135 = arith.constant 0 : index
    %161 = vector.load %arg9[%c0_134, %c0_135] : memref<1x128xf32, #tpu.memory_space<vmem>>, vector<1x128xf32>
    %162 = vector.broadcast %161 : vector<1x128xf32> to vector<46x128xf32>
    %163 = arith.addf %160, %162 : vector<46x128xf32>
    %cst_136 = arith.constant 0.000000e+00 : f32
    %164 = vector.broadcast %cst_136 : f32 to vector<46x128xf32>
    %165 = arith.maximumf %163, %164 : vector<46x128xf32>
    %c0_137 = arith.constant 0 : index
    %c0_138 = arith.constant 0 : index
    %166 = vector.load %arg21[%c0_137, %c0_138] : memref<46x128xf32, #tpu.memory_space<vmem>>, vector<46x128xf32>
    tpu.vector_store %arg21[%c0_137, %c0_138], %165 {strides = array<i32>} : memref<46x128xf32, #tpu.memory_space<vmem>>, vector<46x128xf32>,
    %c0_139 = arith.constant 0 : index
    %c0_140 = arith.constant 0 : index
    %167 = vector.load %arg3[%c0_139, %c0_140] : memref<4x41xf32, #tpu.memory_space<vmem>>, vector<4x41xf32>
    %c0_141 = arith.constant 0 : index
    %c0_142 = arith.constant 0 : index
    %168 = vector.load %arg21[%c0_141, %c0_142] : memref<46x128xf32, #tpu.memory_space<vmem>>, vector<41x128xf32>
    %c1_143 = arith.constant 1 : index
    %c0_144 = arith.constant 0 : index
    %169 = vector.load %arg21[%c1_143, %c0_144] : memref<46x128xf32, #tpu.memory_space<vmem>>, vector<41x128xf32>
    %170 = arith.maximumf %168, %169 : vector<41x128xf32>
    %c4_145 = arith.constant 4 : index
    %c0_146 = arith.constant 0 : index
    %171 = vector.load %arg21[%c4_145, %c0_146] : memref<46x128xf32, #tpu.memory_space<vmem>>, vector<41x128xf32>
    %c5_147 = arith.constant 5 : index
    %c0_148 = arith.constant 0 : index
    %172 = vector.load %arg21[%c5_147, %c0_148] : memref<46x128xf32, #tpu.memory_space<vmem>>, vector<41x128xf32>
    %173 = arith.maximumf %171, %172 : vector<41x128xf32>
    %174 = arith.maximumf %170, %173 : vector<41x128xf32>
    %cst_149 = arith.constant dense<0.000000e+00> : vector<4x128xf32>
    %175 = tpu.matmul %167, %174, %cst_149 {dimension_numbers = #tpu.dot_dimension_numbers<[1], [0], [0], [1], [0, 0, 1, 1], [], []>} : vector<4x41xf32>, vector<41x128xf32>, vector<4x128xf32> -> vector<4x128xf32>
    %c0_150 = arith.constant 0 : index
    %c0_151 = arith.constant 0 : index
    %176 = vector.load %arg22[%c0_150, %c0_151] : memref<4x128xf32, #tpu.memory_space<vmem>>, vector<4x128xf32>
    tpu.vector_store %arg22[%c0_150, %c0_151], %175 {strides = array<i32>} : memref<4x128xf32, #tpu.memory_space<vmem>>, vector<4x128xf32>,
    %cst_152 = arith.constant 0.000000e+00 : f32
    %177 = vector.broadcast %cst_152 : f32 to vector<2x128xf32>
    %c0_153 = arith.constant 0 : index
    %c0_154 = arith.constant 0 : index
    %178 = vector.load %arg22[%c0_153, %c0_154] : memref<4x128xf32, #tpu.memory_space<vmem>>, vector<2x128xf32>
    %c0_155 = arith.constant 0 : index
    %c0_156 = arith.constant 0 : index
    %179 = vector.load %arg10[%c0_155, %c0_156] : memref<256x128xf32, #tpu.memory_space<vmem>>, vector<128x128xf32>
    %cst_157 = arith.constant dense<0.000000e+00> : vector<2x128xf32>
    %180 = tpu.matmul %178, %179, %cst_157 {dimension_numbers = #tpu.dot_dimension_numbers<[1], [0], [0], [1], [0, 0, 1, 1], [], []>} : vector<2x128xf32>, vector<128x128xf32>, vector<2x128xf32> -> vector<2x128xf32>
    %181 = arith.addf %177, %180 : vector<2x128xf32>
    %c2_158 = arith.constant 2 : index
    %c0_159 = arith.constant 0 : index
    %182 = vector.load %arg22[%c2_158, %c0_159] : memref<4x128xf32, #tpu.memory_space<vmem>>, vector<2x128xf32>
    %c128_160 = arith.constant 128 : index
    %c0_161 = arith.constant 0 : index
    %183 = vector.load %arg10[%c128_160, %c0_161] : memref<256x128xf32, #tpu.memory_space<vmem>>, vector<128x128xf32>
    %cst_162 = arith.constant dense<0.000000e+00> : vector<2x128xf32>
    %184 = tpu.matmul %182, %183, %cst_162 {dimension_numbers = #tpu.dot_dimension_numbers<[1], [0], [0], [1], [0, 0, 1, 1], [], []>} : vector<2x128xf32>, vector<128x128xf32>, vector<2x128xf32> -> vector<2x128xf32>
    %185 = arith.addf %181, %184 : vector<2x128xf32>
    %c0_163 = arith.constant 0 : index
    %c0_164 = arith.constant 0 : index
    %186 = vector.load %arg11[%c0_163, %c0_164] : memref<1x128xf32, #tpu.memory_space<vmem>>, vector<1x128xf32>
    %187 = vector.broadcast %186 : vector<1x128xf32> to vector<2x128xf32>
    %188 = arith.addf %185, %187 : vector<2x128xf32>
    %cst_165 = arith.constant 0.000000e+00 : f32
    %189 = vector.broadcast %cst_165 : f32 to vector<2x128xf32>
    %190 = arith.maximumf %188, %189 : vector<2x128xf32>
    %c0_166 = arith.constant 0 : index
    %c0_167 = arith.constant 0 : index
    %191 = vector.load %arg12[%c0_166, %c0_167] : memref<128x64xf32, #tpu.memory_space<vmem>>, vector<128x64xf32>
    %cst_168 = arith.constant dense<0.000000e+00> : vector<2x64xf32>
    %192 = tpu.matmul %190, %191, %cst_168 {dimension_numbers = #tpu.dot_dimension_numbers<[1], [0], [0], [1], [0, 0, 1, 1], [], []>} : vector<2x128xf32>, vector<128x64xf32>, vector<2x64xf32> -> vector<2x64xf32>
    %c0_169 = arith.constant 0 : index
    %c0_170 = arith.constant 0 : index
    %193 = vector.load %arg13[%c0_169, %c0_170] : memref<1x64xf32, #tpu.memory_space<vmem>>, vector<1x64xf32>
    %194 = vector.broadcast %193 : vector<1x64xf32> to vector<2x64xf32>
    %195 = arith.addf %192, %194 : vector<2x64xf32>
    %cst_171 = arith.constant 0.000000e+00 : f32
    %196 = vector.broadcast %cst_171 : f32 to vector<2x64xf32>
    %197 = arith.maximumf %195, %196 : vector<2x64xf32>
    %c0_172 = arith.constant 0 : index
    %c0_173 = arith.constant 0 : index
    %198 = vector.load %arg14[%c0_172, %c0_173] : memref<1x64xf32, #tpu.memory_space<vmem>>, vector<1x64xf32>
    %199 = vector.broadcast %198 : vector<1x64xf32> to vector<2x64xf32>
    %200 = arith.mulf %197, %199 : vector<2x64xf32>
    %cst_174 = arith.constant dense<0.000000e+00> : vector<2xf32>
    %201 = vector.multi_reduction <add>, %200, %cst_174 [1] : vector<2x64xf32> to vector<2xf32>
    %202 = vector.shape_cast %201 : vector<2xf32> to vector<2x1xf32>
    %c0_175 = arith.constant 0 : index
    %c0_176 = arith.constant 0 : index
    %203 = vector.load %arg15[%c0_175, %c0_176] : memref<1x1xf32, #tpu.memory_space<vmem>>, vector<1x1xf32>
    %204 = vector.broadcast %203 : vector<1x1xf32> to vector<2x1xf32>
    %205 = arith.addf %202, %204 : vector<2x1xf32>
    %206 = math.absf %205 : vector<2x1xf32>
    %cst_177 = arith.constant 0.000000e+00 : f32
    %207 = vector.broadcast %cst_177 : f32 to vector<2x1xf32>
    %208 = arith.subf %207, %206 : vector<2x1xf32>
    %209 = math.exp %208 : vector<2x1xf32>
    %cst_178 = arith.constant 0.000000e+00 : f32
    %210 = vector.broadcast %cst_178 : f32 to vector<2x1xf32>
    %211 = arith.cmpf oge, %205, %210 : vector<2x1xf32>
    %cst_179 = arith.constant 1.000000e+00 : f32
    %212 = vector.broadcast %cst_179 : f32 to vector<2x1xf32>
    %213 = arith.addf %212, %209 : vector<2x1xf32>
    %cst_180 = arith.constant 1.000000e+00 : f32
    %214 = vector.broadcast %cst_180 : f32 to vector<2x1xf32>
    %215 = arith.divf %214, %213 : vector<2x1xf32>
    %cst_181 = arith.constant 1.000000e+00 : f32
    %216 = vector.broadcast %cst_181 : f32 to vector<2x1xf32>
    %217 = arith.addf %216, %209 : vector<2x1xf32>
    %218 = arith.divf %209, %217 : vector<2x1xf32>
    %219 = arith.select %211, %215, %218 : vector<2x1xi1>, vector<2x1xf32>
    %c0_182 = arith.constant 0 : index
    %c0_183 = arith.constant 0 : index
    %220 = vector.load %arg16[%c0_182, %c0_183] : memref<2x1xf32, #tpu.memory_space<vmem>>, vector<2x1xf32>
    tpu.vector_store %arg16[%c0_182, %c0_183], %219 {strides = array<i32>} : memref<2x1xf32, #tpu.memory_space<vmem>>, vector<2x1xf32>,
    return
  }
}

</mosaic_0001>

<bundles_post_ra>
// kernel: stock_cnn_forward.1
= control target key start
LH: loop header
LB: loop body
LE: loop exit
PB: predicated region body
PF: predicated region fallthrough
CT: control target
= control target key end

     0   :  { %s19634_s0 = inlined_call_operand.vmem [shape: f32[572,1], index: 0, kind: input, shape index: {}]   ;;  %s19635_s1 = inlined_call_operand.vmem [shape: f32[168,530], index: 1, kind: input, shape index: {}]   ;;  %s19636_s2 = inlined_call_operand.vmem [shape: f32[56,144], index: 2, kind: input, shape index: {}]   ;;  %s19637_s3 = inlined_call_operand.vmem [shape: f32[4,41], index: 3, kind: input, shape index: {}]   ;;  %s19638_s4 = inlined_call_operand.vmem [shape: f32[9,32], index: 4, kind: input, shape index: {}]   ;;  %s19639_s5 = inlined_call_operand.vmem [shape: f32[1,32], index: 5, kind: input, shape index: {}]   ;;  %s19640_s6 = inlined_call_operand.vmem [shape: f32[288,64], index: 6, kind: input, shape index: {}]   ;;  %s19641_s7 = inlined_call_operand.vmem [shape: f32[1,64], index: 7, kind: input, shape index: {}]   ;;  %s19642_s8 = inlined_call_operand.vmem [shape: f32[576,128], index: 8, kind: input, shape index: {}]   ;;  %s19643_s9 = inlined_call_operand.vmem [shape: f32[1,128], index: 9, kind: input, shape index: {}]   ;;  %s19644_s10 = inlined_call_operand.vmem [shape: f32[256,128], index: 10, kind: input, shape index: {}]   ;;  %s19645_s11 = inlined_call_operand.hbm [shape: f32[1,128], index: 11, kind: input, shape index: {}]   ;;  %s19646_s12 = inlined_call_operand.vmem [shape: f32[128,64], index: 12, kind: input, shape index: {}]   ;;  %s19647_s13 = inlined_call_operand.hbm [shape: f32[1,64], index: 13, kind: input, shape index: {}]   ;;  %s19648_s14 = inlined_call_operand.hbm [shape: f32[1,64], index: 14, kind: input, shape index: {}]   ;;  %s19649_s15 = inlined_call_operand.<no memory space> [shape: f32[1,1], index: 15, kind: input, shape index: {}]   ;;  %s19650_s16 = inlined_call_operand.vmem [shape: f32[2,1], index: 16, kind: output, shape index: {}]  }
   0x1   :  { %19654 = sst [smem:[#allocation25_spill]] %s19634_s0  ;;  %v21_v0 = vstv %s19649_s15 }
   0x2   :  { %22 = vst [vmem:[#allocation8] sm:$0x1] %v21_v0 }
   0x3   :  { %23 = vsyncpa [#allocation10], 0 }
   0x4   :  { %24 = vsyncpa [#allocation12], 0  ;;  %s13033_s23 = smov [#allocation11]   ;;  %s13034_s25 = smov [#allocation9]  }
   0x5   :  { %s65_s24 = sshll.u32 %s13033_s23, 4  ;;  %s53_s26 = sshll.u32 %s13034_s25, 4  ;;  %s66_s24 = int_to_ptr.vmem [resolvable:$true] %s65_s24  ;;  %s54_s26 = int_to_ptr.vmem [resolvable:$true] %s53_s26 }
   0x6   :  { %s12963_s29 = scalar_lea.hbm %s19647_s13, 16 }
   0x7   :  { %p12964_p0 = scmp.ne.s32.totalorder %s19647_s13, %s12963_s29  ;;  %p12967_p1 = scmp.lt.u32.totalorder %s12963_s29, %s19647_s13 }
   0x9   :  { %p12969_p2 = pnand %p12967_p1, %p12964_p0 }
   0xb   :  { %12972 = shalt.err (!%p12969_p2)
}
   0xc   :  { %s12973_s15 = scalar_lea.vmem %s66_s24, 16  ;;  %s12977_s19 = scalar_lea.vmem %s66_s24, 32 }
   0xd   :  { %p12974_p3 = scmp.ne.s32.totalorder %s66_s24, %s12973_s15  ;;  %p12978_p4 = scmp.lt.s32.totalorder %s66_s24, %s66_s24 }
   0xe   :  { %p12979_p5 = scmp.lt.s32.totalorder %s12977_s19, %s12973_s15 }
  0x10   :  { %p12980_p6 = por %p12979_p5, %p12978_p4 }
  0x12   :  { %p12981_p7 = pnand %p12980_p6, %p12974_p3 }
  0x14   :  { %12984 = shalt.err (!%p12981_p7)
}
  0x15   :  { %68 = dma.hbm_to_vmem [thread:$0]  %s19647_s13, 16, %s66_s24, [#allocation12]  }
  0x16   :  { %s12985_s25 = scalar_lea.hbm %s19645_s11, 16 }
  0x17   :  { %p12986_p8 = scmp.ne.s32.totalorder %s19645_s11, %s12985_s25  ;;  %p12989_p9 = scmp.lt.u32.totalorder %s12985_s25, %s19645_s11 }
  0x19   :  { %p12991_p10 = pnand %p12989_p9, %p12986_p8 }
  0x1b   :  { %12994 = shalt.err (!%p12991_p10)
}
  0x1c   :  { %s12995_s0 = scalar_lea.vmem %s54_s26, 16  ;;  %s12999_s17 = scalar_lea.vmem %s54_s26, 32 }
  0x1d   :  { %p12996_p11 = scmp.ne.s32.totalorder %s54_s26, %s12995_s0  ;;  %p13000_p12 = scmp.lt.s32.totalorder %s54_s26, %s54_s26 }
  0x1e   :  { %p13001_p13 = scmp.lt.s32.totalorder %s12999_s17, %s12995_s0 }
  0x20   :  { %p13002_p0 = por %p13001_p13, %p13000_p12 }
  0x22   :  { %p13003_p1 = pnand %p13002_p0, %p12996_p11 }
  0x24   :  { %13006 = shalt.err (!%p13003_p1)
}
  0x25   :  { %56 = dma.hbm_to_vmem [thread:$0]  %s19645_s11, 16, %s54_s26, [#allocation10]  }
  0x26   :  { %s13035_s18 = smov [#allocation13]   ;;  %s13007_s21 = scalar_lea.hbm %s19648_s14, 16 }
  0x27   :  { %s75_s15 = sshll.u32 %s13035_s18, 4  ;;  %p13008_p2 = scmp.ne.s32.totalorder %s19648_s14, %s13007_s21  ;;  %s76_s15 = int_to_ptr.vmem [resolvable:$true] %s75_s15 }
  0x28   :  { %p13011_p3 = scmp.lt.u32.totalorder %s13007_s21, %s19648_s14 }
  0x2a   :  { %p13013_p4 = pnand %p13011_p3, %p13008_p2 }
  0x2c   :  { %13016 = shalt.err (!%p13013_p4)
}
  0x2d   :  { %s13017_s28 = scalar_lea.vmem %s76_s15, 16  ;;  %s13021_s11 = scalar_lea.vmem %s76_s15, 32 }
  0x2e   :  { %p13018_p5 = scmp.ne.s32.totalorder %s76_s15, %s13017_s28  ;;  %p13022_p6 = scmp.lt.s32.totalorder %s76_s15, %s76_s15 }
  0x2f   :  { %p13023_p7 = scmp.lt.s32.totalorder %s13021_s11, %s13017_s28 }
  0x31   :  { %p13024_p8 = por %p13023_p7, %p13022_p6 }
  0x33   :  { %p13025_p9 = pnand %p13024_p8, %p13018_p5 }
  0x35   :  { %13028 = shalt.err (!%p13025_p9)
}
  0x36   :  { %78 = dma.hbm_to_vmem [thread:$0]  %s19648_s14, 16, %s76_s15, [#allocation12]  }
  0x37   :  { %13029 = dma.done.wait [#allocation10], 16  }
  0x38   :  { %13030 = vsyncadd [#allocation10], 4294967280 }
  0x39   :  { %13031 = dma.done.wait [#allocation12], 32  }
  0x3a   :  { %13032 = vsyncadd [#allocation12], 4294967264  ;;  %v13036_v1 = vmov 0   ;;  %s19655_s17 = sld [smem:[#allocation25_spill]]  ;;  %vm5174_vm0 = vcmask 261120   ;;  %vm13038_vm1 = vmmov 0  }
  0x3b   :  { %12906 = vset.pattern.permute.xlu1 %v13036_v1  ;;  %12905 = vset.pattern.permute.xlu0 %v13036_v1  ;;  %vm5881_vm2 = vcmask 1041408   ;;  %vm5817_vm3 = vcmask 146432   ;;  %vm8897_vm4 = vcmask 130048   ;;  %vm8754_vm5 = vcmask 523264  }
  0x3c   :  { %vm10283_vm6 = vcmask 1040384   ;;  %vm13040_vm7 = vmmov 1   ;;  %vm10279_vm9 = vcmask 334848   ;;  %vm10643_vm10 = vcmask 517120  }
  0x3d   :  { %vm12691_vm8 = vmpackc.low %vm10283_vm6, %vm13040_vm7  ;;  %vm10665_vm11 = vcmask 1024  }
  0x40   :  { %v92_v2 = vld [vmem:[%s19655_s17 + $0x10] sm:$0xff]  ;;  %v90_v3 = vld [vmem:[%s19655_s17] sm:$0xff]  ;;  %v93_v4 = vld [vmem:[%s19655_s17 + $0x18] sm:$0xff] }
  0x41   :  { %171 = vperm.xlu1 %12906, %v92_v2   ;;  %161 = vperm.xlu0 %12905, %v90_v3   ;;  %v91_v5 = vld [vmem:[%s19655_s17 + $0x8] sm:$0xff]  ;;  %v642_v8 = vld [vmem:[%s19655_s17 + $0x19] sm:$0xff]  ;;  %v641_v9 = vld [vmem:[%s19655_s17 + $0x11] sm:$0xff] }
  0x42   :  { %v640_v6 = vld [vmem:[%s19655_s17 + $0x9] sm:$0xff]  ;;  %v639_v7 = vld [vmem:[%s19655_s17 + $0x1] sm:$0xff]  ;;  %v1190_v13 = vld [vmem:[%s19655_s17 + $0x12] sm:$0xff] }
  0x43   :  { %v1189_v10 = vld [vmem:[%s19655_s17 + $0xa] sm:$0xff]  ;;  %v1188_v11 = vld [vmem:[%s19655_s17 + $0x2] sm:$0xff]  ;;  %v1191_v12 = vld [vmem:[%s19655_s17 + $0x1a] sm:$0xff] }
  0x44   :  { %v95_v14 = vld [vmem:[%s19655_s17 + $0x28] sm:$0xff]  ;;  %v94_v15 = vld [vmem:[%s19655_s17 + $0x20] sm:$0xff]  ;;  %v1738_v18 = vld [vmem:[%s19655_s17 + $0x15] sm:$0xff] }
  0x45   :  { %176 = vperm.xlu1 %12906, %v93_v4   ;;  %166 = vperm.xlu0 %12905, %v91_v5   ;;  %v644_v16 = vld [vmem:[%s19655_s17 + $0x29] sm:$0xff]  ;;  %v643_v17 = vld [vmem:[%s19655_s17 + $0x21] sm:$0xff]  ;;  %v2287_v24 = vld [vmem:[%s19655_s17 + $0x16] sm:$0xff] }
  0x46   :  { %v1737_v19 = vld [vmem:[%s19655_s17 + $0xd] sm:$0xff]  ;;  %v1740_v20 = vld [vmem:[%s19655_s17 + $0x25] sm:$0xff]  ;;  %v1739_v21 = vld [vmem:[%s19655_s17 + $0x1d] sm:$0xff] }
  0x47   :  { %v1193_v22 = vld [vmem:[%s19655_s17 + $0x2a] sm:$0xff]  ;;  %v1192_v23 = vld [vmem:[%s19655_s17 + $0x22] sm:$0xff]  ;;  %v97_v28 = vld [vmem:[%s19655_s17 + $0x38] sm:$0xff] }
  0x48   :  { %v2286_v25 = vld [vmem:[%s19655_s17 + $0xe] sm:$0xff]  ;;  %v2289_v26 = vld [vmem:[%s19655_s17 + $0x26] sm:$0xff]  ;;  %v2288_v27 = vld [vmem:[%s19655_s17 + $0x1e] sm:$0xff] }
  0x49   :  { %715 = vperm.xlu1 %12906, %v640_v6   ;;  %710 = vperm.xlu0 %12905, %v639_v7   ;;  %v96_v29 = vld [vmem:[%s19655_s17 + $0x30] sm:$0xff]  ;;  %v646_v30 = vld [vmem:[%s19655_s17 + $0x39] sm:$0xff]  ;;  %v2838_v36 = vld [vmem:[%s19655_s17 + $0x27] sm:$0xff] }
  0x4a   :  { %v645_v31 = vld [vmem:[%s19655_s17 + $0x31] sm:$0xff]  ;;  %v2837_v37 = vld [vmem:[%s19655_s17 + $0x1f] sm:$0xff]  ;;  %v99_v42 = vld [vmem:[%s19655_s17 + $0x48] sm:$0xff] }
  0x4b   :  { %v1742_v32 = vld [vmem:[%s19655_s17 + $0x35] sm:$0xff]  ;;  %v1741_v33 = vld [vmem:[%s19655_s17 + $0x2d] sm:$0xff]  ;;  %v98_v43 = vld [vmem:[%s19655_s17 + $0x40] sm:$0xff] }
  0x4c   :  { %v2836_v34 = vld [vmem:[%s19655_s17 + $0x17] sm:$0xff]  ;;  %v2835_v35 = vld [vmem:[%s19655_s17 + $0xf] sm:$0xff]  ;;  %v647_v45 = vld [vmem:[%s19655_s17 + $0x41] sm:$0xff] }
  0x4d   :  { %725 = vperm.xlu1 %12906, %v642_v8   ;;  %720 = vperm.xlu0 %12905, %v641_v9   ;;  %v1195_v38 = vld [vmem:[%s19655_s17 + $0x3a] sm:$0xff]  ;;  %v1194_v39 = vld [vmem:[%s19655_s17 + $0x32] sm:$0xff]  ;;  %v648_v44 = vld [vmem:[%s19655_s17 + $0x49] sm:$0xff] }
  0x4e   :  { %v2291_v40 = vld [vmem:[%s19655_s17 + $0x36] sm:$0xff]  ;;  %v2290_v41 = vld [vmem:[%s19655_s17 + $0x2e] sm:$0xff]  ;;  %v1744_v46 = vld [vmem:[%s19655_s17 + $0x45] sm:$0xff] }
  0x4f   :  { %v1743_v47 = vld [vmem:[%s19655_s17 + $0x3d] sm:$0xff]  ;;  %v2839_v49 = vld [vmem:[%s19655_s17 + $0x2f] sm:$0xff]  ;;  %v2293_v56 = vld [vmem:[%s19655_s17 + $0x46] sm:$0xff] }
  0x50   :  { %v2840_v48 = vld [vmem:[%s19655_s17 + $0x37] sm:$0xff]  ;;  %v3934_v50 = vld [vmem:[%s19655_s17 + $0x23] sm:$0xff]  ;;  %v3935_v53 = vld [vmem:[%s19655_s17 + $0x2b] sm:$0xff] }
  0x51   :  { %1264 = vperm.xlu1 %12906, %v1189_v10   ;;  %1259 = vperm.xlu0 %12905, %v1188_v11   ;;  %v3933_v51 = vld [vmem:[%s19655_s17 + $0x1b] sm:$0xff]  ;;  %v3936_v52 = vld [vmem:[%s19655_s17 + $0x33] sm:$0xff]  ;;  %v13324_v54 = vld [vmem:[%s19655_s17 + $0x4a] sm:$0xff] }
  0x52   :  { %v1196_v55 = vld [vmem:[%s19655_s17 + $0x42] sm:$0xff]  ;;  %v4485_v60 = vld [vmem:[%s19655_s17 + $0x34] sm:$0xff]  ;;  %v4484_v61 = vld [vmem:[%s19655_s17 + $0x2c] sm:$0xff] }
  0x53   :  { %v2292_v57 = vld [vmem:[%s19655_s17 + $0x3e] sm:$0xff]  ;;  %v100_v1 = vld [vmem:[%s19655_s17 + $0x50] sm:$0xff] }
  0x54   :  { %v4483_v58 = vld [vmem:[%s19655_s17 + $0x24] sm:$0xff]  ;;  %v4482_v59 = vld [vmem:[%s19655_s17 + $0x1c] sm:$0xff]  ;;  %v649_v5 = vld [vmem:[%s19655_s17 + $0x51] sm:$0xff] }
  0x55   :  { %1274 = vperm.xlu1 %12906, %v1191_v12   ;;  %1269 = vperm.xlu0 %12905, %v1190_v13   ;;  %v101_v0 = vld [vmem:[%s19655_s17 + $0x58] sm:$0xff]  ;;  %v1745_v9 = vld [vmem:[%s19655_s17 + $0x4d] sm:$0xff] }
  0x56   :  { %v650_v4 = vld [vmem:[%s19655_s17 + $0x59] sm:$0xff] }
  0x57   :  { %v1746_v8 = vld [vmem:[%s19655_s17 + $0x55] sm:$0xff]  ;;  %v2841_v13 = vld [vmem:[%s19655_s17 + $0x3f] sm:$0xff] }
  0x59   :  { %186 = vperm.xlu1 %12906, %v95_v14   ;;  %181 = vperm.xlu0 %12905, %v94_v15  }
  0x5d   :  { %735 = vperm.xlu1 %12906, %v644_v16   ;;  %730 = vperm.xlu0 %12905, %v643_v17   ;;  %v3938_v16 = vld [vmem:[%s19655_s17 + $0x43] sm:$0xff]  ;;  %v3937_v17 = vld [vmem:[%s19655_s17 + $0x3b] sm:$0xff] }
  0x61   :  { %1813 = vperm.xlu1 %12906, %v1738_v18   ;;  %1808 = vperm.xlu0 %12905, %v1737_v19  }
  0x65   :  { %1823 = vperm.xlu1 %12906, %v1740_v20   ;;  %1818 = vperm.xlu0 %12905, %v1739_v21   ;;  %v13405_v20 = vld [vmem:[%s19655_s17 + $0x5a] sm:$0xff]  ;;  %v1198_v21 = vld [vmem:[%s19655_s17 + $0x52] sm:$0xff] }
  0x69   :  { %1284 = vperm.xlu1 %12906, %v1193_v22   ;;  %1279 = vperm.xlu0 %12905, %v1192_v23  }
  0x6d   :  { %2362 = vperm.xlu1 %12906, %v2287_v24   ;;  %2357 = vperm.xlu0 %12905, %v2286_v25   ;;  %v2295_v25 = vld [vmem:[%s19655_s17 + $0x56] sm:$0xff] }
  0x71   :  { %2372 = vperm.xlu1 %12906, %v2289_v26   ;;  %2367 = vperm.xlu0 %12905, %v2288_v27   ;;  %v2294_v26 = vld [vmem:[%s19655_s17 + $0x4e] sm:$0xff] }
  0x75   :  { %196 = vperm.xlu1 %12906, %v97_v28   ;;  %191 = vperm.xlu0 %12905, %v96_v29  }
  0x79   :  { %745 = vperm.xlu1 %12906, %v646_v30   ;;  %740 = vperm.xlu0 %12905, %v645_v31   ;;  %v4487_v31 = vld [vmem:[%s19655_s17 + $0x44] sm:$0xff] }
  0x7d   :  { %1833 = vperm.xlu1 %12906, %v1742_v32   ;;  %1828 = vperm.xlu0 %12905, %v1741_v33   ;;  %v4486_v32 = vld [vmem:[%s19655_s17 + $0x3c] sm:$0xff] }
  0x81   :  { %2911 = vperm.xlu1 %12906, %v2836_v34   ;;  %2906 = vperm.xlu0 %12905, %v2835_v35   ;;  %v103_v35 = vld [vmem:[%s19655_s17 + $0x68] sm:$0xff] }
  0x85   :  { %2921 = vperm.xlu1 %12906, %v2838_v36   ;;  %2916 = vperm.xlu0 %12905, %v2837_v37   ;;  %v102_v36 = vld [vmem:[%s19655_s17 + $0x60] sm:$0xff] }
  0x89   :  { %1294 = vperm.xlu1 %12906, %v1195_v38   ;;  %1289 = vperm.xlu0 %12905, %v1194_v39  }
  0x8d   :  { %2382 = vperm.xlu1 %12906, %v2291_v40   ;;  %2377 = vperm.xlu0 %12905, %v2290_v41   ;;  %v651_v40 = vld [vmem:[%s19655_s17 + $0x61] sm:$0xff] }
  0x91   :  { %3460 = vperm.xlu1 %12906, %v1192_v23   ;;  %3455 = vperm.xlu0 %12905, %v1191_v12   ;;  %v2842_v12 = vld [vmem:[%s19655_s17 + $0x47] sm:$0xff] }
  0x95   :  { %3470 = vperm.xlu1 %12906, %v1194_v39   ;;  %3465 = vperm.xlu0 %12905, %v1193_v22   ;;  %v19652_v22 = vmov 0.0|0.0   ;;  %v652_v39 = vld [vmem:[%s19655_s17 + $0x69] sm:$0xff] }
  0x96   :  { %12359 = vmatprep.subr.bf16.mxu0 %v19652_v22  ;;  %12458 = vmatprep.subr.bf16.mxu1 %v19652_v22 }
  0x99   :  { %206 = vperm.xlu1 %12906, %v99_v42   ;;  %201 = vperm.xlu0 %12905, %v98_v43   ;;  %v1748_v43 = vld [vmem:[%s19655_s17 + $0x65] sm:$0xff] }
  0x9d   :  { %755 = vperm.xlu1 %12906, %v648_v44   ;;  %750 = vperm.xlu0 %12905, %v647_v45   ;;  %v1747_v44 = vld [vmem:[%s19655_s17 + $0x5d] sm:$0xff] }
  0xa1   :  { %1843 = vperm.xlu1 %12906, %v1744_v46   ;;  %1838 = vperm.xlu0 %12905, %v1743_v47   ;;  %v2844_v47 = vld [vmem:[%s19655_s17 + $0x57] sm:$0xff] }
  0xa5   :  { %2931 = vperm.xlu1 %12906, %v2840_v48   ;;  %2926 = vperm.xlu0 %12905, %v2839_v49   ;;  %v2843_v48 = vld [vmem:[%s19655_s17 + $0x4f] sm:$0xff] }
  0xa9   :  { %4009 = vperm.xlu1 %12906, %v3934_v50   ;;  %4004 = vperm.xlu0 %12905, %v3933_v51   ;;  %v3940_v51 = vld [vmem:[%s19655_s17 + $0x53] sm:$0xff] }
  0xad   :  { %4019 = vperm.xlu1 %12906, %v3936_v52   ;;  %4014 = vperm.xlu0 %12905, %v3935_v53   ;;  %v3939_v52 = vld [vmem:[%s19655_s17 + $0x4b] sm:$0xff] }
  0xb1   :  { %1304 = vperm.xlu1 %12906, %v13324_v54   ;;  %1299 = vperm.xlu0 %12905, %v1196_v55  }
  0xb5   :  { %2392 = vperm.xlu1 %12906, %v2293_v56   ;;  %2387 = vperm.xlu0 %12905, %v2292_v57   ;;  %v1200_v56 = vld [vmem:[%s19655_s17 + $0x62] sm:$0xff] }
  0xb9   :  { %3480 = vperm.xlu1 %12906, %v1196_v55   ;;  %3475 = vperm.xlu0 %12905, %v1195_v38   ;;  %v13495_v55 = vld [vmem:[%s19655_s17 + $0x6a] sm:$0xff] }
  0xbd   :  { %4558 = vperm.xlu1 %12906, %v4483_v58   ;;  %4553 = vperm.xlu0 %12905, %v4482_v59   ;;  %v2297_v59 = vld [vmem:[%s19655_s17 + $0x66] sm:$0xff] }
  0xc0   :  { %v13348_v62 = vpop.permute.xlu1 %171  ;;  %v13350_v63 = vpop.permute.xlu0 %161 }
  0xc1   :  { %4568 = vperm.xlu1 %12906, %v4485_v60   ;;  %4563 = vperm.xlu0 %12905, %v4484_v61   ;;  %v2296_v60 = vld [vmem:[%s19655_s17 + $0x5e] sm:$0xff] }
  0xc4   :  { %v13358_v2 = vpop.permute.xlu1 %176  ;;  %v13360_v3 = vpop.permute.xlu0 %166 }
  0xc5   :  { %216 = vperm.xlu1 %12906, %v101_v0   ;;  %211 = vperm.xlu0 %12905, %v100_v1  }
  0xc8   :  { %v13368_v6 = vpop.permute.xlu1 %715  ;;  %v13370_v7 = vpop.permute.xlu0 %710 }
  0xc9   :  { %765 = vperm.xlu1 %12906, %v650_v4   ;;  %760 = vperm.xlu0 %12905, %v649_v5   ;;  %v4489_v5 = vld [vmem:[%s19655_s17 + $0x54] sm:$0xff] }
  0xcc   :  { %v13378_v10 = vpop.permute.xlu1 %725  ;;  %v13380_v11 = vpop.permute.xlu0 %720 }
  0xcd   :  { %1853 = vperm.xlu1 %12906, %v1746_v8   ;;  %1848 = vperm.xlu0 %12905, %v1745_v9   ;;  %v4488_v8 = vld [vmem:[%s19655_s17 + $0x4c] sm:$0xff] }
  0xd0   :  { %v13388_v14 = vpop.permute.xlu1 %1264  ;;  %v13390_v15 = vpop.permute.xlu0 %1259 }
  0xd1   :  { %2941 = vperm.xlu1 %12906, %v2842_v12   ;;  %2936 = vperm.xlu0 %12905, %v2841_v13   ;;  %v105_v13 = vld [vmem:[%s19655_s17 + $0x78] sm:$0xff] }
  0xd4   :  { %v13398_v18 = vpop.permute.xlu1 %1274  ;;  %v13400_v19 = vpop.permute.xlu0 %1269 }
  0xd5   :  { %4029 = vperm.xlu1 %12906, %v3938_v16   ;;  %4024 = vperm.xlu0 %12905, %v3937_v17   ;;  %v104_v16 = vld [vmem:[%s19655_s17 + $0x70] sm:$0xff] }
  0xd8   :  { %v13412_v23 = vpop.permute.xlu1 %186  ;;  %v13414_v24 = vpop.permute.xlu0 %181 }
  0xd9   :  { %1314 = vperm.xlu1 %12906, %v13405_v20   ;;  %1309 = vperm.xlu0 %12905, %v1198_v21  }
  0xdc   :  { %v13423_v27 = vpop.permute.xlu1 %735  ;;  %v13425_v28 = vpop.permute.xlu0 %730 }
  0xdd   :  { %2402 = vperm.xlu1 %12906, %v2295_v25   ;;  %2397 = vperm.xlu0 %12905, %v2294_v26   ;;  %v653_v25 = vld [vmem:[%s19655_s17 + $0x71] sm:$0xff] }
  0xe0   :  { %v13427_v29 = vpop.permute.xlu1 %1813  ;;  %v13429_v30 = vpop.permute.xlu0 %1808 }
  0xe1   :  { %3490 = vperm.xlu1 %12906, %v1198_v21   ;;  %3485 = vperm.xlu0 %12905, %v13324_v54   ;;  %v654_v21 = vld [vmem:[%s19655_s17 + $0x79] sm:$0xff] }
  0xe4   :  { %v13438_v33 = vpop.permute.xlu1 %1823  ;;  %v13440_v34 = vpop.permute.xlu0 %1818 }
  0xe5   :  { %4578 = vperm.xlu1 %12906, %v4487_v31   ;;  %4573 = vperm.xlu0 %12905, %v4486_v32   ;;  %v1750_v32 = vld [vmem:[%s19655_s17 + $0x75] sm:$0xff] }
  0xe8   :  { %v13448_v37 = vpop.permute.xlu1 %1284  ;;  %v13450_v38 = vpop.permute.xlu0 %1279 }
  0xe9   :  { %226 = vperm.xlu1 %12906, %v103_v35   ;;  %221 = vperm.xlu0 %12905, %v102_v36   ;;  %v1749_v35 = vld [vmem:[%s19655_s17 + $0x6d] sm:$0xff] }
  0xec   :  { %v13458_v41 = vpop.permute.xlu1 %2362  ;;  %v13460_v42 = vpop.permute.xlu0 %2357 }
  0xed   :  { %775 = vperm.xlu1 %12906, %v652_v39   ;;  %770 = vperm.xlu0 %12905, %v651_v40   ;;  %v2846_v40 = vld [vmem:[%s19655_s17 + $0x67] sm:$0xff] }
  0xf0   :  { %v13468_v45 = vpop.permute.xlu1 %2372  ;;  %v13470_v46 = vpop.permute.xlu0 %2367 }
  0xf1   :  { %1863 = vperm.xlu1 %12906, %v1748_v43   ;;  %1858 = vperm.xlu0 %12905, %v1747_v44   ;;  %v2845_v43 = vld [vmem:[%s19655_s17 + $0x5f] sm:$0xff] }
  0xf4   :  { %v13478_v49 = vpop.permute.xlu1 %196  ;;  %v13480_v50 = vpop.permute.xlu0 %191 }
  0xf5   :  { %19656 = vst [vmem:[#allocation16_spill] sm:$0xff] %v13480_v50  ;;  %2951 = vperm.xlu1 %12906, %v2844_v47   ;;  %2946 = vperm.xlu0 %12905, %v2843_v48   ;;  %v3942_v48 = vld [vmem:[%s19655_s17 + $0x63] sm:$0xff] }
  0xf8   :  { %v13488_v53 = vpop.permute.xlu1 %745  ;;  %v13490_v54 = vpop.permute.xlu0 %740 }
  0xf9   :  { %4039 = vperm.xlu1 %12906, %v3940_v51   ;;  %4034 = vperm.xlu0 %12905, %v3939_v52   ;;  %v3941_v51 = vld [vmem:[%s19655_s17 + $0x5b] sm:$0xff] }
  0xfc   :  { %v13500_v57 = vpop.permute.xlu1 %1833  ;;  %v13502_v58 = vpop.permute.xlu0 %1828 }
  0xfd   :  { %1324 = vperm.xlu1 %12906, %v13495_v55   ;;  %1319 = vperm.xlu0 %12905, %v1200_v56  }
 0x100   :  { %v13511_v61 = vpop.permute.xlu1 %2911  ;;  %v13513_v0 = vpop.permute.xlu0 %2906 }
 0x101   :  { %2412 = vperm.xlu1 %12906, %v2297_v59   ;;  %2407 = vperm.xlu0 %12905, %v2296_v60   ;;  %v13583_v59 = vld [vmem:[%s19655_s17 + $0x7a] sm:$0xff]  ;;  %v1202_v60 = vld [vmem:[%s19655_s17 + $0x72] sm:$0xff] }
 0x104   :  { %v13515_v1 = vpop.permute.xlu1 %2921  ;;  %v13517_v4 = vpop.permute.xlu0 %2916 }
 0x105   :  { %3500 = vperm.xlu1 %12906, %v1200_v56   ;;  %3495 = vperm.xlu0 %12905, %v13405_v20  }
 0x108   :  { %v13526_v9 = vpop.permute.xlu1 %1294  ;;  %v13528_v12 = vpop.permute.xlu0 %1289 }
 0x109   :  { %19657 = vst [vmem:[#allocation17_spill] sm:$0xff] %v13526_v9  ;;  %19658 = vst [vmem:[#allocation18_spill] sm:$0xff] %v13528_v12  ;;  %4588 = vperm.xlu1 %12906, %v4489_v5   ;;  %4583 = vperm.xlu0 %12905, %v4488_v8  }
 0x10c   :  { %v13536_v17 = vpop.permute.xlu1 %2382  ;;  %v13538_v20 = vpop.permute.xlu0 %2377 }
 0x10d   :  { %236 = vperm.xlu1 %12906, %v105_v13   ;;  %231 = vperm.xlu0 %12905, %v104_v16   ;;  %v2299_v13 = vld [vmem:[%s19655_s17 + $0x76] sm:$0xff]  ;;  %v2298_v16 = vld [vmem:[%s19655_s17 + $0x6e] sm:$0xff] }
 0x110   :  { %v13546_v26 = vpop.permute.xlu1 %3460  ;;  %v13548_v31 = vpop.permute.xlu0 %3455 }
 0x111   :  { %785 = vperm.xlu1 %12906, %v654_v21   ;;  %780 = vperm.xlu0 %12905, %v653_v25  }
 0x114   :  { %v13556_v36 = vpop.permute.xlu1 %3470  ;;  %v13558_v39 = vpop.permute.xlu0 %3465 }
 0x115   :  { %1873 = vperm.xlu1 %12906, %v1750_v32   ;;  %1868 = vperm.xlu0 %12905, %v1749_v35  }
 0x118   :  { %v13566_v44 = vpop.permute.xlu1 %206  ;;  %v13568_v47 = vpop.permute.xlu0 %201 }
 0x119   :  { %19659 = vst [vmem:[#allocation19_spill] sm:$0xff] %v13566_v44  ;;  %19660 = vst [vmem:[#allocation20_spill] sm:$0xff] %v13568_v47  ;;  %2961 = vperm.xlu1 %12906, %v2846_v40   ;;  %2956 = vperm.xlu0 %12905, %v2845_v43   ;;  %v13610_v40 = vld [vmem:[%s19638_s4 + $0x1] ss:$0 sm:$0xff]  ;;  %v4491_v43 = vld [vmem:[%s19655_s17 + $0x64] sm:$0xff] }
 0x11a   :  { %v1052_v22 = vmul.f32 %v13610_v40, %v13370_v7  ;;  %v13640_v47 = vld [vmem:[%s19638_s4 + $0x3] ss:$0 sm:$0xff]  ;;  %v107_v7 = vld [vmem:[%s19655_s17 + $0x88] sm:$0xff] }
 0x11b   :  { %v2150_v50 = vmul.f32 %v13640_v47, %v13429_v30 }
 0x11c   :  { %v13576_v52 = vpop.permute.xlu1 %755  ;;  %v13578_v56 = vpop.permute.xlu0 %750 }
 0x11d   :  { %19661 = vst [vmem:[#allocation21_spill] sm:$0xff] %v13576_v52  ;;  %19662 = vst [vmem:[#allocation22_spill] sm:$0xff] %v13578_v56  ;;  %4049 = vperm.xlu1 %12906, %v3942_v48   ;;  %4044 = vperm.xlu0 %12905, %v3941_v51   ;;  %v4490_v48 = vld [vmem:[%s19655_s17 + $0x5c] sm:$0xff] }
 0x11e   :  { %v13622_v51 = vld [vmem:[%s19638_s4 + $0x2] ss:$0 sm:$0xff] }
 0x11f   :  { %v1602_v56 = vmul.f32 %v13622_v51, %v13388_v14  ;;  %v106_v52 = vld [vmem:[%s19655_s17 + $0x80] sm:$0xff] }
 0x120   :  { %v13588_v5 = vpop.permute.xlu1 %1843  ;;  %v13590_v8 = vpop.permute.xlu0 %1838  ;;  %v13663_v14 = vld [vmem:[%s19638_s4 + $0x4] ss:$0 sm:$0xff] }
 0x121   :  { %19663 = vst [vmem:[#allocation23_spill] sm:$0xff] %v13588_v5  ;;  %19664 = vst [vmem:[#allocation24_spill] sm:$0xff] %v13590_v8  ;;  %1334 = vperm.xlu1 %12906, %v13583_v59   ;;  %1329 = vperm.xlu0 %12905, %v1202_v60   ;;  %v1604_v5 = vmul.f32 %v13622_v51, %v13398_v18 }
 0x124   :  { %v13599_v21 = vpop.permute.xlu1 %2931  ;;  %v13601_v25 = vpop.permute.xlu0 %2926 }
 0x125   :  { %2422 = vperm.xlu1 %12906, %v2299_v13   ;;  %2417 = vperm.xlu0 %12905, %v2298_v16   ;;  %v13627_v13 = vld [vmem:[%s19638_s4] ss:$0 sm:$0xff] }
 0x126   :  { %v504_v44 = vmul.f32 %v13627_v13, %v13360_v3  ;;  %v1054_v3 = vmul.f32 %v13610_v40, %v13380_v11 }
 0x128   :  { %v13603_v32 = vpop.permute.xlu1 %4009  ;;  %v13605_v35 = vpop.permute.xlu0 %4004 }
 0x129   :  { %3510 = vperm.xlu1 %12906, %v1202_v60   ;;  %3505 = vperm.xlu0 %12905, %v13495_v55   ;;  %v1053_v55 = vmul.f32 %v13610_v40, %v13368_v6  ;;  %v1055_v6 = vmul.f32 %v13610_v40, %v13378_v10  ;;  %v1601_v10 = vmul.f32 %v13622_v51, %v13390_v15 }
 0x12a   :  { %v505_v15 = vmul.f32 %v13627_v13, %v13348_v62  ;;  %v656_v62 = vld [vmem:[%s19655_s17 + $0x89] sm:$0xff] }
 0x12b   :  { %v1121_v8 = vadd.f32 %v1053_v55, %v504_v44  ;;  %v1603_v44 = vmul.f32 %v13622_v51, %v13400_v19  ;;  %v2700_v55 = vmul.f32 %v13663_v14, %v13458_v41  ;;  %v13701_v19 = vld [vmem:[%s19638_s4 + $0x6] ss:$0 sm:$0xff] }
 0x12c   :  { %v13631_v60 = vpop.permute.xlu1 %4019  ;;  %v13633_v16 = vpop.permute.xlu0 %4014  ;;  %v1122_v30 = vadd.f32 %v1054_v3, %v505_v15 }
 0x12d   :  { %4598 = vperm.xlu1 %12906, %v4491_v43   ;;  %4593 = vperm.xlu0 %12905, %v4490_v48   ;;  %v503_v43 = vmul.f32 %v13627_v13, %v13350_v63  ;;  %v506_v48 = vmul.f32 %v13627_v13, %v13358_v2  ;;  %v2151_v63 = vmul.f32 %v13640_v47, %v13427_v29  ;;  %v13682_v2 = vld [vmem:[%s19638_s4 + $0x5] ss:$0 sm:$0xff] }
 0x12e   :  { %v1670_v29 = vadd.f32 %v1602_v56, %v1121_v8  ;;  %v2699_v56 = vmul.f32 %v13663_v14, %v13460_v42  ;;  %v2702_v42 = vmul.f32 %v13663_v14, %v13468_v45  ;;  %v1752_v45 = vld [vmem:[%s19655_s17 + $0x85] sm:$0xff] }
 0x12f   :  { %v1120_v9 = vadd.f32 %v1052_v22, %v503_v43  ;;  %v1123_v18 = vadd.f32 %v1055_v6, %v506_v48  ;;  %v655_v22 = vld [vmem:[%s19655_s17 + $0x81] sm:$0xff]  ;;  %v2152_v6 = vmul.f32 %v13640_v47, %v13440_v34  ;;  %v1671_v34 = vadd.f32 %v1603_v44, %v1122_v30 }
 0x130   :  { %v13671_v12 = vpop.permute.xlu1 %1304  ;;  %v13673_v11 = vpop.permute.xlu0 %1299  ;;  %v2219_v8 = vadd.f32 %v2151_v63, %v1670_v29  ;;  %v2701_v48 = vmul.f32 %v13663_v14, %v13470_v46  ;;  %v3797_v29 = vmul.f32 %v13701_v19, %v13548_v31 }
 0x131   :  { %246 = vperm.xlu1 %12906, %v107_v7   ;;  %241 = vperm.xlu0 %12905, %v106_v52   ;;  %v1669_v43 = vadd.f32 %v1601_v10, %v1120_v9  ;;  %v2153_v52 = vmul.f32 %v13640_v47, %v13438_v33  ;;  %v1672_v41 = vadd.f32 %v1604_v5, %v1123_v18  ;;  %v13718_v5 = vld [vmem:[%s19638_s4 + $0x7] ss:$0 sm:$0xff] }
 0x132   :  { %v3249_v7 = vmul.f32 %v13682_v2, %v13511_v61  ;;  %v3248_v10 = vmul.f32 %v13682_v2, %v13513_v0  ;;  %v2768_v61 = vadd.f32 %v2700_v55, %v2219_v8  ;;  %v1751_v0 = vld [vmem:[%s19655_s17 + $0x7d] sm:$0xff]  ;;  %v3251_v18 = vmul.f32 %v13682_v2, %v13515_v1 }
 0x133   :  { %v2218_v33 = vadd.f32 %v2150_v50, %v1669_v43  ;;  %v3798_v50 = vmul.f32 %v13701_v19, %v13546_v26  ;;  %v2221_v63 = vadd.f32 %v2153_v52, %v1672_v41  ;;  %v2220_v46 = vadd.f32 %v2152_v6, %v1671_v34  ;;  %v2848_v41 = vld [vmem:[%s19655_s17 + $0x77] sm:$0xff] }
 0x134   :  { %v13707_v9 = vpop.permute.xlu1 %2392  ;;  %v13709_v3 = vpop.permute.xlu0 %2387  ;;  %v3317_v44 = vadd.f32 %v3249_v7, %v2768_v61  ;;  %v3250_v26 = vmul.f32 %v13682_v2, %v13517_v4  ;;  %v4347_v55 = vmul.f32 %v13718_v5, %v13603_v32  ;;  %v4346_v1 = vmul.f32 %v13718_v5, %v13605_v35  ;;  %v13751_v32 = vld [vmem:[%s19638_s4 + $0x8] ss:$0 sm:$0xff]  ;;  %v2847_v35 = vld [vmem:[%s19655_s17 + $0x6f] sm:$0xff] }
 0x135   :  { %795 = vperm.xlu1 %12906, %v656_v62   ;;  %790 = vperm.xlu0 %12905, %v655_v22   ;;  %v2767_v15 = vadd.f32 %v2699_v56, %v2218_v33  ;;  %v2770_v30 = vadd.f32 %v2702_v42, %v2221_v63  ;;  %v2769_v31 = vadd.f32 %v2701_v48, %v2220_v46 }
 0x136   :  { %v3866_v52 = vadd.f32 %v3798_v50, %v3317_v44  ;;  %v3800_v56 = vmul.f32 %v13701_v19, %v13556_v36  ;;  %v3799_v4 = vmul.f32 %v13701_v19, %v13558_v39  ;;  %v4349_v39 = vmul.f32 %v13718_v5, %v13631_v60  ;;  %v3944_v60 = vld [vmem:[%s19655_s17 + $0x73] sm:$0xff] }
 0x137   :  { %v3316_v43 = vadd.f32 %v3248_v10, %v2767_v15  ;;  %v3319_v8 = vadd.f32 %v3251_v18, %v2770_v30  ;;  %v3318_v7 = vadd.f32 %v3250_v26, %v2769_v31  ;;  %v4348_v33 = vmul.f32 %v13718_v5, %v13633_v16  ;;  %v3943_v15 = vld [vmem:[%s19655_s17 + $0x6b] sm:$0xff] }
 0x138   :  { %v13738_v62 = vpop.permute.xlu1 %3480  ;;  %v13740_v22 = vpop.permute.xlu0 %3475  ;;  %v4415_v36 = vadd.f32 %v4347_v55, %v3866_v52 }
 0x139   :  { %1883 = vperm.xlu1 %12906, %v1752_v45   ;;  %1878 = vperm.xlu0 %12905, %v1751_v0   ;;  %v3865_v6 = vadd.f32 %v3797_v29, %v3316_v43  ;;  %v3868_v50 = vadd.f32 %v3800_v56, %v3319_v8  ;;  %v3867_v45 = vadd.f32 %v3799_v4, %v3318_v7  ;;  %v13768_v0 = vld [vmem:[%s19639_s5] ss:$0 sm:$0xff] }
 0x13b   :  { %v4414_v34 = vadd.f32 %v4346_v1, %v3865_v6  ;;  %v4417_v18 = vadd.f32 %v4349_v39, %v3868_v50  ;;  %v4416_v29 = vadd.f32 %v4348_v33, %v3867_v45  ;;  %v13783_v1 = vld [vmem:[%s19655_s17 + $0x8a] sm:$0xff]  ;;  %v4493_v50 = vld [vmem:[%s19655_s17 + $0x74] sm:$0xff] }
 0x13c   :  { %v4559_v42 = vpop.permute.xlu1 %4558  ;;  %v4554_v10 = vpop.permute.xlu0 %4553  ;;  %v4492_v45 = vld [vmem:[%s19655_s17 + $0x6c] sm:$0xff] }
 0x13d   :  { %v4896_v61 = vmul.f32 %v13751_v32, %v4559_v42  ;;  %v4895_v48 = vmul.f32 %v13751_v32, %v4554_v10  ;;  %2971 = vperm.xlu1 %12906, %v2848_v41   ;;  %2966 = vperm.xlu0 %12905, %v2847_v35   ;;  %v1204_v41 = vld [vmem:[%s19655_s17 + $0x82] sm:$0xff] }
 0x13e   :  { %v2300_v42 = vld [vmem:[%s19655_s17 + $0x7e] sm:$0xff] }
 0x13f   :  { %v4964_v16 = vadd.f32 %v4896_v61, %v4415_v36  ;;  %v4963_v63 = vadd.f32 %v4895_v48, %v4414_v34  ;;  %v2301_v36 = vld [vmem:[%s19655_s17 + $0x86] sm:$0xff] }
 0x140   :  { %v4569_v46 = vpop.permute.xlu1 %4568  ;;  %v4564_v44 = vpop.permute.xlu0 %4563 }
 0x141   :  { %v5039_v26 = vadd.f32 %v13768_v0, %v4964_v16  ;;  %v5038_v55 = vadd.f32 %v13768_v0, %v4963_v63  ;;  %v4898_v30 = vmul.f32 %v13751_v32, %v4569_v46  ;;  %v4897_v43 = vmul.f32 %v13751_v32, %v4564_v44  ;;  %4059 = vperm.xlu1 %12906, %v3944_v60  }
 0x142   :  { %4054 = vperm.xlu0 %12905, %v3943_v15  }
 0x143   :  { %v5107_v31 = vmax.f32 %v5039_v26, 0.0  ;;  %v5106_v52 = vmax.f32 %v5038_v55, 0.0  ;;  %v4966_v56 = vadd.f32 %v4898_v30, %v4417_v18  ;;  %v4965_v4 = vadd.f32 %v4897_v43, %v4416_v29  ;;  %v109_v30 = vld [vmem:[%s19655_s17 + $0x98] sm:$0xff] }
 0x144   :  { %v13788_v35 = vpop.permute.xlu1 %216  ;;  %v13790_v8 = vpop.permute.xlu0 %211 }
 0x145   :  { %5176 = vst.msk [vmem:[#allocation2 + $0x8] sm:$0xff] %vm5174_vm0, %v5107_v31  ;;  %5175 = vst.msk [vmem:[#allocation2] sm:$0xff] %vm5174_vm0, %v5106_v52  ;;  %v5041_v6 = vadd.f32 %v13768_v0, %v4966_v56  ;;  %v5040_v7 = vadd.f32 %v13768_v0, %v4965_v4  ;;  %1344 = vperm.xlu1 %12906, %v13783_v1   ;;  %v108_v56 = vld [vmem:[%s19655_s17 + $0x90] sm:$0xff]  ;;  %v1057_v4 = vmul.f32 %v13610_v40, %v13423_v27 }
 0x146   :  { %1339 = vperm.xlu0 %12905, %v1204_v41   ;;  %v507_v27 = vmul.f32 %v13627_v13, %v13414_v24  ;;  %v2155_v24 = vmul.f32 %v13640_v47, %v13500_v57  ;;  %v1753_v57 = vld [vmem:[%s19655_s17 + $0x8d] sm:$0xff] }
 0x147   :  { %v5109_v39 = vmax.f32 %v5041_v6, 0.0  ;;  %v5108_v33 = vmax.f32 %v5040_v7, 0.0 }
 0x148   :  { %v13803_v10 = vpop.permute.xlu1 %765  ;;  %v13805_v34 = vpop.permute.xlu0 %760 }
 0x149   :  { %5178 = vst.msk [vmem:[#allocation2 + $0x18] sm:$0xff] %vm5174_vm0, %v5109_v39  ;;  %5177 = vst.msk [vmem:[#allocation2 + $0x10] sm:$0xff] %vm5174_vm0, %v5108_v33  ;;  %2432 = vperm.xlu1 %12906, %v2301_v36   ;;  %v1056_v39 = vmul.f32 %v13610_v40, %v13425_v28  ;;  %v508_v33 = vmul.f32 %v13627_v13, %v13412_v23  ;;  %v657_v28 = vld [vmem:[%s19655_s17 + $0x91] sm:$0xff] }
 0x14a   :  { %2427 = vperm.xlu0 %12905, %v2300_v42  }
 0x14b   :  { %v1125_v23 = vadd.f32 %v1057_v4, %v508_v33 }
 0x14c   :  { %v13809_v61 = vpop.permute.xlu1 %1853  ;;  %v13811_v48 = vpop.permute.xlu0 %1848  ;;  %v5348_v60 = vld [vmem:[#allocation2] sm:$0xff]  ;;  %v5349_v16 = vld [vmem:[#allocation2 + $0x8] sm:$0xff] }
 0x14d   :  { %3520 = vperm.xlu1 %12906, %v1204_v41   ;;  %v5415_v63 = vld [vmem:[#allocation2 + $0x1] sm:$0xff] }
 0x14e   :  { %3515 = vperm.xlu0 %12905, %v13583_v59   ;;  %v5482_v43 = vmax.f32 %v5348_v60, %v5415_v63  ;;  %v1605_v60 = vmul.f32 %v13622_v51, %v13450_v38  ;;  %v1754_v38 = vld [vmem:[%s19655_s17 + $0x95] sm:$0xff] }
 0x150   :  { %v13820_v15 = vpop.permute.xlu1 %2941  ;;  %v13822_v18 = vpop.permute.xlu0 %2936  ;;  %v5416_v29 = vld [vmem:[#allocation2 + $0x9] sm:$0xff]  ;;  %v5550_v44 = vld [vmem:[#allocation2 + $0x15] sm:$0xff] }
 0x151   :  { %v5549_v46 = vld [vmem:[#allocation2 + $0xd] sm:$0xff]  ;;  %4608 = vperm.xlu1 %12906, %v4493_v50   ;;  %v5483_v59 = vmax.f32 %v5349_v16, %v5416_v29  ;;  %v5617_v55 = vld [vmem:[#allocation2 + $0x16] sm:$0xff]  ;;  %v1124_v29 = vadd.f32 %v1056_v39, %v507_v27 }
 0x152   :  { %v5616_v26 = vld [vmem:[#allocation2 + $0xe] sm:$0xff]  ;;  %4603 = vperm.xlu0 %12905, %v4492_v45   ;;  %v5684_v52 = vmax.f32 %v5550_v44, %v5617_v55  ;;  %v658_v50 = vld [vmem:[%s19655_s17 + $0x99] sm:$0xff]  ;;  %v1606_v45 = vmul.f32 %v13622_v51, %v13448_v37  ;;  %v2154_v37 = vmul.f32 %v13640_v47, %v13502_v58  ;;  %v2703_v55 = vmul.f32 %v13663_v14, %v13538_v20 }
 0x153   :  { %v5683_v31 = vmax.f32 %v5549_v46, %v5616_v26  ;;  %v19665_v46 = vmov 0.0|0.0   ;;  %v2704_v26 = vmul.f32 %v13663_v14, %v13536_v17  ;;  %v2850_v17 = vld [vmem:[%s19655_s17 + $0x87] sm:$0xff] }
 0x154   :  { %v4030_v41 = vpop.permute.xlu1 %4029  ;;  %v4025_v6 = vpop.permute.xlu0 %4024  ;;  %v5751_v36 = vmax.f32 %v5483_v59, %v5684_v52  ;;  %v1674_v44 = vadd.f32 %v1606_v45, %v1125_v23  ;;  %v1673_v59 = vadd.f32 %v1605_v60, %v1124_v29  ;;  %v3253_v52 = vmul.f32 %v13682_v2, %v13599_v21  ;;  %v2849_v21 = vld [vmem:[%s19655_s17 + $0x7f] sm:$0xff] }
 0x155   :  { %v5750_v7 = vmax.f32 %v5482_v43, %v5683_v31  ;;  %256 = vperm.xlu1 %12906, %v109_v30   ;;  %v4350_v27 = vmul.f32 %v13718_v5, %v4025_v6  ;;  %v3945_v60 = vld [vmem:[%s19655_s17 + $0x7b] sm:$0xff] }
 0x156   :  { %251 = vperm.xlu0 %12905, %v108_v56   ;;  %v2223_v43 = vadd.f32 %v2155_v24, %v1674_v44  ;;  %v2222_v31 = vadd.f32 %v2154_v37, %v1673_v59  ;;  %v3252_v56 = vmul.f32 %v13682_v2, %v13601_v25  ;;  %v13902_v37 = vld [vmem:[%s19655_s17 + $0x9a] sm:$0xff]  ;;  %v1206_v59 = vld [vmem:[%s19655_s17 + $0x92] sm:$0xff] }
 0x157   :  { %v12360_v42 = vpack.c.bf16 %v5751_v36, %v5750_v7  ;;  %v3802_v7 = vmul.f32 %v13701_v19, %v13738_v62  ;;  %v3801_v36 = vmul.f32 %v13701_v19, %v13740_v22  ;;  %v3946_v62 = vld [vmem:[%s19655_s17 + $0x83] sm:$0xff] }
 0x158   :  { %v13848_v16 = vpop.permute.xlu1 %1314  ;;  %v13850_v63 = vpop.permute.xlu0 %1309  ;;  %v2772_v20 = vadd.f32 %v2704_v26, %v2223_v43  ;;  %v2771_v4 = vadd.f32 %v2703_v55, %v2222_v31  ;;  %v2303_v31 = vld [vmem:[%s19655_s17 + $0x96] sm:$0xff] }
 0x159   :  { %12361 = vmatpush1.bf16.msra.mxu0 %v12360_v42  ;;  %805 = vperm.xlu1 %12906, %v658_v50   ;;  %v4351_v50 = vmul.f32 %v13718_v5, %v4030_v41 }
 0x15a   :  { %12362 = vmatprep.subr.bf16.mxu0 %v19665_v46  ;;  %800 = vperm.xlu0 %12905, %v657_v28   ;;  %v3321_v33 = vadd.f32 %v3253_v52, %v2772_v20  ;;  %v3320_v42 = vadd.f32 %v3252_v56, %v2771_v4 }
 0x15c   :  { %v13867_v58 = vpop.permute.xlu1 %2402  ;;  %v13869_v30 = vpop.permute.xlu0 %2397  ;;  %v3870_v22 = vadd.f32 %v3802_v7, %v3321_v33  ;;  %v3869_v45 = vadd.f32 %v3801_v36, %v3320_v42  ;;  %v4494_v33 = vld [vmem:[%s19655_s17 + $0x7c] sm:$0xff]  ;;  %v5350_v42 = vld [vmem:[#allocation2 + $0x10] sm:$0xff] }
 0x15d   :  { %1893 = vperm.xlu1 %12906, %v1754_v38  }
 0x15e   :  { %1888 = vperm.xlu0 %12905, %v1753_v57   ;;  %v4419_v29 = vadd.f32 %v4351_v50, %v3870_v22  ;;  %v4418_v24 = vadd.f32 %v4350_v27, %v3869_v45  ;;  %v5351_v50 = vld [vmem:[#allocation2 + $0x18] sm:$0xff] }
 0x15f   :  { %v5417_v27 = vld [vmem:[#allocation2 + $0x11] sm:$0xff] }
 0x160   :  { %v13885_v39 = vpop.permute.xlu1 %3490  ;;  %v13887_v25 = vpop.permute.xlu0 %3485 }
 0x161   :  { %2981 = vperm.xlu1 %12906, %v2850_v17   ;;  %v2302_v17 = vld [vmem:[%s19655_s17 + $0x8e] sm:$0xff] }
 0x162   :  { %2976 = vperm.xlu0 %12905, %v2849_v21   ;;  %v4495_v21 = vld [vmem:[%s19655_s17 + $0x84] sm:$0xff] }
 0x164   :  { %v4579_v28 = vpop.permute.xlu1 %4578  ;;  %v4574_v23 = vpop.permute.xlu0 %4573 }
 0x165   :  { %v4900_v41 = vmul.f32 %v13751_v32, %v4579_v28  ;;  %v4899_v6 = vmul.f32 %v13751_v32, %v4574_v23  ;;  %4069 = vperm.xlu1 %12906, %v3946_v62  }
 0x166   :  { %4064 = vperm.xlu0 %12905, %v3945_v60  }
 0x167   :  { %v4968_v38 = vadd.f32 %v4900_v41, %v4419_v29  ;;  %v4967_v44 = vadd.f32 %v4899_v6, %v4418_v24  ;;  %v111_v24 = vld [vmem:[%s19655_s17 + $0xa8] sm:$0xff]  ;;  %v5484_v41 = vmax.f32 %v5350_v42, %v5417_v27  ;;  %v19666_v42 = vld [vmem:[#allocation16_spill] sm:$0xff] }
 0x168   :  { %v13907_v26 = vpop.permute.xlu1 %226  ;;  %v13909_v55 = vpop.permute.xlu0 %221 }
 0x169   :  { %v5043_v57 = vadd.f32 %v13768_v0, %v4968_v38  ;;  %v5042_v43 = vadd.f32 %v13768_v0, %v4967_v44  ;;  %1354 = vperm.xlu1 %12906, %v13902_v37   ;;  %v110_v44 = vld [vmem:[%s19655_s17 + $0xa0] sm:$0xff] }
 0x16a   :  { %1349 = vperm.xlu0 %12905, %v1206_v59  }
 0x16b   :  { %v5111_v52 = vmax.f32 %v5043_v57, 0.0  ;;  %v5110_v56 = vmax.f32 %v5042_v43, 0.0 }
 0x16c   :  { %v13920_v20 = vpop.permute.xlu1 %775  ;;  %v13922_v4 = vpop.permute.xlu0 %770 }
 0x16d   :  { %5180 = vst.msk [vmem:[#allocation2 + $0x28] sm:$0xff] %vm5174_vm0, %v5111_v52  ;;  %5179 = vst.msk [vmem:[#allocation2 + $0x20] sm:$0xff] %vm5174_vm0, %v5110_v56  ;;  %2442 = vperm.xlu1 %12906, %v2303_v31   ;;  %v1058_v56 = vmul.f32 %v13610_v40, %v13490_v54  ;;  %v659_v54 = vld [vmem:[%s19655_s17 + $0xa1] sm:$0xff] }
 0x16e   :  { %2437 = vperm.xlu0 %12905, %v2302_v17   ;;  %v510_v17 = vmul.f32 %v13627_v13, %v13478_v49 }
 0x170   :  { %v13926_v7 = vpop.permute.xlu1 %1863  ;;  %v13928_v36 = vpop.permute.xlu0 %1858 }
 0x171   :  { %3530 = vperm.xlu1 %12906, %v1206_v59   ;;  %v1059_v59 = vmul.f32 %v13610_v40, %v13488_v53  ;;  %v509_v53 = vmul.f32 %v13627_v13, %v19666_v42 }
 0x172   :  { %3525 = vperm.xlu0 %12905, %v13783_v1  }
 0x173   :  { %v1127_v49 = vadd.f32 %v1059_v59, %v510_v17 }
 0x174   :  { %v13937_v62 = vpop.permute.xlu1 %2951  ;;  %v13939_v22 = vpop.permute.xlu0 %2946  ;;  %v5418_v45 = vld [vmem:[#allocation2 + $0x19] sm:$0xff]  ;;  %v5552_v28 = vld [vmem:[#allocation2 + $0x25] sm:$0xff] }
 0x175   :  { %v5551_v60 = vld [vmem:[#allocation2 + $0x1d] sm:$0xff]  ;;  %4618 = vperm.xlu1 %12906, %v4495_v21   ;;  %v5485_v1 = vmax.f32 %v5351_v50, %v5418_v45  ;;  %v5619_v29 = vld [vmem:[#allocation2 + $0x26] sm:$0xff] }
 0x176   :  { %v5618_v23 = vld [vmem:[#allocation2 + $0x1e] sm:$0xff]  ;;  %4613 = vperm.xlu0 %12905, %v4494_v33   ;;  %v5686_v38 = vmax.f32 %v5552_v28, %v5619_v29  ;;  %v660_v33 = vld [vmem:[%s19655_s17 + $0xa9] sm:$0xff] }
 0x177   :  { %v5685_v6 = vmax.f32 %v5551_v60, %v5618_v23  ;;  %v19667_v50 = vld [vmem:[#allocation17_spill] sm:$0xff]  ;;  %v19668_v45 = vld [vmem:[#allocation18_spill] sm:$0xff]  ;;  %v1126_v23 = vadd.f32 %v1058_v56, %v509_v53  ;;  %v19669_v29 = vld [vmem:[#allocation23_spill] sm:$0xff]  ;;  %v3255_v53 = vmul.f32 %v13682_v2, %v13820_v15 }
 0x178   :  { %v4040_v57 = vpop.permute.xlu1 %4039  ;;  %v4035_v43 = vpop.permute.xlu0 %4034  ;;  %v5753_v52 = vmax.f32 %v5485_v1, %v5686_v38  ;;  %v1608_v27 = vmul.f32 %v13622_v51, %v19667_v50  ;;  %v1607_v60 = vmul.f32 %v13622_v51, %v19668_v45  ;;  %v1756_v38 = vld [vmem:[%s19655_s17 + $0xa5] sm:$0xff]  ;;  %v1755_v56 = vld [vmem:[%s19655_s17 + $0x9d] sm:$0xff]  ;;  %v3254_v50 = vmul.f32 %v13682_v2, %v13822_v18  ;;  %v2851_v15 = vld [vmem:[%s19655_s17 + $0x8f] sm:$0xff] }
 0x179   :  { %v5752_v31 = vmax.f32 %v5484_v41, %v5685_v6  ;;  %266 = vperm.xlu1 %12906, %v111_v24   ;;  %v2157_v24 = vmul.f32 %v13640_v47, %v19669_v29  ;;  %v19670_v41 = vld [vmem:[#allocation24_spill] sm:$0xff]  ;;  %v3804_v45 = vmul.f32 %v13701_v19, %v13885_v39  ;;  %v4353_v29 = vmul.f32 %v13718_v5, %v4040_v57 }
 0x17a   :  { %261 = vperm.xlu0 %12905, %v110_v44   ;;  %v2156_v6 = vmul.f32 %v13640_v47, %v19670_v41  ;;  %v1676_v44 = vadd.f32 %v1608_v27, %v1127_v49  ;;  %v1675_v59 = vadd.f32 %v1607_v60, %v1126_v23  ;;  %v3803_v60 = vmul.f32 %v13701_v19, %v13887_v25  ;;  %v3948_v39 = vld [vmem:[%s19655_s17 + $0x93] sm:$0xff] }
 0x17b   :  { %v12363_v21 = vpack.c.bf16 %v5753_v52, %v5752_v31  ;;  %v2706_v31 = vmul.f32 %v13663_v14, %v13707_v9  ;;  %v2705_v52 = vmul.f32 %v13663_v14, %v13709_v3  ;;  %v2852_v9 = vld [vmem:[%s19655_s17 + $0x97] sm:$0xff] }
 0x17c   :  { %v13965_v28 = vpop.permute.xlu1 %1324  ;;  %v13967_v1 = vpop.permute.xlu0 %1319  ;;  %v2224_v42 = vadd.f32 %v2156_v6, %v1675_v59  ;;  %v3947_v6 = vld [vmem:[%s19655_s17 + $0x8b] sm:$0xff] }
 0x17d   :  { %12364 = vmatpush1.bf16.msra.mxu0 %v12363_v21  ;;  %815 = vperm.xlu1 %12906, %v660_v33   ;;  %v2225_v33 = vadd.f32 %v2157_v24, %v1676_v44  ;;  %v4352_v24 = vmul.f32 %v13718_v5, %v4035_v43 }
 0x17e   :  { %12365 = vmatprep.subr.bf16.mxu0 %v19665_v46  ;;  %810 = vperm.xlu0 %12905, %v659_v54   ;;  %v2773_v27 = vadd.f32 %v2705_v52, %v2224_v42  ;;  %v14019_v52 = vld [vmem:[%s19655_s17 + $0xaa] sm:$0xff]  ;;  %v1208_v42 = vld [vmem:[%s19655_s17 + $0xa2] sm:$0xff] }
 0x17f   :  { %v2774_v3 = vadd.f32 %v2706_v31, %v2225_v33 }
 0x180   :  { %v13984_v17 = vpop.permute.xlu1 %2412  ;;  %v13986_v21 = vpop.permute.xlu0 %2407  ;;  %v3322_v23 = vadd.f32 %v3254_v50, %v2773_v27  ;;  %v2305_v27 = vld [vmem:[%s19655_s17 + $0xa6] sm:$0xff] }
 0x181   :  { %1903 = vperm.xlu1 %12906, %v1756_v38   ;;  %v3323_v49 = vadd.f32 %v3255_v53, %v2774_v3 }
 0x182   :  { %1898 = vperm.xlu0 %12905, %v1755_v56   ;;  %v3871_v41 = vadd.f32 %v3803_v60, %v3322_v23 }
 0x183   :  { %v3872_v25 = vadd.f32 %v3804_v45, %v3323_v49 }
 0x184   :  { %v14002_v54 = vpop.permute.xlu1 %3500  ;;  %v14004_v18 = vpop.permute.xlu0 %3495  ;;  %v4420_v31 = vadd.f32 %v4352_v24, %v3871_v41  ;;  %v5352_v41 = vld [vmem:[#allocation2 + $0x20] sm:$0xff] }
 0x185   :  { %2991 = vperm.xlu1 %12906, %v2852_v9   ;;  %v4421_v59 = vadd.f32 %v4353_v29, %v3872_v25  ;;  %v4496_v25 = vld [vmem:[%s19655_s17 + $0x8c] sm:$0xff] }
 0x186   :  { %2986 = vperm.xlu0 %12905, %v2851_v15   ;;  %v2304_v15 = vld [vmem:[%s19655_s17 + $0x9e] sm:$0xff] }
 0x188   :  { %v4589_v38 = vpop.permute.xlu1 %4588  ;;  %v4584_v44 = vpop.permute.xlu0 %4583 }
 0x189   :  { %v4902_v57 = vmul.f32 %v13751_v32, %v4589_v38  ;;  %v4901_v43 = vmul.f32 %v13751_v32, %v4584_v44  ;;  %4079 = vperm.xlu1 %12906, %v3948_v39   ;;  %v4497_v39 = vld [vmem:[%s19655_s17 + $0x94] sm:$0xff]  ;;  %v5419_v38 = vld [vmem:[#allocation2 + $0x21] sm:$0xff] }
 0x18a   :  { %4074 = vperm.xlu0 %12905, %v3947_v6   ;;  %v5353_v6 = vld [vmem:[#allocation2 + $0x28] sm:$0xff] }
 0x18b   :  { %v4970_v56 = vadd.f32 %v4902_v57, %v4421_v59  ;;  %v4969_v33 = vadd.f32 %v4901_v43, %v4420_v31 }
 0x18c   :  { %v14024_v53 = vpop.permute.xlu1 %236  ;;  %v14026_v50 = vpop.permute.xlu0 %231 }
 0x18d   :  { %19671 = vst [vmem:[#allocation16_spill] sm:$0xff] %v14024_v53  ;;  %19672 = vst [vmem:[#allocation17_spill] sm:$0xff] %v14026_v50  ;;  %v5045_v9 = vadd.f32 %v13768_v0, %v4970_v56  ;;  %v5044_v3 = vadd.f32 %v13768_v0, %v4969_v33  ;;  %1364 = vperm.xlu1 %12906, %v14019_v52   ;;  %v19675_v53 = vld [vmem:[#allocation22_spill] sm:$0xff] }
 0x18e   :  { %1359 = vperm.xlu0 %12905, %v1208_v42  }
 0x18f   :  { %v5113_v45 = vmax.f32 %v5045_v9, 0.0  ;;  %v5112_v60 = vmax.f32 %v5044_v3, 0.0  ;;  %v5486_v9 = vmax.f32 %v5352_v41, %v5419_v38 }
 0x190   :  { %v14037_v49 = vpop.permute.xlu1 %785  ;;  %v14039_v23 = vpop.permute.xlu0 %780 }
 0x191   :  { %19673 = vst [vmem:[#allocation18_spill] sm:$0xff] %v14039_v23  ;;  %5182 = vst.msk [vmem:[#allocation2 + $0x38] sm:$0xff] %vm5174_vm0, %v5113_v45  ;;  %2452 = vperm.xlu1 %12906, %v2305_v27   ;;  %v112_v45 = vld [vmem:[%s19655_s17 + $0xb0] sm:$0xff] }
 0x192   :  { %5181 = vst.msk [vmem:[#allocation2 + $0x30] sm:$0xff] %vm5174_vm0, %v5112_v60  ;;  %2447 = vperm.xlu0 %12905, %v2304_v15   ;;  %v19674_v60 = vld [vmem:[#allocation21_spill] sm:$0xff]  ;;  %v19676_v23 = vld [vmem:[#allocation19_spill] sm:$0xff] }
 0x193   :  { %v1061_v15 = vmul.f32 %v13610_v40, %v19674_v60  ;;  %v512_v41 = vmul.f32 %v13627_v13, %v19676_v23 }
 0x194   :  { %v14043_v29 = vpop.permute.xlu1 %1873  ;;  %v14045_v24 = vpop.permute.xlu0 %1868 }
 0x195   :  { %3540 = vperm.xlu1 %12906, %v1208_v42   ;;  %v113_v42 = vld [vmem:[%s19655_s17 + $0xb8] sm:$0xff]  ;;  %v1129_v23 = vadd.f32 %v1061_v15, %v512_v41  ;;  %v2708_v15 = vmul.f32 %v13663_v14, %v13867_v58  ;;  %v2854_v58 = vld [vmem:[%s19655_s17 + $0xa7] sm:$0xff] }
 0x196   :  { %3535 = vperm.xlu0 %12905, %v13902_v37  }
 0x198   :  { %v14054_v44 = vpop.permute.xlu1 %2961  ;;  %v14056_v59 = vpop.permute.xlu0 %2956 }
 0x199   :  { %v5420_v31 = vld [vmem:[#allocation2 + $0x29] sm:$0xff]  ;;  %v5554_v43 = vld [vmem:[#allocation2 + $0x35] sm:$0xff]  ;;  %4628 = vperm.xlu1 %12906, %v4497_v39  }
 0x19a   :  { %v5553_v57 = vld [vmem:[#allocation2 + $0x2d] sm:$0xff]  ;;  %v5487_v37 = vmax.f32 %v5353_v6, %v5420_v31  ;;  %v5621_v33 = vld [vmem:[#allocation2 + $0x36] sm:$0xff]  ;;  %4623 = vperm.xlu0 %12905, %v4496_v25   ;;  %v1060_v25 = vmul.f32 %v13610_v40, %v19675_v53 }
 0x19b   :  { %v5620_v56 = vld [vmem:[#allocation2 + $0x2e] sm:$0xff]  ;;  %v5688_v27 = vmax.f32 %v5554_v43, %v5621_v33  ;;  %v1610_v33 = vmul.f32 %v13622_v51, %v13671_v12  ;;  %v2158_v12 = vmul.f32 %v13640_v47, %v13811_v48 }
 0x19c   :  { %v5687_v3 = vmax.f32 %v5553_v57, %v5620_v56  ;;  %v4050_v50 = vpop.permute.xlu1 %4049  ;;  %v4045_v39 = vpop.permute.xlu0 %4044  ;;  %v662_v57 = vld [vmem:[%s19655_s17 + $0xb9] sm:$0xff]  ;;  %v661_v53 = vld [vmem:[%s19655_s17 + $0xb1] sm:$0xff] }
 0x19d   :  { %v5755_v31 = vmax.f32 %v5487_v37, %v5688_v27  ;;  %276 = vperm.xlu1 %12906, %v113_v42   ;;  %v19677_v43 = vld [vmem:[#allocation20_spill] sm:$0xff]  ;;  %v1609_v37 = vmul.f32 %v13622_v51, %v13673_v11  ;;  %v2159_v27 = vmul.f32 %v13640_v47, %v13809_v61 }
 0x19e   :  { %v5754_v6 = vmax.f32 %v5486_v9, %v5687_v3  ;;  %271 = vperm.xlu0 %12905, %v112_v45   ;;  %v511_v56 = vmul.f32 %v13627_v13, %v19677_v43  ;;  %v1758_v11 = vld [vmem:[%s19655_s17 + $0xb5] sm:$0xff]  ;;  %v1678_v45 = vadd.f32 %v1610_v33, %v1129_v23  ;;  %v1757_v61 = vld [vmem:[%s19655_s17 + $0xad] sm:$0xff]  ;;  %v3805_v33 = vmul.f32 %v13701_v19, %v14004_v18 }
 0x1a0   :  { %v12366_v38 = vpack.c.bf16 %v5755_v31, %v5754_v6  ;;  %v14082_v42 = vpop.permute.xlu1 %1334  ;;  %v14084_v9 = vpop.permute.xlu0 %1329  ;;  %v1128_v3 = vadd.f32 %v1060_v25, %v511_v56  ;;  %v2707_v6 = vmul.f32 %v13663_v14, %v13869_v30  ;;  %v2227_v25 = vadd.f32 %v2159_v27, %v1678_v45 }
 0x1a1   :  { %825 = vperm.xlu1 %12906, %v662_v57   ;;  %v3256_v57 = vmul.f32 %v13682_v2, %v13939_v22  ;;  %v3806_v56 = vmul.f32 %v13701_v19, %v14002_v54  ;;  %v4354_v27 = vmul.f32 %v13718_v5, %v4045_v39  ;;  %v3950_v54 = vld [vmem:[%s19655_s17 + $0xa3] sm:$0xff] }
 0x1a2   :  { %12367 = vmatpush1.bf16.msra.mxu0 %v12366_v38  ;;  %820 = vperm.xlu0 %12905, %v661_v53   ;;  %v1677_v60 = vadd.f32 %v1609_v37, %v1128_v3  ;;  %v3257_v38 = vmul.f32 %v13682_v2, %v13937_v62  ;;  %v2776_v30 = vadd.f32 %v2708_v15, %v2227_v25  ;;  %v2853_v62 = vld [vmem:[%s19655_s17 + $0x9f] sm:$0xff] }
 0x1a3   :  { %12368 = vmatprep.subr.bf16.mxu0 %v19665_v46  ;;  %v4355_v3 = vmul.f32 %v13718_v5, %v4050_v50 }
 0x1a4   :  { %v14101_v48 = vpop.permute.xlu1 %2422  ;;  %v14103_v31 = vpop.permute.xlu0 %2417  ;;  %v2226_v41 = vadd.f32 %v2158_v12, %v1677_v60  ;;  %v3325_v53 = vadd.f32 %v3257_v38, %v2776_v30  ;;  %v1210_v38 = vld [vmem:[%s19655_s17 + $0xb2] sm:$0xff] }
 0x1a5   :  { %1913 = vperm.xlu1 %12906, %v1758_v11   ;;  %v3949_v11 = vld [vmem:[%s19655_s17 + $0x9b] sm:$0xff] }
 0x1a6   :  { %1908 = vperm.xlu0 %12905, %v1757_v61   ;;  %v2775_v43 = vadd.f32 %v2707_v6, %v2226_v41  ;;  %v3874_v18 = vadd.f32 %v3806_v56, %v3325_v53  ;;  %v14136_v61 = vld [vmem:[%s19655_s17 + $0xba] sm:$0xff]  ;;  %v2306_v53 = vld [vmem:[%s19655_s17 + $0xae] sm:$0xff] }
 0x1a7   :  { %v2307_v56 = vld [vmem:[%s19655_s17 + $0xb6] sm:$0xff] }
 0x1a8   :  { %v14119_v37 = vpop.permute.xlu1 %3510  ;;  %v14121_v22 = vpop.permute.xlu0 %3505  ;;  %v3324_v23 = vadd.f32 %v3256_v57, %v2775_v43  ;;  %v4423_v15 = vadd.f32 %v4355_v3, %v3874_v18  ;;  %v4499_v18 = vld [vmem:[%s19655_s17 + $0xa4] sm:$0xff] }
 0x1a9   :  { %3001 = vperm.xlu1 %12906, %v2854_v58  }
 0x1aa   :  { %2996 = vperm.xlu0 %12905, %v2853_v62   ;;  %v3873_v12 = vadd.f32 %v3805_v33, %v3324_v23 }
 0x1ac   :  { %v4599_v45 = vpop.permute.xlu1 %4598  ;;  %v4594_v60 = vpop.permute.xlu0 %4593  ;;  %v4422_v6 = vadd.f32 %v4354_v27, %v3873_v12  ;;  %v4498_v12 = vld [vmem:[%s19655_s17 + $0x9c] sm:$0xff] }
 0x1ad   :  { %v4904_v50 = vmul.f32 %v13751_v32, %v4599_v45  ;;  %v4903_v39 = vmul.f32 %v13751_v32, %v4594_v60  ;;  %4089 = vperm.xlu1 %12906, %v3950_v54   ;;  %v5355_v45 = vld [vmem:[#allocation2 + $0x38] sm:$0xff] }
 0x1ae   :  { %4084 = vperm.xlu0 %12905, %v3949_v11   ;;  %v5354_v11 = vld [vmem:[#allocation2 + $0x30] sm:$0xff] }
 0x1af   :  { %v4972_v25 = vadd.f32 %v4904_v50, %v4423_v15  ;;  %v4971_v41 = vadd.f32 %v4903_v39, %v4422_v6  ;;  %v5421_v60 = vld [vmem:[#allocation2 + $0x31] sm:$0xff] }
 0x1b0   :  { %v14141_v57 = vpop.permute.xlu1 %246  ;;  %v14143_v58 = vpop.permute.xlu0 %241 }
 0x1b1   :  { %19678 = vst [vmem:[#allocation23_spill] sm:$0xff] %v14141_v57  ;;  %19679 = vst [vmem:[#allocation24_spill] sm:$0xff] %v14143_v58  ;;  %v5047_v30 = vadd.f32 %v13768_v0, %v4972_v25  ;;  %v5046_v43 = vadd.f32 %v13768_v0, %v4971_v41  ;;  %1374 = vperm.xlu1 %12906, %v14136_v61  }
 0x1b2   :  { %1369 = vperm.xlu0 %12905, %v1210_v38  }
 0x1b3   :  { %v5115_v33 = vmax.f32 %v5047_v30, 0.0  ;;  %v5114_v62 = vmax.f32 %v5046_v43, 0.0  ;;  %v115_v30 = vld [vmem:[%s19655_s17 + $0xc8] sm:$0xff]  ;;  %v5488_v43 = vmax.f32 %v5354_v11, %v5421_v60  ;;  %v514_v60 = vmul.f32 %v13627_v13, %v13788_v35 }
 0x1b4   :  { %v14154_v23 = vpop.permute.xlu1 %795  ;;  %v14156_v3 = vpop.permute.xlu0 %790  ;;  %v664_v11 = vld [vmem:[%s19655_s17 + $0xc9] sm:$0xff]  ;;  %v2161_v35 = vmul.f32 %v13640_v47, %v13926_v7 }
 0x1b5   :  { %5184 = vst.msk [vmem:[#allocation2 + $0x48] sm:$0xff] %vm5174_vm0, %v5115_v33  ;;  %5183 = vst.msk [vmem:[#allocation2 + $0x40] sm:$0xff] %vm5174_vm0, %v5114_v62  ;;  %2462 = vperm.xlu1 %12906, %v2307_v56   ;;  %v114_v62 = vld [vmem:[%s19655_s17 + $0xc0] sm:$0xff] }
 0x1b6   :  { %2457 = vperm.xlu0 %12905, %v2306_v53  }
 0x1b8   :  { %v14160_v27 = vpop.permute.xlu1 %1883  ;;  %v14162_v54 = vpop.permute.xlu0 %1878 }
 0x1b9   :  { %3550 = vperm.xlu1 %12906, %v1210_v38  }
 0x1ba   :  { %3545 = vperm.xlu0 %12905, %v14019_v52  }
 0x1bc   :  { %v14171_v15 = vpop.permute.xlu1 %2971  ;;  %v14173_v6 = vpop.permute.xlu0 %2966  ;;  %v5422_v50 = vld [vmem:[#allocation2 + $0x39] sm:$0xff]  ;;  %v5556_v25 = vld [vmem:[#allocation2 + $0x45] sm:$0xff] }
 0x1bd   :  { %v5555_v39 = vld [vmem:[#allocation2 + $0x3d] sm:$0xff]  ;;  %4638 = vperm.xlu1 %12906, %v4499_v18   ;;  %v5489_v52 = vmax.f32 %v5355_v45, %v5422_v50  ;;  %v5623_v38 = vld [vmem:[#allocation2 + $0x46] sm:$0xff]  ;;  %v1063_v18 = vmul.f32 %v13610_v40, %v13803_v10 }
 0x1be   :  { %v5622_v41 = vld [vmem:[#allocation2 + $0x3e] sm:$0xff]  ;;  %4633 = vperm.xlu0 %12905, %v4498_v12   ;;  %v5690_v33 = vmax.f32 %v5556_v25, %v5623_v38  ;;  %v1062_v12 = vmul.f32 %v13610_v40, %v13805_v34  ;;  %v513_v25 = vmul.f32 %v13627_v13, %v13790_v8  ;;  %v1611_v40 = vmul.f32 %v13622_v51, %v13850_v63 }
 0x1bf   :  { %v5689_v56 = vmax.f32 %v5555_v39, %v5622_v41  ;;  %v1612_v39 = vmul.f32 %v13622_v51, %v13848_v16  ;;  %v663_v10 = vld [vmem:[%s19655_s17 + $0xc1] sm:$0xff]  ;;  %v2710_v8 = vmul.f32 %v13663_v14, %v13984_v17  ;;  %v2709_v41 = vmul.f32 %v13663_v14, %v13986_v21  ;;  %v2855_v21 = vld [vmem:[%s19655_s17 + $0xaf] sm:$0xff] }
 0x1c0   :  { %v4060_v53 = vpop.permute.xlu1 %4059  ;;  %v5757_v57 = vmax.f32 %v5489_v52, %v5690_v33  ;;  %v1130_v16 = vadd.f32 %v1062_v12, %v513_v25  ;;  %v2160_v52 = vmul.f32 %v13640_v47, %v13928_v36  ;;  %v1760_v51 = vld [vmem:[%s19655_s17 + $0xc5] sm:$0xff]  ;;  %v1759_v63 = vld [vmem:[%s19655_s17 + $0xbd] sm:$0xff]  ;;  %v3259_v36 = vmul.f32 %v13682_v2, %v14054_v44 }
 0x1c1   :  { %v5756_v58 = vmax.f32 %v5488_v43, %v5689_v56  ;;  %v4055_v45 = vpop.permute.xlu0 %4054  ;;  %286 = vperm.xlu1 %12906, %v115_v30   ;;  %v3258_v17 = vmul.f32 %v13682_v2, %v14056_v59  ;;  %v2856_v56 = vld [vmem:[%s19655_s17 + $0xb7] sm:$0xff]  ;;  %v3808_v14 = vmul.f32 %v13701_v19, %v14119_v37  ;;  %v4357_v59 = vmul.f32 %v13718_v5, %v4060_v53 }
 0x1c2   :  { %281 = vperm.xlu0 %12905, %v114_v62   ;;  %v1679_v7 = vadd.f32 %v1611_v40, %v1130_v16  ;;  %v3807_v62 = vmul.f32 %v13701_v19, %v14121_v22  ;;  %v3952_v37 = vld [vmem:[%s19655_s17 + $0xb3] sm:$0xff]  ;;  %v3951_v19 = vld [vmem:[%s19655_s17 + $0xab] sm:$0xff] }
 0x1c3   :  { %v12369_v50 = vpack.c.bf16 %v5757_v57, %v5756_v58  ;;  %v1131_v57 = vadd.f32 %v1063_v18, %v514_v60 }
 0x1c4   :  { %v14199_v34 = vpop.permute.xlu1 %1344  ;;  %v2228_v43 = vadd.f32 %v2160_v52, %v1679_v7  ;;  %v2308_v7 = vld [vmem:[%s19655_s17 + $0xbe] sm:$0xff] }
 0x1c5   :  { %12370 = vmatpush1.bf16.msra.mxu0 %v12369_v50  ;;  %v14203_v58 = vpop.permute.xlu0 %1339  ;;  %835 = vperm.xlu1 %12906, %v664_v11   ;;  %v1680_v13 = vadd.f32 %v1612_v39, %v1131_v57  ;;  %v4356_v11 = vmul.f32 %v13718_v5, %v4055_v45  ;;  %v14253_v45 = vld [vmem:[%s19655_s17 + $0xca] sm:$0xff] }
 0x1c6   :  { %12371 = vmatprep.subr.bf16.mxu0 %v19665_v46  ;;  %830 = vperm.xlu0 %12905, %v663_v10   ;;  %v2777_v44 = vadd.f32 %v2709_v41, %v2228_v43 }
 0x1c7   :  { %v2229_v47 = vadd.f32 %v2161_v35, %v1680_v13  ;;  %v1212_v35 = vld [vmem:[%s19655_s17 + $0xc2] sm:$0xff] }
 0x1c8   :  { %v14218_v38 = vpop.permute.xlu1 %2432  ;;  %v3326_v50 = vadd.f32 %v3258_v17, %v2777_v44  ;;  %v4501_v17 = vld [vmem:[%s19655_s17 + $0xb4] sm:$0xff]  ;;  %v5423_v44 = vld [vmem:[#allocation2 + $0x41] sm:$0xff] }
 0x1c9   :  { %v14222_v30 = vpop.permute.xlu0 %2427  ;;  %1923 = vperm.xlu1 %12906, %v1760_v51   ;;  %v2778_v33 = vadd.f32 %v2710_v8, %v2229_v47  ;;  %v2309_v8 = vld [vmem:[%s19655_s17 + $0xc6] sm:$0xff] }
 0x1ca   :  { %1918 = vperm.xlu0 %12905, %v1759_v63   ;;  %v3875_v22 = vadd.f32 %v3807_v62, %v3326_v50 }
 0x1cb   :  { %v3327_v2 = vadd.f32 %v3259_v36, %v2778_v33 }
 0x1cc   :  { %v14236_v18 = vpop.permute.xlu1 %3520  ;;  %v4424_v40 = vadd.f32 %v4356_v11, %v3875_v22 }
 0x1cd   :  { %v14239_v12 = vpop.permute.xlu0 %3515  ;;  %3011 = vperm.xlu1 %12906, %v2856_v56   ;;  %v3876_v60 = vadd.f32 %v3808_v14, %v3327_v2  ;;  %v4500_v56 = vld [vmem:[%s19655_s17 + $0xac] sm:$0xff]  ;;  %v5356_v14 = vld [vmem:[#allocation2 + $0x40] sm:$0xff] }
 0x1ce   :  { %3006 = vperm.xlu0 %12905, %v2855_v21   ;;  %v5357_v21 = vld [vmem:[#allocation2 + $0x48] sm:$0xff]  ;;  %v5490_v22 = vmax.f32 %v5356_v14, %v5423_v44  ;;  %v14336_v14 = vld [vmem:[%s19638_s4 + $0x3] ss:$0 sm:$0xff] }
 0x1cf   :  { %v4425_v10 = vadd.f32 %v4357_v59, %v3876_v60 }
 0x1d0   :  { %v4609_v39 = vpop.permute.xlu1 %4608 }
 0x1d1   :  { %v4906_v53 = vmul.f32 %v13751_v32, %v4609_v39  ;;  %v4604_v25 = vpop.permute.xlu0 %4603  ;;  %4099 = vperm.xlu1 %12906, %v3952_v37  }
 0x1d2   :  { %v4905_v5 = vmul.f32 %v13751_v32, %v4604_v25  ;;  %4094 = vperm.xlu0 %12905, %v3951_v19   ;;  %v116_v19 = vld [vmem:[%s19655_s17 + $0xd0] sm:$0xff]  ;;  %v14301_v25 = vld [vmem:[%s19638_s4 + $0x1] ss:$0 sm:$0xff] }
 0x1d3   :  { %v4974_v57 = vadd.f32 %v4906_v53, %v4425_v10 }
 0x1d4   :  { %v4973_v16 = vadd.f32 %v4905_v5, %v4424_v40  ;;  %v14258_v52 = vpop.permute.xlu1 %256  ;;  %v1065_v40 = vmul.f32 %v14301_v25, %v13920_v20 }
 0x1d5   :  { %v5049_v51 = vadd.f32 %v13768_v0, %v4974_v57  ;;  %v14261_v13 = vpop.permute.xlu0 %251  ;;  %1384 = vperm.xlu1 %12906, %v14253_v45  }
 0x1d6   :  { %v5048_v32 = vadd.f32 %v13768_v0, %v4973_v16  ;;  %1379 = vperm.xlu0 %12905, %v1212_v35   ;;  %v1064_v16 = vmul.f32 %v14301_v25, %v13922_v4 }
 0x1d7   :  { %v5117_v63 = vmax.f32 %v5049_v51, 0.0  ;;  %v666_v51 = vld [vmem:[%s19655_s17 + $0xd9] sm:$0xff] }
 0x1d8   :  { %v5116_v41 = vmax.f32 %v5048_v32, 0.0  ;;  %v14271_v47 = vpop.permute.xlu1 %805  ;;  %v14313_v32 = vld [vmem:[%s19638_s4] ss:$0 sm:$0xff] }
 0x1d9   :  { %5186 = vst.msk [vmem:[#allocation2 + $0x58] sm:$0xff] %vm5174_vm0, %v5117_v63  ;;  %v14274_v36 = vpop.permute.xlu0 %800  ;;  %2472 = vperm.xlu1 %12906, %v2309_v8   ;;  %v516_v20 = vmul.f32 %v14313_v32, %v13907_v26  ;;  %v14320_v8 = vld [vmem:[%s19638_s4 + $0x2] ss:$0 sm:$0xff] }
 0x1da   :  { %5185 = vst.msk [vmem:[#allocation2 + $0x50] sm:$0xff] %vm5174_vm0, %v5116_v41  ;;  %2467 = vperm.xlu0 %12905, %v2308_v7   ;;  %v1614_v4 = vmul.f32 %v14320_v8, %v13965_v28  ;;  %v665_v7 = vld [vmem:[%s19655_s17 + $0xd1] sm:$0xff]  ;;  %v515_v41 = vmul.f32 %v14313_v32, %v13909_v55  ;;  %v2163_v28 = vmul.f32 %v14336_v14, %v14043_v29  ;;  %v14351_v29 = vld [vmem:[%s19638_s4 + $0x4] ss:$0 sm:$0xff] }
 0x1db   :  { %v2162_v55 = vmul.f32 %v14336_v14, %v14045_v24  ;;  %v1761_v24 = vld [vmem:[%s19655_s17 + $0xcd] sm:$0xff] }
 0x1dc   :  { %v14277_v0 = vpop.permute.xlu1 %1893  ;;  %v1132_v44 = vadd.f32 %v1064_v16, %v515_v41 }
 0x1dd   :  { %v14279_v43 = vpop.permute.xlu0 %1888  ;;  %3560 = vperm.xlu1 %12906, %v1212_v35  }
 0x1de   :  { %3555 = vperm.xlu0 %12905, %v14136_v61   ;;  %v117_v61 = vld [vmem:[%s19655_s17 + $0xd8] sm:$0xff] }
 0x1e0   :  { %v14288_v33 = vpop.permute.xlu1 %2981 }
 0x1e1   :  { %v14290_v62 = vpop.permute.xlu0 %2976  ;;  %4648 = vperm.xlu1 %12906, %v4501_v17   ;;  %v5424_v2 = vld [vmem:[#allocation2 + $0x49] sm:$0xff]  ;;  %v5558_v50 = vld [vmem:[#allocation2 + $0x55] sm:$0xff]  ;;  %v1613_v17 = vmul.f32 %v14320_v8, %v13967_v1 }
 0x1e2   :  { %v5557_v59 = vld [vmem:[#allocation2 + $0x4d] sm:$0xff]  ;;  %4643 = vperm.xlu0 %12905, %v4500_v56   ;;  %v5491_v11 = vmax.f32 %v5357_v21, %v5424_v2  ;;  %v5625_v60 = vld [vmem:[#allocation2 + $0x56] sm:$0xff]  ;;  %v1133_v56 = vadd.f32 %v1065_v40, %v516_v20  ;;  %v14379_v40 = vld [vmem:[%s19638_s4 + $0x6] ss:$0 sm:$0xff] }
 0x1e3   :  { %v5624_v37 = vld [vmem:[#allocation2 + $0x4e] sm:$0xff]  ;;  %v5692_v10 = vmax.f32 %v5558_v50, %v5625_v60  ;;  %v1681_v50 = vadd.f32 %v1613_v17, %v1132_v44  ;;  %v14365_v60 = vld [vmem:[%s19638_s4 + $0x5] ss:$0 sm:$0xff]  ;;  %v14393_v20 = vld [vmem:[%s19638_s4 + $0x7] ss:$0 sm:$0xff] }
 0x1e4   :  { %v5691_v39 = vmax.f32 %v5557_v59, %v5624_v37  ;;  %v4070_v53 = vpop.permute.xlu1 %4069  ;;  %v1762_v1 = vld [vmem:[%s19655_s17 + $0xd5] sm:$0xff]  ;;  %v1682_v2 = vadd.f32 %v1614_v4, %v1133_v56  ;;  %v2712_v59 = vmul.f32 %v14351_v29, %v14101_v48 }
 0x1e5   :  { %v4065_v5 = vpop.permute.xlu0 %4064  ;;  %296 = vperm.xlu1 %12906, %v117_v61   ;;  %v5759_v35 = vmax.f32 %v5491_v11, %v5692_v10  ;;  %v2711_v61 = vmul.f32 %v14351_v29, %v14103_v31  ;;  %v2858_v31 = vld [vmem:[%s19655_s17 + $0xc7] sm:$0xff]  ;;  %v4359_v4 = vmul.f32 %v14393_v20, %v4070_v53  ;;  %v3953_v17 = vld [vmem:[%s19655_s17 + $0xbb] sm:$0xff] }
 0x1e6   :  { %v5758_v57 = vmax.f32 %v5490_v22, %v5691_v39  ;;  %291 = vperm.xlu0 %12905, %v116_v19   ;;  %v2231_v37 = vadd.f32 %v2163_v28, %v1682_v2  ;;  %v3261_v19 = vmul.f32 %v14365_v60, %v14171_v15  ;;  %v2230_v22 = vadd.f32 %v2162_v55, %v1681_v50  ;;  %v14408_v53 = vld [vmem:[%s19638_s4 + $0x8] ss:$0 sm:$0xff]  ;;  %v1214_v50 = vld [vmem:[%s19655_s17 + $0xd2] sm:$0xff] }
 0x1e7   :  { %v3260_v39 = vmul.f32 %v14365_v60, %v14173_v6  ;;  %v3810_v15 = vmul.f32 %v14379_v40, %v14236_v18  ;;  %v3809_v6 = vmul.f32 %v14379_v40, %v14239_v12  ;;  %v3954_v12 = vld [vmem:[%s19655_s17 + $0xc3] sm:$0xff] }
 0x1e8   :  { %v12372_v63 = vpack.c.bf16 %v5759_v35, %v5758_v57  ;;  %v14331_v26 = vpop.permute.xlu1 %1354  ;;  %v2780_v10 = vadd.f32 %v2712_v59, %v2231_v37  ;;  %v2857_v57 = vld [vmem:[%s19655_s17 + $0xbf] sm:$0xff]  ;;  %v2779_v35 = vadd.f32 %v2711_v61, %v2230_v22 }
 0x1e9   :  { %v14340_v21 = vpop.permute.xlu0 %1349  ;;  %845 = vperm.xlu1 %12906, %v666_v51   ;;  %v14415_v59 = vld [vmem:[%s19655_s17 + $0xda] sm:$0xff] }
 0x1ea   :  { %12373 = vmatpush1.bf16.msra.mxu0 %v12372_v63  ;;  %840 = vperm.xlu0 %12905, %v665_v7   ;;  %v3329_v51 = vadd.f32 %v3261_v19, %v2780_v10  ;;  %v3328_v18 = vadd.f32 %v3260_v39, %v2779_v35  ;;  %v4358_v7 = vmul.f32 %v14393_v20, %v4065_v5  ;;  %v14425_v19 = vld [vmem:[%s19639_s5] ss:$0 sm:$0xff]  ;;  %v2311_v10 = vld [vmem:[%s19655_s17 + $0xd6] sm:$0xff] }
 0x1eb   :  { %12374 = vmatprep.subr.bf16.mxu0 %v19665_v46 }
 0x1ec   :  { %v14360_v11 = vpop.permute.xlu1 %2442  ;;  %v3878_v41 = vadd.f32 %v3810_v15, %v3329_v51  ;;  %v3877_v56 = vadd.f32 %v3809_v6, %v3328_v18 }
 0x1ed   :  { %v14369_v48 = vpop.permute.xlu0 %2437  ;;  %1933 = vperm.xlu1 %12906, %v1762_v1  }
 0x1ee   :  { %1928 = vperm.xlu0 %12905, %v1761_v24   ;;  %v4427_v44 = vadd.f32 %v4359_v4, %v3878_v41  ;;  %v4426_v1 = vadd.f32 %v4358_v7, %v3877_v56  ;;  %v4503_v7 = vld [vmem:[%s19655_s17 + $0xc4] sm:$0xff]  ;;  %v5359_v56 = vld [vmem:[#allocation2 + $0x58] sm:$0xff] }
 0x1f0   :  { %v14388_v16 = vpop.permute.xlu1 %3530 }
 0x1f1   :  { %v14396_v63 = vpop.permute.xlu0 %3525  ;;  %3021 = vperm.xlu1 %12906, %v2858_v31  }
 0x1f2   :  { %3016 = vperm.xlu0 %12905, %v2857_v57   ;;  %v2310_v57 = vld [vmem:[%s19655_s17 + $0xce] sm:$0xff] }
 0x1f4   :  { %v4619_v28 = vpop.permute.xlu1 %4618 }
 0x1f5   :  { %v4908_v5 = vmul.f32 %v14408_v53, %v4619_v28  ;;  %v4614_v55 = vpop.permute.xlu0 %4613  ;;  %4109 = vperm.xlu1 %12906, %v3954_v12   ;;  %v4502_v12 = vld [vmem:[%s19655_s17 + $0xbc] sm:$0xff]  ;;  %v5425_v28 = vld [vmem:[#allocation2 + $0x51] sm:$0xff] }
 0x1f6   :  { %v4907_v2 = vmul.f32 %v14408_v53, %v4614_v55  ;;  %4104 = vperm.xlu0 %12905, %v3953_v17   ;;  %v5358_v17 = vld [vmem:[#allocation2 + $0x50] sm:$0xff] }
 0x1f7   :  { %v4976_v24 = vadd.f32 %v4908_v5, %v4427_v44 }
 0x1f8   :  { %v4975_v61 = vadd.f32 %v4907_v2, %v4426_v1  ;;  %v14420_v37 = vpop.permute.xlu1 %266 }
 0x1f9   :  { %19680 = vst [vmem:[#allocation21_spill] sm:$0xff] %v14420_v37  ;;  %v5051_v22 = vadd.f32 %v14425_v19, %v4976_v24  ;;  %v14428_v39 = vpop.permute.xlu0 %261  ;;  %1394 = vperm.xlu1 %12906, %v14415_v59   ;;  %v19683_v37 = vld [vmem:[#allocation16_spill] sm:$0xff] }
 0x1fa   :  { %19681 = vst [vmem:[#allocation22_spill] sm:$0xff] %v14428_v39  ;;  %v5050_v31 = vadd.f32 %v14425_v19, %v4975_v61  ;;  %1389 = vperm.xlu0 %12905, %v1214_v50   ;;  %v118_v61 = vld [vmem:[%s19655_s17 + $0xe0] sm:$0xff] }
 0x1fb   :  { %v5119_v15 = vmax.f32 %v5051_v22, 0.0  ;;  %v5492_v22 = vmax.f32 %v5358_v17, %v5425_v28  ;;  %v19682_v39 = vld [vmem:[#allocation18_spill] sm:$0xff]  ;;  %v518_v17 = vmul.f32 %v14313_v32, %v19683_v37  ;;  %v1616_v28 = vmul.f32 %v14320_v8, %v14082_v42 }
 0x1fc   :  { %v5118_v35 = vmax.f32 %v5050_v31, 0.0  ;;  %v14438_v6 = vpop.permute.xlu1 %815  ;;  %v2165_v37 = vmul.f32 %v14336_v14, %v14160_v27  ;;  %v1763_v27 = vld [vmem:[%s19655_s17 + $0xdd] sm:$0xff] }
 0x1fd   :  { %5188 = vst.msk [vmem:[#allocation2 + $0x68] sm:$0xff] %vm5174_vm0, %v5119_v15  ;;  %v14441_v51 = vpop.permute.xlu0 %810  ;;  %2482 = vperm.xlu1 %12906, %v2311_v10  }
 0x1fe   :  { %5187 = vst.msk [vmem:[#allocation2 + $0x60] sm:$0xff] %vm5174_vm0, %v5118_v35  ;;  %2477 = vperm.xlu0 %12905, %v2310_v57   ;;  %v1067_v57 = vmul.f32 %v14301_v25, %v14037_v49  ;;  %v667_v49 = vld [vmem:[%s19655_s17 + $0xe1] sm:$0xff] }
 0x200   :  { %v14444_v4 = vpop.permute.xlu1 %1903 }
 0x201   :  { %v14446_v18 = vpop.permute.xlu0 %1898  ;;  %3570 = vperm.xlu1 %12906, %v1214_v50  }
 0x202   :  { %3565 = vperm.xlu0 %12905, %v14253_v45   ;;  %v119_v45 = vld [vmem:[%s19655_s17 + $0xe8] sm:$0xff] }
 0x204   :  { %v14455_v41 = vpop.permute.xlu1 %2991 }
 0x205   :  { %v14457_v44 = vpop.permute.xlu0 %2986  ;;  %4658 = vperm.xlu1 %12906, %v4503_v7   ;;  %v5426_v5 = vld [vmem:[#allocation2 + $0x59] sm:$0xff]  ;;  %v5560_v1 = vld [vmem:[#allocation2 + $0x65] sm:$0xff] }
 0x206   :  { %v5559_v55 = vld [vmem:[#allocation2 + $0x5d] sm:$0xff]  ;;  %4653 = vperm.xlu0 %12905, %v4502_v12   ;;  %v5493_v2 = vmax.f32 %v5359_v56, %v5426_v5  ;;  %v5627_v50 = vld [vmem:[#allocation2 + $0x66] sm:$0xff]  ;;  %v1066_v56 = vmul.f32 %v14301_v25, %v19682_v39  ;;  %v1615_v39 = vmul.f32 %v14320_v8, %v14084_v9 }
 0x207   :  { %v5626_v24 = vld [vmem:[#allocation2 + $0x5e] sm:$0xff]  ;;  %v5694_v10 = vmax.f32 %v5560_v1, %v5627_v50  ;;  %v668_v5 = vld [vmem:[%s19655_s17 + $0xe9] sm:$0xff] }
 0x208   :  { %v5693_v31 = vmax.f32 %v5559_v55, %v5626_v24  ;;  %v4080_v15 = vpop.permute.xlu1 %4079  ;;  %v19684_v1 = vld [vmem:[#allocation17_spill] sm:$0xff]  ;;  %v1135_v24 = vadd.f32 %v1067_v57, %v518_v17  ;;  %v2713_v57 = vmul.f32 %v14351_v29, %v14222_v30  ;;  %v3812_v30 = vmul.f32 %v14379_v40, %v14388_v16  ;;  %v3956_v16 = vld [vmem:[%s19655_s17 + $0xd3] sm:$0xff] }
 0x209   :  { %v4075_v35 = vpop.permute.xlu0 %4074  ;;  %306 = vperm.xlu1 %12906, %v119_v45   ;;  %v5761_v12 = vmax.f32 %v5493_v2, %v5694_v10  ;;  %v517_v45 = vmul.f32 %v14313_v32, %v19684_v1  ;;  %v2860_v17 = vld [vmem:[%s19655_s17 + $0xd7] sm:$0xff] }
 0x20a   :  { %v5760_v7 = vmax.f32 %v5492_v22, %v5693_v31  ;;  %301 = vperm.xlu0 %12905, %v118_v61   ;;  %v2164_v61 = vmul.f32 %v14336_v14, %v14162_v54  ;;  %v1764_v22 = vld [vmem:[%s19655_s17 + $0xe5] sm:$0xff]  ;;  %v1684_v9 = vadd.f32 %v1616_v28, %v1135_v24  ;;  %v2714_v31 = vmul.f32 %v14351_v29, %v14218_v38 }
 0x20b   :  { %v1134_v42 = vadd.f32 %v1066_v56, %v517_v45  ;;  %v3262_v38 = vmul.f32 %v14365_v60, %v14290_v62  ;;  %v4361_v45 = vmul.f32 %v14393_v20, %v4080_v15 }
 0x20c   :  { %v12375_v55 = vpack.c.bf16 %v5761_v12, %v5760_v7  ;;  %v14483_v2 = vpop.permute.xlu1 %1364  ;;  %v2233_v7 = vadd.f32 %v2165_v37, %v1684_v9  ;;  %v3263_v12 = vmul.f32 %v14365_v60, %v14288_v33  ;;  %v2859_v33 = vld [vmem:[%s19655_s17 + $0xcf] sm:$0xff]  ;;  %v4360_v37 = vmul.f32 %v14393_v20, %v4075_v35 }
 0x20d   :  { %v14487_v50 = vpop.permute.xlu0 %1359  ;;  %855 = vperm.xlu1 %12906, %v668_v5   ;;  %v1683_v10 = vadd.f32 %v1615_v39, %v1134_v42 }
 0x20e   :  { %12376 = vmatpush1.bf16.msra.mxu0 %v12375_v55  ;;  %850 = vperm.xlu0 %12905, %v667_v49   ;;  %v2782_v28 = vadd.f32 %v2714_v31, %v2233_v7  ;;  %v3811_v49 = vmul.f32 %v14379_v40, %v14396_v63  ;;  %v3955_v63 = vld [vmem:[%s19655_s17 + $0xcb] sm:$0xff]  ;;  %v1216_v7 = vld [vmem:[%s19655_s17 + $0xe2] sm:$0xff] }
 0x20f   :  { %12377 = vmatprep.subr.bf16.mxu0 %v19665_v46  ;;  %v2232_v5 = vadd.f32 %v2164_v61, %v1683_v10  ;;  %v14537_v10 = vld [vmem:[%s19655_s17 + $0xea] sm:$0xff] }
 0x210   :  { %v14502_v54 = vpop.permute.xlu1 %2452  ;;  %v3331_v62 = vadd.f32 %v3263_v12, %v2782_v28 }
 0x211   :  { %v14506_v56 = vpop.permute.xlu0 %2447  ;;  %1943 = vperm.xlu1 %12906, %v1764_v22   ;;  %v2781_v55 = vadd.f32 %v2713_v57, %v2232_v5 }
 0x212   :  { %1938 = vperm.xlu0 %12905, %v1763_v27   ;;  %v3880_v42 = vadd.f32 %v3812_v30, %v3331_v62  ;;  %v2313_v30 = vld [vmem:[%s19655_s17 + $0xe6] sm:$0xff] }
 0x213   :  { %v3330_v24 = vadd.f32 %v3262_v38, %v2781_v55  ;;  %v2312_v55 = vld [vmem:[%s19655_s17 + $0xde] sm:$0xff] }
 0x214   :  { %v14520_v1 = vpop.permute.xlu1 %3540  ;;  %v4429_v9 = vadd.f32 %v4361_v45, %v3880_v42  ;;  %v4504_v42 = vld [vmem:[%s19655_s17 + $0xcc] sm:$0xff] }
 0x215   :  { %v14523_v39 = vpop.permute.xlu0 %3535  ;;  %3031 = vperm.xlu1 %12906, %v2860_v17   ;;  %v3879_v61 = vadd.f32 %v3811_v49, %v3330_v24 }
 0x216   :  { %3026 = vperm.xlu0 %12905, %v2859_v33  }
 0x217   :  { %v4428_v27 = vadd.f32 %v4360_v37, %v3879_v61  ;;  %v5360_v61 = vld [vmem:[#allocation2 + $0x60] sm:$0xff] }
 0x218   :  { %v4629_v22 = vpop.permute.xlu1 %4628 }
 0x219   :  { %v4910_v15 = vmul.f32 %v14408_v53, %v4629_v22  ;;  %v4624_v31 = vpop.permute.xlu0 %4623  ;;  %4119 = vperm.xlu1 %12906, %v3956_v16   ;;  %v4505_v16 = vld [vmem:[%s19655_s17 + $0xd4] sm:$0xff]  ;;  %v5361_v22 = vld [vmem:[#allocation2 + $0x68] sm:$0xff] }
 0x21a   :  { %v4909_v35 = vmul.f32 %v14408_v53, %v4624_v31  ;;  %4114 = vperm.xlu0 %12905, %v3955_v63  }
 0x21b   :  { %v4978_v57 = vadd.f32 %v4910_v15, %v4429_v9  ;;  %v5427_v9 = vld [vmem:[#allocation2 + $0x61] sm:$0xff] }
 0x21c   :  { %v4977_v12 = vadd.f32 %v4909_v35, %v4428_v27  ;;  %v14542_v5 = vpop.permute.xlu1 %276 }
 0x21d   :  { %19685 = vst [vmem:[#allocation19_spill] sm:$0xff] %v14542_v5  ;;  %v5053_v38 = vadd.f32 %v14425_v19, %v4978_v57  ;;  %v14545_v17 = vpop.permute.xlu0 %271  ;;  %1404 = vperm.xlu1 %12906, %v14537_v10   ;;  %v19687_v5 = vld [vmem:[#allocation23_spill] sm:$0xff] }
 0x21e   :  { %19686 = vst [vmem:[#allocation20_spill] sm:$0xff] %v14545_v17  ;;  %v5052_v28 = vadd.f32 %v14425_v19, %v4977_v12  ;;  %1399 = vperm.xlu0 %12905, %v1216_v7  }
 0x21f   :  { %v5121_v33 = vmax.f32 %v5053_v38, 0.0  ;;  %v120_v38 = vld [vmem:[%s19655_s17 + $0xf0] sm:$0xff] }
 0x220   :  { %v5120_v49 = vmax.f32 %v5052_v28, 0.0  ;;  %v14555_v62 = vpop.permute.xlu1 %825  ;;  %v5494_v28 = vmax.f32 %v5360_v61, %v5427_v9  ;;  %v520_v61 = vmul.f32 %v14313_v32, %v19687_v5  ;;  %v1618_v9 = vmul.f32 %v14320_v8, %v14199_v34 }
 0x221   :  { %5190 = vst.msk [vmem:[#allocation2 + $0x78] sm:$0xff] %vm5174_vm0, %v5121_v33  ;;  %v14558_v45 = vpop.permute.xlu0 %820  ;;  %2492 = vperm.xlu1 %12906, %v2313_v30   ;;  %v2167_v5 = vmul.f32 %v14336_v14, %v14277_v0  ;;  %v1765_v0 = vld [vmem:[%s19655_s17 + $0xed] sm:$0xff] }
 0x222   :  { %5189 = vst.msk [vmem:[#allocation2 + $0x70] sm:$0xff] %vm5174_vm0, %v5120_v49  ;;  %2487 = vperm.xlu0 %12905, %v2312_v55   ;;  %v1069_v49 = vmul.f32 %v14301_v25, %v14154_v23  ;;  %v669_v23 = vld [vmem:[%s19655_s17 + $0xf1] sm:$0xff] }
 0x224   :  { %v14561_v24 = vpop.permute.xlu1 %1913 }
 0x225   :  { %v14563_v37 = vpop.permute.xlu0 %1908  ;;  %3580 = vperm.xlu1 %12906, %v1216_v7  }
 0x226   :  { %3575 = vperm.xlu0 %12905, %v14415_v59   ;;  %v121_v59 = vld [vmem:[%s19655_s17 + $0xf8] sm:$0xff] }
 0x228   :  { %v14572_v63 = vpop.permute.xlu1 %3001 }
 0x229   :  { %v14574_v15 = vpop.permute.xlu0 %2996  ;;  %4668 = vperm.xlu1 %12906, %v4505_v16   ;;  %v5428_v31 = vld [vmem:[#allocation2 + $0x69] sm:$0xff]  ;;  %v5562_v35 = vld [vmem:[#allocation2 + $0x75] sm:$0xff] }
 0x22a   :  { %v5561_v27 = vld [vmem:[#allocation2 + $0x6d] sm:$0xff]  ;;  %4663 = vperm.xlu0 %12905, %v4504_v42   ;;  %v5495_v57 = vmax.f32 %v5361_v22, %v5428_v31  ;;  %v5629_v12 = vld [vmem:[#allocation2 + $0x76] sm:$0xff]  ;;  %v1068_v22 = vmul.f32 %v14301_v25, %v14156_v3  ;;  %v1617_v3 = vmul.f32 %v14320_v8, %v14203_v58 }
 0x22b   :  { %v5628_v7 = vld [vmem:[#allocation2 + $0x6e] sm:$0xff]  ;;  %v5696_v33 = vmax.f32 %v5562_v35, %v5629_v12  ;;  %v670_v31 = vld [vmem:[%s19655_s17 + $0xf9] sm:$0xff] }
 0x22c   :  { %v5695_v30 = vmax.f32 %v5561_v27, %v5628_v7  ;;  %v4090_v55 = vpop.permute.xlu1 %4089  ;;  %v19688_v35 = vld [vmem:[#allocation24_spill] sm:$0xff]  ;;  %v1137_v7 = vadd.f32 %v1069_v49, %v520_v61  ;;  %v2862_v61 = vld [vmem:[%s19655_s17 + $0xe7] sm:$0xff] }
 0x22d   :  { %v4085_v16 = vpop.permute.xlu0 %4084  ;;  %316 = vperm.xlu1 %12906, %v121_v59   ;;  %v5763_v17 = vmax.f32 %v5495_v57, %v5696_v33  ;;  %v519_v59 = vmul.f32 %v14313_v32, %v19688_v35  ;;  %v2715_v33 = vmul.f32 %v14351_v29, %v14369_v48  ;;  %v3814_v48 = vmul.f32 %v14379_v40, %v14520_v1  ;;  %v3958_v1 = vld [vmem:[%s19655_s17 + $0xe3] sm:$0xff] }
 0x22e   :  { %v5762_v42 = vmax.f32 %v5494_v28, %v5695_v30  ;;  %311 = vperm.xlu0 %12905, %v120_v38   ;;  %v1766_v38 = vld [vmem:[%s19655_s17 + $0xf5] sm:$0xff]  ;;  %v1686_v58 = vadd.f32 %v1618_v9, %v1137_v7  ;;  %v2716_v28 = vmul.f32 %v14351_v29, %v14360_v11  ;;  %v3264_v11 = vmul.f32 %v14365_v60, %v14457_v44 }
 0x22f   :  { %v1136_v34 = vadd.f32 %v1068_v22, %v519_v59  ;;  %v4363_v59 = vmul.f32 %v14393_v20, %v4090_v55 }
 0x230   :  { %v12378_v27 = vpack.c.bf16 %v5763_v17, %v5762_v42  ;;  %v14600_v57 = vpop.permute.xlu1 %1374  ;;  %v2166_v17 = vmul.f32 %v14336_v14, %v14279_v43  ;;  %v2235_v49 = vadd.f32 %v2167_v5, %v1686_v58  ;;  %v3265_v42 = vmul.f32 %v14365_v60, %v14455_v41  ;;  %v2861_v41 = vld [vmem:[%s19655_s17 + $0xdf] sm:$0xff] }
 0x231   :  { %v14604_v12 = vpop.permute.xlu0 %1369  ;;  %865 = vperm.xlu1 %12906, %v670_v31   ;;  %v1685_v30 = vadd.f32 %v1617_v3, %v1136_v34  ;;  %v4362_v5 = vmul.f32 %v14393_v20, %v4085_v16 }
 0x232   :  { %12379 = vmatpush1.bf16.msra.mxu0 %v12378_v27  ;;  %860 = vperm.xlu0 %12905, %v669_v23   ;;  %v2784_v9 = vadd.f32 %v2716_v28, %v2235_v49  ;;  %v3813_v23 = vmul.f32 %v14379_v40, %v14523_v39  ;;  %v3957_v39 = vld [vmem:[%s19655_s17 + $0xdb] sm:$0xff]  ;;  %v1218_v49 = vld [vmem:[%s19655_s17 + $0xf2] sm:$0xff] }
 0x233   :  { %12380 = vmatprep.subr.bf16.mxu0 %v19665_v46  ;;  %v2234_v31 = vadd.f32 %v2166_v17, %v1685_v30  ;;  %v14654_v30 = vld [vmem:[%s19655_s17 + $0xfa] sm:$0xff] }
 0x234   :  { %v14619_v43 = vpop.permute.xlu1 %2462  ;;  %v3333_v44 = vadd.f32 %v3265_v42, %v2784_v9 }
 0x235   :  { %v14623_v22 = vpop.permute.xlu0 %2457  ;;  %1953 = vperm.xlu1 %12906, %v1766_v38   ;;  %v2783_v27 = vadd.f32 %v2715_v33, %v2234_v31 }
 0x236   :  { %1948 = vperm.xlu0 %12905, %v1765_v0   ;;  %v3882_v34 = vadd.f32 %v3814_v48, %v3333_v44  ;;  %v2315_v48 = vld [vmem:[%s19655_s17 + $0xf6] sm:$0xff] }
 0x237   :  { %v3332_v7 = vadd.f32 %v3264_v11, %v2783_v27  ;;  %v2314_v27 = vld [vmem:[%s19655_s17 + $0xee] sm:$0xff] }
 0x238   :  { %v14637_v35 = vpop.permute.xlu1 %3550  ;;  %v4431_v58 = vadd.f32 %v4363_v59, %v3882_v34  ;;  %v4506_v34 = vld [vmem:[%s19655_s17 + $0xdc] sm:$0xff] }
 0x239   :  { %v14640_v3 = vpop.permute.xlu0 %3545  ;;  %3041 = vperm.xlu1 %12906, %v2862_v61   ;;  %v3881_v17 = vadd.f32 %v3813_v23, %v3332_v7 }
 0x23a   :  { %3036 = vperm.xlu0 %12905, %v2861_v41  }
 0x23b   :  { %v4430_v0 = vadd.f32 %v4362_v5, %v3881_v17  ;;  %v5362_v17 = vld [vmem:[#allocation2 + $0x70] sm:$0xff] }
 0x23c   :  { %v4639_v38 = vpop.permute.xlu1 %4638 }
 0x23d   :  { %v4912_v55 = vmul.f32 %v14408_v53, %v4639_v38  ;;  %v4634_v28 = vpop.permute.xlu0 %4633  ;;  %4129 = vperm.xlu1 %12906, %v3958_v1   ;;  %v4507_v1 = vld [vmem:[%s19655_s17 + $0xe4] sm:$0xff]  ;;  %v5363_v38 = vld [vmem:[#allocation2 + $0x78] sm:$0xff] }
 0x23e   :  { %v4911_v16 = vmul.f32 %v14408_v53, %v4634_v28  ;;  %4124 = vperm.xlu0 %12905, %v3957_v39  }
 0x23f   :  { %v4980_v33 = vadd.f32 %v4912_v55, %v4431_v58  ;;  %v5429_v58 = vld [vmem:[#allocation2 + $0x71] sm:$0xff] }
 0x240   :  { %v4979_v42 = vadd.f32 %v4911_v16, %v4430_v0  ;;  %v14659_v31 = vpop.permute.xlu1 %286 }
 0x241   :  { %v5055_v11 = vadd.f32 %v14425_v19, %v4980_v33  ;;  %v14662_v61 = vpop.permute.xlu0 %281  ;;  %1414 = vperm.xlu1 %12906, %v14654_v30  }
 0x242   :  { %19689 = vst [vmem:[#allocation18_spill] sm:$0xff] %v14662_v61  ;;  %v5054_v9 = vadd.f32 %v14425_v19, %v4979_v42  ;;  %1409 = vperm.xlu0 %12905, %v1218_v49  }
 0x243   :  { %v5123_v41 = vmax.f32 %v5055_v11, 0.0  ;;  %v122_v11 = vld [vmem:[%s19655_s17 + $0x100] sm:$0xff] }
 0x244   :  { %v5122_v23 = vmax.f32 %v5054_v9, 0.0  ;;  %v14672_v44 = vpop.permute.xlu1 %835  ;;  %v5496_v9 = vmax.f32 %v5362_v17, %v5429_v58  ;;  %v522_v17 = vmul.f32 %v14313_v32, %v14258_v52  ;;  %v1620_v58 = vmul.f32 %v14320_v8, %v14331_v26 }
 0x245   :  { %5192 = vst.msk [vmem:[#allocation2 + $0x88] sm:$0xff] %vm5174_vm0, %v5123_v41  ;;  %v14675_v59 = vpop.permute.xlu0 %830  ;;  %2502 = vperm.xlu1 %12906, %v2315_v48   ;;  %v2169_v52 = vmul.f32 %v14336_v14, %v14444_v4  ;;  %v1767_v4 = vld [vmem:[%s19655_s17 + $0xfd] sm:$0xff] }
 0x246   :  { %5191 = vst.msk [vmem:[#allocation2 + $0x80] sm:$0xff] %vm5174_vm0, %v5122_v23  ;;  %2497 = vperm.xlu0 %12905, %v2314_v27   ;;  %v1071_v23 = vmul.f32 %v14301_v25, %v14271_v47  ;;  %v671_v47 = vld [vmem:[%s19655_s17 + $0x101] sm:$0xff] }
 0x248   :  { %v14678_v7 = vpop.permute.xlu1 %1923 }
 0x249   :  { %v14680_v5 = vpop.permute.xlu0 %1918  ;;  %3590 = vperm.xlu1 %12906, %v1218_v49  }
 0x24a   :  { %3585 = vperm.xlu0 %12905, %v14537_v10   ;;  %v123_v10 = vld [vmem:[%s19655_s17 + $0x108] sm:$0xff] }
 0x24c   :  { %v14689_v39 = vpop.permute.xlu1 %3011 }
 0x24d   :  { %v14691_v55 = vpop.permute.xlu0 %3006  ;;  %4678 = vperm.xlu1 %12906, %v4507_v1   ;;  %v5430_v28 = vld [vmem:[#allocation2 + $0x79] sm:$0xff]  ;;  %v5564_v16 = vld [vmem:[#allocation2 + $0x85] sm:$0xff] }
 0x24e   :  { %v5563_v0 = vld [vmem:[#allocation2 + $0x7d] sm:$0xff]  ;;  %4673 = vperm.xlu0 %12905, %v4506_v34   ;;  %v5497_v33 = vmax.f32 %v5363_v38, %v5430_v28  ;;  %v5631_v42 = vld [vmem:[#allocation2 + $0x86] sm:$0xff]  ;;  %v1070_v38 = vmul.f32 %v14301_v25, %v14274_v36  ;;  %v1619_v36 = vmul.f32 %v14320_v8, %v14340_v21 }
 0x24f   :  { %v5630_v49 = vld [vmem:[#allocation2 + $0x7e] sm:$0xff]  ;;  %v5698_v41 = vmax.f32 %v5564_v16, %v5631_v42  ;;  %v672_v28 = vld [vmem:[%s19655_s17 + $0x109] sm:$0xff]  ;;  %v521_v16 = vmul.f32 %v14313_v32, %v14261_v13  ;;  %v2718_v42 = vmul.f32 %v14351_v29, %v14502_v54  ;;  %v3266_v54 = vmul.f32 %v14365_v60, %v14574_v15 }
 0x250   :  { %v5697_v48 = vmax.f32 %v5563_v0, %v5630_v49  ;;  %v4100_v27 = vpop.permute.xlu1 %4099  ;;  %v1768_v13 = vld [vmem:[%s19655_s17 + $0x105] sm:$0xff] }
 0x251   :  { %v4095_v1 = vpop.permute.xlu0 %4094  ;;  %326 = vperm.xlu1 %12906, %v123_v10   ;;  %v5765_v61 = vmax.f32 %v5497_v33, %v5698_v41  ;;  %v1139_v33 = vadd.f32 %v1071_v23, %v522_v17  ;;  %v1138_v26 = vadd.f32 %v1070_v38, %v521_v16  ;;  %v3267_v41 = vmul.f32 %v14365_v60, %v14572_v63  ;;  %v2864_v38 = vld [vmem:[%s19655_s17 + $0xf7] sm:$0xff]  ;;  %v2863_v63 = vld [vmem:[%s19655_s17 + $0xef] sm:$0xff] }
 0x252   :  { %v5764_v34 = vmax.f32 %v5496_v9, %v5697_v48  ;;  %321 = vperm.xlu0 %12905, %v122_v11   ;;  %v2717_v9 = vmul.f32 %v14351_v29, %v14506_v56  ;;  %v3816_v56 = vmul.f32 %v14379_v40, %v14637_v35  ;;  %v3960_v35 = vld [vmem:[%s19655_s17 + $0xf3] sm:$0xff] }
 0x253   :  { %v1688_v21 = vadd.f32 %v1620_v58, %v1139_v33  ;;  %v1687_v11 = vadd.f32 %v1619_v36, %v1138_v26  ;;  %v3815_v58 = vmul.f32 %v14379_v40, %v14640_v3  ;;  %v4364_v33 = vmul.f32 %v14393_v20, %v4095_v1  ;;  %v3959_v3 = vld [vmem:[%s19655_s17 + $0xeb] sm:$0xff] }
 0x254   :  { %v12381_v0 = vpack.c.bf16 %v5765_v61, %v5764_v34  ;;  %v14717_v10 = vpop.permute.xlu1 %1384  ;;  %v2168_v61 = vmul.f32 %v14336_v14, %v14446_v18 }
 0x255   :  { %v14721_v49 = vpop.permute.xlu0 %1379  ;;  %875 = vperm.xlu1 %12906, %v672_v28   ;;  %v2237_v48 = vadd.f32 %v2169_v52, %v1688_v21 }
 0x256   :  { %12382 = vmatpush1.bf16.msra.mxu0 %v12381_v0  ;;  %870 = vperm.xlu0 %12905, %v671_v47   ;;  %v2236_v34 = vadd.f32 %v2168_v61, %v1687_v11  ;;  %v4365_v47 = vmul.f32 %v14393_v20, %v4100_v27 }
 0x257   :  { %12383 = vmatprep.subr.bf16.mxu0 %v19665_v46  ;;  %v2786_v28 = vadd.f32 %v2718_v42, %v2237_v48 }
 0x258   :  { %v14736_v18 = vpop.permute.xlu1 %2472  ;;  %v2785_v17 = vadd.f32 %v2717_v9, %v2236_v34  ;;  %v1220_v9 = vld [vmem:[%s19655_s17 + $0x102] sm:$0xff] }
 0x259   :  { %v14740_v23 = vpop.permute.xlu0 %2467  ;;  %1963 = vperm.xlu1 %12906, %v1768_v13   ;;  %v3335_v15 = vadd.f32 %v3267_v41, %v2786_v28  ;;  %v2317_v28 = vld [vmem:[%s19655_s17 + $0x106] sm:$0xff] }
 0x25a   :  { %1958 = vperm.xlu0 %12905, %v1767_v4   ;;  %v3334_v36 = vadd.f32 %v3266_v54, %v2785_v17  ;;  %v14771_v4 = vld [vmem:[%s19655_s17 + $0x10a] sm:$0xff] }
 0x25b   :  { %v3884_v52 = vadd.f32 %v3816_v56, %v3335_v15 }
 0x25c   :  { %v14754_v0 = vpop.permute.xlu1 %3560  ;;  %v3883_v26 = vadd.f32 %v3815_v58, %v3334_v36 }
 0x25d   :  { %v14757_v16 = vpop.permute.xlu0 %3555  ;;  %3051 = vperm.xlu1 %12906, %v2864_v38   ;;  %v4433_v13 = vadd.f32 %v4365_v47, %v3884_v52 }
 0x25e   :  { %3046 = vperm.xlu0 %12905, %v2863_v63   ;;  %v4432_v42 = vadd.f32 %v4364_v33, %v3883_v26  ;;  %v2316_v63 = vld [vmem:[%s19655_s17 + $0xfe] sm:$0xff]  ;;  %v4509_v33 = vld [vmem:[%s19655_s17 + $0xf4] sm:$0xff]  ;;  %v5365_v26 = vld [vmem:[#allocation2 + $0x88] sm:$0xff] }
 0x260   :  { %v4649_v61 = vpop.permute.xlu1 %4648 }
 0x261   :  { %v4914_v27 = vmul.f32 %v14408_v53, %v4649_v61  ;;  %v4644_v21 = vpop.permute.xlu0 %4643  ;;  %4139 = vperm.xlu1 %12906, %v3960_v35   ;;  %v4508_v35 = vld [vmem:[%s19655_s17 + $0xec] sm:$0xff]  ;;  %v5431_v61 = vld [vmem:[#allocation2 + $0x81] sm:$0xff] }
 0x262   :  { %v4913_v1 = vmul.f32 %v14408_v53, %v4644_v21  ;;  %4134 = vperm.xlu0 %12905, %v3959_v3   ;;  %v5364_v3 = vld [vmem:[#allocation2 + $0x80] sm:$0xff] }
 0x263   :  { %v4982_v11 = vadd.f32 %v4914_v27, %v4433_v13 }
 0x264   :  { %v4981_v48 = vadd.f32 %v4913_v1, %v4432_v42  ;;  %v14776_v41 = vpop.permute.xlu1 %296 }
 0x265   :  { %v5057_v34 = vadd.f32 %v14425_v19, %v4982_v11  ;;  %v14779_v54 = vpop.permute.xlu0 %291  ;;  %1424 = vperm.xlu1 %12906, %v14771_v4  }
 0x266   :  { %19690 = vst [vmem:[#allocation16_spill] sm:$0xff] %v14779_v54  ;;  %v5056_v38 = vadd.f32 %v14425_v19, %v4981_v48  ;;  %1419 = vperm.xlu0 %12905, %v1220_v9   ;;  %v1769_v48 = vld [vmem:[%s19655_s17 + $0x10d] sm:$0xff]  ;;  %v19691_v54 = vld [vmem:[#allocation21_spill] sm:$0xff] }
 0x267   :  { %v5125_v56 = vmax.f32 %v5057_v34, 0.0  ;;  %v5498_v34 = vmax.f32 %v5364_v3, %v5431_v61  ;;  %v524_v3 = vmul.f32 %v14313_v32, %v19691_v54  ;;  %v1622_v61 = vmul.f32 %v14320_v8, %v14483_v2 }
 0x268   :  { %v5124_v17 = vmax.f32 %v5056_v38, 0.0  ;;  %v14789_v58 = vpop.permute.xlu1 %845  ;;  %v2171_v54 = vmul.f32 %v14336_v14, %v14561_v24  ;;  %v3961_v24 = vld [vmem:[%s19655_s17 + $0xfb] sm:$0xff] }
 0x269   :  { %5194 = vst.msk [vmem:[#allocation2 + $0x98] sm:$0xff] %vm5174_vm0, %v5125_v56  ;;  %v14792_v15 = vpop.permute.xlu0 %840  ;;  %2512 = vperm.xlu1 %12906, %v2317_v28  }
 0x26a   :  { %5193 = vst.msk [vmem:[#allocation2 + $0x90] sm:$0xff] %vm5174_vm0, %v5124_v17  ;;  %2507 = vperm.xlu0 %12905, %v2316_v63   ;;  %v1073_v63 = vmul.f32 %v14301_v25, %v14438_v6  ;;  %v2865_v6 = vld [vmem:[%s19655_s17 + $0xff] sm:$0xff] }
 0x26c   :  { %v14795_v47 = vpop.permute.xlu1 %1933 }
 0x26d   :  { %v14797_v36 = vpop.permute.xlu0 %1928  ;;  %3600 = vperm.xlu1 %12906, %v1220_v9  }
 0x26e   :  { %3595 = vperm.xlu0 %12905, %v14654_v30   ;;  %v1770_v30 = vld [vmem:[%s19655_s17 + $0x115] sm:$0xff] }
 0x270   :  { %v14806_v52 = vpop.permute.xlu1 %3021 }
 0x271   :  { %v14808_v13 = vpop.permute.xlu0 %3016  ;;  %4688 = vperm.xlu1 %12906, %v4509_v33   ;;  %v5432_v27 = vld [vmem:[#allocation2 + $0x89] sm:$0xff]  ;;  %v5566_v42 = vld [vmem:[#allocation2 + $0x95] sm:$0xff] }
 0x272   :  { %v5565_v21 = vld [vmem:[#allocation2 + $0x8d] sm:$0xff]  ;;  %4683 = vperm.xlu0 %12905, %v4508_v35   ;;  %v5499_v1 = vmax.f32 %v5365_v26, %v5432_v27  ;;  %v5633_v9 = vld [vmem:[#allocation2 + $0x96] sm:$0xff]  ;;  %v1072_v26 = vmul.f32 %v14301_v25, %v14441_v51  ;;  %v1621_v25 = vmul.f32 %v14320_v8, %v14487_v50  ;;  %v2720_v50 = vmul.f32 %v14351_v29, %v14619_v43 }
 0x273   :  { %v5632_v11 = vld [vmem:[#allocation2 + $0x8e] sm:$0xff]  ;;  %v5700_v28 = vmax.f32 %v5566_v42, %v5633_v9  ;;  %v19692_v42 = vld [vmem:[#allocation22_spill] sm:$0xff]  ;;  %v2170_v9 = vmul.f32 %v14336_v14, %v14563_v37  ;;  %v3268_v43 = vmul.f32 %v14365_v60, %v14691_v55 }
 0x274   :  { %v5699_v38 = vmax.f32 %v5565_v21, %v5632_v11  ;;  %v4110_v56 = vpop.permute.xlu1 %4109  ;;  %v2866_v27 = vld [vmem:[%s19655_s17 + $0x107] sm:$0xff] }
 0x275   :  { %v4105_v17 = vpop.permute.xlu0 %4104  ;;  %1973 = vperm.xlu1 %12906, %v1770_v30   ;;  %v5767_v35 = vmax.f32 %v5499_v1, %v5700_v28  ;;  %v523_v30 = vmul.f32 %v14313_v32, %v19692_v42  ;;  %v1141_v1 = vadd.f32 %v1073_v63, %v524_v3  ;;  %v3962_v32 = vld [vmem:[%s19655_s17 + $0x103] sm:$0xff]  ;;  %v4367_v55 = vmul.f32 %v14393_v20, %v4110_v56 }
 0x276   :  { %v5766_v33 = vmax.f32 %v5498_v34, %v5699_v38  ;;  %1968 = vperm.xlu0 %12905, %v1769_v48   ;;  %v2719_v34 = vmul.f32 %v14351_v29, %v14623_v22  ;;  %v3269_v38 = vmul.f32 %v14365_v60, %v14689_v39  ;;  %v3818_v29 = vmul.f32 %v14379_v40, %v14754_v0  ;;  %v2318_v22 = vld [vmem:[%s19655_s17 + $0x10e] sm:$0xff] }
 0x277   :  { %v1140_v2 = vadd.f32 %v1072_v26, %v523_v30  ;;  %v1690_v8 = vadd.f32 %v1622_v61, %v1141_v1  ;;  %v3817_v26 = vmul.f32 %v14379_v40, %v14757_v16  ;;  %v14880_v0 = vld [vmem:[%s19655_s17 + $0x112] sm:$0xff] }
 0x278   :  { %v12384_v21 = vpack.c.bf16 %v5767_v35, %v5766_v33  ;;  %v14834_v51 = vpop.permute.xlu1 %1394  ;;  %v2319_v33 = vld [vmem:[%s19655_s17 + $0x116] sm:$0xff] }
 0x279   :  { %v14838_v11 = vpop.permute.xlu0 %1389  ;;  %3061 = vperm.xlu1 %12906, %v2866_v27   ;;  %v1689_v48 = vadd.f32 %v1621_v25, %v1140_v2  ;;  %v2239_v37 = vadd.f32 %v2171_v54, %v1690_v8  ;;  %v4510_v54 = vld [vmem:[%s19655_s17 + $0xfc] sm:$0xff] }
 0x27a   :  { %12385 = vmatpush1.bf16.msra.mxu0 %v12384_v21  ;;  %3056 = vperm.xlu0 %12905, %v2865_v6   ;;  %v4366_v21 = vmul.f32 %v14393_v20, %v4105_v17  ;;  %v4511_v20 = vld [vmem:[%s19655_s17 + $0x104] sm:$0xff] }
 0x27b   :  { %12386 = vmatprep.subr.bf16.mxu0 %v19665_v46  ;;  %v2238_v63 = vadd.f32 %v2170_v9, %v1689_v48  ;;  %v2788_v35 = vadd.f32 %v2720_v50, %v2239_v37 }
 0x27c   :  { %v14853_v14 = vpop.permute.xlu1 %2482 }
 0x27d   :  { %v14857_v28 = vpop.permute.xlu0 %2477  ;;  %4149 = vperm.xlu1 %12906, %v3962_v32   ;;  %v2787_v39 = vadd.f32 %v2719_v34, %v2238_v63  ;;  %v3337_v60 = vadd.f32 %v3269_v38, %v2788_v35  ;;  %v3963_v38 = vld [vmem:[%s19655_s17 + $0x10b] sm:$0xff]  ;;  %v14928_v35 = vld [vmem:[%s19655_s17 + $0x11a] sm:$0xff] }
 0x27e   :  { %4144 = vperm.xlu0 %12905, %v3961_v24   ;;  %v2867_v24 = vld [vmem:[%s19655_s17 + $0x10f] sm:$0xff] }
 0x27f   :  { %v3336_v61 = vadd.f32 %v3268_v43, %v2787_v39  ;;  %v3886_v6 = vadd.f32 %v3818_v29, %v3337_v60  ;;  %v5367_v39 = vld [vmem:[#allocation2 + $0x98] sm:$0xff] }
 0x280   :  { %v14871_v27 = vpop.permute.xlu1 %3570 }
 0x281   :  { %v14874_v3 = vpop.permute.xlu0 %3565  ;;  %2522 = vperm.xlu1 %12906, %v2319_v33   ;;  %v3885_v42 = vadd.f32 %v3817_v26, %v3336_v61  ;;  %v4435_v16 = vadd.f32 %v4367_v55, %v3886_v6  ;;  %v14923_v33 = vld [vmem:[%s19655_s17 + $0x122] sm:$0xff]  ;;  %v5433_v26 = vld [vmem:[#allocation2 + $0x91] sm:$0xff] }
 0x282   :  { %2517 = vperm.xlu0 %12905, %v2318_v22   ;;  %v5366_v22 = vld [vmem:[#allocation2 + $0x90] sm:$0xff] }
 0x283   :  { %v4434_v56 = vadd.f32 %v4366_v21, %v3885_v42  ;;  %v4513_v6 = vld [vmem:[%s19655_s17 + $0x114] sm:$0xff] }
 0x284   :  { %v4659_v40 = vpop.permute.xlu1 %4658 }
 0x285   :  { %v4916_v30 = vmul.f32 %v14408_v53, %v4659_v40  ;;  %v4654_v25 = vpop.permute.xlu0 %4653  ;;  %3610 = vperm.xlu1 %12906, %v14880_v0  }
 0x286   :  { %v4915_v1 = vmul.f32 %v14408_v53, %v4654_v25  ;;  %3605 = vperm.xlu0 %12905, %v14771_v4   ;;  %v2868_v4 = vld [vmem:[%s19655_s17 + $0x117] sm:$0xff]  ;;  %v5500_v25 = vmax.f32 %v5366_v22, %v5433_v26 }
 0x287   :  { %v4984_v17 = vadd.f32 %v4916_v30, %v4435_v16  ;;  %v4512_v30 = vld [vmem:[%s19655_s17 + $0x10c] sm:$0xff]  ;;  %v3965_v22 = vld [vmem:[%s19655_s17 + $0x11b] sm:$0xff] }
 0x288   :  { %v4983_v2 = vadd.f32 %v4915_v1, %v4434_v56  ;;  %v14892_v9 = vpop.permute.xlu1 %306 }
 0x289   :  { %v5059_v32 = vadd.f32 %v14425_v19, %v4984_v17  ;;  %v14895_v8 = vpop.permute.xlu0 %301  ;;  %4698 = vperm.xlu1 %12906, %v4511_v20   ;;  %v14945_v17 = vld [vmem:[%s19638_s4 + $0x1] ss:$0 sm:$0xff] }
 0x28a   :  { %v5058_v53 = vadd.f32 %v14425_v19, %v4983_v2  ;;  %4693 = vperm.xlu0 %12905, %v4510_v54   ;;  %v3964_v19 = vld [vmem:[%s19655_s17 + $0x113] sm:$0xff]  ;;  %v1075_v54 = vmul.f32 %v14945_v17, %v14555_v62 }
 0x28b   :  { %v5127_v50 = vmax.f32 %v5059_v32, 0.0 }
 0x28c   :  { %v5126_v48 = vmax.f32 %v5058_v53, 0.0  ;;  %v14904_v34 = vpop.permute.xlu1 %855 }
 0x28d   :  { %5196 = vst.msk [vmem:[#allocation2 + $0xa8] sm:$0xff] %vm5174_vm0, %v5127_v50  ;;  %v14907_v37 = vpop.permute.xlu0 %850  ;;  %3071 = vperm.xlu1 %12906, %v2868_v4   ;;  %v1074_v4 = vmul.f32 %v14945_v17, %v14558_v45  ;;  %v3966_v50 = vld [vmem:[%s19655_s17 + $0x123] sm:$0xff] }
 0x28e   :  { %5195 = vst.msk [vmem:[#allocation2 + $0xa0] sm:$0xff] %vm5174_vm0, %v5126_v48  ;;  %3066 = vperm.xlu0 %12905, %v2867_v24   ;;  %v14957_v24 = vld [vmem:[%s19638_s4] ss:$0 sm:$0xff]  ;;  %v19693_v48 = vld [vmem:[#allocation19_spill] sm:$0xff] }
 0x28f   :  { %v526_v62 = vmul.f32 %v14957_v24, %v19693_v48 }
 0x290   :  { %v14916_v63 = vpop.permute.xlu1 %1943 }
 0x291   :  { %v14918_v43 = vpop.permute.xlu0 %1938  ;;  %4159 = vperm.xlu1 %12906, %v3964_v19   ;;  %v14964_v19 = vld [vmem:[%s19638_s4 + $0x2] ss:$0 sm:$0xff] }
 0x292   :  { %4154 = vperm.xlu0 %12905, %v3963_v38   ;;  %v1624_v45 = vmul.f32 %v14964_v19, %v14600_v57 }
 0x294   :  { %v14930_v29 = vpop.permute.xlu1 %3031 }
 0x295   :  { %v14932_v60 = vpop.permute.xlu0 %3026  ;;  %3620 = vperm.xlu1 %12906, %v14923_v33   ;;  %v5434_v55 = vld [vmem:[#allocation2 + $0x99] sm:$0xff]  ;;  %v5568_v21 = vld [vmem:[#allocation2 + $0xa5] sm:$0xff] }
 0x296   :  { %v5567_v61 = vld [vmem:[#allocation2 + $0x9d] sm:$0xff]  ;;  %3615 = vperm.xlu0 %12905, %v14928_v35   ;;  %v5501_v42 = vmax.f32 %v5367_v39, %v5434_v55  ;;  %v5635_v16 = vld [vmem:[#allocation2 + $0xa6] sm:$0xff]  ;;  %v19694_v39 = vld [vmem:[#allocation20_spill] sm:$0xff]  ;;  %v1623_v55 = vmul.f32 %v14964_v19, %v14604_v12 }
 0x297   :  { %v5634_v40 = vld [vmem:[#allocation2 + $0x9e] sm:$0xff]  ;;  %v5702_v1 = vmax.f32 %v5568_v21, %v5635_v16  ;;  %v525_v26 = vmul.f32 %v14957_v24, %v19694_v39  ;;  %v1143_v21 = vadd.f32 %v1075_v54, %v526_v62 }
 0x298   :  { %v5701_v56 = vmax.f32 %v5567_v61, %v5634_v40  ;;  %v4120_v20 = vpop.permute.xlu1 %4119  ;;  %v4515_v12 = vld [vmem:[%s19655_s17 + $0x124] sm:$0xff] }
 0x299   :  { %v4115_v2 = vpop.permute.xlu0 %4114  ;;  %4708 = vperm.xlu1 %12906, %v4513_v6   ;;  %v5769_v53 = vmax.f32 %v5501_v42, %v5702_v1  ;;  %v14980_v6 = vld [vmem:[%s19638_s4 + $0x3] ss:$0 sm:$0xff]  ;;  %v1142_v40 = vadd.f32 %v1074_v4, %v525_v26 }
 0x29a   :  { %v5768_v32 = vmax.f32 %v5500_v25, %v5701_v56  ;;  %4703 = vperm.xlu0 %12905, %v4512_v30   ;;  %v2173_v57 = vmul.f32 %v14980_v6, %v14678_v7  ;;  %v2172_v16 = vmul.f32 %v14980_v6, %v14680_v5  ;;  %v1692_v30 = vadd.f32 %v1624_v45, %v1143_v21  ;;  %v14995_v7 = vld [vmem:[%s19638_s4 + $0x4] ss:$0 sm:$0xff]  ;;  %v4514_v5 = vld [vmem:[%s19655_s17 + $0x11c] sm:$0xff]  ;;  %v15023_v45 = vld [vmem:[%s19638_s4 + $0x6] ss:$0 sm:$0xff] }
 0x29b   :  { %v2722_v25 = vmul.f32 %v14995_v7, %v14736_v18  ;;  %v1691_v56 = vadd.f32 %v1623_v55, %v1142_v40  ;;  %v2721_v1 = vmul.f32 %v14995_v7, %v14740_v23  ;;  %v125_v23 = vld [vmem:[%s19655_s17 + $0x118] sm:$0xff]  ;;  %v15037_v55 = vld [vmem:[%s19638_s4 + $0x7] ss:$0 sm:$0xff] }
 0x29c   :  { %v12387_v38 = vpack.c.bf16 %v5769_v53, %v5768_v32  ;;  %v14975_v61 = vpop.permute.xlu1 %1404  ;;  %v2241_v32 = vadd.f32 %v2173_v57, %v1692_v30  ;;  %v15009_v53 = vld [vmem:[%s19638_s4 + $0x5] ss:$0 sm:$0xff]  ;;  %v4369_v21 = vmul.f32 %v15037_v55, %v4120_v20  ;;  %v4368_v40 = vmul.f32 %v15037_v55, %v4115_v2  ;;  %v15052_v20 = vld [vmem:[%s19638_s4 + $0x8] ss:$0 sm:$0xff] }
 0x29d   :  { %v14984_v42 = vpop.permute.xlu0 %1399  ;;  %4169 = vperm.xlu1 %12906, %v3966_v50   ;;  %v3271_v4 = vmul.f32 %v15009_v53, %v14806_v52  ;;  %v2240_v50 = vadd.f32 %v2172_v16, %v1691_v56  ;;  %v3270_v48 = vmul.f32 %v15009_v53, %v14808_v13  ;;  %v3820_v52 = vmul.f32 %v15023_v45, %v14871_v27 }
 0x29e   :  { %12388 = vmatpush1.bf16.msra.mxu0 %v12387_v38  ;;  %4164 = vperm.xlu0 %12905, %v3965_v22   ;;  %v2790_v62 = vadd.f32 %v2722_v25, %v2241_v32  ;;  %v124_v38 = vld [vmem:[%s19655_s17 + $0x110] sm:$0xff]  ;;  %v3819_v13 = vmul.f32 %v15023_v45, %v14874_v3  ;;  %v674_v3 = vld [vmem:[%s19655_s17 + $0x119] sm:$0xff] }
 0x29f   :  { %12389 = vmatprep.subr.bf16.mxu0 %v19665_v46  ;;  %v2789_v22 = vadd.f32 %v2721_v1, %v2240_v50 }
 0x2a0   :  { %v15004_v54 = vpop.permute.xlu1 %2492  ;;  %v3339_v26 = vadd.f32 %v3271_v4, %v2790_v62 }
 0x2a1   :  { %v15013_v18 = vpop.permute.xlu0 %2487  ;;  %4718 = vperm.xlu1 %12906, %v4515_v12   ;;  %v3338_v27 = vadd.f32 %v3270_v48, %v2789_v22  ;;  %v673_v12 = vld [vmem:[%s19655_s17 + $0x111] sm:$0xff]  ;;  %v127_v22 = vld [vmem:[%s19655_s17 + $0x128] sm:$0xff] }
 0x2a2   :  { %4713 = vperm.xlu0 %12905, %v4514_v5   ;;  %v3888_v16 = vadd.f32 %v3820_v52, %v3339_v26  ;;  %v126_v26 = vld [vmem:[%s19655_s17 + $0x120] sm:$0xff] }
 0x2a3   :  { %v3887_v30 = vadd.f32 %v3819_v13, %v3338_v27 }
 0x2a4   :  { %v15032_v39 = vpop.permute.xlu1 %3580  ;;  %v4437_v5 = vadd.f32 %v4369_v21, %v3888_v16 }
 0x2a5   :  { %v15040_v57 = vpop.permute.xlu0 %3575  ;;  %336 = vperm.xlu1 %12906, %v125_v23   ;;  %v4436_v1 = vadd.f32 %v4368_v40, %v3887_v30  ;;  %v15061_v23 = vld [vmem:[%s19639_s5] ss:$0 sm:$0xff] }
 0x2a6   :  { %331 = vperm.xlu0 %12905, %v124_v38   ;;  %v1771_v30 = vld [vmem:[%s19655_s17 + $0x11d] sm:$0xff] }
 0x2a8   :  { %v4669_v25 = vpop.permute.xlu1 %4668 }
 0x2a9   :  { %v4918_v2 = vmul.f32 %v15052_v20, %v4669_v25  ;;  %v4664_v56 = vpop.permute.xlu0 %4663  ;;  %885 = vperm.xlu1 %12906, %v674_v3  }
 0x2aa   :  { %v4917_v32 = vmul.f32 %v15052_v20, %v4664_v56  ;;  %880 = vperm.xlu0 %12905, %v673_v12   ;;  %v1772_v12 = vld [vmem:[%s19655_s17 + $0x125] sm:$0xff] }
 0x2ab   :  { %v4986_v4 = vadd.f32 %v4918_v2, %v4437_v5  ;;  %v5368_v5 = vld [vmem:[#allocation2 + $0xa0] sm:$0xff]  ;;  %v5369_v2 = vld [vmem:[#allocation2 + $0xa8] sm:$0xff] }
 0x2ac   :  { %v4985_v50 = vadd.f32 %v4917_v32, %v4436_v1  ;;  %v15056_v48 = vpop.permute.xlu1 %316  ;;  %v5435_v56 = vld [vmem:[#allocation2 + $0xa1] sm:$0xff] }
 0x2ad   :  { %v5061_v62 = vadd.f32 %v15061_v23, %v4986_v4  ;;  %v15064_v52 = vpop.permute.xlu0 %311  ;;  %1434 = vperm.xlu1 %12906, %v14928_v35   ;;  %v675_v35 = vld [vmem:[%s19655_s17 + $0x121] sm:$0xff] }
 0x2ae   :  { %19695 = vst [vmem:[#allocation17_spill] sm:$0xff] %v15064_v52  ;;  %v5060_v38 = vadd.f32 %v15061_v23, %v4985_v50  ;;  %1429 = vperm.xlu0 %12905, %v14880_v0   ;;  %v676_v0 = vld [vmem:[%s19655_s17 + $0x129] sm:$0xff]  ;;  %v1077_v52 = vmul.f32 %v14945_v17, %v14672_v44  ;;  %v1626_v44 = vmul.f32 %v14964_v19, %v14717_v10 }
 0x2af   :  { %v5129_v13 = vmax.f32 %v5061_v62, 0.0  ;;  %v15104_v62 = vld [vmem:[%s19655_s17 + $0x12a] sm:$0xff] }
 0x2b0   :  { %v5128_v21 = vmax.f32 %v5060_v38, 0.0  ;;  %v15075_v27 = vpop.permute.xlu1 %865 }
 0x2b1   :  { %19696 = vst [vmem:[#allocation23_spill] sm:$0xff] %v15075_v27  ;;  %5198 = vst.msk [vmem:[#allocation2 + $0xb8] sm:$0xff] %vm5174_vm0, %v5129_v13  ;;  %v15078_v40 = vpop.permute.xlu0 %860  ;;  %346 = vperm.xlu1 %12906, %v127_v22   ;;  %v1076_v27 = vmul.f32 %v14945_v17, %v14675_v59 }
 0x2b2   :  { %19697 = vst [vmem:[#allocation24_spill] sm:$0xff] %v15078_v40  ;;  %5197 = vst.msk [vmem:[#allocation2 + $0xb0] sm:$0xff] %vm5174_vm0, %v5128_v21  ;;  %341 = vperm.xlu0 %12905, %v126_v26   ;;  %v5502_v26 = vmax.f32 %v5368_v5, %v5435_v56  ;;  %v2321_v5 = vld [vmem:[%s19655_s17 + $0x126] sm:$0xff] }
 0x2b4   :  { %v15087_v3 = vpop.permute.xlu1 %1953 }
 0x2b5   :  { %v15089_v16 = vpop.permute.xlu0 %1948  ;;  %895 = vperm.xlu1 %12906, %v676_v0  }
 0x2b6   :  { %890 = vperm.xlu0 %12905, %v675_v35  }
 0x2b8   :  { %v15097_v25 = vpop.permute.xlu1 %3041 }
 0x2b9   :  { %v15099_v1 = vpop.permute.xlu0 %3036  ;;  %1983 = vperm.xlu1 %12906, %v1772_v12   ;;  %v5436_v32 = vld [vmem:[#allocation2 + $0xa9] sm:$0xff]  ;;  %v5570_v50 = vld [vmem:[#allocation2 + $0xb5] sm:$0xff] }
 0x2ba   :  { %v5569_v4 = vld [vmem:[#allocation2 + $0xad] sm:$0xff]  ;;  %1978 = vperm.xlu0 %12905, %v1771_v30   ;;  %v5503_v38 = vmax.f32 %v5369_v2, %v5436_v32  ;;  %v5637_v13 = vld [vmem:[#allocation2 + $0xb6] sm:$0xff]  ;;  %v528_v2 = vmul.f32 %v14957_v24, %v14659_v31  ;;  %v2320_v32 = vld [vmem:[%s19655_s17 + $0x11e] sm:$0xff]  ;;  %v2175_v31 = vmul.f32 %v14980_v6, %v14795_v47 }
 0x2bb   :  { %v5636_v22 = vld [vmem:[#allocation2 + $0xae] sm:$0xff]  ;;  %v5704_v0 = vmax.f32 %v5570_v50, %v5637_v13  ;;  %v129_v13 = vld [vmem:[%s19655_s17 + $0x138] sm:$0xff] }
 0x2bc   :  { %v5703_v21 = vmax.f32 %v5569_v4, %v5636_v22  ;;  %v4130_v35 = vpop.permute.xlu1 %4129  ;;  %v19698_v4 = vld [vmem:[#allocation18_spill] sm:$0xff]  ;;  %v128_v47 = vld [vmem:[%s19655_s17 + $0x130] sm:$0xff] }
 0x2bd   :  { %v4125_v12 = vpop.permute.xlu0 %4124  ;;  %1444 = vperm.xlu1 %12906, %v15104_v62   ;;  %v5771_v30 = vmax.f32 %v5503_v38, %v5704_v0  ;;  %v527_v59 = vmul.f32 %v14957_v24, %v19698_v4  ;;  %v1145_v38 = vadd.f32 %v1077_v52, %v528_v2  ;;  %v2724_v52 = vmul.f32 %v14995_v7, %v14853_v14  ;;  %v678_v2 = vld [vmem:[%s19655_s17 + $0x139] sm:$0xff] }
 0x2be   :  { %v5770_v40 = vmax.f32 %v5502_v26, %v5703_v21  ;;  %1439 = vperm.xlu0 %12905, %v14923_v33   ;;  %v1625_v33 = vmul.f32 %v14964_v19, %v14721_v49  ;;  %v3273_v0 = vmul.f32 %v15009_v53, %v14930_v29  ;;  %v3272_v14 = vmul.f32 %v15009_v53, %v14932_v60  ;;  %v677_v29 = vld [vmem:[%s19655_s17 + $0x131] sm:$0xff] }
 0x2bf   :  { %v1144_v10 = vadd.f32 %v1076_v27, %v527_v59  ;;  %v1694_v49 = vadd.f32 %v1626_v44, %v1145_v38  ;;  %v2723_v27 = vmul.f32 %v14995_v7, %v14857_v28  ;;  %v3822_v28 = vmul.f32 %v15023_v45, %v15032_v39  ;;  %v1774_v39 = vld [vmem:[%s19655_s17 + $0x135] sm:$0xff] }
 0x2c0   :  { %v12390_v56 = vpack.c.bf16 %v5771_v30, %v5770_v40  ;;  %v15126_v50 = vpop.permute.xlu1 %1414  ;;  %v2174_v40 = vmul.f32 %v14980_v6, %v14797_v36  ;;  %v4371_v59 = vmul.f32 %v15037_v55, %v4130_v35 }
 0x2c1   :  { %v15130_v22 = vpop.permute.xlu0 %1409  ;;  %2532 = vperm.xlu1 %12906, %v2321_v5   ;;  %v1693_v26 = vadd.f32 %v1625_v33, %v1144_v10  ;;  %v2243_v21 = vadd.f32 %v2175_v31, %v1694_v49  ;;  %v4370_v31 = vmul.f32 %v15037_v55, %v4125_v12 }
 0x2c2   :  { %12391 = vmatpush1.bf16.msra.mxu0 %v12390_v56  ;;  %2527 = vperm.xlu0 %12905, %v2320_v32   ;;  %v3821_v32 = vmul.f32 %v15023_v45, %v15040_v57  ;;  %v1773_v57 = vld [vmem:[%s19655_s17 + $0x12d] sm:$0xff] }
 0x2c3   :  { %12392 = vmatprep.subr.bf16.mxu0 %v19665_v46  ;;  %v2242_v5 = vadd.f32 %v2174_v40, %v1693_v26  ;;  %v2792_v44 = vadd.f32 %v2724_v52, %v2243_v21  ;;  %v2870_v26 = vld [vmem:[%s19655_s17 + $0x127] sm:$0xff]  ;;  %v2869_v21 = vld [vmem:[%s19655_s17 + $0x11f] sm:$0xff] }
 0x2c4   :  { %v15145_v36 = vpop.permute.xlu1 %2502 }
 0x2c5   :  { %v15149_v30 = vpop.permute.xlu0 %2497  ;;  %356 = vperm.xlu1 %12906, %v129_v13   ;;  %v2791_v56 = vadd.f32 %v2723_v27, %v2242_v5  ;;  %v3341_v60 = vadd.f32 %v3273_v0, %v2792_v44 }
 0x2c6   :  { %351 = vperm.xlu0 %12905, %v128_v47  }
 0x2c7   :  { %v3340_v38 = vadd.f32 %v3272_v14, %v2791_v56  ;;  %v3890_v10 = vadd.f32 %v3822_v28, %v3341_v60  ;;  %v15192_v28 = vld [vmem:[%s19655_s17 + $0x13a] sm:$0xff]  ;;  %v1226_v56 = vld [vmem:[%s19655_s17 + $0x132] sm:$0xff] }
 0x2c8   :  { %v15163_v4 = vpop.permute.xlu1 %3590 }
 0x2c9   :  { %v15166_v33 = vpop.permute.xlu0 %3585  ;;  %905 = vperm.xlu1 %12906, %v678_v2   ;;  %v3889_v40 = vadd.f32 %v3821_v32, %v3340_v38  ;;  %v4439_v49 = vadd.f32 %v4371_v59, %v3890_v10  ;;  %v2323_v38 = vld [vmem:[%s19655_s17 + $0x136] sm:$0xff] }
 0x2ca   :  { %900 = vperm.xlu0 %12905, %v677_v29  }
 0x2cb   :  { %v4438_v47 = vadd.f32 %v4370_v31, %v3889_v40  ;;  %v2322_v31 = vld [vmem:[%s19655_s17 + $0x12e] sm:$0xff] }
 0x2cc   :  { %v4679_v13 = vpop.permute.xlu1 %4678  ;;  %v5370_v40 = vld [vmem:[#allocation2 + $0xb0] sm:$0xff] }
 0x2cd   :  { %v4920_v35 = vmul.f32 %v15052_v20, %v4679_v13  ;;  %v4674_v52 = vpop.permute.xlu0 %4673  ;;  %1993 = vperm.xlu1 %12906, %v1774_v39   ;;  %v5371_v13 = vld [vmem:[#allocation2 + $0xb8] sm:$0xff] }
 0x2ce   :  { %v4919_v12 = vmul.f32 %v15052_v20, %v4674_v52  ;;  %1988 = vperm.xlu0 %12905, %v1773_v57  }
 0x2cf   :  { %v4988_v27 = vadd.f32 %v4920_v35, %v4439_v49  ;;  %v5437_v49 = vld [vmem:[#allocation2 + $0xb1] sm:$0xff] }
 0x2d0   :  { %v4987_v0 = vadd.f32 %v4919_v12, %v4438_v47  ;;  %v15183_v5 = vpop.permute.xlu1 %326 }
 0x2d1   :  { %v5063_v14 = vadd.f32 %v15061_v23, %v4988_v27  ;;  %v15186_v2 = vpop.permute.xlu0 %321  ;;  %3081 = vperm.xlu1 %12906, %v2870_v26   ;;  %v131_v26 = vld [vmem:[%s19655_s17 + $0x148] sm:$0xff] }
 0x2d2   :  { %19699 = vst [vmem:[#allocation21_spill] sm:$0xff] %v15186_v2  ;;  %v5062_v44 = vadd.f32 %v15061_v23, %v4987_v0  ;;  %3076 = vperm.xlu0 %12905, %v2869_v21  }
 0x2d3   :  { %v5131_v29 = vmax.f32 %v5063_v14, 0.0  ;;  %v130_v14 = vld [vmem:[%s19655_s17 + $0x140] sm:$0xff] }
 0x2d4   :  { %v5130_v32 = vmax.f32 %v5062_v44, 0.0  ;;  %v15197_v60 = vpop.permute.xlu1 %875  ;;  %v5504_v44 = vmax.f32 %v5370_v40, %v5437_v49  ;;  %v530_v40 = vmul.f32 %v14957_v24, %v14776_v41  ;;  %v1628_v49 = vmul.f32 %v14964_v19, %v14834_v51 }
 0x2d5   :  { %5200 = vst.msk [vmem:[#allocation2 + $0xc8] sm:$0xff] %vm5174_vm0, %v5131_v29  ;;  %v15200_v59 = vpop.permute.xlu0 %870  ;;  %1454 = vperm.xlu1 %12906, %v15192_v28   ;;  %v2177_v41 = vmul.f32 %v14980_v6, %v14916_v63  ;;  %v1775_v63 = vld [vmem:[%s19655_s17 + $0x13d] sm:$0xff] }
 0x2d6   :  { %5199 = vst.msk [vmem:[#allocation2 + $0xc0] sm:$0xff] %vm5174_vm0, %v5130_v32  ;;  %1449 = vperm.xlu0 %12905, %v1226_v56  }
 0x2d8   :  { %v15210_v39 = vpop.permute.xlu1 %1963 }
 0x2d9   :  { %v15212_v10 = vpop.permute.xlu0 %1958  ;;  %2542 = vperm.xlu1 %12906, %v2323_v38   ;;  %v1079_v38 = vmul.f32 %v14945_v17, %v14789_v58  ;;  %v679_v58 = vld [vmem:[%s19655_s17 + $0x141] sm:$0xff] }
 0x2da   :  { %2537 = vperm.xlu0 %12905, %v2322_v31  }
 0x2dc   :  { %v15214_v57 = vpop.permute.xlu1 %3051 }
 0x2dd   :  { %v15216_v35 = vpop.permute.xlu0 %3046  ;;  %3630 = vperm.xlu1 %12906, %v1226_v56   ;;  %v5438_v52 = vld [vmem:[#allocation2 + $0xb9] sm:$0xff]  ;;  %v5572_v12 = vld [vmem:[#allocation2 + $0xc5] sm:$0xff] }
 0x2de   :  { %v5571_v47 = vld [vmem:[#allocation2 + $0xbd] sm:$0xff]  ;;  %3625 = vperm.xlu0 %12905, %v15104_v62   ;;  %v5505_v27 = vmax.f32 %v5371_v13, %v5438_v52  ;;  %v5639_v0 = vld [vmem:[#allocation2 + $0xc6] sm:$0xff]  ;;  %v1078_v13 = vmul.f32 %v14945_v17, %v14792_v15  ;;  %v1627_v15 = vmul.f32 %v14964_v19, %v14838_v11 }
 0x2df   :  { %v5638_v21 = vld [vmem:[#allocation2 + $0xbe] sm:$0xff]  ;;  %v5706_v32 = vmax.f32 %v5572_v12, %v5639_v0  ;;  %v680_v52 = vld [vmem:[%s19655_s17 + $0x149] sm:$0xff]  ;;  %v19700_v12 = vld [vmem:[#allocation16_spill] sm:$0xff] }
 0x2e0   :  { %v5705_v29 = vmax.f32 %v5571_v47, %v5638_v21  ;;  %v4140_v56 = vpop.permute.xlu1 %4139  ;;  %v1147_v21 = vadd.f32 %v1079_v38, %v530_v40  ;;  %v2872_v40 = vld [vmem:[%s19655_s17 + $0x137] sm:$0xff] }
 0x2e1   :  { %v4135_v31 = vpop.permute.xlu0 %4134  ;;  %366 = vperm.xlu1 %12906, %v131_v26   ;;  %v5773_v2 = vmax.f32 %v5505_v27, %v5706_v32  ;;  %v529_v26 = vmul.f32 %v14957_v24, %v19700_v12  ;;  %v2725_v32 = vmul.f32 %v14995_v7, %v15013_v18  ;;  %v3824_v18 = vmul.f32 %v15023_v45, %v15163_v4  ;;  %v3968_v4 = vld [vmem:[%s19655_s17 + $0x133] sm:$0xff] }
 0x2e2   :  { %v5772_v62 = vmax.f32 %v5504_v44, %v5705_v29  ;;  %361 = vperm.xlu0 %12905, %v130_v14   ;;  %v1776_v14 = vld [vmem:[%s19655_s17 + $0x145] sm:$0xff]  ;;  %v1696_v11 = vadd.f32 %v1628_v49, %v1147_v21  ;;  %v2726_v44 = vmul.f32 %v14995_v7, %v15004_v54  ;;  %v3274_v54 = vmul.f32 %v15009_v53, %v15099_v1 }
 0x2e3   :  { %v1146_v51 = vadd.f32 %v1078_v13, %v529_v26  ;;  %v4373_v26 = vmul.f32 %v15037_v55, %v4140_v56 }
 0x2e4   :  { %v12393_v47 = vpack.c.bf16 %v5773_v2, %v5772_v62  ;;  %v15243_v27 = vpop.permute.xlu1 %1424  ;;  %v2176_v2 = vmul.f32 %v14980_v6, %v14918_v43  ;;  %v2245_v38 = vadd.f32 %v2177_v41, %v1696_v11  ;;  %v3275_v62 = vmul.f32 %v15009_v53, %v15097_v25  ;;  %v2871_v25 = vld [vmem:[%s19655_s17 + $0x12f] sm:$0xff] }
 0x2e5   :  { %v15247_v0 = vpop.permute.xlu0 %1419  ;;  %915 = vperm.xlu1 %12906, %v680_v52   ;;  %v1695_v29 = vadd.f32 %v1627_v15, %v1146_v51  ;;  %v4372_v41 = vmul.f32 %v15037_v55, %v4135_v31 }
 0x2e6   :  { %12394 = vmatpush1.bf16.msra.mxu0 %v12393_v47  ;;  %910 = vperm.xlu0 %12905, %v679_v58   ;;  %v2794_v49 = vadd.f32 %v2726_v44, %v2245_v38  ;;  %v3823_v58 = vmul.f32 %v15023_v45, %v15166_v33  ;;  %v3967_v33 = vld [vmem:[%s19655_s17 + $0x12b] sm:$0xff]  ;;  %v1228_v38 = vld [vmem:[%s19655_s17 + $0x142] sm:$0xff] }
 0x2e7   :  { %12395 = vmatprep.subr.bf16.mxu0 %v19665_v46  ;;  %v2244_v52 = vadd.f32 %v2176_v2, %v1695_v29  ;;  %v15297_v29 = vld [vmem:[%s19655_s17 + $0x14a] sm:$0xff] }
 0x2e8   :  { %v15262_v43 = vpop.permute.xlu1 %2512  ;;  %v3343_v1 = vadd.f32 %v3275_v62, %v2794_v49 }
 0x2e9   :  { %v15266_v13 = vpop.permute.xlu0 %2507  ;;  %2003 = vperm.xlu1 %12906, %v1776_v14   ;;  %v2793_v47 = vadd.f32 %v2725_v32, %v2244_v52 }
 0x2ea   :  { %1998 = vperm.xlu0 %12905, %v1775_v63   ;;  %v3892_v51 = vadd.f32 %v3824_v18, %v3343_v1  ;;  %v2325_v18 = vld [vmem:[%s19655_s17 + $0x146] sm:$0xff] }
 0x2eb   :  { %v3342_v21 = vadd.f32 %v3274_v54, %v2793_v47  ;;  %v2324_v47 = vld [vmem:[%s19655_s17 + $0x13e] sm:$0xff] }
 0x2ec   :  { %v15280_v12 = vpop.permute.xlu1 %3600  ;;  %v4441_v11 = vadd.f32 %v4373_v26, %v3892_v51  ;;  %v1630_v51 = vmul.f32 %v14964_v19, %v14975_v61  ;;  %v2178_v61 = vmul.f32 %v14980_v6, %v15089_v16  ;;  %v5372_v16 = vld [vmem:[#allocation2 + $0xc0] sm:$0xff] }
 0x2ed   :  { %v15283_v15 = vpop.permute.xlu0 %3595  ;;  %3091 = vperm.xlu1 %12906, %v2872_v40   ;;  %v3891_v2 = vadd.f32 %v3823_v58, %v3342_v21  ;;  %v1081_v58 = vmul.f32 %v14945_v17, %v14904_v34  ;;  %v531_v34 = vmul.f32 %v14957_v24, %v14895_v8  ;;  %v4517_v8 = vld [vmem:[%s19655_s17 + $0x134] sm:$0xff] }
 0x2ee   :  { %3086 = vperm.xlu0 %12905, %v2871_v25  }
 0x2ef   :  { %v4440_v63 = vadd.f32 %v4372_v41, %v3891_v2  ;;  %v532_v41 = vmul.f32 %v14957_v24, %v14892_v9  ;;  %v1629_v2 = vmul.f32 %v14964_v19, %v14984_v42  ;;  %v4516_v42 = vld [vmem:[%s19655_s17 + $0x12c] sm:$0xff] }
 0x2f0   :  { %v4689_v14 = vpop.permute.xlu1 %4688 }
 0x2f1   :  { %v4922_v56 = vmul.f32 %v15052_v20, %v4689_v14  ;;  %v4684_v44 = vpop.permute.xlu0 %4683  ;;  %4179 = vperm.xlu1 %12906, %v3968_v4   ;;  %v1080_v4 = vmul.f32 %v14945_v17, %v14907_v37  ;;  %v2179_v14 = vmul.f32 %v14980_v6, %v15087_v3 }
 0x2f2   :  { %v4921_v31 = vmul.f32 %v15052_v20, %v4684_v44  ;;  %4174 = vperm.xlu0 %12905, %v3967_v33   ;;  %v1149_v33 = vadd.f32 %v1081_v58, %v532_v41  ;;  %v2728_v44 = vmul.f32 %v14995_v7, %v15145_v36  ;;  %v5439_v36 = vld [vmem:[#allocation2 + $0xc1] sm:$0xff]  ;;  %v3276_v58 = vmul.f32 %v15009_v53, %v15216_v35 }
 0x2f3   :  { %v4990_v32 = vadd.f32 %v4922_v56, %v4441_v11  ;;  %v1148_v37 = vadd.f32 %v1080_v4, %v531_v34  ;;  %v5506_v34 = vmax.f32 %v5372_v16, %v5439_v36  ;;  %v3825_v35 = vmul.f32 %v15023_v45, %v15283_v15  ;;  %v681_v16 = vld [vmem:[%s19655_s17 + $0x151] sm:$0xff] }
 0x2f4   :  { %v4989_v62 = vadd.f32 %v4921_v31, %v4440_v63  ;;  %v15302_v52 = vpop.permute.xlu1 %1973  ;;  %v1698_v56 = vadd.f32 %v1630_v51, %v1149_v33  ;;  %v2727_v31 = vmul.f32 %v14995_v7, %v15149_v30  ;;  %v133_v30 = vld [vmem:[%s19655_s17 + $0x158] sm:$0xff]  ;;  %v132_v51 = vld [vmem:[%s19655_s17 + $0x150] sm:$0xff] }
 0x2f5   :  { %v5065_v54 = vadd.f32 %v15061_v23, %v4990_v32  ;;  %v15305_v40 = vpop.permute.xlu0 %1968  ;;  %1464 = vperm.xlu1 %12906, %v15297_v29   ;;  %v1697_v3 = vadd.f32 %v1629_v2, %v1148_v37 }
 0x2f6   :  { %v5064_v49 = vadd.f32 %v15061_v23, %v4989_v62  ;;  %1459 = vperm.xlu0 %12905, %v1228_v38   ;;  %v2247_v63 = vadd.f32 %v2179_v14, %v1698_v56 }
 0x2f7   :  { %v5133_v25 = vmax.f32 %v5065_v54, 0.0 }
 0x2f8   :  { %v5132_v1 = vmax.f32 %v5064_v49, 0.0  ;;  %v15317_v26 = vpop.permute.xlu1 %3061 }
 0x2f9   :  { %5202 = vst.msk [vmem:[#allocation2 + $0xd8] sm:$0xff] %vm5174_vm0, %v5133_v25  ;;  %v15320_v21 = vpop.permute.xlu0 %3056  ;;  %2552 = vperm.xlu1 %12906, %v2325_v18   ;;  %v2246_v25 = vadd.f32 %v2178_v61, %v1697_v3 }
 0x2fa   :  { %5201 = vst.msk [vmem:[#allocation2 + $0xd0] sm:$0xff] %vm5174_vm0, %v5132_v1  ;;  %2547 = vperm.xlu0 %12905, %v2324_v47   ;;  %v2796_v47 = vadd.f32 %v2728_v44, %v2247_v63  ;;  %v682_v63 = vld [vmem:[%s19655_s17 + $0x159] sm:$0xff] }
 0x2fb   :  { %v2795_v14 = vadd.f32 %v2727_v31, %v2246_v25 }
 0x2fc   :  { %v4150_v9 = vpop.permute.xlu1 %4149 }
 0x2fd   :  { %v4145_v11 = vpop.permute.xlu0 %4144  ;;  %3640 = vperm.xlu1 %12906, %v1228_v38   ;;  %v5373_v38 = vld [vmem:[#allocation2 + $0xc8] sm:$0xff]  ;;  %v4375_v61 = vmul.f32 %v15037_v55, %v4150_v9  ;;  %v534_v9 = vmul.f32 %v14957_v24, %v15056_v48 }
 0x2fe   :  { %3635 = vperm.xlu0 %12905, %v15192_v28   ;;  %v3277_v28 = vmul.f32 %v15009_v53, %v15214_v57  ;;  %v3826_v57 = vmul.f32 %v15023_v45, %v15280_v12  ;;  %v4374_v3 = vmul.f32 %v15037_v55, %v4145_v11  ;;  %v19702_v11 = vld [vmem:[#allocation24_spill] sm:$0xff] }
 0x300   :  { %v15348_v32 = vpop.permute.xlu1 %2522  ;;  %v3345_v56 = vadd.f32 %v3277_v28, %v2796_v47 }
 0x301   :  { %v15352_v62 = vpop.permute.xlu0 %2517  ;;  %4728 = vperm.xlu1 %12906, %v4517_v8   ;;  %v5440_v54 = vld [vmem:[#allocation2 + $0xc9] sm:$0xff]  ;;  %v5574_v18 = vld [vmem:[#allocation2 + $0xd5] sm:$0xff] }
 0x302   :  { %v5573_v49 = vld [vmem:[#allocation2 + $0xcd] sm:$0xff]  ;;  %4723 = vperm.xlu0 %12905, %v4516_v42   ;;  %v5507_v1 = vmax.f32 %v5373_v38, %v5440_v54  ;;  %v5641_v4 = vld [vmem:[#allocation2 + $0xd6] sm:$0xff]  ;;  %v3344_v42 = vadd.f32 %v3276_v58, %v2795_v14  ;;  %v3894_v31 = vadd.f32 %v3826_v57, %v3345_v56  ;;  %v1632_v58 = vmul.f32 %v14964_v19, %v15126_v50 }
 0x303   :  { %v5640_v41 = vld [vmem:[#allocation2 + $0xce] sm:$0xff]  ;;  %v5708_v2 = vmax.f32 %v5574_v18, %v5641_v4  ;;  %v1631_v57 = vmul.f32 %v14964_v19, %v15130_v22  ;;  %v1085_v22 = vmul.f32 %v14945_v17, %v15197_v60  ;;  %v2873_v60 = vld [vmem:[%s19655_s17 + $0x13f] sm:$0xff] }
 0x304   :  { %v5707_v33 = vmax.f32 %v5573_v49, %v5640_v41  ;;  %v15366_v37 = vpop.permute.xlu1 %3610  ;;  %v19701_v38 = vld [vmem:[#allocation23_spill] sm:$0xff]  ;;  %v3893_v28 = vadd.f32 %v3825_v35, %v3344_v42  ;;  %v1082_v49 = vmul.f32 %v14945_v17, %v19702_v11  ;;  %v4443_v18 = vadd.f32 %v4375_v61, %v3894_v31  ;;  %v19703_v41 = vld [vmem:[#allocation17_spill] sm:$0xff] }
 0x305   :  { %v15369_v44 = vpop.permute.xlu0 %3605  ;;  %376 = vperm.xlu1 %12906, %v133_v30   ;;  %v5775_v8 = vmax.f32 %v5507_v1, %v5708_v2  ;;  %v1083_v36 = vmul.f32 %v14945_v17, %v19701_v38  ;;  %v1778_v1 = vld [vmem:[%s19655_s17 + $0x155] sm:$0xff]  ;;  %v533_v4 = vmul.f32 %v14957_v24, %v19703_v41  ;;  %v1777_v50 = vld [vmem:[%s19655_s17 + $0x14d] sm:$0xff]  ;;  %v2181_v35 = vmul.f32 %v14980_v6, %v15210_v39 }
 0x306   :  { %v5774_v12 = vmax.f32 %v5506_v34, %v5707_v33  ;;  %371 = vperm.xlu0 %12905, %v132_v51   ;;  %v4442_v30 = vadd.f32 %v4374_v3, %v3893_v28  ;;  %v2874_v3 = vld [vmem:[%s19655_s17 + $0x147] sm:$0xff]  ;;  %v2730_v31 = vmul.f32 %v14995_v7, %v15262_v43  ;;  %v1633_v28 = vmul.f32 %v14964_v19, %v15247_v0 }
 0x307   :  { %v1151_v34 = vadd.f32 %v1083_v36, %v534_v9  ;;  %v1150_v14 = vadd.f32 %v1082_v49, %v533_v4  ;;  %v2729_v9 = vmul.f32 %v14995_v7, %v15266_v13  ;;  %v2183_v13 = vmul.f32 %v14980_v6, %v15302_v52  ;;  %v3969_v52 = vld [vmem:[%s19655_s17 + $0x13b] sm:$0xff] }
 0x308   :  { %v12396_v15 = vpack.c.bf16 %v5775_v8, %v5774_v12  ;;  %v4699_v54 = vpop.permute.xlu1 %4698  ;;  %v2180_v8 = vmul.f32 %v14980_v6, %v15212_v10  ;;  %v536_v10 = vmul.f32 %v14957_v24, %v15183_v5  ;;  %v3278_v49 = vmul.f32 %v15009_v53, %v15320_v21 }
 0x309   :  { %v4924_v25 = vmul.f32 %v15052_v20, %v4699_v54  ;;  %v4694_v47 = vpop.permute.xlu0 %4693  ;;  %925 = vperm.xlu1 %12906, %v682_v63   ;;  %v1700_v12 = vadd.f32 %v1632_v58, %v1151_v34  ;;  %v1699_v39 = vadd.f32 %v1631_v57, %v1150_v14  ;;  %v1084_v63 = vmul.f32 %v14945_v17, %v15200_v59  ;;  %v19704_v17 = vld [vmem:[#allocation21_spill] sm:$0xff]  ;;  %v1230_v34 = vld [vmem:[%s19655_s17 + $0x152] sm:$0xff] }
 0x30a   :  { %12397 = vmatpush1.bf16.msra.mxu0 %v12396_v15  ;;  %v4923_v48 = vmul.f32 %v15052_v20, %v4694_v47  ;;  %920 = vperm.xlu0 %12905, %v681_v16   ;;  %v1634_v16 = vmul.f32 %v14964_v19, %v15243_v27  ;;  %v535_v59 = vmul.f32 %v14957_v24, %v19704_v17  ;;  %v3970_v24 = vld [vmem:[%s19655_s17 + $0x143] sm:$0xff]  ;;  %v15458_v57 = vld [vmem:[%s19655_s17 + $0x15a] sm:$0xff] }
 0x30b   :  { %12398 = vmatprep.subr.bf16.mxu0 %v19665_v46  ;;  %v4992_v51 = vadd.f32 %v4924_v25, %v4443_v18  ;;  %v2249_v43 = vadd.f32 %v2181_v35, %v1700_v12  ;;  %v3279_v54 = vmul.f32 %v15009_v53, %v15317_v26  ;;  %v1153_v27 = vadd.f32 %v1085_v22, %v536_v10  ;;  %v5375_v22 = vld [vmem:[#allocation2 + $0xd8] sm:$0xff] }
 0x30c   :  { %v4991_v33 = vadd.f32 %v4923_v48, %v4442_v30  ;;  %v15399_v2 = vpop.permute.xlu1 %3071  ;;  %v2248_v11 = vadd.f32 %v2180_v8, %v1699_v39  ;;  %v1152_v19 = vadd.f32 %v1084_v63, %v535_v59  ;;  %v2182_v26 = vmul.f32 %v14980_v6, %v15305_v40  ;;  %v5244_v8 = vld [vmem:[%s19635_s1 + $0x8] sm:$0xff]  ;;  %v2327_v10 = vld [vmem:[%s19655_s17 + $0x156] sm:$0xff] }
 0x30d   :  { %v5067_v56 = vadd.f32 %v15061_v23, %v4992_v51  ;;  %v15404_v61 = vpop.permute.xlu0 %3066  ;;  %2013 = vperm.xlu1 %12906, %v1778_v1   ;;  %v2798_v0 = vadd.f32 %v2730_v31, %v2249_v43  ;;  %v3828_v18 = vmul.f32 %v15023_v45, %v15366_v37  ;;  %v1702_v21 = vadd.f32 %v1634_v16, %v1153_v27  ;;  %v5441_v51 = vld [vmem:[#allocation2 + $0xd1] sm:$0xff] }
 0x30e   :  { %v5066_v42 = vadd.f32 %v15061_v23, %v4991_v33  ;;  %2008 = vperm.xlu0 %12905, %v1777_v50   ;;  %v2797_v25 = vadd.f32 %v2729_v9, %v2248_v11  ;;  %v2732_v47 = vmul.f32 %v14995_v7, %v15348_v32  ;;  %v3827_v58 = vmul.f32 %v15023_v45, %v15369_v44  ;;  %v5374_v32 = vld [vmem:[#allocation2 + $0xd0] sm:$0xff] }
 0x30f   :  { %v5135_v15 = vmax.f32 %v5067_v56, 0.0  ;;  %v1701_v48 = vadd.f32 %v1633_v28, %v1152_v19  ;;  %v3347_v1 = vadd.f32 %v3279_v54, %v2798_v0  ;;  %v2251_v37 = vadd.f32 %v2183_v13, %v1702_v21  ;;  %5949 = vmatprep.mubr.f32.mxu0 %v5244_v8  ;;  %v2326_v59 = vld [vmem:[%s19655_s17 + $0x14e] sm:$0xff] }
 0x310   :  { %v5134_v38 = vmax.f32 %v5066_v42, 0.0  ;;  %v4160_v36 = vpop.permute.xlu1 %4159  ;;  %v3346_v41 = vadd.f32 %v3278_v49, %v2797_v25  ;;  %v2731_v14 = vmul.f32 %v14995_v7, %v15352_v62  ;;  %v3281_v56 = vmul.f32 %v15009_v53, %v15399_v2 }
 0x311   :  { %5204 = vst.msk [vmem:[#allocation2 + $0xe8] sm:$0xff] %vm5174_vm0, %v5135_v15  ;;  %v4155_v5 = vpop.permute.xlu0 %4154  ;;  %3101 = vperm.xlu1 %12906, %v2874_v3   ;;  %v4377_v6 = vmul.f32 %v15037_v55, %v4160_v36  ;;  %v2250_v44 = vadd.f32 %v2182_v26, %v1701_v48  ;;  %v3896_v50 = vadd.f32 %v3828_v18, %v3347_v1 }
 0x312   :  { %5203 = vst.msk [vmem:[#allocation2 + $0xe0] sm:$0xff] %vm5174_vm0, %v5134_v38  ;;  %3096 = vperm.xlu0 %12905, %v2873_v60   ;;  %v4376_v4 = vmul.f32 %v15037_v55, %v4155_v5  ;;  %v2800_v33 = vadd.f32 %v2732_v47, %v2251_v37  ;;  %v3895_v35 = vadd.f32 %v3827_v58, %v3346_v41  ;;  %v4518_v41 = vld [vmem:[%s19655_s17 + $0x13c] sm:$0xff] }
 0x313   :  { %v4445_v42 = vadd.f32 %v4377_v6, %v3896_v50  ;;  %v5508_v31 = vmax.f32 %v5374_v32, %v5441_v51  ;;  %v3280_v62 = vmul.f32 %v15009_v53, %v15404_v61  ;;  %v2799_v61 = vadd.f32 %v2731_v14, %v2250_v44 }
 0x314   :  { %v3621_v30 = vpop.permute.xlu1 %3620  ;;  %v4444_v2 = vadd.f32 %v4376_v4, %v3895_v35  ;;  %v3349_v28 = vadd.f32 %v3281_v56, %v2800_v33 }
 0x315   :  { %v3616_v40 = vpop.permute.xlu0 %3615  ;;  %4189 = vperm.xlu1 %12906, %v3970_v24   ;;  %v3830_v36 = vmul.f32 %v15023_v45, %v3621_v30  ;;  %v3348_v0 = vadd.f32 %v3280_v62, %v2799_v61 }
 0x316   :  { %4184 = vperm.xlu0 %12905, %v3969_v52   ;;  %v3829_v54 = vmul.f32 %v15023_v45, %v3616_v40  ;;  %v4519_v40 = vld [vmem:[%s19655_s17 + $0x144] sm:$0xff] }
 0x317   :  { %v3898_v52 = vadd.f32 %v3830_v36, %v3349_v28 }
 0x318   :  { %v4709_v12 = vpop.permute.xlu1 %4708  ;;  %v3897_v45 = vadd.f32 %v3829_v54, %v3348_v0  ;;  %v5377_v56 = vld [vmem:[#allocation2 + $0xe8] sm:$0xff] }
 0x319   :  { %v4926_v3 = vmul.f32 %v15052_v20, %v4709_v12  ;;  %v4704_v39 = vpop.permute.xlu0 %4703  ;;  %1474 = vperm.xlu1 %12906, %v15458_v57   ;;  %v5442_v63 = vld [vmem:[#allocation2 + $0xd9] sm:$0xff]  ;;  %v5576_v7 = vld [vmem:[#allocation2 + $0xe5] sm:$0xff] }
 0x31a   :  { %v5575_v15 = vld [vmem:[#allocation2 + $0xdd] sm:$0xff]  ;;  %v4925_v60 = vmul.f32 %v15052_v20, %v4704_v39  ;;  %1469 = vperm.xlu0 %12905, %v1230_v34   ;;  %v5509_v16 = vmax.f32 %v5375_v22, %v5442_v63  ;;  %v5643_v38 = vld [vmem:[#allocation2 + $0xe6] sm:$0xff] }
 0x31b   :  { %v5642_v9 = vld [vmem:[#allocation2 + $0xde] sm:$0xff]  ;;  %v4994_v17 = vadd.f32 %v4926_v3, %v4445_v42  ;;  %v5710_v53 = vmax.f32 %v5576_v7, %v5643_v38  ;;  %v684_v3 = vld [vmem:[%s19655_s17 + $0x169] sm:$0xff] }
 0x31c   :  { %v5709_v43 = vmax.f32 %v5575_v15, %v5642_v9  ;;  %v4993_v5 = vadd.f32 %v4925_v60, %v4444_v2  ;;  %v4170_v27 = vpop.permute.xlu1 %4169  ;;  %v5376_v35 = vld [vmem:[#allocation2 + $0xe0] sm:$0xff] }
 0x31d   :  { %v5069_v11 = vadd.f32 %v15061_v23, %v4994_v17  ;;  %v4379_v13 = vmul.f32 %v15037_v55, %v4170_v27  ;;  %v4165_v49 = vpop.permute.xlu0 %4164  ;;  %2562 = vperm.xlu1 %12906, %v2327_v10   ;;  %v5777_v19 = vmax.f32 %v5509_v16, %v5710_v53  ;;  %v5443_v12 = vld [vmem:[#allocation2 + $0xe1] sm:$0xff] }
 0x31e   :  { %v5776_v24 = vmax.f32 %v5508_v31, %v5709_v43  ;;  %v5068_v26 = vadd.f32 %v15061_v23, %v4993_v5  ;;  %v4378_v18 = vmul.f32 %v15037_v55, %v4165_v49  ;;  %2557 = vperm.xlu0 %12905, %v2326_v59   ;;  %v683_v15 = vld [vmem:[%s19655_s17 + $0x161] sm:$0xff]  ;;  %v5510_v7 = vmax.f32 %v5376_v35, %v5443_v12  ;;  %v4520_v35 = vld [vmem:[%s19655_s17 + $0x14c] sm:$0xff] }
 0x31f   :  { %v5137_v21 = vmax.f32 %v5069_v11, 0.0  ;;  %v4447_v30 = vadd.f32 %v4379_v13, %v3898_v52  ;;  %v1780_v38 = vld [vmem:[%s19655_s17 + $0x165] sm:$0xff]  ;;  %v1779_v17 = vld [vmem:[%s19655_s17 + $0x15d] sm:$0xff] }
 0x320   :  { %v12399_v25 = vpack.c.bf16 %v5777_v19, %v5776_v24  ;;  %v5136_v47 = vmax.f32 %v5068_v26, 0.0  ;;  %v4719_v58 = vpop.permute.xlu1 %4718  ;;  %v4446_v6 = vadd.f32 %v4378_v18, %v3897_v45  ;;  %v2876_v11 = vld [vmem:[%s19655_s17 + $0x157] sm:$0xff]  ;;  %v2875_v19 = vld [vmem:[%s19655_s17 + $0x14f] sm:$0xff] }
 0x321   :  { %5206 = vst.msk [vmem:[#allocation2 + $0xf8] sm:$0xff] %vm5174_vm0, %v5137_v21  ;;  %v4928_v48 = vmul.f32 %v15052_v20, %v4719_v58  ;;  %v4714_v1 = vpop.permute.xlu0 %4713  ;;  %3650 = vperm.xlu1 %12906, %v1230_v34   ;;  %v134_v34 = vld [vmem:[%s19655_s17 + $0x160] sm:$0xff] }
 0x322   :  { %12400 = vmatpush1.bf16.msra.mxu0 %v12399_v25  ;;  %5205 = vst.msk [vmem:[#allocation2 + $0xf0] sm:$0xff] %vm5174_vm0, %v5136_v47  ;;  %v4927_v55 = vmul.f32 %v15052_v20, %v4714_v1  ;;  %3645 = vperm.xlu0 %12905, %v15297_v29   ;;  %v135_v29 = vld [vmem:[%s19655_s17 + $0x168] sm:$0xff]  ;;  %v3972_v47 = vld [vmem:[%s19655_s17 + $0x153] sm:$0xff] }
 0x323   :  { %12401 = vmatprep.subr.bf16.mxu0 %v19665_v46  ;;  %v4996_v37 = vadd.f32 %v4928_v48, %v4447_v30  ;;  %v3971_v30 = vld [vmem:[%s19655_s17 + $0x14b] sm:$0xff] }
 0x324   :  { %v4995_v4 = vadd.f32 %v4927_v55, %v4446_v6  ;;  %v15499_v32 = vpop.permute.xlu1 %336  ;;  %v5243_v6 = vld [vmem:[%s19635_s1] sm:$0xff]  ;;  %v15564_v55 = vld [vmem:[%s19655_s17 + $0x16a] sm:$0xff] }
 0x325   :  { %v5071_v51 = vadd.f32 %v15061_v23, %v4996_v37  ;;  %v15502_v44 = vpop.permute.xlu0 %331  ;;  %4738 = vperm.xlu1 %12906, %v4519_v40   ;;  %v1232_v40 = vld [vmem:[%s19655_s17 + $0x162] sm:$0xff] }
 0x326   :  { %v5070_v20 = vadd.f32 %v15061_v23, %v4995_v4  ;;  %4733 = vperm.xlu0 %12905, %v4518_v41   ;;  %v2329_v4 = vld [vmem:[%s19655_s17 + $0x166] sm:$0xff] }
 0x327   :  { %v5139_v50 = vmax.f32 %v5071_v51, 0.0  ;;  %v2328_v51 = vld [vmem:[%s19655_s17 + $0x15e] sm:$0xff] }
 0x328   :  { %v5138_v33 = vmax.f32 %v5070_v20, 0.0  ;;  %v15511_v14 = vpop.permute.xlu1 %885  ;;  %v5379_v53 = vld [vmem:[#allocation2 + $0xf8] sm:$0xff] }
 0x329   :  { %5208 = vst.msk [vmem:[#allocation2 + $0x108] sm:$0xff] %vm5174_vm0, %v5139_v50  ;;  %v15514_v22 = vpop.permute.xlu0 %880  ;;  %386 = vperm.xlu1 %12906, %v135_v29   ;;  %v5444_v23 = vld [vmem:[#allocation2 + $0xe9] sm:$0xff]  ;;  %v5578_v42 = vld [vmem:[#allocation2 + $0xf5] sm:$0xff] }
 0x32a   :  { %v5577_v8 = vld [vmem:[#allocation2 + $0xed] sm:$0xff]  ;;  %5207 = vst.msk [vmem:[#allocation2 + $0x100] sm:$0xff] %vm5174_vm0, %v5138_v33  ;;  %381 = vperm.xlu0 %12905, %v134_v34   ;;  %v5511_v39 = vmax.f32 %v5377_v56, %v5444_v23  ;;  %v5645_v31 = vld [vmem:[#allocation2 + $0xf6] sm:$0xff] }
 0x32b   :  { %v5644_v63 = vld [vmem:[#allocation2 + $0xee] sm:$0xff]  ;;  %v5712_v2 = vmax.f32 %v5578_v42, %v5645_v31  ;;  %v137_v23 = vld [vmem:[%s19655_s17 + $0x178] sm:$0xff] }
 0x32c   :  { %v5711_v62 = vmax.f32 %v5577_v8, %v5644_v63  ;;  %v15523_v60 = vpop.permute.xlu1 %1434  ;;  %v5378_v43 = vld [vmem:[#allocation2 + $0xf0] sm:$0xff] }
 0x32d   :  { %v15525_v10 = vpop.permute.xlu0 %1429  ;;  %935 = vperm.xlu1 %12906, %v684_v3   ;;  %v5779_v9 = vmax.f32 %v5511_v39, %v5712_v2  ;;  %v5445_v61 = vld [vmem:[#allocation2 + $0xf1] sm:$0xff]  ;;  %v686_v3 = vld [vmem:[%s19655_s17 + $0x179] sm:$0xff] }
 0x32e   :  { %v5778_v16 = vmax.f32 %v5510_v7, %v5711_v62  ;;  %930 = vperm.xlu0 %12905, %v683_v15   ;;  %v5512_v0 = vmax.f32 %v5378_v43, %v5445_v61  ;;  %v4521_v33 = vld [vmem:[%s19655_s17 + $0x154] sm:$0xff] }
 0x32f   :  { %v685_v39 = vld [vmem:[%s19655_s17 + $0x171] sm:$0xff]  ;;  %v3973_v43 = vld [vmem:[%s19655_s17 + $0x15b] sm:$0xff] }
 0x330   :  { %v12402_v36 = vpack.c.bf16 %v5779_v9, %v5778_v16  ;;  %v15533_v59 = vpop.permute.xlu1 %346  ;;  %v1782_v15 = vld [vmem:[%s19655_s17 + $0x175] sm:$0xff]  ;;  %v1781_v7 = vld [vmem:[%s19655_s17 + $0x16d] sm:$0xff]  ;;  %v2877_v9 = vld [vmem:[%s19655_s17 + $0x15f] sm:$0xff] }
 0x331   :  { %v15535_v28 = vpop.permute.xlu0 %341  ;;  %2023 = vperm.xlu1 %12906, %v1780_v38   ;;  %v5446_v54 = vld [vmem:[#allocation2 + $0xf9] sm:$0xff]  ;;  %v5580_v27 = vld [vmem:[#allocation2 + $0x105] sm:$0xff] }
 0x332   :  { %12403 = vmatpush1.bf16.msra.mxu0 %v12402_v36  ;;  %v5579_v5 = vld [vmem:[#allocation2 + $0xfd] sm:$0xff]  ;;  %2018 = vperm.xlu0 %12905, %v1779_v17   ;;  %v5513_v13 = vmax.f32 %v5379_v53, %v5446_v54  ;;  %v5647_v24 = vld [vmem:[#allocation2 + $0x106] sm:$0xff] }
 0x333   :  { %12404 = vmatprep.subr.bf16.mxu0 %v19665_v46  ;;  %v5646_v49 = vld [vmem:[#allocation2 + $0xfe] sm:$0xff]  ;;  %v5714_v18 = vmax.f32 %v5580_v27, %v5647_v24  ;;  %v2878_v16 = vld [vmem:[%s19655_s17 + $0x167] sm:$0xff] }
 0x334   :  { %v5713_v26 = vmax.f32 %v5579_v5, %v5646_v49  ;;  %v15544_v52 = vpop.permute.xlu1 %895  ;;  %v3974_v17 = vld [vmem:[%s19655_s17 + $0x163] sm:$0xff]  ;;  %v15653_v54 = vld [vmem:[%s19655_s17 + $0x17a] sm:$0xff]  ;;  %v1234_v5 = vld [vmem:[%s19655_s17 + $0x172] sm:$0xff] }
 0x335   :  { %v15546_v21 = vpop.permute.xlu0 %890  ;;  %3111 = vperm.xlu1 %12906, %v2876_v11   ;;  %v5781_v45 = vmax.f32 %v5513_v13, %v5714_v18  ;;  %v2331_v13 = vld [vmem:[%s19655_s17 + $0x176] sm:$0xff]  ;;  %v2330_v49 = vld [vmem:[%s19655_s17 + $0x16e] sm:$0xff]  ;;  %v4523_v18 = vld [vmem:[%s19655_s17 + $0x164] sm:$0xff] }
 0x336   :  { %v5780_v25 = vmax.f32 %v5512_v0, %v5713_v26  ;;  %3106 = vperm.xlu0 %12905, %v2875_v19  }
 0x338   :  { %v12405_v58 = vpack.c.bf16 %v5781_v45, %v5780_v25  ;;  %v15554_v48 = vpop.permute.xlu1 %1983  ;;  %v4522_v25 = vld [vmem:[%s19655_s17 + $0x15c] sm:$0xff] }
 0x339   :  { %v15556_v1 = vpop.permute.xlu0 %1978  ;;  %4199 = vperm.xlu1 %12906, %v3972_v47  }
 0x33a   :  { %12406 = vmatpush1.bf16.msra.mxu0 %v12405_v58  ;;  %4194 = vperm.xlu0 %12905, %v3971_v30   ;;  %v139_v58 = vld [vmem:[%s19655_s17 + $0x188] sm:$0xff]  ;;  %v138_v30 = vld [vmem:[%s19655_s17 + $0x180] sm:$0xff] }
 0x33b   :  { %12407 = vmatprep.subr.bf16.mxu0 %v19665_v46 }
 0x33c   :  { %v15570_v37 = vpop.permute.xlu1 %1444 }
 0x33d   :  { %5950 = vmatmul.mubr.f32.vlgmr.msra.gmra.mrb[0].mxu0 %v5243_v6  ;;  %v15572_v41 = vpop.permute.xlu0 %1439  ;;  %1484 = vperm.xlu1 %12906, %v15564_v55  }
 0x33e   :  { %1479 = vperm.xlu0 %12905, %v1232_v40  }
 0x340   :  { %v15581_v20 = vpop.permute.xlu1 %2532 }
 0x341   :  { %v15583_v29 = vpop.permute.xlu0 %2527  ;;  %2572 = vperm.xlu1 %12906, %v2329_v4  }
 0x342   :  { %2567 = vperm.xlu0 %12905, %v2328_v51  }
 0x344   :  { %v15585_v50 = vpop.permute.xlu1 %356 }
 0x345   :  { %v15587_v34 = vpop.permute.xlu0 %351  ;;  %3660 = vperm.xlu1 %12906, %v1232_v40  }
 0x346   :  { %3655 = vperm.xlu0 %12905, %v15458_v57   ;;  %v136_v57 = vld [vmem:[%s19655_s17 + $0x170] sm:$0xff] }
 0x348   :  { %v15596_v56 = vpop.permute.xlu1 %905 }
 0x349   :  { %v15598_v12 = vpop.permute.xlu0 %900  ;;  %4748 = vperm.xlu1 %12906, %v4521_v33   ;;  %v688_v33 = vld [vmem:[%s19655_s17 + $0x189] sm:$0xff] }
 0x34a   :  { %4743 = vperm.xlu0 %12905, %v4520_v35   ;;  %v15709_v35 = vld [vmem:[%s19638_s4] ss:$0 sm:$0xff] }
 0x34c   :  { %v15606_v8 = vpop.permute.xlu1 %1993 }
 0x34d   :  { %v15608_v42 = vpop.permute.xlu0 %1988  ;;  %396 = vperm.xlu1 %12906, %v137_v23   ;;  %v538_v23 = vmul.f32 %v15709_v35, %v15499_v32 }
 0x34e   :  { %391 = vperm.xlu0 %12905, %v136_v57   ;;  %v687_v57 = vld [vmem:[%s19655_s17 + $0x181] sm:$0xff] }
 0x350   :  { %v15616_v63 = vpop.permute.xlu1 %3081 }
 0x351   :  { %v15618_v31 = vpop.permute.xlu0 %3076  ;;  %945 = vperm.xlu1 %12906, %v686_v3   ;;  %v537_v3 = vmul.f32 %v15709_v35, %v15502_v44 }
 0x352   :  { %940 = vperm.xlu0 %12905, %v685_v39  }
 0x354   :  { %v15626_v62 = vpop.permute.xlu1 %1454 }
 0x355   :  { %v15628_v2 = vpop.permute.xlu0 %1449  ;;  %2033 = vperm.xlu1 %12906, %v1782_v15  }
 0x356   :  { %2028 = vperm.xlu0 %12905, %v1781_v7   ;;  %v15732_v7 = vld [vmem:[%s19638_s4 + $0x3] ss:$0 sm:$0xff] }
 0x357   :  { %v2184_v44 = vmul.f32 %v15732_v7, %v15556_v1 }
 0x358   :  { %v15636_v38 = vpop.permute.xlu1 %2542 }
 0x359   :  { %v15638_v36 = vpop.permute.xlu0 %2537  ;;  %3121 = vperm.xlu1 %12906, %v2878_v16  }
 0x35a   :  { %3116 = vperm.xlu0 %12905, %v2877_v9  }
 0x35c   :  { %v15646_v53 = vpop.permute.xlu1 %3630 }
 0x35d   :  { %v15648_v61 = vpop.permute.xlu0 %3625  ;;  %4209 = vperm.xlu1 %12906, %v3974_v17  }
 0x35e   :  { %4204 = vperm.xlu0 %12905, %v3973_v43   ;;  %v15746_v43 = vld [vmem:[%s19638_s4 + $0x4] ss:$0 sm:$0xff] }
 0x35f   :  { %v2733_v1 = vmul.f32 %v15746_v43, %v15583_v29  ;;  %v2880_v29 = vld [vmem:[%s19655_s17 + $0x177] sm:$0xff] }
 0x360   :  { %v15658_v27 = vpop.permute.xlu1 %366 }
 0x361   :  { %v15660_v11 = vpop.permute.xlu0 %361  ;;  %1494 = vperm.xlu1 %12906, %v15653_v54  }
 0x362   :  { %1489 = vperm.xlu0 %12905, %v1234_v5  }
 0x364   :  { %v15669_v24 = vpop.permute.xlu1 %915 }
 0x365   :  { %v15671_v19 = vpop.permute.xlu0 %910  ;;  %2582 = vperm.xlu1 %12906, %v2331_v13  }
 0x366   :  { %2577 = vperm.xlu0 %12905, %v2330_v49  }
 0x368   :  { %v15673_v0 = vpop.permute.xlu1 %2003 }
 0x369   :  { %v15675_v26 = vpop.permute.xlu0 %1998  ;;  %3670 = vperm.xlu1 %12906, %v1234_v5   ;;  %v1783_v5 = vld [vmem:[%s19655_s17 + $0x17d] sm:$0xff] }
 0x36a   :  { %3665 = vperm.xlu0 %12905, %v15564_v55   ;;  %v15697_v55 = vld [vmem:[%s19638_s4 + $0x1] ss:$0 sm:$0xff] }
 0x36b   :  { %v1087_v40 = vmul.f32 %v15697_v55, %v15511_v14  ;;  %v1086_v51 = vmul.f32 %v15697_v55, %v15514_v22  ;;  %v15716_v14 = vld [vmem:[%s19638_s4 + $0x2] ss:$0 sm:$0xff] }
 0x36c   :  { %v15684_v45 = vpop.permute.xlu1 %3091  ;;  %v1636_v22 = vmul.f32 %v15716_v14, %v15523_v60  ;;  %v1635_v39 = vmul.f32 %v15716_v14, %v15525_v10  ;;  %v2185_v60 = vmul.f32 %v15732_v7, %v15554_v48  ;;  %v1784_v10 = vld [vmem:[%s19655_s17 + $0x185] sm:$0xff]  ;;  %v2734_v48 = vmul.f32 %v15746_v43, %v15581_v20 }
 0x36d   :  { %v15686_v47 = vpop.permute.xlu0 %3086  ;;  %4758 = vperm.xlu1 %12906, %v4523_v18   ;;  %v1155_v32 = vadd.f32 %v1087_v40, %v538_v23  ;;  %v1154_v9 = vadd.f32 %v1086_v51, %v537_v3  ;;  %v2879_v23 = vld [vmem:[%s19655_s17 + $0x16f] sm:$0xff] }
 0x36e   :  { %4753 = vperm.xlu0 %12905, %v4522_v25   ;;  %v15760_v25 = vld [vmem:[%s19638_s4 + $0x5] ss:$0 sm:$0xff] }
 0x36f   :  { %v1704_v17 = vadd.f32 %v1636_v22, %v1155_v32  ;;  %v1703_v13 = vadd.f32 %v1635_v39, %v1154_v9  ;;  %v3282_v40 = vmul.f32 %v15760_v25, %v15618_v31  ;;  %v15788_v39 = vld [vmem:[%s19638_s4 + $0x7] ss:$0 sm:$0xff] }
 0x370   :  { %v4180_v6 = vpop.permute.xlu1 %4179 }
 0x371   :  { %v4175_v4 = vpop.permute.xlu0 %4174  ;;  %406 = vperm.xlu1 %12906, %v139_v58   ;;  %v2253_v18 = vadd.f32 %v2185_v60, %v1704_v17  ;;  %v3283_v58 = vmul.f32 %v15760_v25, %v15616_v63  ;;  %v4381_v32 = vmul.f32 %v15788_v39, %v4180_v6  ;;  %v15803_v6 = vld [vmem:[%s19638_s4 + $0x8] ss:$0 sm:$0xff] }
 0x372   :  { %401 = vperm.xlu0 %12905, %v138_v30   ;;  %v2252_v30 = vadd.f32 %v2184_v44, %v1703_v13  ;;  %v4380_v9 = vmul.f32 %v15788_v39, %v4175_v4 }
 0x373   :  { %v2802_v51 = vadd.f32 %v2734_v48, %v2253_v18 }
 0x374   :  { %v15727_v15 = vpop.permute.xlu1 %1464  ;;  %v2801_v22 = vadd.f32 %v2733_v1, %v2252_v30 }
 0x375   :  { %v15736_v16 = vpop.permute.xlu0 %1459  ;;  %955 = vperm.xlu1 %12906, %v688_v33   ;;  %v15774_v33 = vld [vmem:[%s19638_s4 + $0x6] ss:$0 sm:$0xff]  ;;  %v3351_v3 = vadd.f32 %v3283_v58, %v2802_v51  ;;  %v15810_v58 = vld [vmem:[%s19655_s17 + $0x18a] sm:$0xff] }
 0x376   :  { %950 = vperm.xlu0 %12905, %v687_v57   ;;  %v3832_v63 = vmul.f32 %v15774_v33, %v15646_v53  ;;  %v3831_v31 = vmul.f32 %v15774_v33, %v15648_v61  ;;  %v3350_v53 = vadd.f32 %v3282_v40, %v2801_v22  ;;  %v3976_v61 = vld [vmem:[%s19655_s17 + $0x173] sm:$0xff]  ;;  %v1236_v40 = vld [vmem:[%s19655_s17 + $0x182] sm:$0xff] }
 0x378   :  { %v15755_v49 = vpop.permute.xlu1 %2552  ;;  %v3900_v44 = vadd.f32 %v3832_v63, %v3351_v3  ;;  %v3899_v17 = vadd.f32 %v3831_v31, %v3350_v53  ;;  %v15820_v63 = vld [vmem:[%s19639_s5] ss:$0 sm:$0xff]  ;;  %v2333_v3 = vld [vmem:[%s19655_s17 + $0x186] sm:$0xff] }
 0x379   :  { %v15764_v20 = vpop.permute.xlu0 %2547  ;;  %2043 = vperm.xlu1 %12906, %v1784_v10   ;;  %v3975_v10 = vld [vmem:[%s19655_s17 + $0x16b] sm:$0xff]  ;;  %v2332_v53 = vld [vmem:[%s19655_s17 + $0x17e] sm:$0xff] }
 0x37a   :  { %2038 = vperm.xlu0 %12905, %v1783_v5   ;;  %v4449_v5 = vadd.f32 %v4381_v32, %v3900_v44  ;;  %v4448_v1 = vadd.f32 %v4380_v9, %v3899_v17 }
 0x37c   :  { %v15783_v57 = vpop.permute.xlu1 %3640 }
 0x37d   :  { %v15791_v60 = vpop.permute.xlu0 %3635  ;;  %3131 = vperm.xlu1 %12906, %v2880_v29  }
 0x37e   :  { %3126 = vperm.xlu0 %12905, %v2879_v23  }
 0x380   :  { %v4729_v48 = vpop.permute.xlu1 %4728 }
 0x381   :  { %v4930_v4 = vmul.f32 %v15803_v6, %v4729_v48  ;;  %v4724_v13 = vpop.permute.xlu0 %4723  ;;  %4219 = vperm.xlu1 %12906, %v3976_v61   ;;  %v4525_v48 = vld [vmem:[%s19655_s17 + $0x174] sm:$0xff] }
 0x382   :  { %v4929_v18 = vmul.f32 %v15803_v6, %v4724_v13  ;;  %4214 = vperm.xlu0 %12905, %v3975_v10   ;;  %v5380_v13 = vld [vmem:[#allocation2 + $0x100] sm:$0xff] }
 0x383   :  { %v4998_v30 = vadd.f32 %v4930_v4, %v4449_v5  ;;  %v4524_v5 = vld [vmem:[%s19655_s17 + $0x16c] sm:$0xff] }
 0x384   :  { %v4997_v29 = vadd.f32 %v4929_v18, %v4448_v1  ;;  %v15815_v51 = vpop.permute.xlu1 %376  ;;  %v5381_v1 = vld [vmem:[#allocation2 + $0x108] sm:$0xff] }
 0x385   :  { %19705 = vst [vmem:[#allocation22_spill] sm:$0xff] %v15815_v51  ;;  %v5073_v23 = vadd.f32 %v15820_v63, %v4998_v30  ;;  %v15823_v22 = vpop.permute.xlu0 %371  ;;  %1504 = vperm.xlu1 %12906, %v15810_v58   ;;  %v5447_v18 = vld [vmem:[#allocation2 + $0x101] sm:$0xff] }
 0x386   :  { %19706 = vst [vmem:[#allocation19_spill] sm:$0xff] %v15823_v22  ;;  %v5072_v31 = vadd.f32 %v15820_v63, %v4997_v29  ;;  %1499 = vperm.xlu0 %12905, %v1236_v40  }
 0x387   :  { %v5141_v32 = vmax.f32 %v5073_v23, 0.0 }
 0x388   :  { %v5140_v9 = vmax.f32 %v5072_v31, 0.0  ;;  %v15833_v61 = vpop.permute.xlu1 %925 }
 0x389   :  { %19707 = vst [vmem:[#allocation20_spill] sm:$0xff] %v15833_v61  ;;  %5210 = vst.msk [vmem:[#allocation2 + $0x118] sm:$0xff] %vm5174_vm0, %v5141_v32  ;;  %v15836_v44 = vpop.permute.xlu0 %920  ;;  %2592 = vperm.xlu1 %12906, %v2333_v3  }
 0x38a   :  { %19708 = vst [vmem:[#allocation18_spill] sm:$0xff] %v15836_v44  ;;  %5209 = vst.msk [vmem:[#allocation2 + $0x110] sm:$0xff] %vm5174_vm0, %v5140_v9  ;;  %2587 = vperm.xlu0 %12905, %v2332_v53   ;;  %v140_v53 = vld [vmem:[%s19655_s17 + $0x190] sm:$0xff]  ;;  %v5514_v9 = vmax.f32 %v5380_v13, %v5447_v18  ;;  %v540_v13 = vmul.f32 %v15709_v35, %v15533_v59  ;;  %v1638_v18 = vmul.f32 %v15716_v14, %v15570_v37 }
 0x38b   :  { %v2187_v59 = vmul.f32 %v15732_v7, %v15606_v8  ;;  %v1785_v8 = vld [vmem:[%s19655_s17 + $0x18d] sm:$0xff] }
 0x38c   :  { %v15839_v10 = vpop.permute.xlu1 %2013 }
 0x38d   :  { %v15841_v17 = vpop.permute.xlu0 %2008  ;;  %3680 = vperm.xlu1 %12906, %v1236_v40  }
 0x38e   :  { %19709 = vst [vmem:[#allocation16_spill] sm:$0xff] %v15841_v17  ;;  %3675 = vperm.xlu0 %12905, %v15653_v54   ;;  %v141_v54 = vld [vmem:[%s19655_s17 + $0x198] sm:$0xff] }
 0x390   :  { %v15850_v4 = vpop.permute.xlu1 %3101 }
 0x391   :  { %v15852_v30 = vpop.permute.xlu0 %3096  ;;  %4768 = vperm.xlu1 %12906, %v4525_v48   ;;  %v5448_v29 = vld [vmem:[#allocation2 + $0x109] sm:$0xff]  ;;  %v5582_v23 = vld [vmem:[#allocation2 + $0x115] sm:$0xff]  ;;  %v1089_v48 = vmul.f32 %v15697_v55, %v15544_v52 }
 0x392   :  { %v5581_v40 = vld [vmem:[#allocation2 + $0x10d] sm:$0xff]  ;;  %4763 = vperm.xlu0 %12905, %v4524_v5   ;;  %v5515_v31 = vmax.f32 %v5381_v1, %v5448_v29  ;;  %v5649_v32 = vld [vmem:[#allocation2 + $0x116] sm:$0xff]  ;;  %v1088_v1 = vmul.f32 %v15697_v55, %v15546_v21  ;;  %v1637_v21 = vmul.f32 %v15716_v14, %v15572_v41 }
 0x393   :  { %v5648_v3 = vld [vmem:[#allocation2 + $0x10e] sm:$0xff]  ;;  %v5716_v51 = vmax.f32 %v5582_v23, %v5649_v32  ;;  %v690_v29 = vld [vmem:[%s19655_s17 + $0x199] sm:$0xff]  ;;  %v1157_v23 = vadd.f32 %v1089_v48, %v540_v13  ;;  %v2735_v32 = vmul.f32 %v15746_v43, %v15638_v36  ;;  %v3834_v36 = vmul.f32 %v15774_v33, %v15783_v57  ;;  %v3978_v57 = vld [vmem:[%s19655_s17 + $0x183] sm:$0xff] }
 0x394   :  { %v5715_v22 = vmax.f32 %v5581_v40, %v5648_v3  ;;  %v4190_v44 = vpop.permute.xlu1 %4189  ;;  %v689_v52 = vld [vmem:[%s19655_s17 + $0x191] sm:$0xff] }
 0x395   :  { %v4185_v61 = vpop.permute.xlu0 %4184  ;;  %416 = vperm.xlu1 %12906, %v141_v54   ;;  %v5783_v17 = vmax.f32 %v5515_v31, %v5716_v51  ;;  %v539_v51 = vmul.f32 %v15709_v35, %v15535_v28  ;;  %v1786_v28 = vld [vmem:[%s19655_s17 + $0x195] sm:$0xff]  ;;  %v1706_v41 = vadd.f32 %v1638_v18, %v1157_v23  ;;  %v2736_v31 = vmul.f32 %v15746_v43, %v15636_v38 }
 0x396   :  { %v5782_v5 = vmax.f32 %v5514_v9, %v5715_v22  ;;  %411 = vperm.xlu0 %12905, %v140_v53   ;;  %v3285_v9 = vmul.f32 %v15760_v25, %v15684_v45  ;;  %v3284_v38 = vmul.f32 %v15760_v25, %v15686_v47  ;;  %v2881_v45 = vld [vmem:[%s19655_s17 + $0x17f] sm:$0xff]  ;;  %v3833_v18 = vmul.f32 %v15774_v33, %v15791_v60 }
 0x397   :  { %v1156_v37 = vadd.f32 %v1088_v1, %v539_v51  ;;  %v2255_v53 = vadd.f32 %v2187_v59, %v1706_v41  ;;  %v2882_v1 = vld [vmem:[%s19655_s17 + $0x187] sm:$0xff]  ;;  %v4382_v23 = vmul.f32 %v15788_v39, %v4185_v61  ;;  %v3977_v60 = vld [vmem:[%s19655_s17 + $0x17b] sm:$0xff] }
 0x398   :  { %v12408_v40 = vpack.c.bf16 %v5783_v17, %v5782_v5  ;;  %v15878_v22 = vpop.permute.xlu1 %1474  ;;  %v2186_v17 = vmul.f32 %v15732_v7, %v15608_v42 }
 0x399   :  { %v15882_v54 = vpop.permute.xlu0 %1469  ;;  %965 = vperm.xlu1 %12906, %v690_v29   ;;  %v1705_v3 = vadd.f32 %v1637_v21, %v1156_v37  ;;  %v2804_v29 = vadd.f32 %v2736_v31, %v2255_v53 }
 0x39a   :  { %12409 = vmatpush1.bf16.msra.mxu0 %v12408_v40  ;;  %960 = vperm.xlu0 %12905, %v689_v52   ;;  %v4383_v52 = vmul.f32 %v15788_v39, %v4190_v44 }
 0x39b   :  { %12410 = vmatprep.subr.bf16.mxu0 %v19665_v46  ;;  %v2254_v5 = vadd.f32 %v2186_v17, %v1705_v3  ;;  %v3353_v47 = vadd.f32 %v3285_v9, %v2804_v29  ;;  %v2335_v29 = vld [vmem:[%s19655_s17 + $0x196] sm:$0xff] }
 0x39c   :  { %v15897_v42 = vpop.permute.xlu1 %2562 }
 0x39d   :  { %v15901_v48 = vpop.permute.xlu0 %2557  ;;  %2053 = vperm.xlu1 %12906, %v1786_v28   ;;  %v2803_v13 = vadd.f32 %v2735_v32, %v2254_v5  ;;  %v3902_v59 = vadd.f32 %v3834_v36, %v3353_v47  ;;  %v1238_v32 = vld [vmem:[%s19655_s17 + $0x192] sm:$0xff] }
 0x39e   :  { %2048 = vperm.xlu0 %12905, %v1785_v8   ;;  %v15932_v8 = vld [vmem:[%s19655_s17 + $0x19a] sm:$0xff] }
 0x39f   :  { %v3352_v21 = vadd.f32 %v3284_v38, %v2803_v13  ;;  %v4451_v28 = vadd.f32 %v4383_v52, %v3902_v59 }
 0x3a0   :  { %v15915_v40 = vpop.permute.xlu1 %3650 }
 0x3a1   :  { %v15918_v51 = vpop.permute.xlu0 %3645  ;;  %3141 = vperm.xlu1 %12906, %v2882_v1   ;;  %v3901_v37 = vadd.f32 %v3833_v18, %v3352_v21 }
 0x3a2   :  { %3136 = vperm.xlu0 %12905, %v2881_v45   ;;  %v2334_v45 = vld [vmem:[%s19655_s17 + $0x18e] sm:$0xff] }
 0x3a3   :  { %v4450_v31 = vadd.f32 %v4382_v23, %v3901_v37  ;;  %v4527_v23 = vld [vmem:[%s19655_s17 + $0x184] sm:$0xff]  ;;  %v5383_v37 = vld [vmem:[#allocation2 + $0x118] sm:$0xff] }
 0x3a4   :  { %v4739_v17 = vpop.permute.xlu1 %4738 }
 0x3a5   :  { %v4932_v44 = vmul.f32 %v15803_v6, %v4739_v17  ;;  %v4734_v41 = vpop.permute.xlu0 %4733  ;;  %4229 = vperm.xlu1 %12906, %v3978_v57   ;;  %v4526_v57 = vld [vmem:[%s19655_s17 + $0x17c] sm:$0xff]  ;;  %v5449_v17 = vld [vmem:[#allocation2 + $0x111] sm:$0xff] }
 0x3a6   :  { %v4931_v61 = vmul.f32 %v15803_v6, %v4734_v41  ;;  %4224 = vperm.xlu0 %12905, %v3977_v60   ;;  %v5382_v60 = vld [vmem:[#allocation2 + $0x110] sm:$0xff] }
 0x3a7   :  { %v5000_v3 = vadd.f32 %v4932_v44, %v4451_v28 }
 0x3a8   :  { %v4999_v53 = vadd.f32 %v4931_v61, %v4450_v31  ;;  %v15937_v9 = vpop.permute.xlu1 %386 }
 0x3a9   :  { %v5075_v5 = vadd.f32 %v15820_v63, %v5000_v3  ;;  %v15940_v38 = vpop.permute.xlu0 %381  ;;  %1514 = vperm.xlu1 %12906, %v15932_v8  }
 0x3aa   :  { %v5074_v1 = vadd.f32 %v15820_v63, %v4999_v53  ;;  %1509 = vperm.xlu0 %12905, %v1238_v32   ;;  %v142_v53 = vld [vmem:[%s19655_s17 + $0x1a0] sm:$0xff] }
 0x3ab   :  { %v5143_v36 = vmax.f32 %v5075_v5, 0.0  ;;  %v5516_v5 = vmax.f32 %v5382_v60, %v5449_v17  ;;  %v542_v60 = vmul.f32 %v15709_v35, %v15585_v50  ;;  %v1640_v17 = vmul.f32 %v15716_v14, %v15626_v62 }
 0x3ac   :  { %v5142_v13 = vmax.f32 %v5074_v1, 0.0  ;;  %v15950_v18 = vpop.permute.xlu1 %935  ;;  %v2189_v50 = vmul.f32 %v15732_v7, %v15673_v0  ;;  %v1787_v0 = vld [vmem:[%s19655_s17 + $0x19d] sm:$0xff] }
 0x3ad   :  { %5212 = vst.msk [vmem:[#allocation2 + $0x128] sm:$0xff] %vm5174_vm0, %v5143_v36  ;;  %v15953_v47 = vpop.permute.xlu0 %930  ;;  %2602 = vperm.xlu1 %12906, %v2335_v29  }
 0x3ae   :  { %5211 = vst.msk [vmem:[#allocation2 + $0x120] sm:$0xff] %vm5174_vm0, %v5142_v13  ;;  %2597 = vperm.xlu0 %12905, %v2334_v45   ;;  %v1091_v45 = vmul.f32 %v15697_v55, %v15596_v56  ;;  %v691_v56 = vld [vmem:[%s19655_s17 + $0x1a1] sm:$0xff] }
 0x3b0   :  { %v15956_v52 = vpop.permute.xlu1 %2023 }
 0x3b1   :  { %v15958_v21 = vpop.permute.xlu0 %2018  ;;  %3690 = vperm.xlu1 %12906, %v1238_v32  }
 0x3b2   :  { %3685 = vperm.xlu0 %12905, %v15810_v58   ;;  %v143_v58 = vld [vmem:[%s19655_s17 + $0x1a8] sm:$0xff] }
 0x3b4   :  { %v15967_v59 = vpop.permute.xlu1 %3111 }
 0x3b5   :  { %v15969_v28 = vpop.permute.xlu0 %3106  ;;  %4778 = vperm.xlu1 %12906, %v4527_v23   ;;  %v5450_v44 = vld [vmem:[#allocation2 + $0x119] sm:$0xff]  ;;  %v5584_v31 = vld [vmem:[#allocation2 + $0x125] sm:$0xff] }
 0x3b6   :  { %v5583_v41 = vld [vmem:[#allocation2 + $0x11d] sm:$0xff]  ;;  %4773 = vperm.xlu0 %12905, %v4526_v57   ;;  %v5517_v61 = vmax.f32 %v5383_v37, %v5450_v44  ;;  %v5651_v32 = vld [vmem:[#allocation2 + $0x126] sm:$0xff]  ;;  %v1090_v37 = vmul.f32 %v15697_v55, %v15598_v12  ;;  %v1639_v12 = vmul.f32 %v15716_v14, %v15628_v2 }
 0x3b7   :  { %v5650_v3 = vld [vmem:[#allocation2 + $0x11e] sm:$0xff]  ;;  %v5718_v29 = vmax.f32 %v5584_v31, %v5651_v32  ;;  %v692_v44 = vld [vmem:[%s19655_s17 + $0x1a9] sm:$0xff]  ;;  %v541_v31 = vmul.f32 %v15709_v35, %v15587_v34  ;;  %v2188_v32 = vmul.f32 %v15732_v7, %v15675_v26 }
 0x3b8   :  { %v5717_v1 = vmax.f32 %v5583_v41, %v5650_v3  ;;  %v4200_v36 = vpop.permute.xlu1 %4199  ;;  %v1788_v34 = vld [vmem:[%s19655_s17 + $0x1a5] sm:$0xff] }
 0x3b9   :  { %v4195_v13 = vpop.permute.xlu0 %4194  ;;  %426 = vperm.xlu1 %12906, %v143_v58   ;;  %v5785_v57 = vmax.f32 %v5517_v61, %v5718_v29  ;;  %v1159_v61 = vadd.f32 %v1091_v45, %v542_v60  ;;  %v1158_v62 = vadd.f32 %v1090_v37, %v541_v31  ;;  %v3287_v45 = vmul.f32 %v15760_v25, %v15850_v4  ;;  %v2884_v37 = vld [vmem:[%s19655_s17 + $0x197] sm:$0xff]  ;;  %v2883_v4 = vld [vmem:[%s19655_s17 + $0x18f] sm:$0xff] }
 0x3ba   :  { %v5784_v23 = vmax.f32 %v5516_v5, %v5717_v1  ;;  %421 = vperm.xlu0 %12905, %v142_v53   ;;  %v2738_v53 = vmul.f32 %v15746_v43, %v15755_v49  ;;  %v2737_v1 = vmul.f32 %v15746_v43, %v15764_v20  ;;  %v3286_v49 = vmul.f32 %v15760_v25, %v15852_v30 }
 0x3bb   :  { %v1708_v2 = vadd.f32 %v1640_v17, %v1159_v61  ;;  %v1707_v5 = vadd.f32 %v1639_v12, %v1158_v62  ;;  %v3836_v20 = vmul.f32 %v15774_v33, %v15915_v40  ;;  %v3835_v17 = vmul.f32 %v15774_v33, %v15918_v51  ;;  %v3980_v40 = vld [vmem:[%s19655_s17 + $0x193] sm:$0xff]  ;;  %v3979_v51 = vld [vmem:[%s19655_s17 + $0x18b] sm:$0xff] }
 0x3bc   :  { %v12411_v41 = vpack.c.bf16 %v5785_v57, %v5784_v23  ;;  %v15995_v58 = vpop.permute.xlu1 %1484  ;;  %v4384_v61 = vmul.f32 %v15788_v39, %v4195_v13 }
 0x3bd   :  { %v15999_v3 = vpop.permute.xlu0 %1479  ;;  %975 = vperm.xlu1 %12906, %v692_v44   ;;  %v2257_v29 = vadd.f32 %v2189_v50, %v1708_v2  ;;  %v2256_v57 = vadd.f32 %v2188_v32, %v1707_v5 }
 0x3be   :  { %12412 = vmatpush1.bf16.msra.mxu0 %v12411_v41  ;;  %970 = vperm.xlu0 %12905, %v691_v56   ;;  %v4385_v56 = vmul.f32 %v15788_v39, %v4200_v36 }
 0x3bf   :  { %12413 = vmatprep.subr.bf16.mxu0 %v19665_v46  ;;  %v2806_v44 = vadd.f32 %v2738_v53, %v2257_v29  ;;  %v2805_v60 = vadd.f32 %v2737_v1, %v2256_v57  ;;  %v1240_v1 = vld [vmem:[%s19655_s17 + $0x1a2] sm:$0xff] }
 0x3c0   :  { %v16014_v26 = vpop.permute.xlu1 %2572 }
 0x3c1   :  { %v16018_v23 = vpop.permute.xlu0 %2567  ;;  %2063 = vperm.xlu1 %12906, %v1788_v34   ;;  %v3355_v30 = vadd.f32 %v3287_v45, %v2806_v44  ;;  %v3354_v12 = vadd.f32 %v3286_v49, %v2805_v60  ;;  %v2337_v44 = vld [vmem:[%s19655_s17 + $0x1a6] sm:$0xff] }
 0x3c2   :  { %2058 = vperm.xlu0 %12905, %v1787_v0   ;;  %v16049_v0 = vld [vmem:[%s19655_s17 + $0x1aa] sm:$0xff] }
 0x3c3   :  { %v3904_v50 = vadd.f32 %v3836_v20, %v3355_v30  ;;  %v3903_v62 = vadd.f32 %v3835_v17, %v3354_v12 }
 0x3c4   :  { %v16032_v41 = vpop.permute.xlu1 %3660 }
 0x3c5   :  { %v16035_v31 = vpop.permute.xlu0 %3655  ;;  %3151 = vperm.xlu1 %12906, %v2884_v37   ;;  %v4453_v34 = vadd.f32 %v4385_v56, %v3904_v50  ;;  %v4452_v53 = vadd.f32 %v4384_v61, %v3903_v62  ;;  %v4529_v61 = vld [vmem:[%s19655_s17 + $0x194] sm:$0xff]  ;;  %v5385_v62 = vld [vmem:[#allocation2 + $0x128] sm:$0xff] }
 0x3c6   :  { %3146 = vperm.xlu0 %12905, %v2883_v4   ;;  %v2336_v4 = vld [vmem:[%s19655_s17 + $0x19e] sm:$0xff] }
 0x3c8   :  { %v4749_v32 = vpop.permute.xlu1 %4748 }
 0x3c9   :  { %v4934_v36 = vmul.f32 %v15803_v6, %v4749_v32  ;;  %v4744_v2 = vpop.permute.xlu0 %4743  ;;  %4239 = vperm.xlu1 %12906, %v3980_v40   ;;  %v4528_v40 = vld [vmem:[%s19655_s17 + $0x18c] sm:$0xff]  ;;  %v5451_v32 = vld [vmem:[#allocation2 + $0x121] sm:$0xff] }
 0x3ca   :  { %v4933_v13 = vmul.f32 %v15803_v6, %v4744_v2  ;;  %4234 = vperm.xlu0 %12905, %v3979_v51   ;;  %v5384_v51 = vld [vmem:[#allocation2 + $0x120] sm:$0xff] }
 0x3cb   :  { %v5002_v5 = vadd.f32 %v4934_v36, %v4453_v34 }
 0x3cc   :  { %v5001_v29 = vadd.f32 %v4933_v13, %v4452_v53  ;;  %v16054_v45 = vpop.permute.xlu1 %396 }
 0x3cd   :  { %v5077_v57 = vadd.f32 %v15820_v63, %v5002_v5  ;;  %v16057_v49 = vpop.permute.xlu0 %391  ;;  %1524 = vperm.xlu1 %12906, %v16049_v0  }
 0x3ce   :  { %v5076_v37 = vadd.f32 %v15820_v63, %v5001_v29  ;;  %1519 = vperm.xlu0 %12905, %v1240_v1   ;;  %v144_v29 = vld [vmem:[%s19655_s17 + $0x1b0] sm:$0xff] }
 0x3cf   :  { %v5145_v20 = vmax.f32 %v5077_v57, 0.0  ;;  %v5518_v57 = vmax.f32 %v5384_v51, %v5451_v32  ;;  %v544_v51 = vmul.f32 %v15709_v35, %v15658_v27  ;;  %v1642_v32 = vmul.f32 %v15716_v14, %v15727_v15 }
 0x3d0   :  { %v5144_v60 = vmax.f32 %v5076_v37, 0.0  ;;  %v16067_v17 = vpop.permute.xlu1 %945  ;;  %v2191_v27 = vmul.f32 %v15732_v7, %v15839_v10  ;;  %v1789_v10 = vld [vmem:[%s19655_s17 + $0x1ad] sm:$0xff] }
 0x3d1   :  { %5214 = vst.msk [vmem:[#allocation2 + $0x138] sm:$0xff] %vm5174_vm0, %v5145_v20  ;;  %v16070_v30 = vpop.permute.xlu0 %940  ;;  %2612 = vperm.xlu1 %12906, %v2337_v44  }
 0x3d2   :  { %5213 = vst.msk [vmem:[#allocation2 + $0x130] sm:$0xff] %vm5174_vm0, %v5144_v60  ;;  %2607 = vperm.xlu0 %12905, %v2336_v4   ;;  %v1093_v4 = vmul.f32 %v15697_v55, %v15669_v24  ;;  %v693_v24 = vld [vmem:[%s19655_s17 + $0x1b1] sm:$0xff] }
 0x3d4   :  { %v16073_v56 = vpop.permute.xlu1 %2033 }
 0x3d5   :  { %v16075_v12 = vpop.permute.xlu0 %2028  ;;  %3700 = vperm.xlu1 %12906, %v1240_v1  }
 0x3d6   :  { %3695 = vperm.xlu0 %12905, %v15932_v8   ;;  %v145_v8 = vld [vmem:[%s19655_s17 + $0x1b8] sm:$0xff] }
 0x3d8   :  { %v16084_v50 = vpop.permute.xlu1 %3121 }
 0x3d9   :  { %v16086_v34 = vpop.permute.xlu0 %3116  ;;  %4788 = vperm.xlu1 %12906, %v4529_v61   ;;  %v5452_v36 = vld [vmem:[#allocation2 + $0x129] sm:$0xff]  ;;  %v5586_v53 = vld [vmem:[#allocation2 + $0x135] sm:$0xff] }
 0x3da   :  { %v5585_v2 = vld [vmem:[#allocation2 + $0x12d] sm:$0xff]  ;;  %4783 = vperm.xlu0 %12905, %v4528_v40   ;;  %v5519_v13 = vmax.f32 %v5385_v62, %v5452_v36  ;;  %v5653_v1 = vld [vmem:[#allocation2 + $0x136] sm:$0xff]  ;;  %v1092_v62 = vmul.f32 %v15697_v55, %v15671_v19  ;;  %v1641_v19 = vmul.f32 %v15716_v14, %v15736_v16 }
 0x3db   :  { %v5652_v5 = vld [vmem:[#allocation2 + $0x12e] sm:$0xff]  ;;  %v5720_v44 = vmax.f32 %v5586_v53, %v5653_v1  ;;  %v694_v36 = vld [vmem:[%s19655_s17 + $0x1b9] sm:$0xff]  ;;  %v543_v53 = vmul.f32 %v15709_v35, %v15660_v11 }
 0x3dc   :  { %v5719_v37 = vmax.f32 %v5585_v2, %v5652_v5  ;;  %v4210_v20 = vpop.permute.xlu1 %4209  ;;  %v19710_v1 = vld [vmem:[#allocation16_spill] sm:$0xff] }
 0x3dd   :  { %v4205_v60 = vpop.permute.xlu0 %4204  ;;  %436 = vperm.xlu1 %12906, %v145_v8   ;;  %v5787_v40 = vmax.f32 %v5519_v13, %v5720_v44  ;;  %v1161_v13 = vadd.f32 %v1093_v4, %v544_v51  ;;  %v1160_v15 = vadd.f32 %v1092_v62, %v543_v53  ;;  %v1790_v11 = vld [vmem:[%s19655_s17 + $0x1b5] sm:$0xff]  ;;  %v2739_v44 = vmul.f32 %v15746_v43, %v15901_v48  ;;  %v2886_v51 = vld [vmem:[%s19655_s17 + $0x1a7] sm:$0xff] }
 0x3de   :  { %v5786_v61 = vmax.f32 %v5518_v57, %v5719_v37  ;;  %431 = vperm.xlu0 %12905, %v144_v29   ;;  %v2190_v29 = vmul.f32 %v15732_v7, %v19710_v1  ;;  %v2740_v57 = vmul.f32 %v15746_v43, %v15897_v42  ;;  %v3288_v42 = vmul.f32 %v15760_v25, %v15969_v28 }
 0x3df   :  { %v1710_v16 = vadd.f32 %v1642_v32, %v1161_v13  ;;  %v1709_v37 = vadd.f32 %v1641_v19, %v1160_v15  ;;  %v3838_v48 = vmul.f32 %v15774_v33, %v16032_v41  ;;  %v4387_v19 = vmul.f32 %v15788_v39, %v4210_v20  ;;  %v3982_v41 = vld [vmem:[%s19655_s17 + $0x1a3] sm:$0xff] }
 0x3e0   :  { %v12414_v2 = vpack.c.bf16 %v5787_v40, %v5786_v61  ;;  %v16112_v8 = vpop.permute.xlu1 %1494  ;;  %v3289_v40 = vmul.f32 %v15760_v25, %v15967_v59  ;;  %v2885_v59 = vld [vmem:[%s19655_s17 + $0x19f] sm:$0xff]  ;;  %v4386_v15 = vmul.f32 %v15788_v39, %v4205_v60 }
 0x3e1   :  { %v16116_v5 = vpop.permute.xlu0 %1489  ;;  %985 = vperm.xlu1 %12906, %v694_v36   ;;  %v2259_v61 = vadd.f32 %v2191_v27, %v1710_v16  ;;  %v2258_v36 = vadd.f32 %v2190_v29, %v1709_v37  ;;  %v16166_v37 = vld [vmem:[%s19655_s17 + $0x1ba] sm:$0xff] }
 0x3e2   :  { %12415 = vmatpush1.bf16.msra.mxu0 %v12414_v2  ;;  %980 = vperm.xlu0 %12905, %v693_v24   ;;  %v3837_v24 = vmul.f32 %v15774_v33, %v16035_v31  ;;  %v3981_v31 = vld [vmem:[%s19655_s17 + $0x19b] sm:$0xff] }
 0x3e3   :  { %12416 = vmatprep.subr.bf16.mxu0 %v19665_v46  ;;  %v2808_v32 = vadd.f32 %v2740_v57, %v2259_v61  ;;  %v2807_v2 = vadd.f32 %v2739_v44, %v2258_v36  ;;  %v1242_v61 = vld [vmem:[%s19655_s17 + $0x1b2] sm:$0xff] }
 0x3e4   :  { %v16131_v4 = vpop.permute.xlu1 %2582 }
 0x3e5   :  { %v16135_v62 = vpop.permute.xlu0 %2577  ;;  %2073 = vperm.xlu1 %12906, %v1790_v11   ;;  %v3357_v28 = vadd.f32 %v3289_v40, %v2808_v32  ;;  %v3356_v27 = vadd.f32 %v3288_v42, %v2807_v2  ;;  %v2338_v2 = vld [vmem:[%s19655_s17 + $0x1ae] sm:$0xff] }
 0x3e6   :  { %2068 = vperm.xlu0 %12905, %v1789_v10  }
 0x3e7   :  { %v3906_v1 = vadd.f32 %v3838_v48, %v3357_v28  ;;  %v3905_v29 = vadd.f32 %v3837_v24, %v3356_v27  ;;  %v2339_v48 = vld [vmem:[%s19655_s17 + $0x1b6] sm:$0xff] }
 0x3e8   :  { %v16149_v53 = vpop.permute.xlu1 %3670 }
 0x3e9   :  { %v16152_v13 = vpop.permute.xlu0 %3665  ;;  %3161 = vperm.xlu1 %12906, %v2886_v51   ;;  %v4455_v16 = vadd.f32 %v4387_v19, %v3906_v1  ;;  %v4454_v10 = vadd.f32 %v4386_v15, %v3905_v29  ;;  %v4530_v1 = vld [vmem:[%s19655_s17 + $0x19c] sm:$0xff]  ;;  %v5386_v29 = vld [vmem:[#allocation2 + $0x130] sm:$0xff] }
 0x3ea   :  { %3156 = vperm.xlu0 %12905, %v2885_v59  }
 0x3ec   :  { %v4759_v11 = vpop.permute.xlu1 %4758 }
 0x3ed   :  { %v4936_v20 = vmul.f32 %v15803_v6, %v4759_v11  ;;  %v4754_v57 = vpop.permute.xlu0 %4753  ;;  %4249 = vperm.xlu1 %12906, %v3982_v41   ;;  %v4531_v41 = vld [vmem:[%s19655_s17 + $0x1a4] sm:$0xff]  ;;  %v5387_v11 = vld [vmem:[#allocation2 + $0x138] sm:$0xff] }
 0x3ee   :  { %v4935_v60 = vmul.f32 %v15803_v6, %v4754_v57  ;;  %4244 = vperm.xlu0 %12905, %v3981_v31  }
 0x3ef   :  { %v5004_v44 = vadd.f32 %v4936_v20, %v4455_v16  ;;  %v5453_v16 = vld [vmem:[#allocation2 + $0x131] sm:$0xff] }
 0x3f0   :  { %v5003_v40 = vadd.f32 %v4935_v60, %v4454_v10  ;;  %v16171_v36 = vpop.permute.xlu1 %406 }
 0x3f1   :  { %19711 = vst [vmem:[#allocation23_spill] sm:$0xff] %v16171_v36  ;;  %v5079_v42 = vadd.f32 %v15820_v63, %v5004_v44  ;;  %v16174_v51 = vpop.permute.xlu0 %401  ;;  %1534 = vperm.xlu1 %12906, %v16166_v37  }
 0x3f2   :  { %19712 = vst [vmem:[#allocation24_spill] sm:$0xff] %v16174_v51  ;;  %v5078_v32 = vadd.f32 %v15820_v63, %v5003_v40  ;;  %1529 = vperm.xlu0 %12905, %v1242_v61  }
 0x3f3   :  { %v5147_v59 = vmax.f32 %v5079_v42, 0.0  ;;  %v146_v42 = vld [vmem:[%s19655_s17 + $0x1c0] sm:$0xff] }
 0x3f4   :  { %v5146_v24 = vmax.f32 %v5078_v32, 0.0  ;;  %v16184_v28 = vpop.permute.xlu1 %955  ;;  %v5520_v32 = vmax.f32 %v5386_v29, %v5453_v16  ;;  %v1644_v16 = vmul.f32 %v15716_v14, %v15878_v22 }
 0x3f5   :  { %19713 = vst [vmem:[#allocation17_spill] sm:$0xff] %v16184_v28  ;;  %5216 = vst.msk [vmem:[#allocation2 + $0x148] sm:$0xff] %vm5174_vm0, %v5147_v59  ;;  %v16187_v19 = vpop.permute.xlu0 %950  ;;  %2622 = vperm.xlu1 %12906, %v2339_v48   ;;  %v19717_v28 = vld [vmem:[#allocation22_spill] sm:$0xff] }
 0x3f6   :  { %19714 = vst [vmem:[#allocation21_spill] sm:$0xff] %v16187_v19  ;;  %5215 = vst.msk [vmem:[#allocation2 + $0x140] sm:$0xff] %vm5174_vm0, %v5146_v24  ;;  %2617 = vperm.xlu0 %12905, %v2338_v2   ;;  %v19715_v24 = vld [vmem:[#allocation20_spill] sm:$0xff]  ;;  %v19716_v19 = vld [vmem:[#allocation18_spill] sm:$0xff]  ;;  %v546_v29 = vmul.f32 %v15709_v35, %v19717_v28  ;;  %v2193_v28 = vmul.f32 %v15732_v7, %v15956_v52 }
 0x3f7   :  { %v1791_v52 = vld [vmem:[%s19655_s17 + $0x1bd] sm:$0xff] }
 0x3f8   :  { %v16190_v27 = vpop.permute.xlu1 %2043 }
 0x3f9   :  { %v16192_v15 = vpop.permute.xlu0 %2038  ;;  %3710 = vperm.xlu1 %12906, %v1242_v61  }
 0x3fa   :  { %3705 = vperm.xlu0 %12905, %v16049_v0   ;;  %v147_v0 = vld [vmem:[%s19655_s17 + $0x1c8] sm:$0xff] }
 0x3fc   :  { %v16201_v31 = vpop.permute.xlu1 %3131 }
 0x3fd   :  { %v16203_v20 = vpop.permute.xlu0 %3126  ;;  %4798 = vperm.xlu1 %12906, %v4531_v41   ;;  %v5454_v57 = vld [vmem:[#allocation2 + $0x139] sm:$0xff]  ;;  %v5588_v60 = vld [vmem:[#allocation2 + $0x145] sm:$0xff]  ;;  %v1095_v41 = vmul.f32 %v15697_v55, %v19715_v24 }
 0x3fe   :  { %v5587_v10 = vld [vmem:[#allocation2 + $0x13d] sm:$0xff]  ;;  %4793 = vperm.xlu0 %12905, %v4530_v1   ;;  %v5521_v44 = vmax.f32 %v5387_v11, %v5454_v57  ;;  %v5655_v40 = vld [vmem:[#allocation2 + $0x146] sm:$0xff]  ;;  %v1094_v11 = vmul.f32 %v15697_v55, %v19716_v19  ;;  %v1643_v55 = vmul.f32 %v15716_v14, %v15882_v54  ;;  %v2742_v54 = vmul.f32 %v15746_v43, %v16014_v26 }
 0x3ff   :  { %v5654_v61 = vld [vmem:[#allocation2 + $0x13e] sm:$0xff]  ;;  %v5722_v59 = vmax.f32 %v5588_v60, %v5655_v40  ;;  %v696_v57 = vld [vmem:[%s19655_s17 + $0x1c9] sm:$0xff]  ;;  %v3290_v26 = vmul.f32 %v15760_v25, %v16086_v34 }
 0x400   :  { %v5721_v48 = vmax.f32 %v5587_v10, %v5654_v61  ;;  %v4220_v2 = vpop.permute.xlu1 %4219  ;;  %v695_v60 = vld [vmem:[%s19655_s17 + $0x1c1] sm:$0xff]  ;;  %v1163_v61 = vadd.f32 %v1095_v41, %v546_v29  ;;  %v2888_v41 = vld [vmem:[%s19655_s17 + $0x1b7] sm:$0xff] }
 0x401   :  { %v4215_v51 = vpop.permute.xlu0 %4214  ;;  %446 = vperm.xlu1 %12906, %v147_v0   ;;  %v5789_v36 = vmax.f32 %v5521_v44, %v5722_v59  ;;  %v19718_v0 = vld [vmem:[#allocation19_spill] sm:$0xff]  ;;  %v4389_v34 = vmul.f32 %v15788_v39, %v4220_v2 }
 0x402   :  { %v5788_v1 = vmax.f32 %v5520_v32, %v5721_v48  ;;  %441 = vperm.xlu0 %12905, %v146_v42   ;;  %v545_v44 = vmul.f32 %v15709_v35, %v19718_v0  ;;  %v1792_v35 = vld [vmem:[%s19655_s17 + $0x1c5] sm:$0xff]  ;;  %v1712_v14 = vadd.f32 %v1644_v16, %v1163_v61  ;;  %v2741_v32 = vmul.f32 %v15746_v43, %v16018_v23  ;;  %v2887_v23 = vld [vmem:[%s19655_s17 + $0x1af] sm:$0xff] }
 0x403   :  { %v3291_v48 = vmul.f32 %v15760_v25, %v16084_v50  ;;  %v3840_v43 = vmul.f32 %v15774_v33, %v16149_v53  ;;  %v3984_v53 = vld [vmem:[%s19655_s17 + $0x1b3] sm:$0xff] }
 0x404   :  { %v12417_v10 = vpack.c.bf16 %v5789_v36, %v5788_v1  ;;  %v16229_v19 = vpop.permute.xlu1 %1504  ;;  %v1162_v22 = vadd.f32 %v1094_v11, %v545_v44  ;;  %v2192_v36 = vmul.f32 %v15732_v7, %v15958_v21  ;;  %v2261_v21 = vadd.f32 %v2193_v28, %v1712_v14 }
 0x405   :  { %v16233_v40 = vpop.permute.xlu0 %1499  ;;  %995 = vperm.xlu1 %12906, %v696_v57   ;;  %v3839_v11 = vmul.f32 %v15774_v33, %v16152_v13  ;;  %v3983_v33 = vld [vmem:[%s19655_s17 + $0x1ab] sm:$0xff] }
 0x406   :  { %12418 = vmatpush1.bf16.msra.mxu0 %v12417_v10  ;;  %990 = vperm.xlu0 %12905, %v695_v60   ;;  %v1711_v42 = vadd.f32 %v1643_v55, %v1162_v22  ;;  %v2810_v1 = vadd.f32 %v2742_v54, %v2261_v21  ;;  %v4388_v10 = vmul.f32 %v15788_v39, %v4215_v51  ;;  %v16283_v51 = vld [vmem:[%s19655_s17 + $0x1ca] sm:$0xff]  ;;  %v1244_v22 = vld [vmem:[%s19655_s17 + $0x1c2] sm:$0xff] }
 0x407   :  { %12419 = vmatprep.subr.bf16.mxu0 %v19665_v46 }
 0x408   :  { %v16248_v7 = vpop.permute.xlu1 %2592  ;;  %v2260_v24 = vadd.f32 %v2192_v36, %v1711_v42  ;;  %v3359_v25 = vadd.f32 %v3291_v48, %v2810_v1  ;;  %v4532_v1 = vld [vmem:[%s19655_s17 + $0x1ac] sm:$0xff] }
 0x409   :  { %v16252_v59 = vpop.permute.xlu0 %2587  ;;  %2083 = vperm.xlu1 %12906, %v1792_v35  }
 0x40a   :  { %2078 = vperm.xlu0 %12905, %v1791_v52   ;;  %v2809_v50 = vadd.f32 %v2741_v32, %v2260_v24  ;;  %v3908_v60 = vadd.f32 %v3840_v43, %v3359_v25  ;;  %v2341_v52 = vld [vmem:[%s19655_s17 + $0x1c6] sm:$0xff]  ;;  %v2340_v32 = vld [vmem:[%s19655_s17 + $0x1be] sm:$0xff] }
 0x40c   :  { %v16266_v57 = vpop.permute.xlu1 %3680  ;;  %v3358_v16 = vadd.f32 %v3290_v26, %v2809_v50  ;;  %v4457_v44 = vadd.f32 %v4389_v34, %v3908_v60  ;;  %v5389_v50 = vld [vmem:[#allocation2 + $0x148] sm:$0xff] }
 0x40d   :  { %v16269_v29 = vpop.permute.xlu0 %3675  ;;  %3171 = vperm.xlu1 %12906, %v2888_v41   ;;  %v4533_v41 = vld [vmem:[%s19655_s17 + $0x1b4] sm:$0xff] }
 0x40e   :  { %3166 = vperm.xlu0 %12905, %v2887_v23   ;;  %v3907_v13 = vadd.f32 %v3839_v11, %v3358_v16  ;;  %v5388_v23 = vld [vmem:[#allocation2 + $0x140] sm:$0xff] }
 0x40f   :  { %v5455_v11 = vld [vmem:[#allocation2 + $0x141] sm:$0xff] }
 0x410   :  { %v4769_v0 = vpop.permute.xlu1 %4768  ;;  %v4456_v61 = vadd.f32 %v4388_v10, %v3907_v13  ;;  %v148_v13 = vld [vmem:[%s19655_s17 + $0x1d0] sm:$0xff] }
 0x411   :  { %v4938_v2 = vmul.f32 %v15803_v6, %v4769_v0  ;;  %v4764_v55 = vpop.permute.xlu0 %4763  ;;  %4259 = vperm.xlu1 %12906, %v3984_v53   ;;  %v5522_v0 = vmax.f32 %v5388_v23, %v5455_v11 }
 0x412   :  { %v4937_v39 = vmul.f32 %v15803_v6, %v4764_v55  ;;  %4254 = vperm.xlu0 %12905, %v3983_v33  }
 0x413   :  { %v5006_v28 = vadd.f32 %v4938_v2, %v4457_v44 }
 0x414   :  { %v5005_v36 = vadd.f32 %v4937_v39, %v4456_v61  ;;  %v16288_v35 = vpop.permute.xlu1 %416  ;;  %v16331_v61 = vld [vmem:[%s19638_s4 + $0x1] ss:$0 sm:$0xff] }
 0x415   :  { %v5081_v14 = vadd.f32 %v15820_v63, %v5006_v28  ;;  %v16291_v54 = vpop.permute.xlu0 %411  ;;  %1544 = vperm.xlu1 %12906, %v16283_v51   ;;  %v1097_v39 = vmul.f32 %v16331_v61, %v15950_v18 }
 0x416   :  { %v5080_v6 = vadd.f32 %v15820_v63, %v5005_v36  ;;  %1539 = vperm.xlu0 %12905, %v1244_v22  }
 0x417   :  { %v5149_v42 = vmax.f32 %v5081_v14, 0.0  ;;  %v1096_v14 = vmul.f32 %v16331_v61, %v15953_v47 }
 0x418   :  { %v5148_v21 = vmax.f32 %v5080_v6, 0.0  ;;  %v16301_v48 = vpop.permute.xlu1 %965  ;;  %v698_v6 = vld [vmem:[%s19655_s17 + $0x1d9] sm:$0xff] }
 0x419   :  { %5218 = vst.msk [vmem:[#allocation2 + $0x158] sm:$0xff] %vm5174_vm0, %v5149_v42  ;;  %v16304_v24 = vpop.permute.xlu0 %960  ;;  %2632 = vperm.xlu1 %12906, %v2341_v52   ;;  %v16343_v52 = vld [vmem:[%s19638_s4] ss:$0 sm:$0xff]  ;;  %v16350_v42 = vld [vmem:[%s19638_s4 + $0x2] ss:$0 sm:$0xff] }
 0x41a   :  { %5217 = vst.msk [vmem:[#allocation2 + $0x150] sm:$0xff] %vm5174_vm0, %v5148_v21  ;;  %2627 = vperm.xlu0 %12905, %v2340_v32   ;;  %v548_v18 = vmul.f32 %v16343_v52, %v15937_v9  ;;  %v1646_v47 = vmul.f32 %v16350_v42, %v15995_v58  ;;  %v697_v21 = vld [vmem:[%s19655_s17 + $0x1d1] sm:$0xff] }
 0x41c   :  { %v16307_v63 = vpop.permute.xlu1 %2053  ;;  %v1165_v23 = vadd.f32 %v1097_v39, %v548_v18 }
 0x41d   :  { %v16309_v26 = vpop.permute.xlu0 %2048  ;;  %3720 = vperm.xlu1 %12906, %v1244_v22  }
 0x41e   :  { %3715 = vperm.xlu0 %12905, %v16166_v37   ;;  %v149_v37 = vld [vmem:[%s19655_s17 + $0x1d8] sm:$0xff] }
 0x420   :  { %v16318_v43 = vpop.permute.xlu1 %3141 }
 0x421   :  { %v16320_v25 = vpop.permute.xlu0 %3136  ;;  %4808 = vperm.xlu1 %12906, %v4533_v41   ;;  %v5456_v34 = vld [vmem:[#allocation2 + $0x149] sm:$0xff]  ;;  %v5590_v10 = vld [vmem:[#allocation2 + $0x155] sm:$0xff]  ;;  %v547_v41 = vmul.f32 %v16343_v52, %v15940_v38 }
 0x422   :  { %v5589_v16 = vld [vmem:[#allocation2 + $0x14d] sm:$0xff]  ;;  %4803 = vperm.xlu0 %12905, %v4532_v1   ;;  %v5523_v53 = vmax.f32 %v5389_v50, %v5456_v34  ;;  %v5657_v33 = vld [vmem:[#allocation2 + $0x156] sm:$0xff]  ;;  %v1645_v1 = vmul.f32 %v16350_v42, %v15999_v3  ;;  %v16366_v50 = vld [vmem:[%s19638_s4 + $0x3] ss:$0 sm:$0xff] }
 0x423   :  { %v5656_v60 = vld [vmem:[#allocation2 + $0x14e] sm:$0xff]  ;;  %v5724_v2 = vmax.f32 %v5590_v10, %v5657_v33  ;;  %v2195_v58 = vmul.f32 %v16366_v50, %v16073_v56  ;;  %v1164_v34 = vadd.f32 %v1096_v14, %v547_v41  ;;  %v2194_v38 = vmul.f32 %v16366_v50, %v16075_v12  ;;  %v16381_v56 = vld [vmem:[%s19638_s4 + $0x4] ss:$0 sm:$0xff] }
 0x424   :  { %v5723_v44 = vmax.f32 %v5589_v16, %v5656_v60  ;;  %v4230_v55 = vpop.permute.xlu1 %4229  ;;  %v1794_v3 = vld [vmem:[%s19655_s17 + $0x1d5] sm:$0xff]  ;;  %v1714_v16 = vadd.f32 %v1646_v47, %v1165_v23  ;;  %v2744_v10 = vmul.f32 %v16381_v56, %v16131_v4  ;;  %v1793_v12 = vld [vmem:[%s19655_s17 + $0x1cd] sm:$0xff]  ;;  %v16423_v47 = vld [vmem:[%s19638_s4 + $0x7] ss:$0 sm:$0xff] }
 0x425   :  { %v4225_v28 = vpop.permute.xlu0 %4224  ;;  %456 = vperm.xlu1 %12906, %v149_v37   ;;  %v5791_v36 = vmax.f32 %v5523_v53, %v5724_v2  ;;  %v1713_v37 = vadd.f32 %v1645_v1, %v1164_v34  ;;  %v2743_v53 = vmul.f32 %v16381_v56, %v16135_v62  ;;  %v2890_v62 = vld [vmem:[%s19655_s17 + $0x1c7] sm:$0xff]  ;;  %v3985_v23 = vld [vmem:[%s19655_s17 + $0x1bb] sm:$0xff] }
 0x426   :  { %v5790_v22 = vmax.f32 %v5522_v0, %v5723_v44  ;;  %451 = vperm.xlu0 %12905, %v148_v13   ;;  %v2263_v33 = vadd.f32 %v2195_v58, %v1714_v16  ;;  %v16395_v13 = vld [vmem:[%s19638_s4 + $0x5] ss:$0 sm:$0xff]  ;;  %v4390_v41 = vmul.f32 %v16423_v47, %v4225_v28 }
 0x427   :  { %v3293_v0 = vmul.f32 %v16395_v13, %v16201_v31  ;;  %v2262_v44 = vadd.f32 %v2194_v38, %v1713_v37  ;;  %v3292_v2 = vmul.f32 %v16395_v13, %v16203_v20 }
 0x428   :  { %v12420_v32 = vpack.c.bf16 %v5791_v36, %v5790_v22  ;;  %v16361_v9 = vpop.permute.xlu1 %1514  ;;  %v2812_v39 = vadd.f32 %v2744_v10, %v2263_v33  ;;  %v16409_v22 = vld [vmem:[%s19638_s4 + $0x6] ss:$0 sm:$0xff] }
 0x429   :  { %v16370_v11 = vpop.permute.xlu0 %1509  ;;  %1005 = vperm.xlu1 %12906, %v698_v6   ;;  %v3842_v31 = vmul.f32 %v16409_v22, %v16266_v57  ;;  %v2889_v36 = vld [vmem:[%s19655_s17 + $0x1bf] sm:$0xff]  ;;  %v2811_v14 = vadd.f32 %v2743_v53, %v2262_v44  ;;  %v3841_v20 = vmul.f32 %v16409_v22, %v16269_v29  ;;  %v1246_v53 = vld [vmem:[%s19655_s17 + $0x1d2] sm:$0xff] }
 0x42a   :  { %12421 = vmatpush1.bf16.msra.mxu0 %v12420_v32  ;;  %1000 = vperm.xlu0 %12905, %v697_v21   ;;  %v3361_v18 = vadd.f32 %v3293_v0, %v2812_v39  ;;  %v4391_v32 = vmul.f32 %v16423_v47, %v4230_v55  ;;  %v3986_v29 = vld [vmem:[%s19655_s17 + $0x1c3] sm:$0xff]  ;;  %v16455_v44 = vld [vmem:[%s19639_s5] ss:$0 sm:$0xff] }
 0x42b   :  { %12422 = vmatprep.subr.bf16.mxu0 %v19665_v46  ;;  %v3360_v57 = vadd.f32 %v3292_v2, %v2811_v14  ;;  %v16438_v55 = vld [vmem:[%s19638_s4 + $0x8] ss:$0 sm:$0xff]  ;;  %v2342_v14 = vld [vmem:[%s19655_s17 + $0x1ce] sm:$0xff] }
 0x42c   :  { %v16390_v60 = vpop.permute.xlu1 %2602  ;;  %v3910_v1 = vadd.f32 %v3842_v31, %v3361_v18  ;;  %v2343_v31 = vld [vmem:[%s19655_s17 + $0x1d6] sm:$0xff] }
 0x42d   :  { %v16399_v4 = vpop.permute.xlu0 %2597  ;;  %2093 = vperm.xlu1 %12906, %v1794_v3   ;;  %v3909_v58 = vadd.f32 %v3841_v20, %v3360_v57 }
 0x42e   :  { %2088 = vperm.xlu0 %12905, %v1793_v12   ;;  %v4459_v38 = vadd.f32 %v4391_v32, %v3910_v1  ;;  %v16445_v12 = vld [vmem:[%s19655_s17 + $0x1da] sm:$0xff] }
 0x42f   :  { %v4458_v16 = vadd.f32 %v4390_v41, %v3909_v58  ;;  %v4534_v1 = vld [vmem:[%s19655_s17 + $0x1bc] sm:$0xff]  ;;  %v5390_v58 = vld [vmem:[#allocation2 + $0x150] sm:$0xff] }
 0x430   :  { %v16418_v6 = vpop.permute.xlu1 %3690 }
 0x431   :  { %v16426_v21 = vpop.permute.xlu0 %3685  ;;  %3181 = vperm.xlu1 %12906, %v2890_v62  }
 0x432   :  { %3176 = vperm.xlu0 %12905, %v2889_v36  }
 0x434   :  { %v4779_v34 = vpop.permute.xlu1 %4778 }
 0x435   :  { %v4940_v28 = vmul.f32 %v16438_v55, %v4779_v34  ;;  %v4774_v3 = vpop.permute.xlu0 %4773  ;;  %4269 = vperm.xlu1 %12906, %v3986_v29   ;;  %v4535_v29 = vld [vmem:[%s19655_s17 + $0x1c4] sm:$0xff]  ;;  %v5391_v34 = vld [vmem:[#allocation2 + $0x158] sm:$0xff] }
 0x436   :  { %v4939_v10 = vmul.f32 %v16438_v55, %v4774_v3  ;;  %4264 = vperm.xlu0 %12905, %v3985_v23  }
 0x437   :  { %v5008_v37 = vadd.f32 %v4940_v28, %v4459_v38  ;;  %v5457_v38 = vld [vmem:[#allocation2 + $0x151] sm:$0xff] }
 0x438   :  { %v5007_v33 = vadd.f32 %v4939_v10, %v4458_v16  ;;  %v16450_v0 = vpop.permute.xlu1 %426 }
 0x439   :  { %v5083_v2 = vadd.f32 %v16455_v44, %v5008_v37  ;;  %v16458_v62 = vpop.permute.xlu0 %421  ;;  %1554 = vperm.xlu1 %12906, %v16445_v12  }
 0x43a   :  { %19719 = vst [vmem:[#allocation16_spill] sm:$0xff] %v16458_v62  ;;  %v5082_v39 = vadd.f32 %v16455_v44, %v5007_v33  ;;  %1549 = vperm.xlu0 %12905, %v1246_v53  }
 0x43b   :  { %v5151_v36 = vmax.f32 %v5083_v2, 0.0  ;;  %v150_v2 = vld [vmem:[%s19655_s17 + $0x1e0] sm:$0xff] }
 0x43c   :  { %v5150_v20 = vmax.f32 %v5082_v39, 0.0  ;;  %v16468_v18 = vpop.permute.xlu1 %975  ;;  %v5524_v39 = vmax.f32 %v5390_v58, %v5457_v38  ;;  %v550_v58 = vmul.f32 %v16343_v52, %v16054_v45  ;;  %v1648_v38 = vmul.f32 %v16350_v42, %v16112_v8 }
 0x43d   :  { %5220 = vst.msk [vmem:[#allocation2 + $0x168] sm:$0xff] %vm5174_vm0, %v5151_v36  ;;  %v16471_v32 = vpop.permute.xlu0 %970  ;;  %2642 = vperm.xlu1 %12906, %v2343_v31   ;;  %v2197_v45 = vmul.f32 %v16366_v50, %v16190_v27  ;;  %v1795_v27 = vld [vmem:[%s19655_s17 + $0x1dd] sm:$0xff] }
 0x43e   :  { %5219 = vst.msk [vmem:[#allocation2 + $0x160] sm:$0xff] %vm5174_vm0, %v5150_v20  ;;  %2637 = vperm.xlu0 %12905, %v2342_v14   ;;  %v1099_v20 = vmul.f32 %v16331_v61, %v16067_v17  ;;  %v699_v17 = vld [vmem:[%s19655_s17 + $0x1e1] sm:$0xff] }
 0x440   :  { %v16474_v57 = vpop.permute.xlu1 %2063 }
 0x441   :  { %v16476_v41 = vpop.permute.xlu0 %2058  ;;  %3730 = vperm.xlu1 %12906, %v1246_v53  }
 0x442   :  { %3725 = vperm.xlu0 %12905, %v16283_v51   ;;  %v151_v51 = vld [vmem:[%s19655_s17 + $0x1e8] sm:$0xff] }
 0x444   :  { %v16485_v23 = vpop.permute.xlu1 %3151 }
 0x445   :  { %v16487_v28 = vpop.permute.xlu0 %3146  ;;  %4818 = vperm.xlu1 %12906, %v4535_v29   ;;  %v5458_v3 = vld [vmem:[#allocation2 + $0x159] sm:$0xff]  ;;  %v5592_v10 = vld [vmem:[#allocation2 + $0x165] sm:$0xff] }
 0x446   :  { %v5591_v16 = vld [vmem:[#allocation2 + $0x15d] sm:$0xff]  ;;  %4813 = vperm.xlu0 %12905, %v4534_v1   ;;  %v5525_v37 = vmax.f32 %v5391_v34, %v5458_v3  ;;  %v5659_v33 = vld [vmem:[#allocation2 + $0x166] sm:$0xff]  ;;  %v1098_v34 = vmul.f32 %v16331_v61, %v16070_v30  ;;  %v1647_v30 = vmul.f32 %v16350_v42, %v16116_v5 }
 0x447   :  { %v5658_v53 = vld [vmem:[#allocation2 + $0x15e] sm:$0xff]  ;;  %v5726_v36 = vmax.f32 %v5592_v10, %v5659_v33  ;;  %v700_v3 = vld [vmem:[%s19655_s17 + $0x1e9] sm:$0xff]  ;;  %v549_v10 = vmul.f32 %v16343_v52, %v16057_v49  ;;  %v2746_v33 = vmul.f32 %v16381_v56, %v16248_v7  ;;  %v3294_v7 = vmul.f32 %v16395_v13, %v16320_v25 }
 0x448   :  { %v5725_v31 = vmax.f32 %v5591_v16, %v5658_v53  ;;  %v4240_v14 = vpop.permute.xlu1 %4239  ;;  %v1796_v49 = vld [vmem:[%s19655_s17 + $0x1e5] sm:$0xff] }
 0x449   :  { %v4235_v29 = vpop.permute.xlu0 %4234  ;;  %466 = vperm.xlu1 %12906, %v151_v51   ;;  %v5793_v62 = vmax.f32 %v5525_v37, %v5726_v36  ;;  %v1167_v37 = vadd.f32 %v1099_v20, %v550_v58  ;;  %v1166_v8 = vadd.f32 %v1098_v34, %v549_v10  ;;  %v3295_v36 = vmul.f32 %v16395_v13, %v16318_v43  ;;  %v2892_v34 = vld [vmem:[%s19655_s17 + $0x1d7] sm:$0xff]  ;;  %v2891_v43 = vld [vmem:[%s19655_s17 + $0x1cf] sm:$0xff] }
 0x44a   :  { %v5792_v1 = vmax.f32 %v5524_v39, %v5725_v31  ;;  %461 = vperm.xlu0 %12905, %v150_v2   ;;  %v2745_v39 = vmul.f32 %v16381_v56, %v16252_v59  ;;  %v3844_v59 = vmul.f32 %v16409_v22, %v16418_v6  ;;  %v3988_v6 = vld [vmem:[%s19655_s17 + $0x1d3] sm:$0xff] }
 0x44b   :  { %v1716_v5 = vadd.f32 %v1648_v38, %v1167_v37  ;;  %v1715_v2 = vadd.f32 %v1647_v30, %v1166_v8  ;;  %v3843_v38 = vmul.f32 %v16409_v22, %v16426_v21  ;;  %v4392_v37 = vmul.f32 %v16423_v47, %v4235_v29  ;;  %v3987_v21 = vld [vmem:[%s19655_s17 + $0x1cb] sm:$0xff] }
 0x44c   :  { %v12423_v16 = vpack.c.bf16 %v5793_v62, %v5792_v1  ;;  %v16513_v51 = vpop.permute.xlu1 %1524  ;;  %v2196_v62 = vmul.f32 %v16366_v50, %v16192_v15 }
 0x44d   :  { %v16517_v53 = vpop.permute.xlu0 %1519  ;;  %1015 = vperm.xlu1 %12906, %v700_v3   ;;  %v2265_v31 = vadd.f32 %v2197_v45, %v1716_v5 }
 0x44e   :  { %12424 = vmatpush1.bf16.msra.mxu0 %v12423_v16  ;;  %1010 = vperm.xlu0 %12905, %v699_v17   ;;  %v2264_v1 = vadd.f32 %v2196_v62, %v1715_v2  ;;  %v4393_v17 = vmul.f32 %v16423_v47, %v4240_v14 }
 0x44f   :  { %12425 = vmatprep.subr.bf16.mxu0 %v19665_v46  ;;  %v2814_v3 = vadd.f32 %v2746_v33, %v2265_v31 }
 0x450   :  { %v16532_v15 = vpop.permute.xlu1 %2612  ;;  %v2813_v58 = vadd.f32 %v2745_v39, %v2264_v1  ;;  %v1248_v39 = vld [vmem:[%s19655_s17 + $0x1e2] sm:$0xff] }
 0x451   :  { %v16536_v20 = vpop.permute.xlu0 %2607  ;;  %2103 = vperm.xlu1 %12906, %v1796_v49   ;;  %v3363_v25 = vadd.f32 %v3295_v36, %v2814_v3  ;;  %v2345_v3 = vld [vmem:[%s19655_s17 + $0x1e6] sm:$0xff] }
 0x452   :  { %2098 = vperm.xlu0 %12905, %v1795_v27   ;;  %v3362_v30 = vadd.f32 %v3294_v7, %v2813_v58  ;;  %v16567_v27 = vld [vmem:[%s19655_s17 + $0x1ea] sm:$0xff] }
 0x453   :  { %v3912_v45 = vadd.f32 %v3844_v59, %v3363_v25 }
 0x454   :  { %v16550_v16 = vpop.permute.xlu1 %3700  ;;  %v3911_v8 = vadd.f32 %v3843_v38, %v3362_v30 }
 0x455   :  { %v16553_v10 = vpop.permute.xlu0 %3695  ;;  %3191 = vperm.xlu1 %12906, %v2892_v34   ;;  %v4461_v49 = vadd.f32 %v4393_v17, %v3912_v45 }
 0x456   :  { %3186 = vperm.xlu0 %12905, %v2891_v43   ;;  %v4460_v33 = vadd.f32 %v4392_v37, %v3911_v8  ;;  %v2344_v43 = vld [vmem:[%s19655_s17 + $0x1de] sm:$0xff]  ;;  %v4537_v37 = vld [vmem:[%s19655_s17 + $0x1d4] sm:$0xff]  ;;  %v5393_v8 = vld [vmem:[#allocation2 + $0x168] sm:$0xff] }
 0x458   :  { %v4789_v62 = vpop.permute.xlu1 %4788 }
 0x459   :  { %v4942_v14 = vmul.f32 %v16438_v55, %v4789_v62  ;;  %v4784_v5 = vpop.permute.xlu0 %4783  ;;  %4279 = vperm.xlu1 %12906, %v3988_v6   ;;  %v4536_v6 = vld [vmem:[%s19655_s17 + $0x1cc] sm:$0xff]  ;;  %v5459_v62 = vld [vmem:[#allocation2 + $0x161] sm:$0xff] }
 0x45a   :  { %v4941_v29 = vmul.f32 %v16438_v55, %v4784_v5  ;;  %4274 = vperm.xlu0 %12905, %v3987_v21   ;;  %v5392_v21 = vld [vmem:[#allocation2 + $0x160] sm:$0xff] }
 0x45b   :  { %v5010_v2 = vadd.f32 %v4942_v14, %v4461_v49 }
 0x45c   :  { %v5009_v31 = vadd.f32 %v4941_v29, %v4460_v33  ;;  %v16572_v36 = vpop.permute.xlu1 %436 }
 0x45d   :  { %19720 = vst [vmem:[#allocation20_spill] sm:$0xff] %v16572_v36  ;;  %v5085_v1 = vadd.f32 %v16455_v44, %v5010_v2  ;;  %v16575_v7 = vpop.permute.xlu0 %431  ;;  %1564 = vperm.xlu1 %12906, %v16567_v27   ;;  %v19724_v36 = vld [vmem:[#allocation21_spill] sm:$0xff] }
 0x45e   :  { %19721 = vst [vmem:[#allocation18_spill] sm:$0xff] %v16575_v7  ;;  %v5084_v34 = vadd.f32 %v16455_v44, %v5009_v31  ;;  %1559 = vperm.xlu0 %12905, %v1248_v39   ;;  %v152_v31 = vld [vmem:[%s19655_s17 + $0x1f0] sm:$0xff] }
 0x45f   :  { %v5153_v59 = vmax.f32 %v5085_v1, 0.0  ;;  %v5526_v1 = vmax.f32 %v5392_v21, %v5459_v62  ;;  %v1650_v62 = vmul.f32 %v16350_v42, %v16229_v19 }
 0x460   :  { %v5152_v58 = vmax.f32 %v5084_v34, 0.0  ;;  %v16585_v38 = vpop.permute.xlu1 %985 }
 0x461   :  { %5222 = vst.msk [vmem:[#allocation2 + $0x178] sm:$0xff] %vm5174_vm0, %v5153_v59  ;;  %v16588_v25 = vpop.permute.xlu0 %980  ;;  %2652 = vperm.xlu1 %12906, %v2345_v3  }
 0x462   :  { %19722 = vst [vmem:[#allocation22_spill] sm:$0xff] %v16588_v25  ;;  %5221 = vst.msk [vmem:[#allocation2 + $0x170] sm:$0xff] %vm5174_vm0, %v5152_v58  ;;  %2647 = vperm.xlu0 %12905, %v2344_v43   ;;  %v19723_v43 = vld [vmem:[#allocation17_spill] sm:$0xff]  ;;  %v19725_v25 = vld [vmem:[#allocation23_spill] sm:$0xff] }
 0x463   :  { %v1101_v58 = vmul.f32 %v16331_v61, %v19723_v43  ;;  %v552_v21 = vmul.f32 %v16343_v52, %v19725_v25  ;;  %v2199_v25 = vmul.f32 %v16366_v50, %v16307_v63  ;;  %v1797_v63 = vld [vmem:[%s19655_s17 + $0x1ed] sm:$0xff]  ;;  %v2747_v43 = vmul.f32 %v16381_v56, %v16399_v4 }
 0x464   :  { %v16591_v17 = vpop.permute.xlu1 %2073  ;;  %v3846_v4 = vmul.f32 %v16409_v22, %v16550_v16  ;;  %v3990_v16 = vld [vmem:[%s19655_s17 + $0x1e3] sm:$0xff] }
 0x465   :  { %v16593_v30 = vpop.permute.xlu0 %2068  ;;  %3740 = vperm.xlu1 %12906, %v1248_v39  }
 0x466   :  { %3735 = vperm.xlu0 %12905, %v16445_v12   ;;  %v153_v12 = vld [vmem:[%s19655_s17 + $0x1f8] sm:$0xff] }
 0x468   :  { %v16602_v45 = vpop.permute.xlu1 %3161 }
 0x469   :  { %v16604_v49 = vpop.permute.xlu0 %3156  ;;  %4828 = vperm.xlu1 %12906, %v4537_v37   ;;  %v5460_v14 = vld [vmem:[#allocation2 + $0x169] sm:$0xff]  ;;  %v5594_v33 = vld [vmem:[#allocation2 + $0x175] sm:$0xff] }
 0x46a   :  { %v5593_v5 = vld [vmem:[#allocation2 + $0x16d] sm:$0xff]  ;;  %4823 = vperm.xlu0 %12905, %v4536_v6   ;;  %v5527_v29 = vmax.f32 %v5393_v8, %v5460_v14  ;;  %v5661_v39 = vld [vmem:[#allocation2 + $0x176] sm:$0xff]  ;;  %v1100_v8 = vmul.f32 %v16331_v61, %v19724_v36  ;;  %v1649_v36 = vmul.f32 %v16350_v42, %v16233_v40 }
 0x46b   :  { %v5660_v2 = vld [vmem:[#allocation2 + $0x16e] sm:$0xff]  ;;  %v5728_v3 = vmax.f32 %v5594_v33, %v5661_v39  ;;  %v702_v14 = vld [vmem:[%s19655_s17 + $0x1f9] sm:$0xff]  ;;  %v1169_v39 = vadd.f32 %v1101_v58, %v552_v21 }
 0x46c   :  { %v5727_v34 = vmax.f32 %v5593_v5, %v5660_v2  ;;  %v4250_v59 = vpop.permute.xlu1 %4249  ;;  %v701_v33 = vld [vmem:[%s19655_s17 + $0x1f1] sm:$0xff]  ;;  %v2894_v21 = vld [vmem:[%s19655_s17 + $0x1e7] sm:$0xff] }
 0x46d   :  { %v4245_v37 = vpop.permute.xlu0 %4244  ;;  %476 = vperm.xlu1 %12906, %v153_v12   ;;  %v5795_v7 = vmax.f32 %v5527_v29, %v5728_v3  ;;  %v19726_v12 = vld [vmem:[#allocation24_spill] sm:$0xff]  ;;  %v1718_v40 = vadd.f32 %v1650_v62, %v1169_v39 }
 0x46e   :  { %v5794_v6 = vmax.f32 %v5526_v1, %v5727_v34  ;;  %471 = vperm.xlu0 %12905, %v152_v31   ;;  %v551_v29 = vmul.f32 %v16343_v52, %v19726_v12  ;;  %v1798_v1 = vld [vmem:[%s19655_s17 + $0x1f5] sm:$0xff]  ;;  %v2748_v34 = vmul.f32 %v16381_v56, %v16390_v60  ;;  %v3296_v60 = vmul.f32 %v16395_v13, %v16487_v28 }
 0x46f   :  { %v2267_v58 = vadd.f32 %v2199_v25, %v1718_v40  ;;  %v4394_v25 = vmul.f32 %v16423_v47, %v4245_v37 }
 0x470   :  { %v12426_v5 = vpack.c.bf16 %v5795_v7, %v5794_v6  ;;  %v16630_v2 = vpop.permute.xlu1 %1534  ;;  %v1168_v19 = vadd.f32 %v1100_v8, %v551_v29  ;;  %v2198_v7 = vmul.f32 %v16366_v50, %v16309_v26  ;;  %v3297_v6 = vmul.f32 %v16395_v13, %v16485_v23  ;;  %v2893_v23 = vld [vmem:[%s19655_s17 + $0x1df] sm:$0xff] }
 0x471   :  { %v16634_v31 = vpop.permute.xlu0 %1529  ;;  %1025 = vperm.xlu1 %12906, %v702_v14   ;;  %v2816_v62 = vadd.f32 %v2748_v34, %v2267_v58  ;;  %v4395_v29 = vmul.f32 %v16423_v47, %v4250_v59  ;;  %v1250_v58 = vld [vmem:[%s19655_s17 + $0x1f2] sm:$0xff] }
 0x472   :  { %12427 = vmatpush1.bf16.msra.mxu0 %v12426_v5  ;;  %1020 = vperm.xlu0 %12905, %v701_v33   ;;  %v1717_v3 = vadd.f32 %v1649_v36, %v1168_v19  ;;  %v3845_v33 = vmul.f32 %v16409_v22, %v16553_v10  ;;  %v3989_v10 = vld [vmem:[%s19655_s17 + $0x1db] sm:$0xff] }
 0x473   :  { %12428 = vmatprep.subr.bf16.mxu0 %v19665_v46  ;;  %v3365_v28 = vadd.f32 %v3297_v6, %v2816_v62 }
 0x474   :  { %v16649_v26 = vpop.permute.xlu1 %2622  ;;  %v2266_v14 = vadd.f32 %v2198_v7, %v1717_v3  ;;  %v16684_v3 = vld [vmem:[%s19655_s17 + $0x1fa] sm:$0xff] }
 0x475   :  { %v16653_v8 = vpop.permute.xlu0 %2617  ;;  %2113 = vperm.xlu1 %12906, %v1798_v1   ;;  %v3914_v19 = vadd.f32 %v3846_v4, %v3365_v28  ;;  %v2347_v4 = vld [vmem:[%s19655_s17 + $0x1f6] sm:$0xff] }
 0x476   :  { %2108 = vperm.xlu0 %12905, %v1797_v63   ;;  %v2815_v5 = vadd.f32 %v2747_v43, %v2266_v14 }
 0x477   :  { %v4463_v40 = vadd.f32 %v4395_v29, %v3914_v19  ;;  %v4538_v19 = vld [vmem:[%s19655_s17 + $0x1dc] sm:$0xff] }
 0x478   :  { %v16667_v12 = vpop.permute.xlu1 %3710  ;;  %v3364_v39 = vadd.f32 %v3296_v60, %v2815_v5  ;;  %v2346_v5 = vld [vmem:[%s19655_s17 + $0x1ee] sm:$0xff] }
 0x479   :  { %v16670_v36 = vpop.permute.xlu0 %3705  ;;  %3201 = vperm.xlu1 %12906, %v2894_v21  }
 0x47a   :  { %3196 = vperm.xlu0 %12905, %v2893_v23   ;;  %v3913_v7 = vadd.f32 %v3845_v33, %v3364_v39 }
 0x47c   :  { %v4799_v1 = vpop.permute.xlu1 %4798  ;;  %v4462_v63 = vadd.f32 %v4394_v25, %v3913_v7  ;;  %v5394_v7 = vld [vmem:[#allocation2 + $0x170] sm:$0xff] }
 0x47d   :  { %v4944_v59 = vmul.f32 %v16438_v55, %v4799_v1  ;;  %v4794_v34 = vpop.permute.xlu0 %4793  ;;  %4289 = vperm.xlu1 %12906, %v3990_v16   ;;  %v4539_v16 = vld [vmem:[%s19655_s17 + $0x1e4] sm:$0xff]  ;;  %v5395_v1 = vld [vmem:[#allocation2 + $0x178] sm:$0xff] }
 0x47e   :  { %v4943_v37 = vmul.f32 %v16438_v55, %v4794_v34  ;;  %4284 = vperm.xlu0 %12905, %v3989_v10  }
 0x47f   :  { %v5012_v43 = vadd.f32 %v4944_v59, %v4463_v40  ;;  %v5461_v40 = vld [vmem:[#allocation2 + $0x171] sm:$0xff] }
 0x480   :  { %v5011_v6 = vadd.f32 %v4943_v37, %v4462_v63  ;;  %v16689_v14 = vpop.permute.xlu1 %446 }
 0x481   :  { %v5087_v60 = vadd.f32 %v16455_v44, %v5012_v43  ;;  %v16692_v21 = vpop.permute.xlu0 %441  ;;  %1574 = vperm.xlu1 %12906, %v16684_v3  }
 0x482   :  { %19727 = vst [vmem:[#allocation19_spill] sm:$0xff] %v16692_v21  ;;  %v5086_v62 = vadd.f32 %v16455_v44, %v5011_v6  ;;  %1569 = vperm.xlu0 %12905, %v1250_v58  }
 0x483   :  { %v5155_v23 = vmax.f32 %v5087_v60, 0.0  ;;  %v154_v60 = vld [vmem:[%s19655_s17 + $0x200] sm:$0xff] }
 0x484   :  { %v5154_v33 = vmax.f32 %v5086_v62, 0.0  ;;  %v16702_v28 = vpop.permute.xlu1 %995  ;;  %v5528_v62 = vmax.f32 %v5394_v7, %v5461_v40  ;;  %v554_v7 = vmul.f32 %v16343_v52, %v16288_v35  ;;  %v1652_v40 = vmul.f32 %v16350_v42, %v16361_v9 }
 0x485   :  { %5224 = vst.msk [vmem:[#allocation2 + $0x188] sm:$0xff] %vm5174_vm0, %v5155_v23  ;;  %v16705_v29 = vpop.permute.xlu0 %990  ;;  %2662 = vperm.xlu1 %12906, %v2347_v4   ;;  %v2201_v35 = vmul.f32 %v16366_v50, %v16474_v57  ;;  %v1799_v57 = vld [vmem:[%s19655_s17 + $0x1fd] sm:$0xff] }
 0x486   :  { %5223 = vst.msk [vmem:[#allocation2 + $0x180] sm:$0xff] %vm5174_vm0, %v5154_v33  ;;  %2657 = vperm.xlu0 %12905, %v2346_v5   ;;  %v1103_v33 = vmul.f32 %v16331_v61, %v16301_v48  ;;  %v703_v48 = vld [vmem:[%s19655_s17 + $0x201] sm:$0xff] }
 0x488   :  { %v16708_v39 = vpop.permute.xlu1 %2083 }
 0x489   :  { %v16710_v25 = vpop.permute.xlu0 %2078  ;;  %3750 = vperm.xlu1 %12906, %v1250_v58  }
 0x48a   :  { %3745 = vperm.xlu0 %12905, %v16567_v27   ;;  %v155_v27 = vld [vmem:[%s19655_s17 + $0x208] sm:$0xff] }
 0x48c   :  { %v16719_v10 = vpop.permute.xlu1 %3171 }
 0x48d   :  { %v16721_v59 = vpop.permute.xlu0 %3166  ;;  %4838 = vperm.xlu1 %12906, %v4539_v16   ;;  %v5462_v34 = vld [vmem:[#allocation2 + $0x179] sm:$0xff]  ;;  %v5596_v37 = vld [vmem:[#allocation2 + $0x185] sm:$0xff] }
 0x48e   :  { %v5595_v63 = vld [vmem:[#allocation2 + $0x17d] sm:$0xff]  ;;  %4833 = vperm.xlu0 %12905, %v4538_v19   ;;  %v5529_v43 = vmax.f32 %v5395_v1, %v5462_v34  ;;  %v5663_v6 = vld [vmem:[#allocation2 + $0x186] sm:$0xff]  ;;  %v1102_v1 = vmul.f32 %v16331_v61, %v16304_v24  ;;  %v1651_v24 = vmul.f32 %v16350_v42, %v16370_v11 }
 0x48f   :  { %v5662_v58 = vld [vmem:[#allocation2 + $0x17e] sm:$0xff]  ;;  %v5730_v23 = vmax.f32 %v5596_v37, %v5663_v6  ;;  %v704_v34 = vld [vmem:[%s19655_s17 + $0x209] sm:$0xff]  ;;  %v553_v37 = vmul.f32 %v16343_v52, %v16291_v54  ;;  %v2750_v6 = vmul.f32 %v16381_v56, %v16532_v15  ;;  %v3298_v15 = vmul.f32 %v16395_v13, %v16604_v49 }
 0x490   :  { %v5729_v4 = vmax.f32 %v5595_v63, %v5662_v58  ;;  %v4260_v5 = vpop.permute.xlu1 %4259  ;;  %v1800_v54 = vld [vmem:[%s19655_s17 + $0x205] sm:$0xff] }
 0x491   :  { %v4255_v16 = vpop.permute.xlu0 %4254  ;;  %486 = vperm.xlu1 %12906, %v155_v27   ;;  %v5797_v21 = vmax.f32 %v5529_v43, %v5730_v23  ;;  %v1171_v43 = vadd.f32 %v1103_v33, %v554_v7  ;;  %v1170_v9 = vadd.f32 %v1102_v1, %v553_v37  ;;  %v3299_v23 = vmul.f32 %v16395_v13, %v16602_v45  ;;  %v2896_v1 = vld [vmem:[%s19655_s17 + $0x1f7] sm:$0xff]  ;;  %v2895_v45 = vld [vmem:[%s19655_s17 + $0x1ef] sm:$0xff] }
 0x492   :  { %v5796_v19 = vmax.f32 %v5528_v62, %v5729_v4  ;;  %481 = vperm.xlu0 %12905, %v154_v60   ;;  %v2749_v62 = vmul.f32 %v16381_v56, %v16536_v20  ;;  %v3848_v20 = vmul.f32 %v16409_v22, %v16667_v12  ;;  %v3992_v12 = vld [vmem:[%s19655_s17 + $0x1f3] sm:$0xff] }
 0x493   :  { %v1720_v11 = vadd.f32 %v1652_v40, %v1171_v43  ;;  %v1719_v60 = vadd.f32 %v1651_v24, %v1170_v9  ;;  %v3847_v40 = vmul.f32 %v16409_v22, %v16670_v36  ;;  %v4396_v43 = vmul.f32 %v16423_v47, %v4255_v16  ;;  %v3991_v36 = vld [vmem:[%s19655_s17 + $0x1eb] sm:$0xff] }
 0x494   :  { %v12429_v63 = vpack.c.bf16 %v5797_v21, %v5796_v19  ;;  %v16747_v27 = vpop.permute.xlu1 %1544  ;;  %v2200_v21 = vmul.f32 %v16366_v50, %v16476_v41 }
 0x495   :  { %v16751_v58 = vpop.permute.xlu0 %1539  ;;  %1035 = vperm.xlu1 %12906, %v704_v34   ;;  %v2269_v4 = vadd.f32 %v2201_v35, %v1720_v11 }
 0x496   :  { %12430 = vmatpush1.bf16.msra.mxu0 %v12429_v63  ;;  %1030 = vperm.xlu0 %12905, %v703_v48   ;;  %v2268_v19 = vadd.f32 %v2200_v21, %v1719_v60  ;;  %v4397_v48 = vmul.f32 %v16423_v47, %v4260_v5 }
 0x497   :  { %12431 = vmatprep.subr.bf16.mxu0 %v19665_v46  ;;  %v2818_v34 = vadd.f32 %v2750_v6, %v2269_v4 }
 0x498   :  { %v16766_v41 = vpop.permute.xlu1 %2632  ;;  %v2817_v7 = vadd.f32 %v2749_v62, %v2268_v19  ;;  %v1252_v62 = vld [vmem:[%s19655_s17 + $0x202] sm:$0xff] }
 0x499   :  { %v16770_v33 = vpop.permute.xlu0 %2627  ;;  %2123 = vperm.xlu1 %12906, %v1800_v54   ;;  %v3367_v49 = vadd.f32 %v3299_v23, %v2818_v34  ;;  %v2349_v34 = vld [vmem:[%s19655_s17 + $0x206] sm:$0xff] }
 0x49a   :  { %2118 = vperm.xlu0 %12905, %v1799_v57   ;;  %v3366_v24 = vadd.f32 %v3298_v15, %v2817_v7  ;;  %v16801_v57 = vld [vmem:[%s19655_s17 + $0x20a] sm:$0xff] }
 0x49b   :  { %v3916_v35 = vadd.f32 %v3848_v20, %v3367_v49 }
 0x49c   :  { %v16784_v63 = vpop.permute.xlu1 %3720  ;;  %v3915_v9 = vadd.f32 %v3847_v40, %v3366_v24 }
 0x49d   :  { %v16787_v37 = vpop.permute.xlu0 %3715  ;;  %3211 = vperm.xlu1 %12906, %v2896_v1   ;;  %v4465_v54 = vadd.f32 %v4397_v48, %v3916_v35  ;;  %v5249_v48 = vld [vmem:[%s19635_s1 + $0x30] sm:$0xff] }
 0x49e   :  { %3206 = vperm.xlu0 %12905, %v2895_v45   ;;  %v4464_v6 = vadd.f32 %v4396_v43, %v3915_v9  ;;  %v2348_v45 = vld [vmem:[%s19655_s17 + $0x1fe] sm:$0xff]  ;;  %5954 = vmatprep.mubr.f32.mxu0 %v5249_v48  ;;  %v5248_v43 = vld [vmem:[%s19635_s1 + $0x28] sm:$0xff]  ;;  %v4541_v35 = vld [vmem:[%s19655_s17 + $0x1f4] sm:$0xff] }
 0x49f   :  { %5955 = vmatmul.mubr.f32.gmra.mrb[2].mxu0 %v5248_v43  ;;  %v5397_v9 = vld [vmem:[#allocation2 + $0x188] sm:$0xff]  ;;  %v5259_v43 = vld [vmem:[%s19635_s1 + $0x80] sm:$0xff] }
 0x4a0   :  { %v4809_v21 = vpop.permute.xlu1 %4808 }
 0x4a1   :  { %v4946_v5 = vmul.f32 %v16438_v55, %v4809_v21  ;;  %v4804_v11 = vpop.permute.xlu0 %4803  ;;  %4299 = vperm.xlu1 %12906, %v3992_v12   ;;  %v5254_v21 = vld [vmem:[%s19635_s1 + $0x58] sm:$0xff] }
 0x4a2   :  { %v4945_v16 = vmul.f32 %v16438_v55, %v4804_v11  ;;  %4294 = vperm.xlu0 %12905, %v3991_v36   ;;  %v4540_v36 = vld [vmem:[%s19655_s17 + $0x1ec] sm:$0xff]  ;;  %v5463_v11 = vld [vmem:[#allocation2 + $0x181] sm:$0xff]  ;;  %5959 = vmatprep.mubr.f32.mxu0 %v5254_v21 }
 0x4a3   :  { %v5014_v60 = vadd.f32 %v4946_v5, %v4465_v54  ;;  %v5396_v5 = vld [vmem:[#allocation2 + $0x180] sm:$0xff] }
 0x4a4   :  { %v5013_v4 = vadd.f32 %v4945_v16, %v4464_v6  ;;  %v16806_v23 = vpop.permute.xlu1 %456 }
 0x4a5   :  { %v5089_v19 = vadd.f32 %v16455_v44, %v5014_v60  ;;  %v16809_v15 = vpop.permute.xlu0 %451  ;;  %1584 = vperm.xlu1 %12906, %v16801_v57  }
 0x4a6   :  { %v5088_v1 = vadd.f32 %v16455_v44, %v5013_v4  ;;  %1579 = vperm.xlu0 %12905, %v1252_v62   ;;  %v1802_v4 = vld [vmem:[%s19655_s17 + $0x215] sm:$0xff] }
 0x4a7   :  { %v5157_v20 = vmax.f32 %v5089_v19, 0.0 }
 0x4a8   :  { %v5156_v7 = vmax.f32 %v5088_v1, 0.0  ;;  %v16819_v40 = vpop.permute.xlu1 %1005 }
 0x4a9   :  { %5226 = vst.msk [vmem:[#allocation2 + $0x198] sm:$0xff] %vm5174_vm0, %v5157_v20  ;;  %v16822_v49 = vpop.permute.xlu0 %1000  ;;  %2672 = vperm.xlu1 %12906, %v2349_v34   ;;  %v1801_v20 = vld [vmem:[%s19655_s17 + $0x20d] sm:$0xff] }
 0x4aa   :  { %5225 = vst.msk [vmem:[#allocation2 + $0x190] sm:$0xff] %vm5174_vm0, %v5156_v7  ;;  %2667 = vperm.xlu0 %12905, %v2348_v45   ;;  %v5530_v45 = vmax.f32 %v5396_v5, %v5463_v11  ;;  %v1104_v5 = vmul.f32 %v16331_v61, %v16471_v32  ;;  %v2898_v11 = vld [vmem:[%s19655_s17 + $0x207] sm:$0xff]  ;;  %v19728_v32 = vld [vmem:[#allocation16_spill] sm:$0xff] }
 0x4ac   :  { %v16828_v24 = vpop.permute.xlu1 %2093 }
 0x4ad   :  { %v16833_v12 = vpop.permute.xlu0 %2088  ;;  %3760 = vperm.xlu1 %12906, %v1252_v62  }
 0x4ae   :  { %3755 = vperm.xlu0 %12905, %v16684_v3   ;;  %v5253_v3 = vld [vmem:[%s19635_s1 + $0x50] sm:$0xff] }
 0x4af   :  { %5960 = vmatmul.mubr.f32.gmra.mrb[4].mxu0 %v5253_v3 }
 0x4b0   :  { %v16845_v54 = vpop.permute.xlu1 %3181  ;;  %5964 = vmatprep.mubr.f32.mxu0 %v5259_v43  ;;  %v2751_v43 = vmul.f32 %v16381_v56, %v16653_v8 }
 0x4b1   :  { %v16850_v6 = vpop.permute.xlu0 %3176  ;;  %4848 = vperm.xlu1 %12906, %v4541_v35   ;;  %v5464_v16 = vld [vmem:[#allocation2 + $0x189] sm:$0xff]  ;;  %v5598_v62 = vld [vmem:[#allocation2 + $0x195] sm:$0xff] }
 0x4b2   :  { %v5597_v60 = vld [vmem:[#allocation2 + $0x18d] sm:$0xff]  ;;  %4843 = vperm.xlu0 %12905, %v4540_v36   ;;  %v5531_v19 = vmax.f32 %v5397_v9, %v5464_v16  ;;  %v5665_v34 = vld [vmem:[#allocation2 + $0x196] sm:$0xff]  ;;  %v1105_v9 = vmul.f32 %v16331_v61, %v16468_v18 }
 0x4b3   :  { %v5664_v1 = vld [vmem:[#allocation2 + $0x18e] sm:$0xff]  ;;  %v5732_v48 = vmax.f32 %v5598_v62, %v5665_v34  ;;  %v5258_v36 = vld [vmem:[%s19635_s1 + $0x78] sm:$0xff]  ;;  %v1654_v62 = vmul.f32 %v16350_v42, %v16513_v51 }
 0x4b4   :  { %v5731_v7 = vmax.f32 %v5597_v60, %v5664_v1  ;;  %v4270_v35 = vpop.permute.xlu1 %4269  ;;  %5965 = vmatmul.mubr.f32.gmra.mrb[6].mxu0 %v5258_v36  ;;  %v556_v60 = vmul.f32 %v16343_v52, %v16450_v0  ;;  %v5264_v61 = vld [vmem:[%s19635_s1 + $0xa8] sm:$0xff]  ;;  %v1653_v1 = vmul.f32 %v16350_v42, %v16517_v53  ;;  %v5263_v0 = vld [vmem:[%s19635_s1 + $0xa0] sm:$0xff] }
 0x4b5   :  { %v4265_v21 = vpop.permute.xlu0 %4264  ;;  %2133 = vperm.xlu1 %12906, %v1802_v4   ;;  %v5799_v16 = vmax.f32 %v5531_v19, %v5732_v48  ;;  %v2897_v4 = vld [vmem:[%s19655_s17 + $0x1ff] sm:$0xff]  ;;  %v555_v19 = vmul.f32 %v16343_v52, %v19728_v32  ;;  %5969 = vmatprep.mubr.f32.mxu0 %v5264_v61  ;;  %v2202_v52 = vmul.f32 %v16366_v50, %v16593_v30 }
 0x4b6   :  { %v5798_v3 = vmax.f32 %v5530_v45, %v5731_v7  ;;  %2128 = vperm.xlu0 %12905, %v1801_v20   ;;  %v1173_v51 = vadd.f32 %v1105_v9, %v556_v60  ;;  %v2203_v20 = vmul.f32 %v16366_v50, %v16591_v17  ;;  %v3994_v42 = vld [vmem:[%s19655_s17 + $0x203] sm:$0xff]  ;;  %v2752_v48 = vmul.f32 %v16381_v56, %v16649_v26  ;;  %v3993_v17 = vld [vmem:[%s19655_s17 + $0x1fb] sm:$0xff]  ;;  %v5269_v50 = vld [vmem:[%s19635_s1 + $0xd0] sm:$0xff] }
 0x4b7   :  { %v1172_v7 = vadd.f32 %v1104_v5, %v555_v19  ;;  %v5268_v26 = vld [vmem:[%s19635_s1 + $0xc8] sm:$0xff]  ;;  %v2351_v56 = vld [vmem:[%s19655_s17 + $0x216] sm:$0xff]  ;;  %v3850_v60 = vmul.f32 %v16409_v22, %v16784_v63  ;;  %v4399_v61 = vmul.f32 %v16423_v47, %v4270_v35 }
 0x4b8   :  { %v12432_v18 = vpack.c.bf16 %v5799_v16, %v5798_v3  ;;  %v16885_v34 = vpop.permute.xlu1 %1554  ;;  %v1722_v53 = vadd.f32 %v1654_v62, %v1173_v51  ;;  %5970 = vmatmul.mubr.f32.gmra.mrb[8].mxu0 %v5263_v0  ;;  %v3301_v3 = vmul.f32 %v16395_v13, %v16719_v10  ;;  %v2350_v10 = vld [vmem:[%s19655_s17 + $0x20e] sm:$0xff]  ;;  %v5274_v62 = vld [vmem:[%s19635_s1 + $0xf8] sm:$0xff]  ;;  %v5279_v0 = vld [vmem:[%s19635_s1 + $0x120] sm:$0xff] }
 0x4b9   :  { %v16892_v45 = vpop.permute.xlu0 %1549  ;;  %3221 = vperm.xlu1 %12906, %v2898_v11   ;;  %v1721_v30 = vadd.f32 %v1653_v1, %v1172_v7  ;;  %5974 = vmatprep.mubr.f32.mxu0 %v5269_v50  ;;  %v3300_v11 = vmul.f32 %v16395_v13, %v16721_v59  ;;  %v3849_v13 = vmul.f32 %v16409_v22, %v16787_v37  ;;  %v5273_v63 = vld [vmem:[%s19635_s1 + $0xf0] sm:$0xff]  ;;  %v5284_v50 = vld [vmem:[%s19635_s1 + $0x148] sm:$0xff] }
 0x4ba   :  { %12433 = vmatpush1.bf16.msra.mxu0 %v12432_v18  ;;  %3216 = vperm.xlu0 %12905, %v2897_v4   ;;  %v2271_v9 = vadd.f32 %v2203_v20, %v1722_v53  ;;  %v4398_v1 = vmul.f32 %v16423_v47, %v4265_v21  ;;  %v16946_v22 = vld [vmem:[%s19655_s17 + $0x212] sm:$0xff]  ;;  %v4543_v53 = vld [vmem:[%s19655_s17 + $0x204] sm:$0xff] }
 0x4bb   :  { %12434 = vmatprep.subr.bf16.mxu0 %v19665_v46  ;;  %v2270_v5 = vadd.f32 %v2202_v52, %v1721_v30  ;;  %v5278_v20 = vld [vmem:[%s19635_s1 + $0x118] sm:$0xff] }
 0x4bc   :  { %v16910_v36 = vpop.permute.xlu1 %2642  ;;  %v2820_v8 = vadd.f32 %v2752_v48, %v2271_v9  ;;  %5975 = vmatmul.mubr.f32.gmra.mrb[10].mxu0 %v5268_v26 }
 0x4bd   :  { %v16917_v16 = vpop.permute.xlu0 %2637  ;;  %4309 = vperm.xlu1 %12906, %v3994_v42   ;;  %v2819_v18 = vadd.f32 %v2751_v43, %v2270_v5  ;;  %5979 = vmatprep.mubr.f32.mxu0 %v5274_v62 }
 0x4be   :  { %4304 = vperm.xlu0 %12905, %v3993_v17   ;;  %v3369_v4 = vadd.f32 %v3301_v3, %v2820_v8  ;;  %v4542_v17 = vld [vmem:[%s19655_s17 + $0x1fc] sm:$0xff] }
 0x4bf   :  { %v3368_v19 = vadd.f32 %v3300_v11, %v2819_v18  ;;  %v2900_v3 = vld [vmem:[%s19655_s17 + $0x217] sm:$0xff]  ;;  %v2899_v11 = vld [vmem:[%s19655_s17 + $0x20f] sm:$0xff]  ;;  %v16994_v18 = vld [vmem:[%s19638_s4 + $0x1] ss:$0 sm:$0xff] }
 0x4c0   :  { %v16934_v59 = vpop.permute.xlu1 %3730  ;;  %v3918_v37 = vadd.f32 %v3850_v60, %v3369_v4  ;;  %5980 = vmatmul.mubr.f32.gmra.mrb[12].mxu0 %v5273_v63 }
 0x4c1   :  { %v16940_v32 = vpop.permute.xlu0 %3725  ;;  %2682 = vperm.xlu1 %12906, %v2351_v56   ;;  %v3917_v51 = vadd.f32 %v3849_v13, %v3368_v19  ;;  %5984 = vmatprep.mubr.f32.mxu0 %v5279_v0  ;;  %v5289_v56 = vld [vmem:[%s19635_s1 + $0x170] sm:$0xff]  ;;  %v5294_v0 = vld [vmem:[%s19635_s1 + $0x198] sm:$0xff] }
 0x4c2   :  { %2677 = vperm.xlu0 %12905, %v2350_v10   ;;  %v4467_v47 = vadd.f32 %v4399_v61, %v3918_v37  ;;  %v16988_v10 = vld [vmem:[%s19638_s4] ss:$0 sm:$0xff]  ;;  %v3996_v19 = vld [vmem:[%s19655_s17 + $0x213] sm:$0xff]  ;;  %v3995_v37 = vld [vmem:[%s19655_s17 + $0x20b] sm:$0xff] }
 0x4c3   :  { %v4466_v52 = vadd.f32 %v4398_v1, %v3917_v51 }
 0x4c4   :  { %v4819_v35 = vpop.permute.xlu1 %4818  ;;  %5985 = vmatmul.mubr.f32.gmra.mrb[14].mxu0 %v5278_v20  ;;  %v5293_v20 = vld [vmem:[%s19635_s1 + $0x190] sm:$0xff] }
 0x4c5   :  { %v4948_v21 = vmul.f32 %v16438_v55, %v4819_v35  ;;  %v4814_v7 = vpop.permute.xlu0 %4813  ;;  %3770 = vperm.xlu1 %12906, %v16946_v22   ;;  %5989 = vmatprep.mubr.f32.mxu0 %v5284_v50  ;;  %v5298_v50 = vld [vmem:[%s19635_s1 + $0x1b8] sm:$0xff] }
 0x4c6   :  { %v4947_v42 = vmul.f32 %v16438_v55, %v4814_v7  ;;  %3765 = vperm.xlu0 %12905, %v16801_v57   ;;  %v5283_v55 = vld [vmem:[%s19635_s1 + $0x140] sm:$0xff] }
 0x4c7   :  { %v5016_v48 = vadd.f32 %v4948_v21, %v4467_v47  ;;  %v3449_v21 = vld [vmem:[%s19655_s17 + $0x222] sm:$0xff]  ;;  %v17026_v7 = vld [vmem:[%s19655_s17 + $0x21a] sm:$0xff] }
 0x4c8   :  { %v5015_v30 = vadd.f32 %v4947_v42, %v4466_v52  ;;  %v467_v43 = vpop.permute.xlu1 %466  ;;  %5990 = vmatmul.mubr.f32.gmra.mrb[16].mxu0 %v5283_v55  ;;  %v5399_v52 = vld [vmem:[#allocation2 + $0x198] sm:$0xff]  ;;  %v5299_v42 = vld [vmem:[%s19635_s1 + $0x1c0] sm:$0xff] }
 0x4c9   :  { %v5091_v57 = vadd.f32 %v16455_v44, %v5016_v48  ;;  %v462_v26 = vpop.permute.xlu0 %461  ;;  %4858 = vperm.xlu1 %12906, %v4543_v53   ;;  %5994 = vmatprep.mubr.f32.mxu0 %v5289_v56  ;;  %v564_v62 = vmul.f32 %v16988_v10, %v467_v43  ;;  %v5398_v48 = vld [vmem:[#allocation2 + $0x190] sm:$0xff] }
 0x4ca   :  { %v5090_v9 = vadd.f32 %v16455_v44, %v5015_v30  ;;  %4853 = vperm.xlu0 %12905, %v4542_v17   ;;  %v5288_v44 = vld [vmem:[%s19635_s1 + $0x168] sm:$0xff]  ;;  %v563_v4 = vmul.f32 %v16988_v10, %v462_v26  ;;  %v5465_v17 = vld [vmem:[#allocation2 + $0x191] sm:$0xff]  ;;  %v1107_v26 = vmul.f32 %v16994_v18, %v16585_v38 }
 0x4cb   :  { %v5159_v5 = vmax.f32 %v5091_v57, 0.0  ;;  %v5304_v38 = vld [vmem:[%s19635_s1 + $0x1e8] sm:$0xff] }
 0x4cc   :  { %v5158_v8 = vmax.f32 %v5090_v9, 0.0  ;;  %v1016_v60 = vpop.permute.xlu1 %1015  ;;  %5995 = vmatmul.mubr.f32.gmra.mrb[18].mxu0 %v5288_v44  ;;  %v19729_v9 = vld [vmem:[#allocation22_spill] sm:$0xff]  ;;  %v5532_v44 = vmax.f32 %v5398_v48, %v5465_v17 }
 0x4cd   :  { %5228 = vst.msk [vmem:[#allocation2 + $0x1a8] sm:$0xff] %vm5174_vm0, %v5159_v5  ;;  %v1113_v13 = vmul.f32 %v16994_v18, %v1016_v60  ;;  %v1011_v63 = vpop.permute.xlu0 %1010  ;;  %3231 = vperm.xlu1 %12906, %v2900_v3   ;;  %5999 = vmatprep.mubr.f32.mxu0 %v5294_v0  ;;  %v1106_v3 = vmul.f32 %v16994_v18, %v19729_v9  ;;  %v4545_v5 = vld [vmem:[%s19655_s17 + $0x214] sm:$0xff]  ;;  %v4544_v60 = vld [vmem:[%s19655_s17 + $0x20c] sm:$0xff]  ;;  %v5303_v0 = vld [vmem:[%s19635_s1 + $0x1e0] sm:$0xff] }
 0x4ce   :  { %5227 = vst.msk [vmem:[#allocation2 + $0x1a0] sm:$0xff] %vm5174_vm0, %v5158_v8  ;;  %v1112_v61 = vmul.f32 %v16994_v18, %v1011_v63  ;;  %3226 = vperm.xlu0 %12905, %v2899_v11   ;;  %v19730_v63 = vld [vmem:[#allocation20_spill] sm:$0xff] }
 0x4cf   :  { %v17003_v1 = vadd.f32 %v1113_v13, %v564_v62 }
 0x4d0   :  { %v17011_v51 = vadd.f32 %v1112_v61, %v563_v4  ;;  %v17013_v35 = vpop.permute.xlu1 %2103  ;;  %6000 = vmatmul.mubr.f32.gmra.mrb[20].mxu0 %v5293_v20  ;;  %v558_v4 = vmul.f32 %v16988_v10, %v19730_v63  ;;  %v19731_v61 = vld [vmem:[#allocation18_spill] sm:$0xff]  ;;  %v1111_v20 = vmul.f32 %v16994_v18, %v16819_v40 }
 0x4d1   :  { %v17018_v47 = vpop.permute.xlu0 %2098  ;;  %4319 = vperm.xlu1 %12906, %v3996_v19   ;;  %6004 = vmatprep.mubr.f32.mxu0 %v5299_v42  ;;  %v557_v19 = vmul.f32 %v16988_v10, %v19731_v61  ;;  %v3998_v40 = vld [vmem:[%s19655_s17 + $0x223] sm:$0xff] }
 0x4d2   :  { %4314 = vperm.xlu0 %12905, %v3995_v37   ;;  %v1175_v48 = vadd.f32 %v1107_v26, %v558_v4  ;;  %v562_v26 = vmul.f32 %v16988_v10, %v16806_v23  ;;  %v4546_v61 = vld [vmem:[%s19655_s17 + $0x21c] sm:$0xff] }
 0x4d3   :  { %v1174_v17 = vadd.f32 %v1106_v3, %v557_v19  ;;  %v5314_v19 = vld [vmem:[%s19635_s1 + $0x238] sm:$0xff] }
 0x4d4   :  { %v17031_v53 = vpop.permute.xlu1 %3191  ;;  %6005 = vmatmul.mubr.f32.gmra.mrb[22].mxu0 %v5298_v50  ;;  %v17068_v50 = vld [vmem:[%s19638_s4 + $0x2] ss:$0 sm:$0xff] }
 0x4d5   :  { %v17036_v30 = vpop.permute.xlu0 %3186  ;;  %3780 = vperm.xlu1 %12906, %v3449_v21   ;;  %v5466_v43 = vld [vmem:[#allocation2 + $0x199] sm:$0xff]  ;;  %v5600_v57 = vld [vmem:[#allocation2 + $0x1a5] sm:$0xff]  ;;  %6009 = vmatprep.mubr.f32.mxu0 %v5304_v38  ;;  %v1660_v9 = vmul.f32 %v17068_v50, %v16885_v34 }
 0x4d6   :  { %v5599_v55 = vld [vmem:[#allocation2 + $0x19d] sm:$0xff]  ;;  %3775 = vperm.xlu0 %12905, %v17026_v7   ;;  %v5533_v11 = vmax.f32 %v5399_v52, %v5466_v43  ;;  %v5667_v8 = vld [vmem:[#allocation2 + $0x1a6] sm:$0xff]  ;;  %v1656_v43 = vmul.f32 %v17068_v50, %v16630_v2 }
 0x4d7   :  { %v5666_v56 = vld [vmem:[#allocation2 + $0x19e] sm:$0xff]  ;;  %v5734_v13 = vmax.f32 %v5600_v57, %v5667_v8  ;;  %v1655_v57 = vmul.f32 %v17068_v50, %v16634_v31  ;;  %v5308_v8 = vld [vmem:[%s19635_s1 + $0x208] sm:$0xff] }
 0x4d8   :  { %v5733_v62 = vmax.f32 %v5599_v55, %v5666_v56  ;;  %v17056_v37 = vpop.permute.xlu1 %4279  ;;  %v1110_v55 = vmul.f32 %v16994_v18, %v16822_v49  ;;  %v3997_v2 = vld [vmem:[%s19655_s17 + $0x21b] sm:$0xff]  ;;  %6010 = vmatmul.mubr.f32.gmra.mrb[24].mxu0 %v5303_v0  ;;  %v5309_v49 = vld [vmem:[%s19635_s1 + $0x210] sm:$0xff]  ;;  %v17092_v31 = vld [vmem:[%s19638_s4 + $0x3] ss:$0 sm:$0xff]  ;;  %v1724_v38 = vadd.f32 %v1656_v43, %v1175_v48 }
 0x4d9   :  { %v17063_v21 = vpop.permute.xlu0 %4274  ;;  %4868 = vperm.xlu1 %12906, %v4545_v5   ;;  %v5801_v42 = vmax.f32 %v5533_v11, %v5734_v13  ;;  %v2205_v23 = vmul.f32 %v17092_v31, %v16708_v39  ;;  %v2204_v34 = vmul.f32 %v17092_v31, %v16710_v25  ;;  %v561_v5 = vmul.f32 %v16988_v10, %v16809_v15  ;;  %v4547_v13 = vld [vmem:[%s19655_s17 + $0x224] sm:$0xff] }
 0x4da   :  { %v5800_v52 = vmax.f32 %v5532_v44, %v5733_v62  ;;  %4863 = vperm.xlu0 %12905, %v4544_v60   ;;  %v1659_v11 = vmul.f32 %v17068_v50, %v16892_v45  ;;  %6014 = vmatprep.mubr.f32.mxu0 %v5309_v49  ;;  %v1179_v60 = vadd.f32 %v1111_v20, %v562_v26  ;;  %v17142_v43 = vld [vmem:[%s19638_s4 + $0x5] ss:$0 sm:$0xff] }
 0x4db   :  { %v2209_v44 = vmul.f32 %v17092_v31, %v17013_v35  ;;  %v1178_v62 = vadd.f32 %v1110_v55, %v561_v5  ;;  %v2208_v15 = vmul.f32 %v17092_v31, %v17018_v47  ;;  %v17118_v35 = vld [vmem:[%s19638_s4 + $0x4] ss:$0 sm:$0xff]  ;;  %v1723_v0 = vadd.f32 %v1655_v57, %v1174_v17 }
 0x4dc   :  { %v12435_v3 = vpack.c.bf16 %v5801_v42, %v5800_v52  ;;  %v1565_v56 = vpop.permute.xlu1 %1564  ;;  %v2754_v63 = vmul.f32 %v17118_v35, %v16766_v41  ;;  %v1728_v4 = vadd.f32 %v1660_v9, %v1179_v60  ;;  %6015 = vmatmul.mubr.f32.gmra.mrb[26].mxu0 %v5308_v8  ;;  %v2753_v20 = vmul.f32 %v17118_v35, %v16770_v33 }
 0x4dd   :  { %v1662_v39 = vmul.f32 %v17068_v50, %v1565_v56  ;;  %v1560_v25 = vpop.permute.xlu0 %1559  ;;  %4329 = vperm.xlu1 %12906, %v3998_v40   ;;  %v1727_v52 = vadd.f32 %v1659_v11, %v1178_v62  ;;  %6019 = vmatprep.mubr.f32.mxu0 %v5314_v19  ;;  %v2273_v48 = vadd.f32 %v2205_v23, %v1724_v38 }
 0x4de   :  { %12436 = vmatpush1.bf16.msra.mxu0 %v12435_v3  ;;  %v1661_v45 = vmul.f32 %v17068_v50, %v1560_v25  ;;  %4324 = vperm.xlu0 %12905, %v3997_v2   ;;  %v3303_v17 = vmul.f32 %v17142_v43, %v16845_v54  ;;  %v2277_v33 = vadd.f32 %v2209_v44, %v1728_v4  ;;  %v157_v3 = vld [vmem:[%s19655_s17 + $0x218] sm:$0xff]  ;;  %v17156_v54 = vld [vmem:[%s19638_s4 + $0x6] ss:$0 sm:$0xff]  ;;  %v17180_v44 = vld [vmem:[%s19638_s4 + $0x7] ss:$0 sm:$0xff] }
 0x4df   :  { %12437 = vmatprep.subr.bf16.mxu0 %v19665_v46  ;;  %v17123_v47 = vadd.f32 %v1662_v39, %v17003_v1  ;;  %v5313_v1 = vld [vmem:[%s19635_s1 + $0x230] sm:$0xff]  ;;  %v2272_v40 = vadd.f32 %v2204_v34, %v1723_v0  ;;  %v3302_v57 = vmul.f32 %v17142_v43, %v16850_v6  ;;  %v2276_v26 = vadd.f32 %v2208_v15, %v1727_v52  ;;  %v5319_v34 = vld [vmem:[%s19635_s1 + $0x260] sm:$0xff] }
 0x4e0   :  { %v17134_v41 = vadd.f32 %v1661_v45, %v17011_v51  ;;  %v2653_v42 = vpop.permute.xlu1 %2652  ;;  %v2822_v2 = vadd.f32 %v2754_v63, %v2273_v48  ;;  %v3852_v49 = vmul.f32 %v17156_v54, %v16934_v59  ;;  %v156_v6 = vld [vmem:[%s19655_s17 + $0x210] sm:$0xff]  ;;  %6020 = vmatmul.mubr.f32.gmra.mrb[28].mxu0 %v5313_v1  ;;  %v3851_v11 = vmul.f32 %v17156_v54, %v16940_v32  ;;  %v5318_v59 = vld [vmem:[%s19635_s1 + $0x258] sm:$0xff] }
 0x4e1   :  { %v2758_v55 = vmul.f32 %v17118_v35, %v2653_v42  ;;  %v2648_v51 = vpop.permute.xlu0 %2647  ;;  %4878 = vperm.xlu1 %12906, %v4547_v13   ;;  %v2821_v5 = vadd.f32 %v2753_v20, %v2272_v40  ;;  %6024 = vmatprep.mubr.f32.mxu0 %v5319_v34  ;;  %v4401_v39 = vmul.f32 %v17180_v44, %v17056_v37  ;;  %v706_v15 = vld [vmem:[%s19655_s17 + $0x219] sm:$0xff]  ;;  %v705_v13 = vld [vmem:[%s19655_s17 + $0x211] sm:$0xff]  ;;  %v5324_v37 = vld [vmem:[%s19635_s1 + $0x288] sm:$0xff] }
 0x4e2   :  { %v2757_v9 = vmul.f32 %v17118_v35, %v2648_v51  ;;  %4873 = vperm.xlu0 %12905, %v4546_v61   ;;  %v3371_v60 = vadd.f32 %v3303_v17, %v2822_v2  ;;  %v4400_v62 = vmul.f32 %v17180_v44, %v17063_v21  ;;  %v5323_v21 = vld [vmem:[%s19635_s1 + $0x280] sm:$0xff]  ;;  %v17203_v61 = vld [vmem:[%s19638_s4 + $0x8] ss:$0 sm:$0xff]  ;;  %v5329_v1 = vld [vmem:[%s19635_s1 + $0x2b0] sm:$0xff] }
 0x4e3   :  { %v17160_v23 = vadd.f32 %v2758_v55, %v2277_v33  ;;  %v3370_v32 = vadd.f32 %v3302_v57, %v2821_v5  ;;  %v5328_v33 = vld [vmem:[%s19635_s1 + $0x2a8] sm:$0xff]  ;;  %v17216_v55 = vld [vmem:[%s19639_s5] ss:$0 sm:$0xff]  ;;  %v5334_v2 = vld [vmem:[%s19635_s1 + $0x2d8] sm:$0xff] }
 0x4e4   :  { %v17170_v56 = vadd.f32 %v2757_v9, %v2276_v26  ;;  %v17172_v8 = vpop.permute.xlu1 %3740  ;;  %v3920_v45 = vadd.f32 %v3852_v49, %v3371_v60  ;;  %6025 = vmatmul.mubr.f32.gmra.mrb[30].mxu0 %v5318_v59  ;;  %v1804_v26 = vld [vmem:[%s19655_s17 + $0x225] sm:$0xff] }
 0x4e5   :  { %v17184_v25 = vpop.permute.xlu0 %3735  ;;  %496 = vperm.xlu1 %12906, %v157_v3   ;;  %v3919_v38 = vadd.f32 %v3851_v11, %v3370_v32  ;;  %6029 = vmatprep.mubr.f32.mxu0 %v5324_v37  ;;  %v1803_v3 = vld [vmem:[%s19655_s17 + $0x21d] sm:$0xff]  ;;  %v2353_v60 = vld [vmem:[%s19655_s17 + $0x226] sm:$0xff] }
 0x4e6   :  { %491 = vperm.xlu0 %12905, %v156_v6   ;;  %v4469_v4 = vadd.f32 %v4401_v39, %v3920_v45  ;;  %v2352_v32 = vld [vmem:[%s19655_s17 + $0x21e] sm:$0xff] }
 0x4e7   :  { %v4468_v20 = vadd.f32 %v4400_v62, %v3919_v38  ;;  %v5339_v62 = vld [vmem:[%s19635_s1 + $0x300] sm:$0xff] }
 0x4e8   :  { %v4829_v63 = vpop.permute.xlu1 %4828  ;;  %6030 = vmatmul.mubr.f32.gmra.mrb[32].mxu0 %v5323_v21  ;;  %v2902_v21 = vld [vmem:[%s19655_s17 + $0x227] sm:$0xff] }
 0x4e9   :  { %v4950_v19 = vmul.f32 %v17203_v61, %v4829_v63  ;;  %v4824_v0 = vpop.permute.xlu0 %4823  ;;  %1045 = vperm.xlu1 %12906, %v706_v15   ;;  %6034 = vmatprep.mubr.f32.mxu0 %v5329_v1  ;;  %v5400_v1 = vld [vmem:[#allocation2 + $0x1a0] sm:$0xff] }
 0x4ea   :  { %v4949_v52 = vmul.f32 %v17203_v61, %v4824_v0  ;;  %1040 = vperm.xlu0 %12905, %v705_v13   ;;  %v5338_v13 = vld [vmem:[%s19635_s1 + $0x2f8] sm:$0xff]  ;;  %v5401_v0 = vld [vmem:[#allocation2 + $0x1a8] sm:$0xff] }
 0x4eb   :  { %v5018_v42 = vadd.f32 %v4950_v19, %v4469_v4  ;;  %v2901_v19 = vld [vmem:[%s19655_s17 + $0x21f] sm:$0xff] }
 0x4ec   :  { %v5017_v48 = vadd.f32 %v4949_v52, %v4468_v20  ;;  %v477_v17 = vpop.permute.xlu1 %476  ;;  %6035 = vmatmul.mubr.f32.gmra.mrb[34].mxu0 %v5328_v33  ;;  %v5344_v20 = vld [vmem:[%s19635_s1 + $0x328] sm:$0xff] }
 0x4ed   :  { %v5093_v51 = vadd.f32 %v17216_v55, %v5018_v42  ;;  %v472_v40 = vpop.permute.xlu0 %471  ;;  %1594 = vperm.xlu1 %12906, %v17026_v7   ;;  %6039 = vmatprep.mubr.f32.mxu0 %v5334_v2  ;;  %v566_v6 = vmul.f32 %v16988_v10, %v477_v17 }
 0x4ee   :  { %v5092_v57 = vadd.f32 %v17216_v55, %v5017_v48  ;;  %1589 = vperm.xlu0 %12905, %v16946_v22   ;;  %v5333_v22 = vld [vmem:[%s19635_s1 + $0x2d0] sm:$0xff]  ;;  %v565_v11 = vmul.f32 %v16988_v10, %v472_v40  ;;  %v5467_v48 = vld [vmem:[#allocation2 + $0x1a1] sm:$0xff] }
 0x4ef   :  { %v5161_v9 = vmax.f32 %v5093_v51, 0.0  ;;  %v5534_v2 = vmax.f32 %v5400_v1, %v5467_v48 }
 0x4f0   :  { %v5160_v49 = vmax.f32 %v5092_v57, 0.0  ;;  %v1026_v7 = vpop.permute.xlu1 %1025  ;;  %6040 = vmatmul.mubr.f32.gmra.mrb[36].mxu0 %v5333_v22  ;;  %v5246_v22 = vld [vmem:[%s19635_s1 + $0x18] sm:$0xff] }
 0x4f1   :  { %5230 = vst.msk [vmem:[#allocation2 + $0x1b8] sm:$0xff] %vm5174_vm0, %v5161_v9  ;;  %v1115_v34 = vmul.f32 %v16994_v18, %v1026_v7  ;;  %v1021_v5 = vpop.permute.xlu0 %1020  ;;  %2143 = vperm.xlu1 %12906, %v1804_v26   ;;  %6044 = vmatprep.mubr.f32.mxu0 %v5339_v62  ;;  %v560_v62 = vmul.f32 %v16988_v10, %v16689_v14 }
 0x4f2   :  { %5229 = vst.msk [vmem:[#allocation2 + $0x1b0] sm:$0xff] %vm5174_vm0, %v5160_v49  ;;  %v1114_v59 = vmul.f32 %v16994_v18, %v1021_v5  ;;  %2138 = vperm.xlu0 %12905, %v1803_v3   ;;  %v3450_v3 = vld [vmem:[%s19655_s17 + $0x22a] sm:$0xff] }
 0x4f3   :  { %v17243_v39 = vadd.f32 %v1115_v34, %v566_v6  ;;  %v1109_v34 = vmul.f32 %v16994_v18, %v16702_v28  ;;  %v3999_v28 = vld [vmem:[%s19655_s17 + $0x22b] sm:$0xff] }
 0x4f4   :  { %v17251_v15 = vadd.f32 %v1114_v59, %v565_v11  ;;  %v2114_v45 = vpop.permute.xlu1 %2113  ;;  %6045 = vmatmul.mubr.f32.gmra.mrb[38].mxu0 %v5338_v13 }
 0x4f5   :  { %v2211_v37 = vmul.f32 %v17092_v31, %v2114_v45  ;;  %v2109_v38 = vpop.permute.xlu0 %2108  ;;  %2692 = vperm.xlu1 %12906, %v2353_v60   ;;  %6049 = vmatprep.mubr.f32.mxu0 %v5344_v20  ;;  %v1108_v60 = vmul.f32 %v16994_v18, %v16705_v29  ;;  %v1658_v45 = vmul.f32 %v17068_v50, %v16747_v27 }
 0x4f6   :  { %v2210_v63 = vmul.f32 %v17092_v31, %v2109_v38  ;;  %2687 = vperm.xlu0 %12905, %v2352_v32   ;;  %v4000_v32 = vld [vmem:[%s19655_s17 + $0x233] sm:$0xff]  ;;  %v1657_v29 = vmul.f32 %v17068_v50, %v16751_v58  ;;  %v2206_v20 = vmul.f32 %v17092_v31, %v16833_v12 }
 0x4f7   :  { %v17262_v4 = vadd.f32 %v2211_v37, %v17123_v47  ;;  %v5343_v47 = vld [vmem:[%s19635_s1 + $0x320] sm:$0xff]  ;;  %v19732_v37 = vld [vmem:[#allocation19_spill] sm:$0xff]  ;;  %v4549_v58 = vld [vmem:[%s19655_s17 + $0x234] sm:$0xff] }
 0x4f8   :  { %v17271_v52 = vadd.f32 %v2210_v63, %v17134_v41  ;;  %v17273_v42 = vpop.permute.xlu1 %3201  ;;  %v3451_v41 = vld [vmem:[%s19655_s17 + $0x232] sm:$0xff]  ;;  %6050 = vmatmul.mubr.f32.gmra.mrb[40].mxu0 %v5343_v47  ;;  %v559_v38 = vmul.f32 %v16988_v10, %v19732_v37 }
 0x4f9   :  { %v17278_v17 = vpop.permute.xlu0 %3196  ;;  %3241 = vperm.xlu1 %12906, %v2902_v21   ;;  %v5468_v33 = vld [vmem:[#allocation2 + $0x1a9] sm:$0xff]  ;;  %v5602_v40 = vld [vmem:[#allocation2 + $0x1b5] sm:$0xff]  ;;  %6119 = vmatprep.mubr.f32.mxu0 %v5246_v22  ;;  %v1177_v21 = vadd.f32 %v1109_v34, %v560_v62 }
 0x4fa   :  { %v5601_v51 = vld [vmem:[#allocation2 + $0x1ad] sm:$0xff]  ;;  %3236 = vperm.xlu0 %12905, %v2901_v19   ;;  %v5535_v57 = vmax.f32 %v5401_v0, %v5468_v33  ;;  %v5669_v9 = vld [vmem:[#allocation2 + $0x1b6] sm:$0xff]  ;;  %v2207_v19 = vmul.f32 %v17092_v31, %v16828_v24  ;;  %v1176_v0 = vadd.f32 %v1108_v60, %v559_v38  ;;  %v2756_v24 = vmul.f32 %v17118_v35, %v16910_v36 }
 0x4fb   :  { %v5668_v26 = vld [vmem:[#allocation2 + $0x1ae] sm:$0xff]  ;;  %v5736_v7 = vmax.f32 %v5602_v40, %v5669_v9  ;;  %v1726_v48 = vadd.f32 %v1658_v45, %v1177_v21  ;;  %v3305_v36 = vmul.f32 %v17142_v43, %v17031_v53  ;;  %v3304_v9 = vmul.f32 %v17142_v43, %v17036_v30 }
 0x4fc   :  { %v5735_v49 = vmax.f32 %v5601_v51, %v5668_v26  ;;  %v4290_v6 = vpop.permute.xlu1 %4289  ;;  %v4548_v12 = vld [vmem:[%s19655_s17 + $0x22c] sm:$0xff]  ;;  %v1725_v33 = vadd.f32 %v1657_v29, %v1176_v0  ;;  %v2755_v51 = vmul.f32 %v17118_v35, %v16917_v16  ;;  %v3854_v16 = vmul.f32 %v17156_v54, %v17172_v8 }
 0x4fd   :  { %v4285_v5 = vpop.permute.xlu0 %4284  ;;  %3790 = vperm.xlu1 %12906, %v3451_v41   ;;  %v5803_v59 = vmax.f32 %v5535_v57, %v5736_v7  ;;  %v2275_v57 = vadd.f32 %v2207_v19, %v1726_v48  ;;  %v4403_v53 = vmul.f32 %v17180_v44, %v4290_v6 }
 0x4fe   :  { %v5802_v11 = vmax.f32 %v5534_v2, %v5735_v49  ;;  %3785 = vperm.xlu0 %12905, %v3450_v3   ;;  %v3853_v2 = vmul.f32 %v17156_v54, %v17184_v25 }
 0x4ff   :  { %v2824_v3 = vadd.f32 %v2756_v24, %v2275_v57 }
 0x500   :  { %v12438_v13 = vpack.c.bf16 %v5803_v59, %v5802_v11  ;;  %v1575_v63 = vpop.permute.xlu1 %1574  ;;  %v4402_v11 = vmul.f32 %v17180_v44, %v4285_v5 }
 0x501   :  { %v1664_v14 = vmul.f32 %v17068_v50, %v1575_v63  ;;  %v1570_v27 = vpop.permute.xlu0 %1569  ;;  %4339 = vperm.xlu1 %12906, %v4000_v32   ;;  %v3373_v7 = vadd.f32 %v3305_v36, %v2824_v3 }
 0x502   :  { %12439 = vmatpush1.bf16.msra.mxu0 %v12438_v13  ;;  %v1663_v1 = vmul.f32 %v17068_v50, %v1570_v27  ;;  %4334 = vperm.xlu0 %12905, %v3999_v28  }
 0x503   :  { %12440 = vmatprep.subr.bf16.mxu0 %v19665_v46  ;;  %v17320_v47 = vadd.f32 %v1664_v14, %v17243_v39  ;;  %v2274_v39 = vadd.f32 %v2206_v20, %v1725_v33  ;;  %v3922_v59 = vadd.f32 %v3854_v16, %v3373_v7  ;;  %v5402_v20 = vld [vmem:[#allocation2 + $0x1b0] sm:$0xff] }
 0x504   :  { %v17328_v40 = vadd.f32 %v1663_v1, %v17251_v15  ;;  %v17330_v41 = vpop.permute.xlu1 %2662  ;;  %v5403_v1 = vld [vmem:[#allocation2 + $0x1b8] sm:$0xff] }
 0x505   :  { %v17334_v26 = vpop.permute.xlu0 %2657  ;;  %4888 = vperm.xlu1 %12906, %v4549_v58   ;;  %v2823_v15 = vadd.f32 %v2755_v51, %v2274_v39  ;;  %v4471_v32 = vadd.f32 %v4403_v53, %v3922_v59  ;;  %v5469_v58 = vld [vmem:[#allocation2 + $0x1b1] sm:$0xff] }
 0x506   :  { %4883 = vperm.xlu0 %12905, %v4548_v12   ;;  %v5536_v39 = vmax.f32 %v5402_v20, %v5469_v58 }
 0x507   :  { %v3372_v34 = vadd.f32 %v3304_v9, %v2823_v15 }
 0x508   :  { %v3751_v49 = vpop.permute.xlu1 %3750 }
 0x509   :  { %v3746_v22 = vpop.permute.xlu0 %3745  ;;  %v3921_v60 = vadd.f32 %v3853_v2, %v3372_v34 }
 0x50b   :  { %v4470_v8 = vadd.f32 %v4402_v11, %v3921_v60  ;;  %v3307_v60 = vmul.f32 %v17142_v43, %v17273_v42 }
 0x50c   :  { %v4839_v30 = vpop.permute.xlu1 %4838 }
 0x50d   :  { %v4952_v62 = vmul.f32 %v17203_v61, %v4839_v30  ;;  %v4834_v45 = vpop.permute.xlu0 %4833 }
 0x50e   :  { %v4951_v13 = vmul.f32 %v17203_v61, %v4834_v45  ;;  %v3855_v45 = vmul.f32 %v17156_v54, %v3746_v22 }
 0x50f   :  { %v5020_v28 = vadd.f32 %v4952_v62, %v4471_v32  ;;  %v3306_v32 = vmul.f32 %v17142_v43, %v17278_v17  ;;  %v3856_v62 = vmul.f32 %v17156_v54, %v3751_v49 }
 0x510   :  { %v5019_v25 = vadd.f32 %v4951_v13, %v4470_v8  ;;  %v17346_v37 = vpop.permute.xlu1 %486  ;;  %v3375_v13 = vadd.f32 %v3307_v60, %v17160_v23 }
 0x511   :  { %v5095_v6 = vadd.f32 %v17216_v55, %v5020_v28  ;;  %v17349_v38 = vpop.permute.xlu0 %481 }
 0x512   :  { %v5094_v5 = vadd.f32 %v17216_v55, %v5019_v25  ;;  %v3924_v42 = vadd.f32 %v3856_v62, %v3375_v13 }
 0x513   :  { %v5163_v29 = vmax.f32 %v5095_v6, 0.0  ;;  %v3374_v6 = vadd.f32 %v3306_v32, %v17170_v56 }
 0x514   :  { %v5162_v63 = vmax.f32 %v5094_v5, 0.0  ;;  %v17352_v21 = vpop.permute.xlu1 %1035 }
 0x515   :  { %5232 = vst.msk [vmem:[#allocation2 + $0x1c8] sm:$0xff] %vm5174_vm0, %v5163_v29  ;;  %v17355_v19 = vpop.permute.xlu0 %1030  ;;  %v3923_v29 = vadd.f32 %v3855_v45, %v3374_v6 }
 0x516   :  { %5231 = vst.msk [vmem:[#allocation2 + $0x1c0] sm:$0xff] %vm5174_vm0, %v5162_v63 }
 0x518   :  { %v17358_v14 = vpop.permute.xlu1 %2123 }
 0x519   :  { %v17360_v27 = vpop.permute.xlu0 %2118 }
 0x51c   :  { %v17362_v0 = vpop.permute.xlu1 %3211 }
 0x51d   :  { %v17364_v48 = vpop.permute.xlu0 %3206  ;;  %v5470_v24 = vld [vmem:[#allocation2 + $0x1b9] sm:$0xff]  ;;  %v5604_v33 = vld [vmem:[#allocation2 + $0x1c5] sm:$0xff]  ;;  %v3309_v32 = vmul.f32 %v17142_v43, %v17362_v0 }
 0x51e   :  { %v5603_v12 = vld [vmem:[#allocation2 + $0x1bd] sm:$0xff]  ;;  %v5537_v51 = vmax.f32 %v5403_v1, %v5470_v24  ;;  %v5671_v36 = vld [vmem:[#allocation2 + $0x1c6] sm:$0xff] }
 0x51f   :  { %v5670_v57 = vld [vmem:[#allocation2 + $0x1be] sm:$0xff]  ;;  %v5738_v3 = vmax.f32 %v5604_v33, %v5671_v36 }
 0x520   :  { %v5737_v9 = vmax.f32 %v5603_v12, %v5670_v57  ;;  %v4300_v16 = vpop.permute.xlu1 %4299  ;;  %v5471_v60 = vld [vmem:[#allocation2 + $0x1c1] sm:$0xff] }
 0x521   :  { %v4295_v15 = vpop.permute.xlu0 %4294  ;;  %v5805_v7 = vmax.f32 %v5537_v51, %v5738_v3  ;;  %v4405_v28 = vmul.f32 %v17180_v44, %v4300_v16  ;;  %v2760_v16 = vmul.f32 %v17118_v35, %v17330_v41  ;;  %v3308_v41 = vmul.f32 %v17142_v43, %v17364_v48 }
 0x522   :  { %v5804_v2 = vmax.f32 %v5536_v39, %v5737_v9  ;;  %v4404_v5 = vmul.f32 %v17180_v44, %v4295_v15  ;;  %v2759_v15 = vmul.f32 %v17118_v35, %v17334_v26 }
 0x523   :  { %v4473_v20 = vadd.f32 %v4405_v28, %v3924_v42  ;;  %v2828_v6 = vadd.f32 %v2760_v16, %v17262_v4 }
 0x524   :  { %v12441_v53 = vpack.c.bf16 %v5805_v7, %v5804_v2  ;;  %v17366_v34 = vpop.permute.xlu1 %1584  ;;  %v4472_v49 = vadd.f32 %v4404_v5, %v3923_v29  ;;  %v5404_v7 = vld [vmem:[#allocation2 + $0x1c0] sm:$0xff]  ;;  %v2827_v0 = vadd.f32 %v2759_v15, %v17271_v52 }
 0x525   :  { %v17368_v11 = vpop.permute.xlu0 %1579 }
 0x526   :  { %12442 = vmatpush1.bf16.msra.mxu0 %v12441_v53  ;;  %v5405_v53 = vld [vmem:[#allocation2 + $0x1c8] sm:$0xff]  ;;  %v3376_v48 = vadd.f32 %v3308_v41, %v2827_v0 }
 0x527   :  { %12443 = vmatprep.subr.bf16.mxu0 %v19665_v46 }
 0x528   :  { %v17371_v59 = vpop.permute.xlu1 %2672 }
 0x529   :  { %v17375_v30 = vpop.permute.xlu0 %2667 }
 0x52c   :  { %v3761_v8 = vpop.permute.xlu1 %3760 }
 0x52d   :  { %v3756_v25 = vpop.permute.xlu0 %3755  ;;  %v3858_v29 = vmul.f32 %v17156_v54, %v3761_v8 }
 0x530   :  { %v4849_v63 = vpop.permute.xlu1 %4848 }
 0x531   :  { %v4954_v17 = vmul.f32 %v17203_v61, %v4849_v63  ;;  %v4844_v1 = vpop.permute.xlu0 %4843  ;;  %v5538_v63 = vmax.f32 %v5404_v7, %v5471_v60 }
 0x532   :  { %v4953_v22 = vmul.f32 %v17203_v61, %v4844_v1  ;;  %v3857_v1 = vmul.f32 %v17156_v54, %v3756_v25 }
 0x533   :  { %v5022_v58 = vadd.f32 %v4954_v17, %v4473_v20 }
 0x534   :  { %v5021_v24 = vadd.f32 %v4953_v22, %v4472_v49  ;;  %v17387_v23 = vpop.permute.xlu1 %2133  ;;  %v3377_v22 = vadd.f32 %v3309_v32, %v2828_v6  ;;  %v3925_v8 = vadd.f32 %v3857_v1, %v3376_v48  ;;  %v2212_v6 = vmul.f32 %v17092_v31, %v17360_v27 }
 0x535   :  { %v5097_v12 = vadd.f32 %v17216_v55, %v5022_v58  ;;  %v17390_v33 = vpop.permute.xlu0 %2128  ;;  %v568_v27 = vmul.f32 %v16988_v10, %v17346_v37 }
 0x536   :  { %v5096_v56 = vadd.f32 %v17216_v55, %v5021_v24 }
 0x537   :  { %v5165_v51 = vmax.f32 %v5097_v12, 0.0 }
 0x538   :  { %v5164_v57 = vmax.f32 %v5096_v56, 0.0  ;;  %v17393_v36 = vpop.permute.xlu1 %3221 }
 0x539   :  { %5234 = vst.msk [vmem:[#allocation2 + $0x1d8] sm:$0xff] %vm5174_vm0, %v5165_v51  ;;  %v17396_v39 = vpop.permute.xlu0 %3216  ;;  %v3926_v51 = vadd.f32 %v3858_v29, %v3377_v22  ;;  %v2761_v29 = vmul.f32 %v17118_v35, %v17375_v30  ;;  %v1665_v30 = vmul.f32 %v17068_v50, %v17368_v11 }
 0x53a   :  { %5233 = vst.msk [vmem:[#allocation2 + $0x1d0] sm:$0xff] %vm5174_vm0, %v5164_v57 }
 0x53c   :  { %v4310_v9 = vpop.permute.xlu1 %4309 }
 0x53d   :  { %v4305_v3 = vpop.permute.xlu0 %4304  ;;  %v4407_v58 = vmul.f32 %v17180_v44, %v4310_v9 }
 0x53e   :  { %v4406_v56 = vmul.f32 %v17180_v44, %v4305_v3  ;;  %v2213_v3 = vmul.f32 %v17092_v31, %v17358_v14 }
 0x53f   :  { %v4475_v7 = vadd.f32 %v4407_v58, %v3926_v51 }
 0x540   :  { %v17403_v2 = vpop.permute.xlu1 %2682  ;;  %v4474_v25 = vadd.f32 %v4406_v56, %v3925_v8 }
 0x541   :  { %v17407_v62 = vpop.permute.xlu0 %2677  ;;  %v5472_v45 = vld [vmem:[#allocation2 + $0x1c9] sm:$0xff]  ;;  %v5606_v28 = vld [vmem:[#allocation2 + $0x1d5] sm:$0xff] }
 0x542   :  { %v5605_v13 = vld [vmem:[#allocation2 + $0x1cd] sm:$0xff]  ;;  %v5539_v5 = vmax.f32 %v5405_v53, %v5472_v45  ;;  %v5673_v42 = vld [vmem:[#allocation2 + $0x1d6] sm:$0xff] }
 0x543   :  { %v5672_v26 = vld [vmem:[#allocation2 + $0x1ce] sm:$0xff]  ;;  %v5740_v17 = vmax.f32 %v5606_v28, %v5673_v42  ;;  %v13039_v28 = vmov 0.0   ;;  %v1116_v42 = vmul.f32 %v16994_v18, %v17355_v19  ;;  %v2280_v19 = vadd.f32 %v2212_v6, %v17328_v40 }
 0x544   :  { %v5739_v20 = vmax.f32 %v5605_v13, %v5672_v26  ;;  %v3771_v49 = vpop.permute.xlu1 %3770  ;;  %11437 = vmatprep.mubr.msk.f32.mxu1 %vm13038_vm1, %v13039_v28  ;;  %v2762_v26 = vmul.f32 %v17118_v35, %v17371_v59  ;;  %v3311_v59 = vmul.f32 %v17142_v43, %v17393_v36  ;;  %v2215_v36 = vmul.f32 %v17092_v31, %v17387_v23  ;;  %v5406_v51 = vld [vmem:[#allocation2 + $0x1d0] sm:$0xff] }
 0x545   :  { %v3766_v4 = vpop.permute.xlu0 %3765  ;;  %v5807_v12 = vmax.f32 %v5539_v5, %v5740_v17  ;;  %v1117_v5 = vmul.f32 %v16994_v18, %v17352_v21  ;;  %v2281_v17 = vadd.f32 %v2213_v3, %v17320_v47  ;;  %v1666_v21 = vmul.f32 %v17068_v50, %v17366_v34 }
 0x546   :  { %v5806_v24 = vmax.f32 %v5538_v63, %v5739_v20  ;;  %v567_v18 = vmul.f32 %v16988_v10, %v17349_v38  ;;  %v3310_v47 = vmul.f32 %v17142_v43, %v17396_v39  ;;  %v3860_v1 = vmul.f32 %v17156_v54, %v3771_v49 }
 0x547   :  { %v1185_v37 = vadd.f32 %v1117_v5, %v568_v27  ;;  %v2830_v34 = vadd.f32 %v2762_v26, %v2281_v17  ;;  %v2829_v58 = vadd.f32 %v2761_v29, %v2280_v19  ;;  %v2214_v10 = vmul.f32 %v17092_v31, %v17390_v33 }
 0x548   :  { %v12444_v57 = vpack.c.bf16 %v5807_v12, %v5806_v24  ;;  %v4859_v16 = vpop.permute.xlu1 %4858  ;;  %v1184_v22 = vadd.f32 %v1116_v42, %v567_v18  ;;  %v3859_v40 = vmul.f32 %v17156_v54, %v3766_v4  ;;  %v2764_v39 = vmul.f32 %v17118_v35, %v17403_v2  ;;  %v5407_v2 = vld [vmem:[#allocation2 + $0x1d8] sm:$0xff] }
 0x549   :  { %v4956_v52 = vmul.f32 %v17203_v61, %v4859_v16  ;;  %v4854_v15 = vpop.permute.xlu0 %4853  ;;  %v1734_v11 = vadd.f32 %v1666_v21, %v1185_v37  ;;  %v3379_v24 = vadd.f32 %v3311_v59, %v2830_v34  ;;  %v3378_v23 = vadd.f32 %v3310_v47, %v2829_v58 }
 0x54a   :  { %12445 = vmatpush1.bf16.msra.mxu0 %v12444_v57  ;;  %v4955_v53 = vmul.f32 %v17203_v61, %v4854_v15  ;;  %v1733_v56 = vadd.f32 %v1665_v30, %v1184_v22  ;;  %v5473_v57 = vld [vmem:[#allocation2 + $0x1d1] sm:$0xff]  ;;  %v2763_v4 = vmul.f32 %v17118_v35, %v17407_v62 }
 0x54b   :  { %12446 = vmatprep.subr.bf16.mxu0 %v19665_v46  ;;  %v5024_v9 = vadd.f32 %v4956_v52, %v4475_v7  ;;  %v2283_v8 = vadd.f32 %v2215_v36, %v1734_v11  ;;  %v3928_v16 = vadd.f32 %v3860_v1, %v3379_v24  ;;  %v3927_v7 = vadd.f32 %v3859_v40, %v3378_v23 }
 0x54c   :  { %v5023_v60 = vadd.f32 %v4955_v53, %v4474_v25  ;;  %v3232_v32 = vpop.permute.xlu1 %3231  ;;  %v2282_v33 = vadd.f32 %v2214_v10, %v1733_v56 }
 0x54d   :  { %v5099_v45 = vadd.f32 %v17216_v55, %v5024_v9  ;;  %v3227_v13 = vpop.permute.xlu0 %3226  ;;  %v3313_v52 = vmul.f32 %v17142_v43, %v3232_v32  ;;  %v2832_v25 = vadd.f32 %v2764_v39, %v2283_v8 }
 0x54e   :  { %v5098_v41 = vadd.f32 %v17216_v55, %v5023_v60  ;;  %v3312_v5 = vmul.f32 %v17142_v43, %v3227_v13  ;;  %v2831_v17 = vadd.f32 %v2763_v4, %v2282_v33 }
 0x54f   :  { %v5167_v14 = vmax.f32 %v5099_v45, 0.0  ;;  %v5540_v45 = vmax.f32 %v5406_v51, %v5473_v57  ;;  %v3381_v21 = vadd.f32 %v3313_v52, %v2832_v25 }
 0x550   :  { %v5166_v63 = vmax.f32 %v5098_v41, 0.0  ;;  %v4320_v20 = vpop.permute.xlu1 %4319  ;;  %v3380_v34 = vadd.f32 %v3312_v5, %v2831_v17 }
 0x551   :  { %5236 = vst.msk [vmem:[#allocation2 + $0x1e8] sm:$0xff] %vm5174_vm0, %v5167_v14  ;;  %v4315_v0 = vpop.permute.xlu0 %4314  ;;  %v4409_v12 = vmul.f32 %v17180_v44, %v4320_v20 }
 0x552   :  { %5235 = vst.msk [vmem:[#allocation2 + $0x1e0] sm:$0xff] %vm5174_vm0, %v5166_v63  ;;  %v4408_v49 = vmul.f32 %v17180_v44, %v4315_v0 }
 0x553   :  { %v4477_v53 = vadd.f32 %v4409_v12, %v3928_v16 }
 0x554   :  { %v3781_v38 = vpop.permute.xlu1 %3780  ;;  %v4476_v26 = vadd.f32 %v4408_v49, %v3927_v7 }
 0x555   :  { %v3776_v48 = vpop.permute.xlu0 %3775  ;;  %v3862_v32 = vmul.f32 %v17156_v54, %v3781_v38 }
 0x556   :  { %v3861_v59 = vmul.f32 %v17156_v54, %v3776_v48 }
 0x557   :  { %v3930_v22 = vadd.f32 %v3862_v32, %v3381_v21 }
 0x558   :  { %v4869_v15 = vpop.permute.xlu1 %4868  ;;  %v3929_v40 = vadd.f32 %v3861_v59, %v3380_v34 }
 0x559   :  { %v4958_v9 = vmul.f32 %v17203_v61, %v4869_v15  ;;  %v4864_v60 = vpop.permute.xlu0 %4863  ;;  %v5474_v3 = vld [vmem:[#allocation2 + $0x1d9] sm:$0xff]  ;;  %v5608_v41 = vld [vmem:[#allocation2 + $0x1e5] sm:$0xff] }
 0x55a   :  { %v5607_v6 = vld [vmem:[#allocation2 + $0x1dd] sm:$0xff]  ;;  %v4957_v14 = vmul.f32 %v17203_v61, %v4864_v60  ;;  %v5541_v62 = vmax.f32 %v5407_v2, %v5474_v3  ;;  %v5675_v29 = vld [vmem:[#allocation2 + $0x1e6] sm:$0xff] }
 0x55b   :  { %v5674_v42 = vld [vmem:[#allocation2 + $0x1de] sm:$0xff]  ;;  %v5026_v63 = vadd.f32 %v4958_v9, %v4477_v53  ;;  %v5742_v27 = vmax.f32 %v5608_v41, %v5675_v29  ;;  %v5409_v15 = vld [vmem:[#allocation2 + $0x1e8] sm:$0xff] }
 0x55c   :  { %v5741_v20 = vmax.f32 %v5607_v6, %v5674_v42  ;;  %v5025_v0 = vadd.f32 %v4957_v14, %v4476_v26  ;;  %v4330_v18 = vpop.permute.xlu1 %4329  ;;  %v5408_v52 = vld [vmem:[#allocation2 + $0x1e0] sm:$0xff] }
 0x55d   :  { %v5101_v19 = vadd.f32 %v17216_v55, %v5026_v63  ;;  %v4411_v13 = vmul.f32 %v17180_v44, %v4330_v18  ;;  %v4325_v30 = vpop.permute.xlu0 %4324  ;;  %v5809_v37 = vmax.f32 %v5541_v62, %v5742_v27  ;;  %v5475_v2 = vld [vmem:[#allocation2 + $0x1e1] sm:$0xff] }
 0x55e   :  { %v5808_v47 = vmax.f32 %v5540_v45, %v5741_v20  ;;  %v5100_v36 = vadd.f32 %v17216_v55, %v5025_v0  ;;  %v4410_v1 = vmul.f32 %v17180_v44, %v4325_v30  ;;  %v5542_v41 = vmax.f32 %v5408_v52, %v5475_v2 }
 0x55f   :  { %v5169_v58 = vmax.f32 %v5101_v19, 0.0  ;;  %v4479_v24 = vadd.f32 %v4411_v13, %v3930_v22 }
 0x560   :  { %v12447_v10 = vpack.c.bf16 %v5809_v37, %v5808_v47  ;;  %v5168_v38 = vmax.f32 %v5100_v36, 0.0  ;;  %v4879_v11 = vpop.permute.xlu1 %4878  ;;  %v4478_v48 = vadd.f32 %v4410_v1, %v3929_v40  ;;  %v12961_v1 = vld [vmem:[%s19638_s4 + $0x1] ss:$0 sm:$0xff] }
 0x561   :  { %5238 = vst.msk [vmem:[#allocation2 + $0x1f8] sm:$0xff] %vm5174_vm0, %v5169_v58  ;;  %v4960_v39 = vmul.f32 %v17203_v61, %v4879_v11  ;;  %v4874_v12 = vpop.permute.xlu0 %4873  ;;  %v12962_v11 = vld [vmem:[%s19638_s4] ss:$0 sm:$0xff] }
 0x562   :  { %12448 = vmatpush1.bf16.msra.mxu0 %v12447_v10  ;;  %5237 = vst.msk [vmem:[#allocation2 + $0x1f0] sm:$0xff] %vm5174_vm0, %v5168_v38  ;;  %v4959_v56 = vmul.f32 %v17203_v61, %v4874_v12 }
 0x563   :  { %12449 = vmatprep.subr.bf16.mxu0 %v19665_v46  ;;  %v5028_v23 = vadd.f32 %v4960_v39, %v4479_v24 }
 0x564   :  { %v5027_v49 = vadd.f32 %v4959_v56, %v4478_v48  ;;  %v497_v51 = vpop.permute.xlu1 %496 }
 0x565   :  { %v5103_v57 = vadd.f32 %v17216_v55, %v5028_v23  ;;  %v492_v8 = vpop.permute.xlu0 %491  ;;  %v570_v24 = vmul.f32 %v12962_v11, %v497_v51  ;;  %v5251_v51 = vld [vmem:[%s19635_s1 + $0x40] sm:$0xff] }
 0x566   :  { %v5102_v16 = vadd.f32 %v17216_v55, %v5027_v49  ;;  %v569_v48 = vmul.f32 %v12962_v11, %v492_v8 }
 0x567   :  { %v5171_v33 = vmax.f32 %v5103_v57, 0.0 }
 0x568   :  { %v5170_v4 = vmax.f32 %v5102_v16, 0.0  ;;  %v1046_v7 = vpop.permute.xlu1 %1045  ;;  %v5411_v27 = vld [vmem:[#allocation2 + $0x1f8] sm:$0xff] }
 0x569   :  { %5240 = vst.msk [vmem:[#allocation2 + $0x208] sm:$0xff] %vm5174_vm0, %v5171_v33  ;;  %v1041_v25 = vpop.permute.xlu0 %1040  ;;  %v5476_v53 = vld [vmem:[#allocation2 + $0x1e9] sm:$0xff]  ;;  %v5610_v60 = vld [vmem:[#allocation2 + $0x1f5] sm:$0xff]  ;;  %v1119_v22 = vmul.f32 %v12961_v1, %v1046_v7 }
 0x56a   :  { %v5609_v9 = vld [vmem:[#allocation2 + $0x1ed] sm:$0xff]  ;;  %5239 = vst.msk [vmem:[#allocation2 + $0x200] sm:$0xff] %vm5174_vm0, %v5170_v4  ;;  %v5543_v3 = vmax.f32 %v5409_v15, %v5476_v53  ;;  %v5677_v6 = vld [vmem:[#allocation2 + $0x1f6] sm:$0xff]  ;;  %v1118_v38 = vmul.f32 %v12961_v1, %v1041_v25 }
 0x56b   :  { %v5676_v45 = vld [vmem:[#allocation2 + $0x1ee] sm:$0xff]  ;;  %v5744_v26 = vmax.f32 %v5610_v60, %v5677_v6  ;;  %v1187_v49 = vadd.f32 %v1119_v22, %v570_v24  ;;  %v5270_v22 = vld [vmem:[%s19635_s1 + $0xd8] sm:$0xff] }
 0x56c   :  { %v5743_v5 = vmax.f32 %v5609_v9, %v5676_v45  ;;  %v1595_v14 = vpop.permute.xlu1 %1594  ;;  %v5410_v20 = vld [vmem:[#allocation2 + $0x1f0] sm:$0xff]  ;;  %v1186_v4 = vadd.f32 %v1118_v38, %v569_v48  ;;  %v5256_v45 = vld [vmem:[%s19635_s1 + $0x68] sm:$0xff] }
 0x56d   :  { %v1590_v62 = vpop.permute.xlu0 %1589  ;;  %v5811_v29 = vmax.f32 %v5543_v3, %v5744_v26  ;;  %v5477_v17 = vld [vmem:[#allocation2 + $0x1f1] sm:$0xff]  ;;  %v1668_v39 = vmul.f32 %v17068_v50, %v1595_v14 }
 0x56e   :  { %v5810_v42 = vmax.f32 %v5542_v41, %v5743_v5  ;;  %v5544_v47 = vmax.f32 %v5410_v20, %v5477_v17  ;;  %v1667_v56 = vmul.f32 %v17068_v50, %v1590_v62  ;;  %v5245_v33 = vld [vmem:[%s19635_s1 + $0x10] sm:$0xff] }
 0x56f   :  { %v1736_v50 = vadd.f32 %v1668_v39, %v1187_v49 }
 0x570   :  { %v12450_v32 = vpack.c.bf16 %v5811_v29, %v5810_v42  ;;  %v2144_v63 = vpop.permute.xlu1 %2143  ;;  %v1735_v52 = vadd.f32 %v1667_v56, %v1186_v4  ;;  %v5413_v11 = vld [vmem:[#allocation2 + $0x208] sm:$0xff]  ;;  %v5286_v56 = vld [vmem:[%s19635_s1 + $0x158] sm:$0xff] }
 0x571   :  { %v2139_v21 = vpop.permute.xlu0 %2138  ;;  %v5478_v59 = vld [vmem:[#allocation2 + $0x1f9] sm:$0xff]  ;;  %v5612_v18 = vld [vmem:[#allocation2 + $0x205] sm:$0xff]  ;;  %v2217_v57 = vmul.f32 %v17092_v31, %v2144_v63  ;;  %v5261_v63 = vld [vmem:[%s19635_s1 + $0x90] sm:$0xff] }
 0x572   :  { %12451 = vmatpush1.bf16.msra.mxu0 %v12450_v32  ;;  %v5611_v0 = vld [vmem:[#allocation2 + $0x1fd] sm:$0xff]  ;;  %v5545_v19 = vmax.f32 %v5411_v27, %v5478_v59  ;;  %v5679_v30 = vld [vmem:[#allocation2 + $0x206] sm:$0xff]  ;;  %v2216_v7 = vmul.f32 %v17092_v31, %v2139_v21 }
 0x573   :  { %12452 = vmatprep.subr.bf16.mxu0 %v19665_v46  ;;  %v5678_v13 = vld [vmem:[#allocation2 + $0x1fe] sm:$0xff]  ;;  %v5746_v34 = vmax.f32 %v5612_v18, %v5679_v30  ;;  %v2285_v25 = vadd.f32 %v2217_v57, %v1736_v50 }
 0x574   :  { %v5745_v37 = vmax.f32 %v5611_v0, %v5678_v13  ;;  %v2693_v36 = vpop.permute.xlu1 %2692  ;;  %v5250_v31 = vld [vmem:[%s19635_s1 + $0x38] sm:$0xff]  ;;  %v2284_v60 = vadd.f32 %v2216_v7, %v1735_v52  ;;  %v5260_v0 = vld [vmem:[%s19635_s1 + $0x88] sm:$0xff]  ;;  %v5412_v38 = vld [vmem:[#allocation2 + $0x200] sm:$0xff] }
 0x575   :  { %v2688_v58 = vpop.permute.xlu0 %2687  ;;  %v5813_v40 = vmax.f32 %v5545_v19, %v5746_v34  ;;  %v2766_v8 = vmul.f32 %v17118_v35, %v2693_v36  ;;  %v5266_v19 = vld [vmem:[%s19635_s1 + $0xb8] sm:$0xff]  ;;  %v5479_v24 = vld [vmem:[#allocation2 + $0x201] sm:$0xff]  ;;  %v5285_v52 = vld [vmem:[%s19635_s1 + $0x150] sm:$0xff] }
 0x576   :  { %v5812_v10 = vmax.f32 %v5544_v47, %v5745_v37  ;;  %v2765_v15 = vmul.f32 %v17118_v35, %v2688_v58  ;;  %v5265_v37 = vld [vmem:[%s19635_s1 + $0xb0] sm:$0xff]  ;;  %v5275_v58 = vld [vmem:[%s19635_s1 + $0x100] sm:$0xff] }
 0x577   :  { %v2834_v6 = vadd.f32 %v2766_v8, %v2285_v25  ;;  %v5291_v25 = vld [vmem:[%s19635_s1 + $0x180] sm:$0xff] }
 0x578   :  { %v12453_v12 = vpack.c.bf16 %v5813_v40, %v5812_v10  ;;  %v3242_v23 = vpop.permute.xlu1 %3241  ;;  %v2833_v41 = vadd.f32 %v2765_v15, %v2284_v60  ;;  %v5281_v10 = vld [vmem:[%s19635_s1 + $0x130] sm:$0xff]  ;;  %v5280_v40 = vld [vmem:[%s19635_s1 + $0x128] sm:$0xff]  ;;  %v5290_v60 = vld [vmem:[%s19635_s1 + $0x178] sm:$0xff] }
 0x579   :  { %v3237_v16 = vpop.permute.xlu0 %3236  ;;  %v3315_v53 = vmul.f32 %v17142_v43, %v3242_v23 }
 0x57a   :  { %12454 = vmatpush1.bf16.msra.mxu0 %v12453_v12  ;;  %v3314_v3 = vmul.f32 %v17142_v43, %v3237_v16  ;;  %v5255_v43 = vld [vmem:[%s19635_s1 + $0x60] sm:$0xff]  ;;  %v5546_v16 = vmax.f32 %v5412_v38, %v5479_v24  ;;  %v5317_v38 = vld [vmem:[%s19635_s1 + $0x250] sm:$0xff] }
 0x57b   :  { %12455 = vmatprep.subr.bf16.mxu0 %v19665_v46  ;;  %v3383_v14 = vadd.f32 %v3315_v53, %v2834_v6  ;;  %v5295_v6 = vld [vmem:[%s19635_s1 + $0x1a0] sm:$0xff] }
 0x57c   :  { %v3791_v2 = vpop.permute.xlu1 %3790  ;;  %v3382_v29 = vadd.f32 %v3314_v3, %v2833_v41  ;;  %v5296_v3 = vld [vmem:[%s19635_s1 + $0x1a8] sm:$0xff]  ;;  %v5327_v24 = vld [vmem:[%s19635_s1 + $0x2a0] sm:$0xff] }
 0x57d   :  { %6120 = vmatmul.mubr.f32.vlgmr.msra.gmra.mrb[0].mxu0 %v5245_v33  ;;  %v3786_v9 = vpop.permute.xlu0 %3785  ;;  %v3864_v35 = vmul.f32 %v17156_v54, %v3791_v2  ;;  %v5300_v41 = vld [vmem:[%s19635_s1 + $0x1c8] sm:$0xff] }
 0x57e   :  { %6124 = vmatprep.mubr.f32.mxu0 %v5251_v51  ;;  %v3863_v5 = vmul.f32 %v17156_v54, %v3786_v9 }
 0x57f   :  { %v3932_v20 = vadd.f32 %v3864_v35, %v3383_v14  ;;  %v5301_v35 = vld [vmem:[%s19635_s1 + $0x1d0] sm:$0xff]  ;;  %v5311_v14 = vld [vmem:[%s19635_s1 + $0x220] sm:$0xff] }
 0x580   :  { %v4340_v26 = vpop.permute.xlu1 %4339  ;;  %v3931_v54 = vadd.f32 %v3863_v5, %v3382_v29  ;;  %v5306_v5 = vld [vmem:[%s19635_s1 + $0x1f8] sm:$0xff]  ;;  %v5321_v29 = vld [vmem:[%s19635_s1 + $0x270] sm:$0xff] }
 0x581   :  { %6125 = vmatmul.mubr.f32.gmra.mrb[2].mxu0 %v5250_v31  ;;  %v4413_v62 = vmul.f32 %v17180_v44, %v4340_v26  ;;  %v4335_v42 = vpop.permute.xlu0 %4334  ;;  %v5305_v26 = vld [vmem:[%s19635_s1 + $0x1f0] sm:$0xff] }
 0x582   :  { %6129 = vmatprep.mubr.f32.mxu0 %v5256_v45  ;;  %v4412_v32 = vmul.f32 %v17180_v44, %v4335_v42  ;;  %v5316_v42 = vld [vmem:[%s19635_s1 + $0x248] sm:$0xff] }
 0x583   :  { %v4481_v17 = vadd.f32 %v4413_v62, %v3932_v20  ;;  %v5310_v62 = vld [vmem:[%s19635_s1 + $0x218] sm:$0xff]  ;;  %v5325_v20 = vld [vmem:[%s19635_s1 + $0x290] sm:$0xff] }
 0x584   :  { %v4889_v27 = vpop.permute.xlu1 %4888  ;;  %v4480_v18 = vadd.f32 %v4412_v32, %v3931_v54  ;;  %v5320_v32 = vld [vmem:[%s19635_s1 + $0x268] sm:$0xff]  ;;  %v5331_v54 = vld [vmem:[%s19635_s1 + $0x2c0] sm:$0xff] }
 0x585   :  { %6130 = vmatmul.mubr.f32.gmra.mrb[4].mxu0 %v5255_v43  ;;  %v4962_v21 = vmul.f32 %v17203_v61, %v4889_v27  ;;  %v4884_v59 = vpop.permute.xlu0 %4883  ;;  %v5315_v43 = vld [vmem:[%s19635_s1 + $0x240] sm:$0xff]  ;;  %v5330_v27 = vld [vmem:[%s19635_s1 + $0x2b8] sm:$0xff] }
 0x586   :  { %6134 = vmatprep.mubr.f32.mxu0 %v5261_v63  ;;  %v4961_v44 = vmul.f32 %v17203_v61, %v4884_v59  ;;  %v5271_v61 = vld [vmem:[%s19635_s1 + $0xe0] sm:$0xff]  ;;  %v5326_v63 = vld [vmem:[%s19635_s1 + $0x298] sm:$0xff]  ;;  %v5341_v59 = vld [vmem:[%s19635_s1 + $0x310] sm:$0xff] }
 0x587   :  { %v5030_v13 = vadd.f32 %v4962_v21, %v4481_v17  ;;  %v5336_v17 = vld [vmem:[%s19635_s1 + $0x2e8] sm:$0xff]  ;;  %v5335_v21 = vld [vmem:[%s19635_s1 + $0x2e0] sm:$0xff] }
 0x588   :  { %v5029_v30 = vadd.f32 %v4961_v44, %v4480_v18  ;;  %v5346_v18 = vld [vmem:[%s19635_s1 + $0x338] sm:$0xff]  ;;  %v5345_v44 = vld [vmem:[%s19635_s1 + $0x330] sm:$0xff] }
 0x589   :  { %6135 = vmatmul.mubr.f32.gmra.mrb[6].mxu0 %v5260_v0  ;;  %v5105_v47 = vadd.f32 %v17216_v55, %v5030_v13  ;;  %v5340_v0 = vld [vmem:[%s19635_s1 + $0x308] sm:$0xff] }
 0x58a   :  { %6139 = vmatprep.mubr.f32.mxu0 %v5266_v19  ;;  %v5104_v34 = vadd.f32 %v17216_v55, %v5029_v30  ;;  %v5276_v55 = vld [vmem:[%s19635_s1 + $0x108] sm:$0xff]  ;;  %v5247_v19 = vld [vmem:[%s19635_s1 + $0x20] sm:$0xff]  ;;  %v5257_v30 = vld [vmem:[%s19635_s1 + $0x70] sm:$0xff] }
 0x58b   :  { %v5173_v36 = vmax.f32 %v5105_v47, 0.0  ;;  %v5252_v13 = vld [vmem:[%s19635_s1 + $0x48] sm:$0xff]  ;;  %v5262_v47 = vld [vmem:[%s19635_s1 + $0x98] sm:$0xff] }
 0x58c   :  { %v5172_v1 = vmax.f32 %v5104_v34, 0.0  ;;  %v5272_v34 = vld [vmem:[%s19635_s1 + $0xe8] sm:$0xff] }
 0x58d   :  { %6140 = vmatmul.mubr.f32.gmra.mrb[8].mxu0 %v5265_v37  ;;  %5242 = vst.msk [vmem:[#allocation2 + $0x218] sm:$0xff] %vm5174_vm0, %v5173_v36  ;;  %v5267_v37 = vld [vmem:[%s19635_s1 + $0xc0] sm:$0xff]  ;;  %v5282_v36 = vld [vmem:[%s19635_s1 + $0x138] sm:$0xff] }
 0x58e   :  { %6144 = vmatprep.mubr.f32.mxu0 %v5271_v61  ;;  %5241 = vst.msk [vmem:[#allocation2 + $0x210] sm:$0xff] %vm5174_vm0, %v5172_v1  ;;  %v5277_v61 = vld [vmem:[%s19635_s1 + $0x110] sm:$0xff]  ;;  %v5287_v1 = vld [vmem:[%s19635_s1 + $0x160] sm:$0xff] }
 0x591   :  { %6145 = vmatmul.mubr.f32.gmra.mrb[10].mxu0 %v5270_v22  ;;  %v5292_v22 = vld [vmem:[%s19635_s1 + $0x188] sm:$0xff] }
 0x592   :  { %6149 = vmatprep.mubr.f32.mxu0 %v5276_v55  ;;  %v5297_v55 = vld [vmem:[%s19635_s1 + $0x1b0] sm:$0xff] }
 0x594   :  { %v5615_v7 = vld [vmem:[#allocation2 + $0x21d] sm:$0x3] }
 0x595   :  { %6150 = vmatmul.mubr.f32.gmra.mrb[12].mxu0 %v5275_v58  ;;  %v5480_v39 = vld [vmem:[#allocation2 + $0x209] sm:$0xff]  ;;  %v5614_v48 = vld [vmem:[#allocation2 + $0x215] sm:$0xff]  ;;  %v5481_v50 = vld [vmem:[#allocation2 + $0x211] sm:$0x3] }
 0x596   :  { %6154 = vmatprep.mubr.f32.mxu0 %v5281_v10  ;;  %v5613_v12 = vld [vmem:[#allocation2 + $0x20d] sm:$0xff]  ;;  %v5547_v23 = vmax.f32 %v5413_v11, %v5480_v39  ;;  %v5681_v57 = vld [vmem:[#allocation2 + $0x216] sm:$0xff]  ;;  %v5682_v8 = vld [vmem:[#allocation2 + $0x21e] sm:$0x3] }
 0x597   :  { %v5680_v49 = vld [vmem:[#allocation2 + $0x20e] sm:$0xff]  ;;  %v5748_v4 = vmax.f32 %v5614_v48, %v5681_v57  ;;  %v5749_v31 = vmax.f32 %v5615_v7, %v5682_v8  ;;  %v5302_v58 = vld [vmem:[%s19635_s1 + $0x1d8] sm:$0xff]  ;;  %v5307_v10 = vld [vmem:[%s19635_s1 + $0x200] sm:$0xff] }
 0x598   :  { %v5747_v33 = vmax.f32 %v5613_v12, %v5680_v49  ;;  %v5414_v51 = vld [vmem:[#allocation2 + $0x210] sm:$0x3]  ;;  %v5322_v11 = vld [vmem:[%s19635_s1 + $0x278] sm:$0xff]  ;;  %v5332_v39 = vld [vmem:[%s19635_s1 + $0x2c8] sm:$0xff] }
 0x599   :  { %6155 = vmatmul.mubr.f32.gmra.mrb[14].mxu0 %v5280_v40  ;;  %v5815_v2 = vmax.f32 %v5547_v23, %v5748_v4  ;;  %v5548_v9 = vmax.f32 %v5414_v51, %v5481_v50  ;;  %v5312_v40 = vld [vmem:[%s19635_s1 + $0x228] sm:$0xff]  ;;  %v5337_v12 = vld [vmem:[%s19635_s1 + $0x2f0] sm:$0xff]  ;;  %v5342_v48 = vld [vmem:[%s19635_s1 + $0x318] sm:$0xff] }
 0x59a   :  { %6159 = vmatprep.mubr.f32.mxu0 %v5286_v56  ;;  %v5814_v15 = vmax.f32 %v5546_v16, %v5747_v33  ;;  %v5347_v56 = vld [vmem:[%s19635_s1 + $0x340] sm:$0xff]  ;;  %v6459_v49 = vld [vmem:[%s19640_s6 + $0x28] sm:$0xff]  ;;  %v6460_v16 = vld [vmem:[%s19640_s6 + $0x30] sm:$0xff] }
 0x59b   :  { %v5816_v45 = vmax.f32 %v5548_v9, %v5749_v31  ;;  %v6458_v23 = vld [vmem:[%s19640_s6 + $0x20] sm:$0xff]  ;;  %v6461_v33 = vld [vmem:[%s19640_s6 + $0x38] sm:$0xff]  ;;  %v7693_v51 = vld [vmem:[%s19640_s6 + $0xa8] sm:$0xff] }
 0x59c   :  { %v12456_v53 = vpack.c.bf16 %v5815_v2, %v5814_v15  ;;  %v12459_v57 = vpack.c.bf16 %v6459_v49, %v6458_v23  ;;  %v7692_v4 = vld [vmem:[%s19640_s6 + $0xa0] sm:$0xff]  ;;  %v12462_v7 = vpack.c.bf16 %v6461_v33, %v6460_v16  ;;  %v7694_v8 = vld [vmem:[%s19640_s6 + $0xb0] sm:$0xff] }
 0x59d   :  { %6160 = vmatmul.mubr.f32.gmra.mrb[16].mxu0 %v5285_v52  ;;  %v12489_v50 = vpack.c.bf16 %v7693_v51, %v7692_v4  ;;  %v7695_v52 = vld [vmem:[%s19640_s6 + $0xb8] sm:$0xff]  ;;  %v6435_v31 = vld [vmem:[%s19640_s6] sm:$0xff] }
 0x59e   :  { %12457 = vmatpush3.bf16.msra.mxu0 %v12456_v53  ;;  %6164 = vmatprep.mubr.f32.mxu0 %v5291_v25  ;;  %v12492_v15 = vpack.c.bf16 %v7695_v52, %v7694_v8 }
 0x59f   :  { %11364 = vmatprep.subr.mxu0 %v13039_v28  ;;  %12460 = vmatpush3.bf16.msra.mxu1 %v12459_v57 }
 0x5a0   :  { %12461 = vmatprep.subr.bf16.mxu1 %v19665_v46 }
 0x5a1   :  { %6165 = vmatmul.mubr.f32.gmra.mrb[18].mxu0 %v5290_v60  ;;  %v6436_v60 = vld [vmem:[%s19640_s6 + $0x8] sm:$0xff] }
 0x5a2   :  { %11365 = vmatpush3.msk.msra.mxu0 %vm5881_vm2, %v5816_v45  ;;  %6169 = vmatprep.mubr.f32.mxu0 %v5296_v3 }
 0x5a3   :  { %12488 = vmatprep.subr.bf16.mxu0 %v19665_v46  ;;  %12463 = vmatpush3.bf16.msra.mxu1 %v12462_v7 }
 0x5a4   :  { %12464 = vmatprep.subr.bf16.mxu1 %v19665_v46 }
 0x5a5   :  { %6170 = vmatmul.mubr.f32.gmra.mrb[20].mxu0 %v5295_v6  ;;  %v12465_v6 = vpack.c.bf16 %v6436_v60, %v6435_v31 }
 0x5a6   :  { %6174 = vmatprep.mubr.f32.mxu0 %v5301_v35  ;;  %v6437_v35 = vld [vmem:[%s19640_s6 + $0x10] sm:$0xff] }
 0x5a9   :  { %6175 = vmatmul.mubr.f32.gmra.mrb[22].mxu0 %v5300_v41  ;;  %v6438_v41 = vld [vmem:[%s19640_s6 + $0x18] sm:$0xff] }
 0x5aa   :  { %6179 = vmatprep.mubr.f32.mxu0 %v5306_v5 }
 0x5ad   :  { %6180 = vmatmul.mubr.f32.gmra.mrb[24].mxu0 %v5305_v26 }
 0x5ae   :  { %6184 = vmatprep.mubr.f32.mxu0 %v5311_v14  ;;  %v8210_v14 = vld [vmem:[%s19640_s6 + $0xe0] sm:$0xff] }
 0x5b1   :  { %6185 = vmatmul.mubr.f32.gmra.mrb[26].mxu0 %v5310_v62  ;;  %v8211_v62 = vld [vmem:[%s19640_s6 + $0xe8] sm:$0xff] }
 0x5b2   :  { %6189 = vmatprep.mubr.f32.mxu0 %v5316_v42 }
 0x5b5   :  { %6190 = vmatmul.mubr.f32.gmra.mrb[28].mxu0 %v5315_v43  ;;  %v12468_v43 = vpack.c.bf16 %v6438_v41, %v6437_v35 }
 0x5b6   :  { %6194 = vmatprep.mubr.f32.mxu0 %v5321_v29  ;;  %v12501_v29 = vpack.c.bf16 %v8211_v62, %v8210_v14 }
 0x5b9   :  { %6195 = vmatmul.mubr.f32.gmra.mrb[30].mxu0 %v5320_v32 }
 0x5ba   :  { %6199 = vmatprep.mubr.f32.mxu0 %v5326_v63 }
 0x5bd   :  { %6200 = vmatmul.mubr.f32.gmra.mrb[32].mxu0 %v5325_v20  ;;  %v8212_v20 = vld [vmem:[%s19640_s6 + $0xf0] sm:$0xff] }
 0x5be   :  { %6204 = vmatprep.mubr.f32.mxu0 %v5331_v54  ;;  %v8213_v54 = vld [vmem:[%s19640_s6 + $0xf8] sm:$0xff] }
 0x5c1   :  { %6205 = vmatmul.mubr.f32.gmra.mrb[34].mxu0 %v5330_v27 }
 0x5c2   :  { %6209 = vmatprep.mubr.f32.mxu0 %v5336_v17  ;;  %v12504_v17 = vpack.c.bf16 %v8213_v54, %v8212_v20 }
 0x5c5   :  { %6210 = vmatmul.mubr.f32.gmra.mrb[36].mxu0 %v5335_v21 }
 0x5c6   :  { %6214 = vmatprep.mubr.f32.mxu0 %v5341_v59 }
 0x5c9   :  { %6215 = vmatmul.mubr.f32.gmra.mrb[38].mxu0 %v5340_v0 }
 0x5ca   :  { %6219 = vmatprep.mubr.f32.mxu0 %v5346_v18 }
 0x5cd   :  { %6220 = vmatmul.mubr.f32.gmra.mrb[40].mxu0 %v5345_v44 }
 0x5ce   :  { %11366 = vmatprep.mubr.msk.f32.mxu0 %vm13038_vm1, %v13039_v28 }
 0x5d1   :  { %11367 = vmatmul.mubr.msk.f32.vlgmr.msra.gmra.mrb[0].mxu0 %vm5817_vm3, %v5247_v19 }
 0x5d2   :  { %11369 = vmatprep.mubr.msk.f32.mxu0 %vm13038_vm1, %v13039_v28  ;;  %12490 = vmatpush3.bf16.msra.mxu0 %v12489_v50 }
 0x5d3   :  { %12491 = vmatprep.subr.bf16.mxu0 %v19665_v46 }
 0x5d5   :  { %11370 = vmatmul.mubr.msk.f32.gmra.mrb[2].mxu0 %vm5817_vm3, %v5252_v13 }
 0x5d6   :  { %11372 = vmatprep.mubr.msk.f32.mxu0 %vm13038_vm1, %v13039_v28  ;;  %12493 = vmatpush3.bf16.msra.mxu0 %v12492_v15 }
 0x5d7   :  { %12500 = vmatprep.subr.bf16.mxu0 %v19665_v46 }
 0x5d9   :  { %11373 = vmatmul.mubr.msk.f32.gmra.mrb[4].mxu0 %vm5817_vm3, %v5257_v30 }
 0x5da   :  { %11375 = vmatprep.mubr.msk.f32.mxu0 %vm13038_vm1, %v13039_v28 }
 0x5dd   :  { %11376 = vmatmul.mubr.msk.f32.gmra.mrb[6].mxu0 %vm5817_vm3, %v5262_v47 }
 0x5de   :  { %11378 = vmatprep.mubr.msk.f32.mxu0 %vm13038_vm1, %v13039_v28 }
 0x5e1   :  { %11379 = vmatmul.mubr.msk.f32.gmra.mrb[8].mxu0 %vm5817_vm3, %v5267_v37 }
 0x5e2   :  { %11381 = vmatprep.mubr.msk.f32.mxu0 %vm13038_vm1, %v13039_v28 }
 0x5e5   :  { %11382 = vmatmul.mubr.msk.f32.gmra.mrb[10].mxu0 %vm5817_vm3, %v5272_v34 }
 0x5e6   :  { %11384 = vmatprep.mubr.msk.f32.mxu0 %vm13038_vm1, %v13039_v28 }
 0x5e9   :  { %11385 = vmatmul.mubr.msk.f32.gmra.mrb[12].mxu0 %vm5817_vm3, %v5277_v61 }
 0x5ea   :  { %11387 = vmatprep.mubr.msk.f32.mxu0 %vm13038_vm1, %v13039_v28 }
 0x5ed   :  { %11388 = vmatmul.mubr.msk.f32.gmra.mrb[14].mxu0 %vm5817_vm3, %v5282_v36 }
 0x5ee   :  { %11390 = vmatprep.mubr.msk.f32.mxu0 %vm13038_vm1, %v13039_v28 }
 0x5f1   :  { %11391 = vmatmul.mubr.msk.f32.gmra.mrb[16].mxu0 %vm5817_vm3, %v5287_v1 }
 0x5f2   :  { %11393 = vmatprep.mubr.msk.f32.mxu0 %vm13038_vm1, %v13039_v28 }
 0x5f5   :  { %11394 = vmatmul.mubr.msk.f32.gmra.mrb[18].mxu0 %vm5817_vm3, %v5292_v22 }
 0x5f6   :  { %11396 = vmatprep.mubr.msk.f32.mxu0 %vm13038_vm1, %v13039_v28 }
 0x5f9   :  { %11397 = vmatmul.mubr.msk.f32.gmra.mrb[20].mxu0 %vm5817_vm3, %v5297_v55 }
 0x5fa   :  { %11399 = vmatprep.mubr.msk.f32.mxu0 %vm13038_vm1, %v13039_v28 }
 0x5fd   :  { %11400 = vmatmul.mubr.msk.f32.gmra.mrb[22].mxu0 %vm5817_vm3, %v5302_v58 }
 0x5fe   :  { %11402 = vmatprep.mubr.msk.f32.mxu0 %vm13038_vm1, %v13039_v28 }
 0x601   :  { %11403 = vmatmul.mubr.msk.f32.gmra.mrb[24].mxu0 %vm5817_vm3, %v5307_v10 }
 0x602   :  { %11405 = vmatprep.mubr.msk.f32.mxu0 %vm13038_vm1, %v13039_v28 }
 0x605   :  { %11406 = vmatmul.mubr.msk.f32.gmra.mrb[26].mxu0 %vm5817_vm3, %v5312_v40 }
 0x606   :  { %11408 = vmatprep.mubr.msk.f32.mxu0 %vm13038_vm1, %v13039_v28 }
 0x609   :  { %11409 = vmatmul.mubr.msk.f32.gmra.mrb[28].mxu0 %vm5817_vm3, %v5317_v38 }
 0x60a   :  { %11411 = vmatprep.mubr.msk.f32.mxu0 %vm13038_vm1, %v13039_v28 }
 0x60d   :  { %11412 = vmatmul.mubr.msk.f32.gmra.mrb[30].mxu0 %vm5817_vm3, %v5322_v11 }
 0x60e   :  { %11414 = vmatprep.mubr.msk.f32.mxu0 %vm13038_vm1, %v13039_v28 }
 0x611   :  { %11415 = vmatmul.mubr.msk.f32.gmra.mrb[32].mxu0 %vm5817_vm3, %v5327_v24 }
 0x612   :  { %11417 = vmatprep.mubr.msk.f32.mxu0 %vm13038_vm1, %v13039_v28 }
 0x615   :  { %11418 = vmatmul.mubr.msk.f32.gmra.mrb[34].mxu0 %vm5817_vm3, %v5332_v39 }
 0x616   :  { %11420 = vmatprep.mubr.msk.f32.mxu0 %vm13038_vm1, %v13039_v28 }
 0x619   :  { %11421 = vmatmul.mubr.msk.f32.gmra.mrb[36].mxu0 %vm5817_vm3, %v5337_v12 }
 0x61a   :  { %11423 = vmatprep.mubr.msk.f32.mxu0 %vm13038_vm1, %v13039_v28 }
 0x61d   :  { %11424 = vmatmul.mubr.msk.f32.gmra.mrb[38].mxu0 %vm5817_vm3, %v5342_v48 }
 0x61e   :  { %11426 = vmatprep.mubr.msk.f32.mxu0 %vm13038_vm1, %v13039_v28 }
 0x621   :  { %11427 = vmatmul.mubr.msk.f32.gmra.mrb[40].mxu0 %vm5817_vm3, %v5347_v56 }
 0x622   :  { %11762 = vmatprep.mubr.msk.f32.mxu0 %vm13038_vm1, %v13039_v28 }
 0x6a4   :  { %v6291_v2 = vpop.f32.mrb[0].mxu0 }
 0x6a5   :  { %6395 = vst.msk [vmem:[#allocation3] sm:$0xff] %vm5174_vm0, %v6291_v2  ;;  %v11368_v25 = vpop.f32.mrb[1].mxu0 }
 0x6a8   :  { %v6296_v53 = vpop.f32.mrb[2].mxu0 }
 0x6a9   :  { %6396 = vst.msk [vmem:[#allocation3 + $0x8] sm:$0xff] %vm5174_vm0, %v6296_v53  ;;  %v11371_v9 = vpop.f32.mrb[3].mxu0 }
 0x6ac   :  { %v6301_v3 = vpop.f32.mrb[4].mxu0  ;;  %v6416_v14 = vld [vmem:[#allocation3] sm:$0xff] }
 0x6ad   :  { %6397 = vst.msk [vmem:[#allocation3 + $0x10] sm:$0xff] %vm5174_vm0, %v6301_v3  ;;  %v11374_v45 = vpop.f32.mrb[5].mxu0 }
 0x6b0   :  { %v6306_v5 = vpop.f32.mrb[6].mxu0  ;;  %v6439_v26 = vld [vmem:[#allocation3 + $0x1] sm:$0xff] }
 0x6b1   :  { %6398 = vst.msk [vmem:[#allocation3 + $0x18] sm:$0xff] %vm5174_vm0, %v6306_v5  ;;  %v11377_v42 = vpop.f32.mrb[7].mxu0  ;;  %11438 = vmatmul.mubr.msk.f32.vlgmr.msra.gmra.mrb[0].mxu1 %vm5174_vm0, %v6439_v26  ;;  %v6915_v5 = vld [vmem:[%s19640_s6 + $0x40] sm:$0xff]  ;;  %v6916_v26 = vld [vmem:[%s19640_s6 + $0x48] sm:$0xff] }
 0x6b2   :  { %11440 = vmatprep.mubr.msk.f32.mxu1 %vm13038_vm1, %v13039_v28  ;;  %12466 = vmatpush3.bf16.msra.mxu1 %v12465_v6  ;;  %v12471_v62 = vpack.c.bf16 %v6916_v26, %v6915_v5 }
 0x6b3   :  { %12467 = vmatprep.subr.bf16.mxu1 %v19665_v46 }
 0x6b4   :  { %v6311_v32 = vpop.f32.mrb[8].mxu0  ;;  %v6440_v63 = vld [vmem:[#allocation3 + $0x9] sm:$0xff] }
 0x6b5   :  { %6399 = vst.msk [vmem:[#allocation3 + $0x20] sm:$0xff] %vm5174_vm0, %v6311_v32  ;;  %v11380_v27 = vpop.f32.mrb[9].mxu0  ;;  %11441 = vmatmul.mubr.msk.f32.gmra.mrb[2].mxu1 %vm5174_vm0, %v6440_v63  ;;  %11763 = vmatmul.mubr.msk.f32.vlgmr.msra.gmra.mrb[42].mxu0 %vm5174_vm0, %v6440_v63  ;;  %v17968_v63 = vld [vmem:[#allocation3 + $0x8] sm:$0xff]  ;;  %v17981_v54 = vld [vmem:[#allocation3 + $0x10] sm:$0xff] }
 0x6b6   :  { %11443 = vmatprep.mubr.msk.f32.mxu1 %vm13038_vm1, %v13039_v28  ;;  %11765 = vmatprep.mubr.msk.f32.mxu0 %vm13038_vm1, %v13039_v28  ;;  %v17970_v20 = vld [vmem:[#allocation3 + $0xf] sm:$0xff] }
 0x6b7   :  { %12469 = vmatpush3.bf16.msra.mxu1 %v12468_v43  ;;  %12502 = vmatpush3.bf16.msra.mxu0 %v12501_v29  ;;  %v6917_v43 = vld [vmem:[%s19640_s6 + $0x50] sm:$0xff]  ;;  %v6918_v29 = vld [vmem:[%s19640_s6 + $0x58] sm:$0xff] }
 0x6b8   :  { %v6316_v21 = vpop.f32.mrb[10].mxu0  ;;  %v6441_v59 = vld [vmem:[#allocation3 + $0x11] sm:$0xff]  ;;  %12503 = vmatprep.subr.bf16.mxu0 %v19665_v46  ;;  %12470 = vmatprep.subr.bf16.mxu1 %v19665_v46  ;;  %v12474_v32 = vpack.c.bf16 %v6918_v29, %v6917_v43 }
 0x6b9   :  { %6400 = vst.msk [vmem:[#allocation3 + $0x28] sm:$0xff] %vm5174_vm0, %v6316_v21  ;;  %v11383_v0 = vpop.f32.mrb[11].mxu0  ;;  %11444 = vmatmul.mubr.msk.f32.gmra.mrb[4].mxu1 %vm5174_vm0, %v6441_v59  ;;  %11766 = vmatmul.mubr.msk.f32.gmra.mrb[44].mxu0 %vm5174_vm0, %v6441_v59  ;;  %v17983_v27 = vld [vmem:[#allocation3 + $0x17] sm:$0xff] }
 0x6ba   :  { %11446 = vmatprep.mubr.msk.f32.mxu1 %vm13038_vm1, %v13039_v28  ;;  %11768 = vmatprep.mubr.msk.f32.mxu0 %vm13038_vm1, %v13039_v28 }
 0x6bb   :  { %12505 = vmatpush3.bf16.msra.mxu0 %v12504_v17  ;;  %v17994_v17 = vld [vmem:[#allocation3 + $0x18] sm:$0xff] }
 0x6bc   :  { %v6321_v18 = vpop.f32.mrb[12].mxu0  ;;  %v6442_v44 = vld [vmem:[#allocation3 + $0x19] sm:$0xff]  ;;  %12512 = vmatprep.subr.bf16.mxu0 %v19665_v46 }
 0x6bd   :  { %6401 = vst.msk [vmem:[#allocation3 + $0x30] sm:$0xff] %vm5174_vm0, %v6321_v18  ;;  %v11386_v19 = vpop.f32.mrb[13].mxu0  ;;  %11447 = vmatmul.mubr.msk.f32.gmra.mrb[6].mxu1 %vm5174_vm0, %v6442_v44  ;;  %11769 = vmatmul.mubr.msk.f32.gmra.mrb[46].mxu0 %vm5174_vm0, %v6442_v44  ;;  %v17996_v21 = vld [vmem:[#allocation3 + $0x1f] sm:$0xff] }
 0x6be   :  { %11449 = vmatprep.mubr.msk.f32.mxu1 %vm13038_vm1, %v13039_v28  ;;  %11771 = vmatprep.mubr.msk.f32.mxu0 %vm13038_vm1, %v13039_v28  ;;  %v18006_v59 = vld [vmem:[#allocation3 + $0x20] sm:$0xff] }
 0x6c0   :  { %v6326_v13 = vpop.f32.mrb[14].mxu0  ;;  %v6443_v30 = vld [vmem:[#allocation3 + $0x21] sm:$0xff] }
 0x6c1   :  { %6402 = vst.msk [vmem:[#allocation3 + $0x38] sm:$0xff] %vm5174_vm0, %v6326_v13  ;;  %v11389_v47 = vpop.f32.mrb[15].mxu0  ;;  %11450 = vmatmul.mubr.msk.f32.gmra.mrb[8].mxu1 %vm5174_vm0, %v6443_v30  ;;  %11772 = vmatmul.mubr.msk.f32.gmra.mrb[48].mxu0 %vm5174_vm0, %v6443_v30  ;;  %v18008_v0 = vld [vmem:[#allocation3 + $0x27] sm:$0xff] }
 0x6c2   :  { %11452 = vmatprep.mubr.msk.f32.mxu1 %vm13038_vm1, %v13039_v28  ;;  %11774 = vmatprep.mubr.msk.f32.mxu0 %vm13038_vm1, %v13039_v28  ;;  %v18018_v18 = vld [vmem:[#allocation3 + $0x28] sm:$0xff] }
 0x6c4   :  { %v6331_v37 = vpop.f32.mrb[16].mxu0  ;;  %v6444_v34 = vld [vmem:[#allocation3 + $0x29] sm:$0xff] }
 0x6c5   :  { %6403 = vst.msk [vmem:[#allocation3 + $0x40] sm:$0xff] %vm5174_vm0, %v6331_v37  ;;  %v11392_v61 = vpop.f32.mrb[17].mxu0  ;;  %11453 = vmatmul.mubr.msk.f32.gmra.mrb[10].mxu1 %vm5174_vm0, %v6444_v34  ;;  %11775 = vmatmul.mubr.msk.f32.gmra.mrb[50].mxu0 %vm5174_vm0, %v6444_v34  ;;  %v18020_v44 = vld [vmem:[#allocation3 + $0x2f] sm:$0xff] }
 0x6c6   :  { %11455 = vmatprep.mubr.msk.f32.mxu1 %vm13038_vm1, %v13039_v28  ;;  %11777 = vmatprep.mubr.msk.f32.mxu0 %vm13038_vm1, %v13039_v28  ;;  %v18030_v19 = vld [vmem:[#allocation3 + $0x30] sm:$0xff] }
 0x6c8   :  { %v6336_v36 = vpop.f32.mrb[18].mxu0  ;;  %v6445_v1 = vld [vmem:[#allocation3 + $0x31] sm:$0xff] }
 0x6c9   :  { %6404 = vst.msk [vmem:[#allocation3 + $0x48] sm:$0xff] %vm5174_vm0, %v6336_v36  ;;  %v11395_v22 = vpop.f32.mrb[19].mxu0  ;;  %11456 = vmatmul.mubr.msk.f32.gmra.mrb[12].mxu1 %vm5174_vm0, %v6445_v1  ;;  %11778 = vmatmul.mubr.msk.f32.gmra.mrb[52].mxu0 %vm5174_vm0, %v6445_v1  ;;  %v18032_v13 = vld [vmem:[#allocation3 + $0x37] sm:$0xff] }
 0x6ca   :  { %11458 = vmatprep.mubr.msk.f32.mxu1 %vm13038_vm1, %v13039_v28  ;;  %11780 = vmatprep.mubr.msk.f32.mxu0 %vm13038_vm1, %v13039_v28  ;;  %v18042_v30 = vld [vmem:[#allocation3 + $0x38] sm:$0xff] }
 0x6cc   :  { %v6341_v55 = vpop.f32.mrb[20].mxu0  ;;  %v6446_v58 = vld [vmem:[#allocation3 + $0x39] sm:$0xff] }
 0x6cd   :  { %6405 = vst.msk [vmem:[#allocation3 + $0x50] sm:$0xff] %vm5174_vm0, %v6341_v55  ;;  %v11398_v10 = vpop.f32.mrb[21].mxu0  ;;  %11459 = vmatmul.mubr.msk.f32.gmra.mrb[14].mxu1 %vm5174_vm0, %v6446_v58  ;;  %11781 = vmatmul.mubr.msk.f32.gmra.mrb[54].mxu0 %vm5174_vm0, %v6446_v58  ;;  %v18044_v47 = vld [vmem:[#allocation3 + $0x3f] sm:$0xff] }
 0x6ce   :  { %11461 = vmatprep.mubr.msk.f32.mxu1 %vm13038_vm1, %v13039_v28  ;;  %11783 = vmatprep.mubr.msk.f32.mxu0 %vm13038_vm1, %v13039_v28  ;;  %v18054_v37 = vld [vmem:[#allocation3 + $0x40] sm:$0xff] }
 0x6d0   :  { %v6346_v40 = vpop.f32.mrb[22].mxu0  ;;  %v6447_v38 = vld [vmem:[#allocation3 + $0x41] sm:$0xff] }
 0x6d1   :  { %6406 = vst.msk [vmem:[#allocation3 + $0x58] sm:$0xff] %vm5174_vm0, %v6346_v40  ;;  %v11401_v11 = vpop.f32.mrb[23].mxu0  ;;  %11462 = vmatmul.mubr.msk.f32.gmra.mrb[16].mxu1 %vm5174_vm0, %v6447_v38  ;;  %11784 = vmatmul.mubr.msk.f32.gmra.mrb[56].mxu0 %vm5174_vm0, %v6447_v38  ;;  %v18056_v34 = vld [vmem:[#allocation3 + $0x47] sm:$0xff] }
 0x6d2   :  { %11464 = vmatprep.mubr.msk.f32.mxu1 %vm13038_vm1, %v13039_v28  ;;  %11786 = vmatprep.mubr.msk.f32.mxu0 %vm13038_vm1, %v13039_v28  ;;  %v18066_v61 = vld [vmem:[#allocation3 + $0x48] sm:$0xff] }
 0x6d4   :  { %v6351_v24 = vpop.f32.mrb[24].mxu0  ;;  %v6448_v39 = vld [vmem:[#allocation3 + $0x49] sm:$0xff] }
 0x6d5   :  { %6407 = vst.msk [vmem:[#allocation3 + $0x60] sm:$0xff] %vm5174_vm0, %v6351_v24  ;;  %v11404_v12 = vpop.f32.mrb[25].mxu0  ;;  %11465 = vmatmul.mubr.msk.f32.gmra.mrb[18].mxu1 %vm5174_vm0, %v6448_v39  ;;  %11787 = vmatmul.mubr.msk.f32.gmra.mrb[58].mxu0 %vm5174_vm0, %v6448_v39  ;;  %v18068_v36 = vld [vmem:[#allocation3 + $0x4f] sm:$0xff] }
 0x6d6   :  { %11467 = vmatprep.mubr.msk.f32.mxu1 %vm13038_vm1, %v13039_v28  ;;  %11789 = vmatprep.mubr.msk.f32.mxu0 %vm13038_vm1, %v13039_v28  ;;  %v18078_v1 = vld [vmem:[#allocation3 + $0x50] sm:$0xff] }
 0x6d8   :  { %v6356_v48 = vpop.f32.mrb[26].mxu0  ;;  %v6449_v56 = vld [vmem:[#allocation3 + $0x51] sm:$0xff] }
 0x6d9   :  { %6408 = vst.msk [vmem:[#allocation3 + $0x68] sm:$0xff] %vm5174_vm0, %v6356_v48  ;;  %v11407_v23 = vpop.f32.mrb[27].mxu0  ;;  %11468 = vmatmul.mubr.msk.f32.gmra.mrb[20].mxu1 %vm5174_vm0, %v6449_v56  ;;  %11790 = vmatmul.mubr.msk.f32.gmra.mrb[60].mxu0 %vm5174_vm0, %v6449_v56  ;;  %v18080_v22 = vld [vmem:[#allocation3 + $0x57] sm:$0xff] }
 0x6da   :  { %11470 = vmatprep.mubr.msk.f32.mxu1 %vm13038_vm1, %v13039_v28  ;;  %11792 = vmatprep.mubr.msk.f32.mxu0 %vm13038_vm1, %v13039_v28  ;;  %v18090_v55 = vld [vmem:[#allocation3 + $0x58] sm:$0xff] }
 0x6dc   :  { %v6361_v49 = vpop.f32.mrb[28].mxu0  ;;  %v6450_v57 = vld [vmem:[#allocation3 + $0x59] sm:$0xff] }
 0x6dd   :  { %6409 = vst.msk [vmem:[#allocation3 + $0x70] sm:$0xff] %vm5174_vm0, %v6361_v49  ;;  %v11410_v16 = vpop.f32.mrb[29].mxu0  ;;  %11471 = vmatmul.mubr.msk.f32.gmra.mrb[22].mxu1 %vm5174_vm0, %v6450_v57  ;;  %11793 = vmatmul.mubr.msk.f32.gmra.mrb[62].mxu0 %vm5174_vm0, %v6450_v57  ;;  %v18092_v58 = vld [vmem:[#allocation3 + $0x5f] sm:$0xff] }
 0x6de   :  { %11473 = vmatprep.mubr.msk.f32.mxu1 %vm13038_vm1, %v13039_v28  ;;  %11795 = vmatprep.mubr.msk.f32.mxu0 %vm13038_vm1, %v13039_v28  ;;  %v18102_v10 = vld [vmem:[#allocation3 + $0x60] sm:$0xff] }
 0x6df   :  { %v7174_v16 = vld [vmem:[%s19640_s6 + $0x60] sm:$0xff] }
 0x6e0   :  { %v6366_v33 = vpop.f32.mrb[30].mxu0  ;;  %v6451_v4 = vld [vmem:[#allocation3 + $0x61] sm:$0xff] }
 0x6e1   :  { %6410 = vst.msk [vmem:[#allocation3 + $0x78] sm:$0xff] %vm5174_vm0, %v6366_v33  ;;  %v11413_v7 = vpop.f32.mrb[31].mxu0  ;;  %11474 = vmatmul.mubr.msk.f32.gmra.mrb[24].mxu1 %vm5174_vm0, %v6451_v4  ;;  %11796 = vmatmul.mubr.msk.f32.gmra.mrb[64].mxu0 %vm5174_vm0, %v6451_v4  ;;  %v18104_v40 = vld [vmem:[#allocation3 + $0x67] sm:$0xff]  ;;  %v6907_v5 = vld [vmem:[#allocation3 + $0x5a] sm:$0xff] }
 0x6e2   :  { %11476 = vmatprep.mubr.msk.f32.mxu1 %vm13038_vm1, %v13039_v28  ;;  %11798 = vmatprep.mubr.msk.f32.mxu0 %vm13038_vm1, %v13039_v28  ;;  %v18114_v38 = vld [vmem:[#allocation3 + $0x68] sm:$0xff] }
 0x6e3   :  { %v7175_v33 = vld [vmem:[%s19640_s6 + $0x68] sm:$0xff] }
 0x6e4   :  { %v6371_v51 = vpop.f32.mrb[32].mxu0  ;;  %v6452_v50 = vld [vmem:[#allocation3 + $0x69] sm:$0xff] }
 0x6e5   :  { %6411 = vst.msk [vmem:[#allocation3 + $0x80] sm:$0xff] %vm5174_vm0, %v6371_v51  ;;  %v11416_v8 = vpop.f32.mrb[33].mxu0  ;;  %11477 = vmatmul.mubr.msk.f32.gmra.mrb[26].mxu1 %vm5174_vm0, %v6452_v50  ;;  %11799 = vmatmul.mubr.msk.f32.gmra.mrb[66].mxu0 %vm5174_vm0, %v6452_v50  ;;  %v18116_v11 = vld [vmem:[#allocation3 + $0x6f] sm:$0xff]  ;;  %v12477_v51 = vpack.c.bf16 %v7175_v33, %v7174_v16  ;;  %v6908_v26 = vld [vmem:[#allocation3 + $0x62] sm:$0xff] }
 0x6e6   :  { %11479 = vmatprep.mubr.msk.f32.mxu1 %vm13038_vm1, %v13039_v28  ;;  %11801 = vmatprep.mubr.msk.f32.mxu0 %vm13038_vm1, %v13039_v28  ;;  %v18126_v24 = vld [vmem:[#allocation3 + $0x70] sm:$0xff]  ;;  %v7177_v8 = vld [vmem:[%s19640_s6 + $0x78] sm:$0xff] }
 0x6e7   :  { %v7176_v50 = vld [vmem:[%s19640_s6 + $0x70] sm:$0xff] }
 0x6e8   :  { %v6376_v52 = vpop.f32.mrb[34].mxu0  ;;  %v6453_v15 = vld [vmem:[#allocation3 + $0x71] sm:$0xff] }
 0x6e9   :  { %6412 = vst.msk [vmem:[#allocation3 + $0x88] sm:$0xff] %vm5174_vm0, %v6376_v52  ;;  %v11419_v2 = vpop.f32.mrb[35].mxu0  ;;  %11480 = vmatmul.mubr.msk.f32.gmra.mrb[28].mxu1 %vm5174_vm0, %v6453_v15  ;;  %11802 = vmatmul.mubr.msk.f32.gmra.mrb[68].mxu0 %vm5174_vm0, %v6453_v15  ;;  %v18128_v39 = vld [vmem:[#allocation3 + $0x77] sm:$0xff]  ;;  %v6896_v52 = vld [vmem:[#allocation3 + $0x2] sm:$0xff] }
 0x6ea   :  { %11482 = vmatprep.mubr.msk.f32.mxu1 %vm13038_vm1, %v13039_v28  ;;  %11804 = vmatprep.mubr.msk.f32.mxu0 %vm13038_vm1, %v13039_v28  ;;  %v18138_v12 = vld [vmem:[#allocation3 + $0x78] sm:$0xff]  ;;  %v12480_v2 = vpack.c.bf16 %v7177_v8, %v7176_v50 }
 0x6ec   :  { %v6381_v25 = vpop.f32.mrb[36].mxu0  ;;  %v6454_v53 = vld [vmem:[#allocation3 + $0x79] sm:$0xff] }
 0x6ed   :  { %6413 = vst.msk [vmem:[#allocation3 + $0x90] sm:$0xff] %vm5174_vm0, %v6381_v25  ;;  %v11422_v9 = vpop.f32.mrb[37].mxu0  ;;  %11483 = vmatmul.mubr.msk.f32.gmra.mrb[30].mxu1 %vm5174_vm0, %v6454_v53  ;;  %11805 = vmatmul.mubr.msk.f32.gmra.mrb[70].mxu0 %vm5174_vm0, %v6454_v53  ;;  %v18140_v48 = vld [vmem:[#allocation3 + $0x7f] sm:$0xff]  ;;  %v6897_v25 = vld [vmem:[#allocation3 + $0xa] sm:$0xff]  ;;  %v6898_v53 = vld [vmem:[#allocation3 + $0x12] sm:$0xff] }
 0x6ee   :  { %11485 = vmatprep.mubr.msk.f32.mxu1 %vm13038_vm1, %v13039_v28  ;;  %11807 = vmatprep.mubr.msk.f32.mxu0 %vm13038_vm1, %v13039_v28  ;;  %v18150_v56 = vld [vmem:[#allocation3 + $0x80] sm:$0xff] }
 0x6ef   :  { %v6899_v9 = vld [vmem:[#allocation3 + $0x1a] sm:$0xff] }
 0x6f0   :  { %v6386_v31 = vpop.f32.mrb[38].mxu0  ;;  %v6455_v60 = vld [vmem:[#allocation3 + $0x81] sm:$0xff] }
 0x6f1   :  { %6414 = vst.msk [vmem:[#allocation3 + $0x98] sm:$0xff] %vm5174_vm0, %v6386_v31  ;;  %v11425_v3 = vpop.f32.mrb[39].mxu0  ;;  %11486 = vmatmul.mubr.msk.f32.gmra.mrb[32].mxu1 %vm5174_vm0, %v6455_v60  ;;  %11808 = vmatmul.mubr.msk.f32.gmra.mrb[72].mxu0 %vm5174_vm0, %v6455_v60  ;;  %v18152_v23 = vld [vmem:[#allocation3 + $0x87] sm:$0xff]  ;;  %v6911_v43 = vld [vmem:[#allocation3 + $0x7a] sm:$0xff] }
 0x6f2   :  { %11488 = vmatprep.mubr.msk.f32.mxu1 %vm13038_vm1, %v13039_v28  ;;  %11810 = vmatprep.mubr.msk.f32.mxu0 %vm13038_vm1, %v13039_v28  ;;  %v18162_v49 = vld [vmem:[#allocation3 + $0x88] sm:$0xff]  ;;  %v6902_v3 = vld [vmem:[#allocation3 + $0x32] sm:$0xff] }
 0x6f3   :  { %v6900_v31 = vld [vmem:[#allocation3 + $0x22] sm:$0xff]  ;;  %v6901_v60 = vld [vmem:[#allocation3 + $0x2a] sm:$0xff] }
 0x6f4   :  { %v6391_v45 = vpop.f32.mrb[40].mxu0  ;;  %v6456_v6 = vld [vmem:[#allocation3 + $0x89] sm:$0xff] }
 0x6f5   :  { %6415 = vst.msk [vmem:[#allocation3 + $0xa0] sm:$0xff] %vm5174_vm0, %v6391_v45  ;;  %v11428_v35 = vpop.f32.mrb[41].mxu0  ;;  %11489 = vmatmul.mubr.msk.f32.gmra.mrb[34].mxu1 %vm5174_vm0, %v6456_v6  ;;  %11811 = vmatmul.mubr.msk.f32.gmra.mrb[74].mxu0 %vm5174_vm0, %v6456_v6  ;;  %v18164_v57 = vld [vmem:[#allocation3 + $0x8f] sm:$0xff]  ;;  %v6903_v45 = vld [vmem:[#allocation3 + $0x3a] sm:$0xff]  ;;  %v6904_v6 = vld [vmem:[#allocation3 + $0x42] sm:$0xff] }
 0x6f6   :  { %11491 = vmatprep.mubr.msk.f32.mxu1 %vm13038_vm1, %v13039_v28  ;;  %11813 = vmatprep.mubr.msk.f32.mxu0 %vm13038_vm1, %v13039_v28  ;;  %v18180_v4 = vld [vmem:[#allocation3 + $0x90] sm:$0xff]  ;;  %v6912_v33 = vld [vmem:[#allocation3 + $0x82] sm:$0xff] }
 0x6f7   :  { %v6905_v35 = vld [vmem:[#allocation3 + $0x4a] sm:$0xff] }
 0x6f8   :  { %v6457_v41 = vld [vmem:[#allocation3 + $0x91] sm:$0xff] }
 0x6f9   :  { %11492 = vmatmul.mubr.msk.f32.gmra.mrb[36].mxu1 %vm5174_vm0, %v6457_v41  ;;  %11814 = vmatmul.mubr.msk.f32.gmra.mrb[76].mxu0 %vm5174_vm0, %v6457_v41  ;;  %v18182_v7 = vld [vmem:[#allocation3 + $0x97] sm:$0xff] }
 0x6fa   :  { %11502 = vmatprep.mubr.msk.f32.mxu1 %vm13038_vm1, %v13039_v28  ;;  %11816 = vmatprep.mubr.msk.f32.mxu0 %vm13038_vm1, %v13039_v28  ;;  %v6906_v41 = vld [vmem:[#allocation3 + $0x52] sm:$0xff] }
 0x6fc   :  { %v7691_v42 = vld [vmem:[#allocation3 + $0x99] sm:$0xff] }
 0x6fd   :  { %11503 = vmatmul.mubr.msk.f32.vlgmr.msra.gmra.mrb[38].mxu1 %vm5174_vm0, %v6416_v14  ;;  %11817 = vmatmul.mubr.msk.f32.gmra.mrb[78].mxu0 %vm5174_vm0, %v7691_v42  ;;  %v8209_v15 = vld [vmem:[#allocation3 + $0x9f] sm:$0xff]  ;;  %v6909_v14 = vld [vmem:[#allocation3 + $0x6a] sm:$0xff] }
 0x6fe   :  { %11505 = vmatprep.mubr.msk.f32.mxu1 %vm13038_vm1, %v13039_v28  ;;  %11892 = vmatprep.mubr.msk.f32.mxu0 %vm13038_vm1, %v13039_v28 }
 0x6ff   :  { %12472 = vmatpush3.bf16.msra.mxu1 %v12471_v62  ;;  %v6910_v62 = vld [vmem:[#allocation3 + $0x72] sm:$0xff] }
 0x700   :  { %12473 = vmatprep.subr.bf16.mxu1 %v19665_v46 }
 0x701   :  { %11506 = vmatmul.mubr.msk.f32.gmra.mrb[40].mxu1 %vm5174_vm0, %v17968_v63  ;;  %11893 = vmatmul.mubr.msk.f32.vlgmr.msra.gmra.mrb[80].mxu0 %vm5174_vm0, %v17970_v20 }
 0x702   :  { %11508 = vmatprep.mubr.msk.f32.mxu1 %vm13038_vm1, %v13039_v28  ;;  %11895 = vmatprep.mubr.msk.f32.mxu0 %vm13038_vm1, %v13039_v28 }
 0x703   :  { %12475 = vmatpush3.bf16.msra.mxu1 %v12474_v32 }
 0x704   :  { %12476 = vmatprep.subr.bf16.mxu1 %v19665_v46 }
 0x705   :  { %11509 = vmatmul.mubr.msk.f32.gmra.mrb[42].mxu1 %vm5174_vm0, %v17981_v54  ;;  %11896 = vmatmul.mubr.msk.f32.gmra.mrb[82].mxu0 %vm5174_vm0, %v17983_v27 }
 0x706   :  { %11511 = vmatprep.mubr.msk.f32.mxu1 %vm13038_vm1, %v13039_v28  ;;  %11898 = vmatprep.mubr.msk.f32.mxu0 %vm13038_vm1, %v13039_v28 }
 0x709   :  { %11512 = vmatmul.mubr.msk.f32.gmra.mrb[44].mxu1 %vm5174_vm0, %v17994_v17  ;;  %11899 = vmatmul.mubr.msk.f32.gmra.mrb[84].mxu0 %vm5174_vm0, %v17996_v21 }
 0x70a   :  { %11514 = vmatprep.mubr.msk.f32.mxu1 %vm13038_vm1, %v13039_v28  ;;  %11901 = vmatprep.mubr.msk.f32.mxu0 %vm13038_vm1, %v13039_v28 }
 0x70d   :  { %11515 = vmatmul.mubr.msk.f32.gmra.mrb[46].mxu1 %vm5174_vm0, %v18006_v59  ;;  %11902 = vmatmul.mubr.msk.f32.gmra.mrb[86].mxu0 %vm5174_vm0, %v18008_v0 }
 0x70e   :  { %11517 = vmatprep.mubr.msk.f32.mxu1 %vm13038_vm1, %v13039_v28  ;;  %11904 = vmatprep.mubr.msk.f32.mxu0 %vm13038_vm1, %v13039_v28 }
 0x711   :  { %11518 = vmatmul.mubr.msk.f32.gmra.mrb[48].mxu1 %vm5174_vm0, %v18018_v18  ;;  %11905 = vmatmul.mubr.msk.f32.gmra.mrb[88].mxu0 %vm5174_vm0, %v18020_v44 }
 0x712   :  { %11520 = vmatprep.mubr.msk.f32.mxu1 %vm13038_vm1, %v13039_v28  ;;  %11907 = vmatprep.mubr.msk.f32.mxu0 %vm13038_vm1, %v13039_v28 }
 0x715   :  { %11521 = vmatmul.mubr.msk.f32.gmra.mrb[50].mxu1 %vm5174_vm0, %v18030_v19  ;;  %11908 = vmatmul.mubr.msk.f32.gmra.mrb[90].mxu0 %vm5174_vm0, %v18032_v13 }
 0x716   :  { %11523 = vmatprep.mubr.msk.f32.mxu1 %vm13038_vm1, %v13039_v28  ;;  %11910 = vmatprep.mubr.msk.f32.mxu0 %vm13038_vm1, %v13039_v28 }
 0x719   :  { %11524 = vmatmul.mubr.msk.f32.gmra.mrb[52].mxu1 %vm5174_vm0, %v18042_v30  ;;  %11911 = vmatmul.mubr.msk.f32.gmra.mrb[92].mxu0 %vm5174_vm0, %v18044_v47 }
 0x71a   :  { %11526 = vmatprep.mubr.msk.f32.mxu1 %vm13038_vm1, %v13039_v28  ;;  %11913 = vmatprep.mubr.msk.f32.mxu0 %vm13038_vm1, %v13039_v28 }
 0x71d   :  { %11527 = vmatmul.mubr.msk.f32.gmra.mrb[54].mxu1 %vm5174_vm0, %v18054_v37  ;;  %11914 = vmatmul.mubr.msk.f32.gmra.mrb[94].mxu0 %vm5174_vm0, %v18056_v34 }
 0x71e   :  { %11529 = vmatprep.mubr.msk.f32.mxu1 %vm13038_vm1, %v13039_v28  ;;  %11916 = vmatprep.mubr.msk.f32.mxu0 %vm13038_vm1, %v13039_v28 }
 0x721   :  { %11530 = vmatmul.mubr.msk.f32.gmra.mrb[56].mxu1 %vm5174_vm0, %v18066_v61  ;;  %11917 = vmatmul.mubr.msk.f32.gmra.mrb[96].mxu0 %vm5174_vm0, %v18068_v36 }
 0x722   :  { %11532 = vmatprep.mubr.msk.f32.mxu1 %vm13038_vm1, %v13039_v28  ;;  %11919 = vmatprep.mubr.msk.f32.mxu0 %vm13038_vm1, %v13039_v28 }
 0x725   :  { %11533 = vmatmul.mubr.msk.f32.gmra.mrb[58].mxu1 %vm5174_vm0, %v18078_v1  ;;  %11920 = vmatmul.mubr.msk.f32.gmra.mrb[98].mxu0 %vm5174_vm0, %v18080_v22 }
 0x726   :  { %11535 = vmatprep.mubr.msk.f32.mxu1 %vm13038_vm1, %v13039_v28  ;;  %11922 = vmatprep.mubr.msk.f32.mxu0 %vm13038_vm1, %v13039_v28 }
 0x729   :  { %11536 = vmatmul.mubr.msk.f32.gmra.mrb[60].mxu1 %vm5174_vm0, %v18090_v55  ;;  %11923 = vmatmul.mubr.msk.f32.gmra.mrb[100].mxu0 %vm5174_vm0, %v18092_v58 }
 0x72a   :  { %11538 = vmatprep.mubr.msk.f32.mxu1 %vm13038_vm1, %v13039_v28  ;;  %11925 = vmatprep.mubr.msk.f32.mxu0 %vm13038_vm1, %v13039_v28 }
 0x72d   :  { %11539 = vmatmul.mubr.msk.f32.gmra.mrb[62].mxu1 %vm5174_vm0, %v18102_v10  ;;  %11926 = vmatmul.mubr.msk.f32.gmra.mrb[102].mxu0 %vm5174_vm0, %v18104_v40 }
 0x72e   :  { %11541 = vmatprep.mubr.msk.f32.mxu1 %vm13038_vm1, %v13039_v28  ;;  %11928 = vmatprep.mubr.msk.f32.mxu0 %vm13038_vm1, %v13039_v28 }
 0x731   :  { %11542 = vmatmul.mubr.msk.f32.gmra.mrb[64].mxu1 %vm5174_vm0, %v18114_v38  ;;  %11929 = vmatmul.mubr.msk.f32.gmra.mrb[104].mxu0 %vm5174_vm0, %v18116_v11 }
 0x732   :  { %11544 = vmatprep.mubr.msk.f32.mxu1 %vm13038_vm1, %v13039_v28  ;;  %11931 = vmatprep.mubr.msk.f32.mxu0 %vm13038_vm1, %v13039_v28 }
 0x735   :  { %11545 = vmatmul.mubr.msk.f32.gmra.mrb[66].mxu1 %vm5174_vm0, %v18126_v24  ;;  %11932 = vmatmul.mubr.msk.f32.gmra.mrb[106].mxu0 %vm5174_vm0, %v18128_v39 }
 0x736   :  { %11547 = vmatprep.mubr.msk.f32.mxu1 %vm13038_vm1, %v13039_v28  ;;  %11934 = vmatprep.mubr.msk.f32.mxu0 %vm13038_vm1, %v13039_v28 }
 0x739   :  { %11548 = vmatmul.mubr.msk.f32.gmra.mrb[68].mxu1 %vm5174_vm0, %v18138_v12  ;;  %11935 = vmatmul.mubr.msk.f32.gmra.mrb[108].mxu0 %vm5174_vm0, %v18140_v48 }
 0x73a   :  { %11550 = vmatprep.mubr.msk.f32.mxu1 %vm13038_vm1, %v13039_v28  ;;  %11937 = vmatprep.mubr.msk.f32.mxu0 %vm13038_vm1, %v13039_v28 }
 0x73d   :  { %11551 = vmatmul.mubr.msk.f32.gmra.mrb[70].mxu1 %vm5174_vm0, %v18150_v56  ;;  %11938 = vmatmul.mubr.msk.f32.gmra.mrb[110].mxu0 %vm5174_vm0, %v18152_v23 }
 0x73e   :  { %11553 = vmatprep.mubr.msk.f32.mxu1 %vm13038_vm1, %v13039_v28  ;;  %11940 = vmatprep.mubr.msk.f32.mxu0 %vm13038_vm1, %v13039_v28 }
 0x741   :  { %11554 = vmatmul.mubr.msk.f32.gmra.mrb[72].mxu1 %vm5174_vm0, %v18162_v49  ;;  %11941 = vmatmul.mubr.msk.f32.gmra.mrb[112].mxu0 %vm5174_vm0, %v18164_v57 }
 0x742   :  { %11556 = vmatprep.mubr.msk.f32.mxu1 %vm13038_vm1, %v13039_v28  ;;  %11943 = vmatprep.mubr.msk.f32.mxu0 %vm13038_vm1, %v13039_v28 }
 0x745   :  { %11557 = vmatmul.mubr.msk.f32.gmra.mrb[74].mxu1 %vm5174_vm0, %v18180_v4  ;;  %11944 = vmatmul.mubr.msk.f32.gmra.mrb[114].mxu0 %vm5174_vm0, %v18182_v7 }
 0x746   :  { %11567 = vmatprep.mubr.msk.f32.mxu1 %vm13038_vm1, %v13039_v28  ;;  %11946 = vmatprep.mubr.msk.f32.mxu0 %vm13038_vm1, %v13039_v28 }
 0x749   :  { %11568 = vmatmul.mubr.msk.f32.vlgmr.msra.gmra.mrb[76].mxu1 %vm5174_vm0, %v6896_v52  ;;  %11947 = vmatmul.mubr.msk.f32.gmra.mrb[116].mxu0 %vm5174_vm0, %v8209_v15  ;;  %v6913_v15 = vld [vmem:[#allocation3 + $0x8a] sm:$0xff] }
 0x74a   :  { %11570 = vmatprep.mubr.msk.f32.mxu1 %vm13038_vm1, %v13039_v28  ;;  %12478 = vmatpush3.bf16.msra.mxu1 %v12477_v51 }
 0x74b   :  { %12479 = vmatprep.subr.bf16.mxu1 %v19665_v46 }
 0x74d   :  { %11571 = vmatmul.mubr.msk.f32.gmra.mrb[78].mxu1 %vm5174_vm0, %v6897_v25 }
 0x74e   :  { %11573 = vmatprep.mubr.msk.f32.mxu1 %vm13038_vm1, %v13039_v28  ;;  %12481 = vmatpush3.bf16.msra.mxu1 %v12480_v2 }
 0x74f   :  { %12482 = vmatprep.subr.bf16.mxu1 %v19665_v46 }
 0x751   :  { %11574 = vmatmul.mubr.msk.f32.gmra.mrb[80].mxu1 %vm5174_vm0, %v6898_v53  ;;  %v7433_v53 = vld [vmem:[%s19640_s6 + $0x80] sm:$0xff] }
 0x752   :  { %11576 = vmatprep.mubr.msk.f32.mxu1 %vm13038_vm1, %v13039_v28 }
 0x755   :  { %11577 = vmatmul.mubr.msk.f32.gmra.mrb[82].mxu1 %vm5174_vm0, %v6899_v9  ;;  %v7434_v9 = vld [vmem:[%s19640_s6 + $0x88] sm:$0xff] }
 0x756   :  { %11579 = vmatprep.mubr.msk.f32.mxu1 %vm13038_vm1, %v13039_v28 }
 0x759   :  { %11580 = vmatmul.mubr.msk.f32.gmra.mrb[84].mxu1 %vm5174_vm0, %v6900_v31 }
 0x75a   :  { %11582 = vmatprep.mubr.msk.f32.mxu1 %vm13038_vm1, %v13039_v28 }
 0x75d   :  { %11583 = vmatmul.mubr.msk.f32.gmra.mrb[86].mxu1 %vm5174_vm0, %v6901_v60 }
 0x75e   :  { %11585 = vmatprep.mubr.msk.f32.mxu1 %vm13038_vm1, %v13039_v28 }
 0x761   :  { %11586 = vmatmul.mubr.msk.f32.gmra.mrb[88].mxu1 %vm5174_vm0, %v6902_v3  ;;  %v6914_v3 = vld [vmem:[#allocation3 + $0x92] sm:$0xff] }
 0x762   :  { %11588 = vmatprep.mubr.msk.f32.mxu1 %vm13038_vm1, %v13039_v28 }
 0x765   :  { %11589 = vmatmul.mubr.msk.f32.gmra.mrb[90].mxu1 %vm5174_vm0, %v6903_v45 }
 0x766   :  { %11591 = vmatprep.mubr.msk.f32.mxu1 %vm13038_vm1, %v13039_v28 }
 0x769   :  { %11592 = vmatmul.mubr.msk.f32.gmra.mrb[92].mxu1 %vm5174_vm0, %v6904_v6 }
 0x76a   :  { %11594 = vmatprep.mubr.msk.f32.mxu1 %vm13038_vm1, %v13039_v28 }
 0x76d   :  { %11595 = vmatmul.mubr.msk.f32.gmra.mrb[94].mxu1 %vm5174_vm0, %v6905_v35  ;;  %v12483_v35 = vpack.c.bf16 %v7434_v9, %v7433_v53 }
 0x76e   :  { %11597 = vmatprep.mubr.msk.f32.mxu1 %vm13038_vm1, %v13039_v28 }
 0x771   :  { %11598 = vmatmul.mubr.msk.f32.gmra.mrb[96].mxu1 %vm5174_vm0, %v6906_v41  ;;  %v7435_v41 = vld [vmem:[%s19640_s6 + $0x90] sm:$0xff] }
 0x772   :  { %11600 = vmatprep.mubr.msk.f32.mxu1 %vm13038_vm1, %v13039_v28 }
 0x775   :  { %11601 = vmatmul.mubr.msk.f32.gmra.mrb[98].mxu1 %vm5174_vm0, %v6907_v5  ;;  %v7436_v5 = vld [vmem:[%s19640_s6 + $0x98] sm:$0xff] }
 0x776   :  { %11603 = vmatprep.mubr.msk.f32.mxu1 %vm13038_vm1, %v13039_v28 }
 0x779   :  { %11604 = vmatmul.mubr.msk.f32.gmra.mrb[100].mxu1 %vm5174_vm0, %v6908_v26 }
 0x77a   :  { %11606 = vmatprep.mubr.msk.f32.mxu1 %vm13038_vm1, %v13039_v28 }
 0x77d   :  { %11607 = vmatmul.mubr.msk.f32.gmra.mrb[102].mxu1 %vm5174_vm0, %v6909_v14 }
 0x77e   :  { %11609 = vmatprep.mubr.msk.f32.mxu1 %vm13038_vm1, %v13039_v28 }
 0x781   :  { %11610 = vmatmul.mubr.msk.f32.gmra.mrb[104].mxu1 %vm5174_vm0, %v6910_v62  ;;  %v7155_v62 = vld [vmem:[#allocation3 + $0x7] sm:$0xff] }
 0x782   :  { %11612 = vmatprep.mubr.msk.f32.mxu1 %vm13038_vm1, %v13039_v28 }
 0x784   :  { %v18246_v42 = vpop.f32.mrb[0].mxu1 }
 0x785   :  { %v11439_v29 = vpop.f32.mrb[1].mxu1  ;;  %11613 = vmatmul.mubr.msk.f32.gmra.mrb[106].mxu1 %vm5174_vm0, %v6911_v43 }
 0x786   :  { %11615 = vmatprep.mubr.msk.f32.mxu1 %vm13038_vm1, %v13039_v28 }
 0x788   :  { %v18251_v32 = vpop.f32.mrb[2].mxu1  ;;  %v18253_v16 = vpop.f32.mrb[42].mxu0 }
 0x789   :  { %v11442_v51 = vpop.f32.mrb[3].mxu1  ;;  %11616 = vmatmul.mubr.msk.f32.gmra.mrb[108].mxu1 %vm5174_vm0, %v6912_v33  ;;  %v11764_v50 = vpop.f32.mrb[43].mxu0  ;;  %v12486_v33 = vpack.c.bf16 %v7436_v5, %v7435_v41 }
 0x78a   :  { %11618 = vmatprep.mubr.msk.f32.mxu1 %vm13038_vm1, %v13039_v28 }
 0x78c   :  { %v18258_v8 = vpop.f32.mrb[4].mxu1  ;;  %v18260_v52 = vpop.f32.mrb[44].mxu0 }
 0x78d   :  { %v11445_v2 = vpop.f32.mrb[5].mxu1  ;;  %11619 = vmatmul.mubr.msk.f32.gmra.mrb[110].mxu1 %vm5174_vm0, %v6913_v15  ;;  %v11767_v25 = vpop.f32.mrb[45].mxu0 }
 0x78e   :  { %11621 = vmatprep.mubr.msk.f32.mxu1 %vm13038_vm1, %v13039_v28 }
 0x790   :  { %v18271_v31 = vpop.f32.mrb[6].mxu1  ;;  %v18273_v60 = vpop.f32.mrb[46].mxu0 }
 0x791   :  { %v11448_v45 = vpop.f32.mrb[7].mxu1  ;;  %11622 = vmatmul.mubr.msk.f32.gmra.mrb[112].mxu1 %vm5174_vm0, %v6914_v3  ;;  %v11770_v6 = vpop.f32.mrb[47].mxu0 }
 0x792   :  { %11632 = vmatprep.mubr.msk.f32.mxu1 %vm13038_vm1, %v13039_v28 }
 0x794   :  { %v18284_v26 = vpop.f32.mrb[8].mxu1  ;;  %v18286_v14 = vpop.f32.mrb[48].mxu0 }
 0x795   :  { %v11451_v43 = vpop.f32.mrb[9].mxu1  ;;  %11633 = vmatmul.mubr.msk.f32.vlgmr.msra.gmra.mrb[114].mxu1 %vm5174_vm0, %v7155_v62  ;;  %v11773_v29 = vpop.f32.mrb[49].mxu0 }
 0x796   :  { %11635 = vmatprep.mubr.msk.f32.mxu1 %vm13038_vm1, %v13039_v28  ;;  %12484 = vmatpush3.bf16.msra.mxu1 %v12483_v35 }
 0x797   :  { %12485 = vmatprep.subr.bf16.mxu1 %v19665_v46 }
 0x798   :  { %v18292_v51 = vpop.f32.mrb[10].mxu1  ;;  %v18294_v50 = vpop.f32.mrb[50].mxu0 }
 0x799   :  { %v11454_v15 = vpop.f32.mrb[11].mxu1  ;;  %11636 = vmatmul.mubr.msk.f32.gmra.mrb[116].mxu1 %vm5174_vm0, %v17970_v20  ;;  %v11776_v2 = vpop.f32.mrb[51].mxu0 }
 0x79a   :  { %11638 = vmatprep.mubr.msk.f32.mxu1 %vm13038_vm1, %v13039_v28  ;;  %12487 = vmatpush3.bf16.msra.mxu1 %v12486_v33 }
 0x79b   :  { %12494 = vmatprep.subr.bf16.mxu1 %v19665_v46 }
 0x79c   :  { %v18301_v25 = vpop.f32.mrb[12].mxu1  ;;  %v18303_v53 = vpop.f32.mrb[52].mxu0 }
 0x79d   :  { %v11457_v9 = vpop.f32.mrb[13].mxu1  ;;  %11639 = vmatmul.mubr.msk.f32.gmra.mrb[118].mxu1 %vm5174_vm0, %v17983_v27  ;;  %v11779_v3 = vpop.f32.mrb[53].mxu0 }
 0x79e   :  { %11641 = vmatprep.mubr.msk.f32.mxu1 %vm13038_vm1, %v13039_v28 }
 0x7a0   :  { %v18309_v20 = vpop.f32.mrb[14].mxu1  ;;  %v18311_v45 = vpop.f32.mrb[54].mxu0 }
 0x7a1   :  { %v11460_v6 = vpop.f32.mrb[15].mxu1  ;;  %11642 = vmatmul.mubr.msk.f32.gmra.mrb[120].mxu1 %vm5174_vm0, %v17996_v21  ;;  %v11782_v35 = vpop.f32.mrb[55].mxu0 }
 0x7a2   :  { %11644 = vmatprep.mubr.msk.f32.mxu1 %vm13038_vm1, %v13039_v28 }
 0x7a4   :  { %v18317_v41 = vpop.f32.mrb[16].mxu1  ;;  %v18319_v5 = vpop.f32.mrb[56].mxu0 }
 0x7a5   :  { %v11463_v27 = vpop.f32.mrb[17].mxu1  ;;  %11645 = vmatmul.mubr.msk.f32.gmra.mrb[122].mxu1 %vm5174_vm0, %v18008_v0  ;;  %v11785_v62 = vpop.f32.mrb[57].mxu0 }
 0x7a6   :  { %11647 = vmatprep.mubr.msk.f32.mxu1 %vm13038_vm1, %v13039_v28 }
 0x7a8   :  { %v18325_v43 = vpop.f32.mrb[18].mxu1  ;;  %v18327_v29 = vpop.f32.mrb[58].mxu0 }
 0x7a9   :  { %v11466_v21 = vpop.f32.mrb[19].mxu1  ;;  %11648 = vmatmul.mubr.msk.f32.gmra.mrb[124].mxu1 %vm5174_vm0, %v18020_v44  ;;  %v11788_v33 = vpop.f32.mrb[59].mxu0 }
 0x7aa   :  { %11650 = vmatprep.mubr.msk.f32.mxu1 %vm13038_vm1, %v13039_v28 }
 0x7ac   :  { %v18333_v15 = vpop.f32.mrb[20].mxu1  ;;  %v18335_v2 = vpop.f32.mrb[60].mxu0 }
 0x7ad   :  { %v11469_v0 = vpop.f32.mrb[21].mxu1  ;;  %11651 = vmatmul.mubr.msk.f32.gmra.mrb[126].mxu1 %vm5174_vm0, %v18032_v13  ;;  %v11791_v9 = vpop.f32.mrb[61].mxu0 }
 0x7ae   :  { %11653 = vmatprep.mubr.msk.f32.mxu1 %vm13038_vm1, %v13039_v28 }
 0x7b0   :  { %v18341_v3 = vpop.f32.mrb[22].mxu1  ;;  %v18343_v6 = vpop.f32.mrb[62].mxu0 }
 0x7b1   :  { %v11472_v44 = vpop.f32.mrb[23].mxu1  ;;  %11654 = vmatmul.mubr.msk.f32.gmra.mrb[128].mxu1 %vm5174_vm0, %v18044_v47  ;;  %v11794_v35 = vpop.f32.mrb[63].mxu0 }
 0x7b2   :  { %11656 = vmatprep.mubr.msk.f32.mxu1 %vm13038_vm1, %v13039_v28 }
 0x7b4   :  { %v18349_v27 = vpop.f32.mrb[24].mxu1  ;;  %v18351_v62 = vpop.f32.mrb[64].mxu0 }
 0x7b5   :  { %v11475_v13 = vpop.f32.mrb[25].mxu1  ;;  %11657 = vmatmul.mubr.msk.f32.gmra.mrb[130].mxu1 %vm5174_vm0, %v18056_v34  ;;  %v11797_v21 = vpop.f32.mrb[65].mxu0 }
 0x7b6   :  { %11659 = vmatprep.mubr.msk.f32.mxu1 %vm13038_vm1, %v13039_v28 }
 0x7b8   :  { %v18357_v33 = vpop.f32.mrb[26].mxu1  ;;  %v18359_v0 = vpop.f32.mrb[66].mxu0 }
 0x7b9   :  { %19733 = vst [vmem:[#allocation17_spill] sm:$0xff] %v18359_v0  ;;  %v11478_v47 = vpop.f32.mrb[27].mxu1  ;;  %11660 = vmatmul.mubr.msk.f32.gmra.mrb[132].mxu1 %vm5174_vm0, %v18068_v36  ;;  %v11800_v9 = vpop.f32.mrb[67].mxu0 }
 0x7ba   :  { %11662 = vmatprep.mubr.msk.f32.mxu1 %vm13038_vm1, %v13039_v28 }
 0x7bc   :  { %v18365_v44 = vpop.f32.mrb[28].mxu1  ;;  %v18367_v35 = vpop.f32.mrb[68].mxu0 }
 0x7bd   :  { %19734 = vst [vmem:[#allocation21_spill] sm:$0xff] %v18367_v35  ;;  %v11481_v34 = vpop.f32.mrb[29].mxu1  ;;  %11663 = vmatmul.mubr.msk.f32.gmra.mrb[134].mxu1 %vm5174_vm0, %v18080_v22  ;;  %v11803_v13 = vpop.f32.mrb[69].mxu0 }
 0x7be   :  { %11665 = vmatprep.mubr.msk.f32.mxu1 %vm13038_vm1, %v13039_v28 }
 0x7c0   :  { %v18373_v21 = vpop.f32.mrb[30].mxu1  ;;  %v18375_v47 = vpop.f32.mrb[70].mxu0 }
 0x7c1   :  { %19735 = vst [vmem:[#allocation23_spill] sm:$0xff] %v18375_v47  ;;  %v11484_v36 = vpop.f32.mrb[31].mxu1  ;;  %11666 = vmatmul.mubr.msk.f32.gmra.mrb[136].mxu1 %vm5174_vm0, %v18092_v58  ;;  %v11806_v9 = vpop.f32.mrb[71].mxu0 }
 0x7c2   :  { %11668 = vmatprep.mubr.msk.f32.mxu1 %vm13038_vm1, %v13039_v28 }
 0x7c4   :  { %v18381_v34 = vpop.f32.mrb[32].mxu1  ;;  %v18383_v35 = vpop.f32.mrb[72].mxu0 }
 0x7c5   :  { %19736 = vst [vmem:[#allocation24_spill] sm:$0xff] %v18383_v35  ;;  %v11487_v22 = vpop.f32.mrb[33].mxu1  ;;  %11669 = vmatmul.mubr.msk.f32.gmra.mrb[138].mxu1 %vm5174_vm0, %v18104_v40  ;;  %v11809_v13 = vpop.f32.mrb[73].mxu0 }
 0x7c6   :  { %11671 = vmatprep.mubr.msk.f32.mxu1 %vm13038_vm1, %v13039_v28 }
 0x7c8   :  { %v18389_v36 = vpop.f32.mrb[34].mxu1  ;;  %v18391_v47 = vpop.f32.mrb[74].mxu0 }
 0x7c9   :  { %19737 = vst [vmem:[#allocation16_spill] sm:$0xff] %v18391_v47  ;;  %v11490_v58 = vpop.f32.mrb[35].mxu1  ;;  %11672 = vmatmul.mubr.msk.f32.gmra.mrb[140].mxu1 %vm5174_vm0, %v18116_v11  ;;  %v11812_v9 = vpop.f32.mrb[75].mxu0 }
 0x7ca   :  { %11674 = vmatprep.mubr.msk.f32.mxu1 %vm13038_vm1, %v13039_v28 }
 0x7cc   :  { %v18397_v22 = vpop.f32.mrb[36].mxu1  ;;  %v18399_v35 = vpop.f32.mrb[76].mxu0 }
 0x7cd   :  { %19738 = vst [vmem:[#allocation22_spill] sm:$0xff] %v18399_v35  ;;  %v11493_v40 = vpop.f32.mrb[37].mxu1  ;;  %11675 = vmatmul.mubr.msk.f32.gmra.mrb[142].mxu1 %vm5174_vm0, %v18128_v39  ;;  %v11815_v13 = vpop.f32.mrb[77].mxu0 }
 0x7ce   :  { %11677 = vmatprep.mubr.msk.f32.mxu1 %vm13038_vm1, %v13039_v28 }
 0x7d0   :  { %v6802_v58 = vpop.f32.mrb[38].mxu1  ;;  %v18405_v47 = vpop.f32.mrb[78].mxu0 }
 0x7d1   :  { %v18408_v11 = vadd.f32 %v6802_v58, %v18246_v42  ;;  %v11504_v9 = vpop.f32.mrb[39].mxu1  ;;  %11678 = vmatmul.mubr.msk.f32.gmra.mrb[144].mxu1 %vm5174_vm0, %v18140_v48  ;;  %v11818_v0 = vpop.f32.mrb[79].mxu0 }
 0x7d2   :  { %11680 = vmatprep.mubr.msk.f32.mxu1 %vm13038_vm1, %v13039_v28 }
 0x7d4   :  { %v6807_v40 = vpop.f32.mrb[40].mxu1  ;;  %v18414_v39 = vpop.f32.mrb[80].mxu0 }
 0x7d5   :  { %v18417_v13 = vadd.f32 %v6807_v40, %v18251_v32  ;;  %v11507_v35 = vpop.f32.mrb[41].mxu1  ;;  %11681 = vmatmul.mubr.msk.f32.gmra.mrb[146].mxu1 %vm5174_vm0, %v18152_v23  ;;  %v11894_v42 = vpop.f32.mrb[81].mxu0  ;;  %v7951_v23 = vld [vmem:[%s19640_s6 + $0xc0] sm:$0xff] }
 0x7d6   :  { %11683 = vmatprep.mubr.msk.f32.mxu1 %vm13038_vm1, %v13039_v28  ;;  %v7952_v35 = vld [vmem:[%s19640_s6 + $0xc8] sm:$0xff] }
 0x7d8   :  { %v6812_v58 = vpop.f32.mrb[42].mxu1  ;;  %v18423_v48 = vpop.f32.mrb[82].mxu0 }
 0x7d9   :  { %19739 = vst [vmem:[#allocation20_spill] sm:$0xff] %v18423_v48  ;;  %v18426_v0 = vadd.f32 %v6812_v58, %v18258_v8  ;;  %v11510_v9 = vpop.f32.mrb[43].mxu1  ;;  %11684 = vmatmul.mubr.msk.f32.gmra.mrb[148].mxu1 %vm5174_vm0, %v18164_v57  ;;  %v11897_v32 = vpop.f32.mrb[83].mxu0 }
 0x7da   :  { %11686 = vmatprep.mubr.msk.f32.mxu1 %vm13038_vm1, %v13039_v28  ;;  %v12495_v9 = vpack.c.bf16 %v7952_v35, %v7951_v23  ;;  %v7953_v32 = vld [vmem:[%s19640_s6 + $0xd0] sm:$0xff] }
 0x7dc   :  { %v6817_v40 = vpop.f32.mrb[44].mxu1  ;;  %v18438_v42 = vpop.f32.mrb[84].mxu0 }
 0x7dd   :  { %19740 = vst [vmem:[#allocation18_spill] sm:$0xff] %v18438_v42  ;;  %v18441_v8 = vadd.f32 %v6817_v40, %v18271_v31  ;;  %v11513_v58 = vpop.f32.mrb[45].mxu1  ;;  %11687 = vmatmul.mubr.msk.f32.gmra.mrb[150].mxu1 %vm5174_vm0, %v18182_v7  ;;  %v11900_v57 = vpop.f32.mrb[85].mxu0  ;;  %v7954_v42 = vld [vmem:[%s19640_s6 + $0xd8] sm:$0xff] }
 0x7de   :  { %11697 = vmatprep.mubr.msk.f32.mxu1 %vm13038_vm1, %v13039_v28  ;;  %v12498_v23 = vpack.c.bf16 %v7954_v42, %v7953_v32 }
 0x7e0   :  { %v6822_v48 = vpop.f32.mrb[46].mxu1  ;;  %v18453_v31 = vpop.f32.mrb[86].mxu0 }
 0x7e1   :  { %19741 = vst [vmem:[#allocation19_spill] sm:$0xff] %v18453_v31  ;;  %v18456_v40 = vadd.f32 %v6822_v48, %v18284_v26  ;;  %v11516_v7 = vpop.f32.mrb[47].mxu1  ;;  %11698 = vmatmul.mubr.msk.f32.vlgmr.msra.gmra.mrb[152].mxu1 %vm5174_vm0, %v17968_v63  ;;  %v11903_v58 = vpop.f32.mrb[87].mxu0 }
 0x7e2   :  { %11700 = vmatprep.mubr.msk.f32.mxu1 %vm13038_vm1, %v13039_v28  ;;  %12496 = vmatpush3.bf16.msra.mxu1 %v12495_v9 }
 0x7e3   :  { %12497 = vmatprep.subr.bf16.mxu1 %v19665_v46 }
 0x7e4   :  { %v6827_v35 = vpop.f32.mrb[48].mxu1  ;;  %v18463_v57 = vpop.f32.mrb[88].mxu0 }
 0x7e5   :  { %v18466_v31 = vadd.f32 %v6827_v35, %v18292_v51  ;;  %v11519_v26 = vpop.f32.mrb[49].mxu1  ;;  %11701 = vmatmul.mubr.msk.f32.gmra.mrb[154].mxu1 %vm5174_vm0, %v17981_v54  ;;  %v11906_v48 = vpop.f32.mrb[89].mxu0 }
 0x7e6   :  { %11703 = vmatprep.mubr.msk.f32.mxu1 %vm13038_vm1, %v13039_v28  ;;  %12499 = vmatpush3.bf16.msra.mxu1 %v12498_v23 }
 0x7e7   :  { %12506 = vmatprep.subr.bf16.mxu1 %v19665_v46 }
 0x7e8   :  { %v6832_v63 = vpop.f32.mrb[50].mxu1  ;;  %v18473_v42 = vpop.f32.mrb[90].mxu0 }
 0x7e9   :  { %v18476_v9 = vadd.f32 %v6832_v63, %v18301_v25  ;;  %v11522_v32 = vpop.f32.mrb[51].mxu1  ;;  %11704 = vmatmul.mubr.msk.f32.gmra.mrb[156].mxu1 %vm5174_vm0, %v17994_v17  ;;  %v11909_v51 = vpop.f32.mrb[91].mxu0 }
 0x7ea   :  { %11706 = vmatprep.mubr.msk.f32.mxu1 %vm13038_vm1, %v13039_v28 }
 0x7ec   :  { %v6837_v54 = vpop.f32.mrb[52].mxu1  ;;  %v18482_v7 = vpop.f32.mrb[92].mxu0 }
 0x7ed   :  { %v18485_v58 = vadd.f32 %v6837_v54, %v18309_v20  ;;  %v11525_v23 = vpop.f32.mrb[53].mxu1  ;;  %11707 = vmatmul.mubr.msk.f32.gmra.mrb[158].mxu1 %vm5174_vm0, %v18006_v59  ;;  %v11912_v25 = vpop.f32.mrb[93].mxu0 }
 0x7ee   :  { %11709 = vmatprep.mubr.msk.f32.mxu1 %vm13038_vm1, %v13039_v28 }
 0x7f0   :  { %v6842_v35 = vpop.f32.mrb[54].mxu1  ;;  %v18491_v17 = vpop.f32.mrb[94].mxu0 }
 0x7f1   :  { %v18494_v26 = vadd.f32 %v6842_v35, %v18317_v41  ;;  %v11528_v48 = vpop.f32.mrb[55].mxu1  ;;  %11710 = vmatmul.mubr.msk.f32.gmra.mrb[160].mxu1 %vm5174_vm0, %v18018_v18  ;;  %v11915_v20 = vpop.f32.mrb[95].mxu0 }
 0x7f2   :  { %11712 = vmatprep.mubr.msk.f32.mxu1 %vm13038_vm1, %v13039_v28 }
 0x7f4   :  { %v6847_v63 = vpop.f32.mrb[56].mxu1  ;;  %v18500_v59 = vpop.f32.mrb[96].mxu0 }
 0x7f5   :  { %v18503_v32 = vadd.f32 %v6847_v63, %v18325_v43  ;;  %v11531_v51 = vpop.f32.mrb[57].mxu1  ;;  %11713 = vmatmul.mubr.msk.f32.gmra.mrb[162].mxu1 %vm5174_vm0, %v18030_v19  ;;  %v11918_v41 = vpop.f32.mrb[97].mxu0 }
 0x7f6   :  { %11715 = vmatprep.mubr.msk.f32.mxu1 %vm13038_vm1, %v13039_v28 }
 0x7f8   :  { %v6852_v54 = vpop.f32.mrb[58].mxu1  ;;  %v18509_v18 = vpop.f32.mrb[98].mxu0 }
 0x7f9   :  { %v18512_v23 = vadd.f32 %v6852_v54, %v18333_v15  ;;  %v11534_v25 = vpop.f32.mrb[59].mxu1  ;;  %11716 = vmatmul.mubr.msk.f32.gmra.mrb[164].mxu1 %vm5174_vm0, %v18042_v30  ;;  %v11921_v43 = vpop.f32.mrb[99].mxu0 }
 0x7fa   :  { %11718 = vmatprep.mubr.msk.f32.mxu1 %vm13038_vm1, %v13039_v28 }
 0x7fc   :  { %v6857_v35 = vpop.f32.mrb[60].mxu1  ;;  %v18518_v19 = vpop.f32.mrb[100].mxu0 }
 0x7fd   :  { %v18521_v48 = vadd.f32 %v6857_v35, %v18341_v3  ;;  %v11537_v20 = vpop.f32.mrb[61].mxu1  ;;  %11719 = vmatmul.mubr.msk.f32.gmra.mrb[166].mxu1 %vm5174_vm0, %v18054_v37  ;;  %v11924_v15 = vpop.f32.mrb[101].mxu0 }
 0x7fe   :  { %11721 = vmatprep.mubr.msk.f32.mxu1 %vm13038_vm1, %v13039_v28 }
 0x800   :  { %v6862_v63 = vpop.f32.mrb[62].mxu1  ;;  %v18527_v30 = vpop.f32.mrb[102].mxu0 }
 0x801   :  { %v18530_v51 = vadd.f32 %v6862_v63, %v18349_v27  ;;  %v11540_v41 = vpop.f32.mrb[63].mxu1  ;;  %11722 = vmatmul.mubr.msk.f32.gmra.mrb[168].mxu1 %vm5174_vm0, %v18066_v61  ;;  %v11927_v3 = vpop.f32.mrb[103].mxu0 }
 0x802   :  { %11724 = vmatprep.mubr.msk.f32.mxu1 %vm13038_vm1, %v13039_v28 }
 0x804   :  { %v6867_v54 = vpop.f32.mrb[64].mxu1  ;;  %v18536_v37 = vpop.f32.mrb[104].mxu0 }
 0x805   :  { %v18539_v25 = vadd.f32 %v6867_v54, %v18357_v33  ;;  %v11543_v43 = vpop.f32.mrb[65].mxu1  ;;  %11725 = vmatmul.mubr.msk.f32.gmra.mrb[170].mxu1 %vm5174_vm0, %v18078_v1  ;;  %v11930_v27 = vpop.f32.mrb[105].mxu0 }
 0x806   :  { %11727 = vmatprep.mubr.msk.f32.mxu1 %vm13038_vm1, %v13039_v28 }
 0x808   :  { %v6872_v35 = vpop.f32.mrb[66].mxu1  ;;  %v18545_v61 = vpop.f32.mrb[106].mxu0 }
 0x809   :  { %v18548_v20 = vadd.f32 %v6872_v35, %v18365_v44  ;;  %v11546_v15 = vpop.f32.mrb[67].mxu1  ;;  %11728 = vmatmul.mubr.msk.f32.gmra.mrb[172].mxu1 %vm5174_vm0, %v18090_v55  ;;  %v11933_v33 = vpop.f32.mrb[107].mxu0 }
 0x80a   :  { %11730 = vmatprep.mubr.msk.f32.mxu1 %vm13038_vm1, %v13039_v28 }
 0x80c   :  { %v6877_v63 = vpop.f32.mrb[68].mxu1  ;;  %v18554_v1 = vpop.f32.mrb[108].mxu0 }
 0x80d   :  { %v18557_v41 = vadd.f32 %v6877_v63, %v18373_v21  ;;  %v11549_v3 = vpop.f32.mrb[69].mxu1  ;;  %11731 = vmatmul.mubr.msk.f32.gmra.mrb[174].mxu1 %vm5174_vm0, %v18102_v10  ;;  %v11936_v44 = vpop.f32.mrb[109].mxu0 }
 0x80e   :  { %11733 = vmatprep.mubr.msk.f32.mxu1 %vm13038_vm1, %v13039_v28 }
 0x810   :  { %v6882_v54 = vpop.f32.mrb[70].mxu1  ;;  %v18563_v55 = vpop.f32.mrb[110].mxu0 }
 0x811   :  { %v18566_v43 = vadd.f32 %v6882_v54, %v18381_v34  ;;  %v11552_v27 = vpop.f32.mrb[71].mxu1  ;;  %11734 = vmatmul.mubr.msk.f32.gmra.mrb[176].mxu1 %vm5174_vm0, %v18114_v38  ;;  %v11939_v21 = vpop.f32.mrb[111].mxu0 }
 0x812   :  { %11736 = vmatprep.mubr.msk.f32.mxu1 %vm13038_vm1, %v13039_v28 }
 0x814   :  { %v6887_v35 = vpop.f32.mrb[72].mxu1  ;;  %v18572_v10 = vpop.f32.mrb[112].mxu0 }
 0x815   :  { %v18575_v15 = vadd.f32 %v6887_v35, %v18389_v36  ;;  %v11555_v33 = vpop.f32.mrb[73].mxu1  ;;  %11737 = vmatmul.mubr.msk.f32.gmra.mrb[178].mxu1 %vm5174_vm0, %v18126_v24  ;;  %v11942_v34 = vpop.f32.mrb[113].mxu0 }
 0x816   :  { %11739 = vmatprep.mubr.msk.f32.mxu1 %vm13038_vm1, %v13039_v28 }
 0x818   :  { %v6892_v63 = vpop.f32.mrb[74].mxu1  ;;  %v18581_v38 = vpop.f32.mrb[114].mxu0 }
 0x819   :  { %v18584_v3 = vadd.f32 %v6892_v63, %v18397_v22  ;;  %v11558_v44 = vpop.f32.mrb[75].mxu1  ;;  %11740 = vmatmul.mubr.msk.f32.gmra.mrb[180].mxu1 %vm5174_vm0, %v18138_v12  ;;  %v11945_v36 = vpop.f32.mrb[115].mxu0 }
 0x81a   :  { %11742 = vmatprep.mubr.msk.f32.mxu1 %vm13038_vm1, %v13039_v28  ;;  %v18619_v44 = vld [vmem:[#allocation3 + $0x98] sm:$0xff] }
 0x81c   :  { %v7042_v54 = vpop.f32.mrb[76].mxu1  ;;  %v18590_v24 = vpop.f32.mrb[116].mxu0 }
 0x81d   :  { %v18593_v27 = vadd.f32 %v7042_v54, %v18408_v11  ;;  %v11569_v21 = vpop.f32.mrb[77].mxu1  ;;  %11743 = vmatmul.mubr.msk.f32.gmra.mrb[182].mxu1 %vm5174_vm0, %v18150_v56  ;;  %v11948_v22 = vpop.f32.mrb[117].mxu0  ;;  %v8471_v54 = vld [vmem:[%s19640_s6 + $0x110] sm:$0xff] }
 0x81e   :  { %11745 = vmatprep.mubr.msk.f32.mxu1 %vm13038_vm1, %v13039_v28  ;;  %v8472_v21 = vld [vmem:[%s19640_s6 + $0x118] sm:$0xff] }
 0x820   :  { %v7047_v35 = vpop.f32.mrb[78].mxu1 }
 0x821   :  { %v18600_v12 = vadd.f32 %v7047_v35, %v18417_v13  ;;  %v11572_v33 = vpop.f32.mrb[79].mxu1  ;;  %11746 = vmatmul.mubr.msk.f32.gmra.mrb[184].mxu1 %vm5174_vm0, %v18162_v49  ;;  %v8469_v13 = vld [vmem:[%s19640_s6 + $0x100] sm:$0xff]  ;;  %v8470_v49 = vld [vmem:[%s19640_s6 + $0x108] sm:$0xff] }
 0x822   :  { %11748 = vmatprep.mubr.msk.f32.mxu1 %vm13038_vm1, %v13039_v28  ;;  %v7932_v35 = vld [vmem:[#allocation3 + $0xe] sm:$0xff] }
 0x824   :  { %v7052_v11 = vpop.f32.mrb[80].mxu1 }
 0x825   :  { %v18607_v34 = vadd.f32 %v7052_v11, %v18426_v0  ;;  %v11575_v56 = vpop.f32.mrb[81].mxu1  ;;  %11749 = vmatmul.mubr.msk.f32.gmra.mrb[186].mxu1 %vm5174_vm0, %v18180_v4  ;;  %v12507_v4 = vpack.c.bf16 %v8470_v49, %v8469_v13  ;;  %v12510_v11 = vpack.c.bf16 %v8472_v21, %v8471_v54  ;;  %v7933_v13 = vld [vmem:[#allocation3 + $0x16] sm:$0xff]  ;;  %v7935_v21 = vld [vmem:[#allocation3 + $0x26] sm:$0xff] }
 0x826   :  { %11751 = vmatprep.mubr.msk.f32.mxu1 %vm13038_vm1, %v13039_v28 }
 0x828   :  { %v7057_v63 = vpop.f32.mrb[82].mxu1 }
 0x829   :  { %v18622_v0 = vadd.f32 %v7057_v63, %v18441_v8  ;;  %v11578_v36 = vpop.f32.mrb[83].mxu1  ;;  %11752 = vmatmul.mubr.msk.f32.gmra.mrb[188].mxu1 %vm5174_vm0, %v18619_v44 }
 0x82a   :  { %11827 = vmatprep.mubr.msk.f32.mxu1 %vm13038_vm1, %v13039_v28  ;;  %v7934_v36 = vld [vmem:[#allocation3 + $0x1e] sm:$0xff] }
 0x82c   :  { %v7062_v22 = vpop.f32.mrb[84].mxu1 }
 0x82d   :  { %v18635_v8 = vadd.f32 %v7062_v22, %v18456_v40  ;;  %v11581_v33 = vpop.f32.mrb[85].mxu1  ;;  %11828 = vmatmul.mubr.msk.f32.vlgmr.msra.gmra.mrb[190].mxu1 %vm5174_vm0, %v7932_v35 }
 0x82e   :  { %11830 = vmatprep.mubr.msk.f32.mxu1 %vm13038_vm1, %v13039_v28  ;;  %12508 = vmatpush3.bf16.msra.mxu1 %v12507_v4 }
 0x82f   :  { %12509 = vmatprep.subr.bf16.mxu1 %v19665_v46 }
 0x830   :  { %v7067_v56 = vpop.f32.mrb[86].mxu1 }
 0x831   :  { %v18642_v49 = vadd.f32 %v7067_v56, %v18466_v31  ;;  %v11584_v63 = vpop.f32.mrb[87].mxu1  ;;  %11831 = vmatmul.mubr.msk.f32.gmra.mrb[192].mxu1 %vm5174_vm0, %v7933_v13 }
 0x832   :  { %11833 = vmatprep.mubr.msk.f32.mxu1 %vm13038_vm1, %v13039_v28  ;;  %12511 = vmatpush3.bf16.msra.mxu1 %v12510_v11 }
 0x833   :  { %12683 = vmatprep.subr.bf16.mxu1 %v19665_v46 }
 0x834   :  { %v7072_v40 = vpop.f32.mrb[88].mxu1 }
 0x835   :  { %v18649_v4 = vadd.f32 %v7072_v40, %v18476_v9  ;;  %v11587_v54 = vpop.f32.mrb[89].mxu1  ;;  %11834 = vmatmul.mubr.msk.f32.gmra.mrb[194].mxu1 %vm5174_vm0, %v7934_v36  ;;  %v7936_v9 = vld [vmem:[#allocation3 + $0x2e] sm:$0xff] }
 0x836   :  { %11836 = vmatprep.mubr.msk.f32.mxu1 %vm13038_vm1, %v13039_v28 }
 0x838   :  { %v7077_v31 = vpop.f32.mrb[90].mxu1 }
 0x839   :  { %v18655_v22 = vadd.f32 %v7077_v31, %v18485_v58  ;;  %v11590_v35 = vpop.f32.mrb[91].mxu1  ;;  %11837 = vmatmul.mubr.msk.f32.gmra.mrb[196].mxu1 %vm5174_vm0, %v7935_v21  ;;  %v7937_v58 = vld [vmem:[#allocation3 + $0x36] sm:$0xff] }
 0x83a   :  { %11839 = vmatprep.mubr.msk.f32.mxu1 %vm13038_vm1, %v13039_v28 }
 0x83c   :  { %v7082_v33 = vpop.f32.mrb[92].mxu1 }
 0x83d   :  { %v18661_v11 = vadd.f32 %v7082_v33, %v18494_v26  ;;  %v11593_v56 = vpop.f32.mrb[93].mxu1  ;;  %11840 = vmatmul.mubr.msk.f32.gmra.mrb[198].mxu1 %vm5174_vm0, %v7936_v9  ;;  %v7938_v26 = vld [vmem:[#allocation3 + $0x3e] sm:$0xff] }
 0x83e   :  { %11842 = vmatprep.mubr.msk.f32.mxu1 %vm13038_vm1, %v13039_v28 }
 0x840   :  { %v7087_v13 = vpop.f32.mrb[94].mxu1 }
 0x841   :  { %v18667_v63 = vadd.f32 %v7087_v13, %v18503_v32  ;;  %v11596_v40 = vpop.f32.mrb[95].mxu1  ;;  %11843 = vmatmul.mubr.msk.f32.gmra.mrb[200].mxu1 %vm5174_vm0, %v7937_v58  ;;  %v7939_v32 = vld [vmem:[#allocation3 + $0x46] sm:$0xff] }
 0x842   :  { %11845 = vmatprep.mubr.msk.f32.mxu1 %vm13038_vm1, %v13039_v28 }
 0x844   :  { %v7092_v36 = vpop.f32.mrb[96].mxu1 }
 0x845   :  { %v18673_v54 = vadd.f32 %v7092_v36, %v18512_v23  ;;  %v11599_v31 = vpop.f32.mrb[97].mxu1  ;;  %11846 = vmatmul.mubr.msk.f32.gmra.mrb[202].mxu1 %vm5174_vm0, %v7938_v26  ;;  %v7940_v23 = vld [vmem:[#allocation3 + $0x4e] sm:$0xff] }
 0x846   :  { %11848 = vmatprep.mubr.msk.f32.mxu1 %vm13038_vm1, %v13039_v28 }
 0x848   :  { %v7097_v21 = vpop.f32.mrb[98].mxu1 }
 0x849   :  { %v18679_v35 = vadd.f32 %v7097_v21, %v18521_v48  ;;  %v11602_v33 = vpop.f32.mrb[99].mxu1  ;;  %11849 = vmatmul.mubr.msk.f32.gmra.mrb[204].mxu1 %vm5174_vm0, %v7939_v32  ;;  %v7941_v48 = vld [vmem:[#allocation3 + $0x56] sm:$0xff] }
 0x84a   :  { %11851 = vmatprep.mubr.msk.f32.mxu1 %vm13038_vm1, %v13039_v28 }
 0x84c   :  { %v7102_v9 = vpop.f32.mrb[100].mxu1 }
 0x84d   :  { %v18685_v56 = vadd.f32 %v7102_v9, %v18530_v51  ;;  %v11605_v13 = vpop.f32.mrb[101].mxu1  ;;  %11852 = vmatmul.mubr.msk.f32.gmra.mrb[206].mxu1 %vm5174_vm0, %v7940_v23  ;;  %v7942_v51 = vld [vmem:[#allocation3 + $0x5e] sm:$0xff] }
 0x84e   :  { %11854 = vmatprep.mubr.msk.f32.mxu1 %vm13038_vm1, %v13039_v28 }
 0x850   :  { %v7107_v58 = vpop.f32.mrb[102].mxu1 }
 0x851   :  { %v18691_v40 = vadd.f32 %v7107_v58, %v18539_v25  ;;  %v11608_v36 = vpop.f32.mrb[103].mxu1  ;;  %11855 = vmatmul.mubr.msk.f32.gmra.mrb[208].mxu1 %vm5174_vm0, %v7941_v48  ;;  %v7943_v25 = vld [vmem:[#allocation3 + $0x66] sm:$0xff] }
 0x852   :  { %11857 = vmatprep.mubr.msk.f32.mxu1 %vm13038_vm1, %v13039_v28 }
 0x854   :  { %v7112_v26 = vpop.f32.mrb[104].mxu1 }
 0x855   :  { %v18697_v31 = vadd.f32 %v7112_v26, %v18548_v20  ;;  %v11611_v21 = vpop.f32.mrb[105].mxu1  ;;  %11858 = vmatmul.mubr.msk.f32.gmra.mrb[210].mxu1 %vm5174_vm0, %v7942_v51  ;;  %v7944_v20 = vld [vmem:[#allocation3 + $0x6e] sm:$0xff] }
 0x856   :  { %11860 = vmatprep.mubr.msk.f32.mxu1 %vm13038_vm1, %v13039_v28 }
 0x858   :  { %v7117_v32 = vpop.f32.mrb[106].mxu1 }
 0x859   :  { %v18703_v33 = vadd.f32 %v7117_v32, %v18557_v41  ;;  %v11614_v9 = vpop.f32.mrb[107].mxu1  ;;  %11861 = vmatmul.mubr.msk.f32.gmra.mrb[212].mxu1 %vm5174_vm0, %v7943_v25  ;;  %v7945_v41 = vld [vmem:[#allocation3 + $0x76] sm:$0xff] }
 0x85a   :  { %11863 = vmatprep.mubr.msk.f32.mxu1 %vm13038_vm1, %v13039_v28 }
 0x85c   :  { %v7122_v23 = vpop.f32.mrb[108].mxu1 }
 0x85d   :  { %v18709_v13 = vadd.f32 %v7122_v23, %v18566_v43  ;;  %v11617_v58 = vpop.f32.mrb[109].mxu1  ;;  %11864 = vmatmul.mubr.msk.f32.gmra.mrb[214].mxu1 %vm5174_vm0, %v7944_v20  ;;  %v7946_v43 = vld [vmem:[#allocation3 + $0x7e] sm:$0xff] }
 0x85e   :  { %11866 = vmatprep.mubr.msk.f32.mxu1 %vm13038_vm1, %v13039_v28 }
 0x860   :  { %v7127_v48 = vpop.f32.mrb[110].mxu1 }
 0x861   :  { %v18715_v36 = vadd.f32 %v7127_v48, %v18575_v15  ;;  %v11620_v26 = vpop.f32.mrb[111].mxu1  ;;  %11867 = vmatmul.mubr.msk.f32.gmra.mrb[216].mxu1 %vm5174_vm0, %v7945_v41  ;;  %v7947_v15 = vld [vmem:[#allocation3 + $0x86] sm:$0xff] }
 0x862   :  { %11869 = vmatprep.mubr.msk.f32.mxu1 %vm13038_vm1, %v13039_v28 }
 0x864   :  { %v7132_v51 = vpop.f32.mrb[112].mxu1 }
 0x865   :  { %v18721_v21 = vadd.f32 %v7132_v51, %v18584_v3  ;;  %v11623_v32 = vpop.f32.mrb[113].mxu1  ;;  %11870 = vmatmul.mubr.msk.f32.gmra.mrb[218].mxu1 %vm5174_vm0, %v7946_v43  ;;  %v7948_v3 = vld [vmem:[#allocation3 + $0x8e] sm:$0xff] }
 0x866   :  { %11872 = vmatprep.mubr.msk.f32.mxu1 %vm13038_vm1, %v13039_v28 }
 0x868   :  { %v7301_v25 = vpop.f32.mrb[114].mxu1 }
 0x869   :  { %v18727_v9 = vadd.f32 %v7301_v25, %v18593_v27  ;;  %v11634_v23 = vpop.f32.mrb[115].mxu1  ;;  %11873 = vmatmul.mubr.msk.f32.gmra.mrb[220].mxu1 %vm5174_vm0, %v7947_v15  ;;  %v7949_v27 = vld [vmem:[#allocation3 + $0x96] sm:$0xff] }
 0x86a   :  { %11875 = vmatprep.mubr.msk.f32.mxu1 %vm13038_vm1, %v13039_v28 }
 0x86c   :  { %v7306_v20 = vpop.f32.mrb[116].mxu1 }
 0x86d   :  { %v18733_v58 = vadd.f32 %v7306_v20, %v18600_v12  ;;  %v11637_v48 = vpop.f32.mrb[117].mxu1  ;;  %11876 = vmatmul.mubr.msk.f32.gmra.mrb[222].mxu1 %vm5174_vm0, %v7948_v3  ;;  %v7950_v12 = vld [vmem:[#allocation3 + $0x9e] sm:$0xff] }
 0x86e   :  { %11878 = vmatprep.mubr.msk.f32.mxu1 %vm13038_vm1, %v13039_v28 }
 0x870   :  { %v7311_v41 = vpop.f32.mrb[118].mxu1 }
 0x871   :  { %v18739_v26 = vadd.f32 %v7311_v41, %v18607_v34  ;;  %v11640_v51 = vpop.f32.mrb[119].mxu1  ;;  %11879 = vmatmul.mubr.msk.f32.gmra.mrb[224].mxu1 %vm5174_vm0, %v7949_v27  ;;  %v8450_v34 = vld [vmem:[#allocation3 + $0x10] sm:$0xff] }
 0x872   :  { %11881 = vmatprep.mubr.msk.f32.mxu1 %vm13038_vm1, %v13039_v28 }
 0x874   :  { %v7316_v43 = vpop.f32.mrb[120].mxu1 }
 0x875   :  { %v18745_v32 = vadd.f32 %v7316_v43, %v18622_v0  ;;  %v11643_v25 = vpop.f32.mrb[121].mxu1  ;;  %11882 = vmatmul.mubr.msk.f32.gmra.mrb[226].mxu1 %vm5174_vm0, %v7950_v12  ;;  %v8451_v0 = vld [vmem:[#allocation3 + $0x18] sm:$0xff] }
 0x876   :  { %11957 = vmatprep.mubr.msk.f32.mxu1 %vm13038_vm1, %v13039_v28 }
 0x878   :  { %v7321_v15 = vpop.f32.mrb[122].mxu1 }
 0x879   :  { %v18751_v23 = vadd.f32 %v7321_v15, %v18635_v8  ;;  %v11646_v20 = vpop.f32.mrb[123].mxu1  ;;  %11958 = vmatmul.mubr.msk.f32.vlgmr.msra.gmra.mrb[228].mxu1 %vm5174_vm0, %v8450_v34  ;;  %v8452_v8 = vld [vmem:[#allocation3 + $0x20] sm:$0xff] }
 0x87a   :  { %11960 = vmatprep.mubr.msk.f32.mxu1 %vm13038_vm1, %v13039_v28 }
 0x87c   :  { %v7326_v3 = vpop.f32.mrb[124].mxu1 }
 0x87d   :  { %v18757_v48 = vadd.f32 %v7326_v3, %v18642_v49  ;;  %v11649_v41 = vpop.f32.mrb[125].mxu1  ;;  %11961 = vmatmul.mubr.msk.f32.gmra.mrb[230].mxu1 %vm5174_vm0, %v8451_v0  ;;  %v8453_v49 = vld [vmem:[#allocation3 + $0x28] sm:$0xff] }
 0x87e   :  { %11963 = vmatprep.mubr.msk.f32.mxu1 %vm13038_vm1, %v13039_v28 }
 0x880   :  { %v7331_v27 = vpop.f32.mrb[126].mxu1 }
 0x881   :  { %v18763_v51 = vadd.f32 %v7331_v27, %v18649_v4  ;;  %v11652_v43 = vpop.f32.mrb[127].mxu1  ;;  %11964 = vmatmul.mubr.msk.f32.gmra.mrb[232].mxu1 %vm5174_vm0, %v8452_v8  ;;  %v8454_v4 = vld [vmem:[#allocation3 + $0x30] sm:$0xff] }
 0x882   :  { %11966 = vmatprep.mubr.msk.f32.mxu1 %vm13038_vm1, %v13039_v28 }
 0x884   :  { %v7336_v12 = vpop.f32.mrb[128].mxu1 }
 0x885   :  { %v18769_v25 = vadd.f32 %v7336_v12, %v18655_v22  ;;  %v11655_v15 = vpop.f32.mrb[129].mxu1  ;;  %11967 = vmatmul.mubr.msk.f32.gmra.mrb[234].mxu1 %vm5174_vm0, %v8453_v49  ;;  %v8455_v22 = vld [vmem:[#allocation3 + $0x38] sm:$0xff] }
 0x886   :  { %11969 = vmatprep.mubr.msk.f32.mxu1 %vm13038_vm1, %v13039_v28 }
 0x888   :  { %v7341_v34 = vpop.f32.mrb[130].mxu1 }
 0x889   :  { %v18775_v20 = vadd.f32 %v7341_v34, %v18661_v11  ;;  %v11658_v3 = vpop.f32.mrb[131].mxu1  ;;  %11970 = vmatmul.mubr.msk.f32.gmra.mrb[236].mxu1 %vm5174_vm0, %v8454_v4  ;;  %v8456_v11 = vld [vmem:[#allocation3 + $0x40] sm:$0xff] }
 0x88a   :  { %11972 = vmatprep.mubr.msk.f32.mxu1 %vm13038_vm1, %v13039_v28 }
 0x88c   :  { %v7346_v0 = vpop.f32.mrb[132].mxu1 }
 0x88d   :  { %v18781_v41 = vadd.f32 %v7346_v0, %v18667_v63  ;;  %v11661_v27 = vpop.f32.mrb[133].mxu1  ;;  %11973 = vmatmul.mubr.msk.f32.gmra.mrb[238].mxu1 %vm5174_vm0, %v8455_v22  ;;  %v8457_v63 = vld [vmem:[#allocation3 + $0x48] sm:$0xff] }
 0x88e   :  { %11975 = vmatprep.mubr.msk.f32.mxu1 %vm13038_vm1, %v13039_v28 }
 0x890   :  { %v7351_v8 = vpop.f32.mrb[134].mxu1 }
 0x891   :  { %v18787_v43 = vadd.f32 %v7351_v8, %v18673_v54  ;;  %v11664_v12 = vpop.f32.mrb[135].mxu1  ;;  %11976 = vmatmul.mubr.msk.f32.gmra.mrb[240].mxu1 %vm5174_vm0, %v8456_v11  ;;  %v8458_v54 = vld [vmem:[#allocation3 + $0x50] sm:$0xff] }
 0x892   :  { %11978 = vmatprep.mubr.msk.f32.mxu1 %vm13038_vm1, %v13039_v28 }
 0x894   :  { %v7356_v49 = vpop.f32.mrb[136].mxu1 }
 0x895   :  { %v18793_v15 = vadd.f32 %v7356_v49, %v18679_v35  ;;  %v11667_v34 = vpop.f32.mrb[137].mxu1  ;;  %11979 = vmatmul.mubr.msk.f32.gmra.mrb[242].mxu1 %vm5174_vm0, %v8457_v63  ;;  %v8459_v35 = vld [vmem:[#allocation3 + $0x58] sm:$0xff] }
 0x896   :  { %11981 = vmatprep.mubr.msk.f32.mxu1 %vm13038_vm1, %v13039_v28 }
 0x898   :  { %v7361_v4 = vpop.f32.mrb[138].mxu1 }
 0x899   :  { %v18799_v3 = vadd.f32 %v7361_v4, %v18685_v56  ;;  %v11670_v0 = vpop.f32.mrb[139].mxu1  ;;  %11982 = vmatmul.mubr.msk.f32.gmra.mrb[244].mxu1 %vm5174_vm0, %v8458_v54  ;;  %v8460_v56 = vld [vmem:[#allocation3 + $0x60] sm:$0xff] }
 0x89a   :  { %11984 = vmatprep.mubr.msk.f32.mxu1 %vm13038_vm1, %v13039_v28 }
 0x89c   :  { %v7366_v22 = vpop.f32.mrb[140].mxu1 }
 0x89d   :  { %v18805_v27 = vadd.f32 %v7366_v22, %v18691_v40  ;;  %v11673_v8 = vpop.f32.mrb[141].mxu1  ;;  %11985 = vmatmul.mubr.msk.f32.gmra.mrb[246].mxu1 %vm5174_vm0, %v8459_v35  ;;  %v8461_v40 = vld [vmem:[#allocation3 + $0x68] sm:$0xff] }
 0x89e   :  { %11987 = vmatprep.mubr.msk.f32.mxu1 %vm13038_vm1, %v13039_v28 }
 0x8a0   :  { %v7371_v11 = vpop.f32.mrb[142].mxu1 }
 0x8a1   :  { %v18811_v12 = vadd.f32 %v7371_v11, %v18697_v31  ;;  %v11676_v49 = vpop.f32.mrb[143].mxu1  ;;  %11988 = vmatmul.mubr.msk.f32.gmra.mrb[248].mxu1 %vm5174_vm0, %v8460_v56  ;;  %v8462_v31 = vld [vmem:[#allocation3 + $0x70] sm:$0xff] }
 0x8a2   :  { %11990 = vmatprep.mubr.msk.f32.mxu1 %vm13038_vm1, %v13039_v28 }
 0x8a4   :  { %v7376_v63 = vpop.f32.mrb[144].mxu1 }
 0x8a5   :  { %v18817_v34 = vadd.f32 %v7376_v63, %v18703_v33  ;;  %v11679_v4 = vpop.f32.mrb[145].mxu1  ;;  %11991 = vmatmul.mubr.msk.f32.gmra.mrb[250].mxu1 %vm5174_vm0, %v8461_v40  ;;  %v8463_v33 = vld [vmem:[#allocation3 + $0x78] sm:$0xff] }
 0x8a6   :  { %11993 = vmatprep.mubr.msk.f32.mxu1 %vm13038_vm1, %v13039_v28 }
 0x8a8   :  { %v7381_v54 = vpop.f32.mrb[146].mxu1 }
 0x8a9   :  { %v18823_v0 = vadd.f32 %v7381_v54, %v18709_v13  ;;  %v11682_v22 = vpop.f32.mrb[147].mxu1  ;;  %11994 = vmatmul.mubr.msk.f32.gmra.mrb[252].mxu1 %vm5174_vm0, %v8462_v31  ;;  %v8464_v13 = vld [vmem:[#allocation3 + $0x80] sm:$0xff] }
 0x8aa   :  { %11996 = vmatprep.mubr.msk.f32.mxu1 %vm13038_vm1, %v13039_v28  ;;  %v8466_v22 = vld [vmem:[#allocation3 + $0x90] sm:$0xff] }
 0x8ac   :  { %v7386_v35 = vpop.f32.mrb[148].mxu1 }
 0x8ad   :  { %v18829_v8 = vadd.f32 %v7386_v35, %v18715_v36  ;;  %v11685_v11 = vpop.f32.mrb[149].mxu1  ;;  %11997 = vmatmul.mubr.msk.f32.gmra.mrb[254].mxu1 %vm5174_vm0, %v8463_v33  ;;  %v8465_v36 = vld [vmem:[#allocation3 + $0x88] sm:$0xff] }
 0x8ae   :  { %11999 = vmatprep.mubr.msk.f32.mxu1 %vm13038_vm1, %v13039_v28 }
 0x8b0   :  { %v7391_v56 = vpop.f32.mrb[150].mxu1 }
 0x8b1   :  { %v18835_v49 = vadd.f32 %v7391_v56, %v18721_v21  ;;  %v11688_v63 = vpop.f32.mrb[151].mxu1  ;;  %12000 = vmatmul.mubr.msk.f32.gmra.mrb[0].mxu1 %vm5174_vm0, %v8464_v13 }
 0x8b2   :  { %12002 = vmatprep.mubr.msk.f32.mxu1 %vm13038_vm1, %v13039_v28  ;;  %v8468_v63 = vld [vmem:[#allocation3 + $0xa0] sm:$0xff] }
 0x8b4   :  { %v7560_v40 = vpop.f32.mrb[152].mxu1 }
 0x8b5   :  { %v7654_v4 = vadd.f32 %v7560_v40, %v18727_v9  ;;  %v11699_v54 = vpop.f32.mrb[153].mxu1  ;;  %12003 = vmatmul.mubr.msk.f32.gmra.mrb[2].mxu1 %vm5174_vm0, %v8465_v36 }
 0x8b6   :  { %12005 = vmatprep.mubr.msk.f32.mxu1 %vm13038_vm1, %v13039_v28 }
 0x8b7   :  { %v18845_v31 = vadd.f32 %v18253_v16, %v7654_v4 }
 0x8b8   :  { %v7565_v21 = vpop.f32.mrb[154].mxu1 }
 0x8b9   :  { %v7655_v35 = vadd.f32 %v7565_v21, %v18733_v58  ;;  %v11702_v33 = vpop.f32.mrb[155].mxu1  ;;  %12006 = vmatmul.mubr.msk.f32.gmra.mrb[4].mxu1 %vm5174_vm0, %v8466_v22 }
 0x8ba   :  { %12008 = vmatprep.mubr.msk.f32.mxu1 %vm13038_vm1, %v13039_v28 }
 0x8bb   :  { %v18852_v9 = vadd.f32 %v18260_v52, %v7655_v35 }
 0x8bc   :  { %v7570_v11 = vpop.f32.mrb[156].mxu1 }
 0x8bd   :  { %v7656_v56 = vadd.f32 %v7570_v11, %v18739_v26  ;;  %v11705_v13 = vpop.f32.mrb[157].mxu1  ;;  %12009 = vmatmul.mubr.msk.f32.gmra.mrb[6].mxu1 %vm5174_vm0, %v18619_v44 }
 0x8be   :  { %12011 = vmatprep.mubr.msk.f32.mxu1 %vm13038_vm1, %v13039_v28 }
 0x8bf   :  { %v18860_v16 = vadd.f32 %v18273_v60, %v7656_v56 }
 0x8c0   :  { %v7575_v58 = vpop.f32.mrb[158].mxu1 }
 0x8c1   :  { %v7657_v40 = vadd.f32 %v7575_v58, %v18745_v32  ;;  %v11708_v36 = vpop.f32.mrb[159].mxu1  ;;  %12012 = vmatmul.mubr.msk.f32.gmra.mrb[8].mxu1 %vm5174_vm0, %v8468_v63 }
 0x8c2   :  { %12251 = vmatprep.mubr.msk.f32.mxu1 %vm13038_vm1, %v13039_v28 }
 0x8c3   :  { %v18867_v52 = vadd.f32 %v18286_v14, %v7657_v40 }
 0x8c4   :  { %v7580_v44 = vpop.f32.mrb[160].mxu1 }
 0x8c5   :  { %v7658_v26 = vadd.f32 %v7580_v44, %v18751_v23  ;;  %v11711_v4 = vpop.f32.mrb[161].mxu1 }
 0x8c7   :  { %v18871_v60 = vadd.f32 %v18294_v50, %v7658_v26 }
 0x8c8   :  { %v7585_v54 = vpop.f32.mrb[162].mxu1 }
 0x8c9   :  { %v7659_v21 = vadd.f32 %v7585_v54, %v18757_v48  ;;  %v11714_v32 = vpop.f32.mrb[163].mxu1 }
 0x8cb   :  { %v18875_v22 = vadd.f32 %v18303_v53, %v7659_v21 }
 0x8cc   :  { %v7590_v35 = vpop.f32.mrb[164].mxu1 }
 0x8cd   :  { %v7660_v33 = vadd.f32 %v7590_v35, %v18763_v51  ;;  %v11717_v11 = vpop.f32.mrb[165].mxu1 }
 0x8cf   :  { %v18879_v14 = vadd.f32 %v18311_v45, %v7660_v33 }
 0x8d0   :  { %v7595_v56 = vpop.f32.mrb[166].mxu1 }
 0x8d1   :  { %v7661_v23 = vadd.f32 %v7595_v56, %v18769_v25  ;;  %v11720_v13 = vpop.f32.mrb[167].mxu1 }
 0x8d3   :  { %v18883_v50 = vadd.f32 %v18319_v5, %v7661_v23 }
 0x8d4   :  { %v7600_v58 = vpop.f32.mrb[168].mxu1 }
 0x8d5   :  { %v7662_v48 = vadd.f32 %v7600_v58, %v18775_v20  ;;  %v11723_v63 = vpop.f32.mrb[169].mxu1 }
 0x8d7   :  { %v18887_v53 = vadd.f32 %v18327_v29, %v7662_v48 }
 0x8d8   :  { %v7605_v40 = vpop.f32.mrb[170].mxu1 }
 0x8d9   :  { %v7663_v51 = vadd.f32 %v7605_v40, %v18781_v41  ;;  %v11726_v36 = vpop.f32.mrb[171].mxu1  ;;  %v19745_v40 = vld [vmem:[#allocation24_spill] sm:$0xff] }
 0x8db   :  { %v18891_v45 = vadd.f32 %v18335_v2, %v7663_v51  ;;  %v19742_v2 = vld [vmem:[#allocation17_spill] sm:$0xff] }
 0x8dc   :  { %v7610_v44 = vpop.f32.mrb[172].mxu1 }
 0x8dd   :  { %v7664_v25 = vadd.f32 %v7610_v44, %v18787_v43  ;;  %v11729_v26 = vpop.f32.mrb[173].mxu1 }
 0x8df   :  { %v18895_v5 = vadd.f32 %v18343_v6, %v7664_v25  ;;  %v19743_v6 = vld [vmem:[#allocation21_spill] sm:$0xff]  ;;  %v19746_v25 = vld [vmem:[#allocation16_spill] sm:$0xff] }
 0x8e0   :  { %v7615_v4 = vpop.f32.mrb[174].mxu1 }
 0x8e1   :  { %v7665_v20 = vadd.f32 %v7615_v4, %v18793_v15  ;;  %v11732_v54 = vpop.f32.mrb[175].mxu1 }
 0x8e2   :  { %v19747_v54 = vld [vmem:[#allocation22_spill] sm:$0xff] }
 0x8e3   :  { %v18899_v29 = vadd.f32 %v18351_v62, %v7665_v20  ;;  %v19744_v62 = vld [vmem:[#allocation23_spill] sm:$0xff] }
 0x8e4   :  { %v7620_v21 = vpop.f32.mrb[176].mxu1 }
 0x8e5   :  { %v7666_v41 = vadd.f32 %v7620_v21, %v18799_v3  ;;  %v11735_v32 = vpop.f32.mrb[177].mxu1 }
 0x8e7   :  { %v18903_v35 = vadd.f32 %v19742_v2, %v7666_v41 }
 0x8e8   :  { %v7625_v33 = vpop.f32.mrb[178].mxu1 }
 0x8e9   :  { %v7667_v43 = vadd.f32 %v7625_v33, %v18805_v27  ;;  %v11738_v11 = vpop.f32.mrb[179].mxu1 }
 0x8eb   :  { %v18907_v56 = vadd.f32 %v19743_v6, %v7667_v43 }
 0x8ec   :  { %v7630_v23 = vpop.f32.mrb[180].mxu1 }
 0x8ed   :  { %v7668_v15 = vadd.f32 %v7630_v23, %v18811_v12  ;;  %v11741_v13 = vpop.f32.mrb[181].mxu1 }
 0x8ef   :  { %v18911_v58 = vadd.f32 %v19744_v62, %v7668_v15  ;;  %v19748_v15 = vld [vmem:[#allocation20_spill] sm:$0xff] }
 0x8f0   :  { %v7635_v48 = vpop.f32.mrb[182].mxu1 }
 0x8f1   :  { %v7669_v3 = vadd.f32 %v7635_v48, %v18817_v34  ;;  %v11744_v63 = vpop.f32.mrb[183].mxu1 }
 0x8f3   :  { %v18915_v51 = vadd.f32 %v19745_v40, %v7669_v3 }
 0x8f4   :  { %v7640_v36 = vpop.f32.mrb[184].mxu1 }
 0x8f5   :  { %v7670_v27 = vadd.f32 %v7640_v36, %v18823_v0  ;;  %v11747_v44 = vpop.f32.mrb[185].mxu1 }
 0x8f7   :  { %v18919_v26 = vadd.f32 %v19746_v25, %v7670_v27 }
 0x8f8   :  { %v7645_v4 = vpop.f32.mrb[186].mxu1 }
 0x8f9   :  { %v7671_v12 = vadd.f32 %v7645_v4, %v18829_v8  ;;  %v11750_v20 = vpop.f32.mrb[187].mxu1 }
 0x8fb   :  { %v18923_v21 = vadd.f32 %v19747_v54, %v7671_v12 }
 0x8fc   :  { %v7650_v41 = vpop.f32.mrb[188].mxu1 }
 0x8fd   :  { %v7672_v34 = vadd.f32 %v7650_v41, %v18835_v49  ;;  %v11753_v32 = vpop.f32.mrb[189].mxu1 }
 0x8ff   :  { %v18927_v2 = vadd.f32 %v18405_v47, %v7672_v34  ;;  %v19749_v47 = vld [vmem:[#allocation18_spill] sm:$0xff] }
 0x900   :  { %v8078_v33 = vpop.f32.mrb[190].mxu1 }
 0x901   :  { %v8172_v0 = vadd.f32 %v8078_v33, %v18845_v31  ;;  %v11829_v43 = vpop.f32.mrb[191].mxu1 }
 0x903   :  { %v18931_v11 = vadd.f32 %v18414_v39, %v8172_v0  ;;  %v19750_v39 = vld [vmem:[#allocation19_spill] sm:$0xff] }
 0x904   :  { %v8083_v6 = vpop.f32.mrb[192].mxu1 }
 0x905   :  { %v8173_v8 = vadd.f32 %v8083_v6, %v18852_v9  ;;  %v11832_v23 = vpop.f32.mrb[193].mxu1 }
 0x907   :  { %v18935_v13 = vadd.f32 %v19748_v15, %v8173_v8 }
 0x908   :  { %v8088_v62 = vpop.f32.mrb[194].mxu1 }
 0x909   :  { %v8174_v49 = vadd.f32 %v8088_v62, %v18860_v16  ;;  %v11835_v48 = vpop.f32.mrb[195].mxu1 }
 0x90b   :  { %v18939_v3 = vadd.f32 %v19749_v47, %v8174_v49 }
 0x90c   :  { %v8093_v63 = vpop.f32.mrb[196].mxu1 }
 0x90d   :  { %v8175_v31 = vadd.f32 %v8093_v63, %v18867_v52  ;;  %v11838_v40 = vpop.f32.mrb[197].mxu1 }
 0x90f   :  { %v18943_v36 = vadd.f32 %v19750_v39, %v8175_v31 }
 0x910   :  { %v8098_v27 = vpop.f32.mrb[198].mxu1 }
 0x911   :  { %v8176_v9 = vadd.f32 %v8098_v27, %v18871_v60  ;;  %v11841_v44 = vpop.f32.mrb[199].mxu1 }
 0x913   :  { %v18947_v25 = vadd.f32 %v18463_v57, %v8176_v9 }
 0x914   :  { %v8103_v4 = vpop.f32.mrb[200].mxu1 }
 0x915   :  { %v8177_v16 = vadd.f32 %v8103_v4, %v18875_v22  ;;  %v11844_v12 = vpop.f32.mrb[201].mxu1 }
 0x917   :  { %v18951_v20 = vadd.f32 %v18473_v42, %v8177_v16 }
 0x918   :  { %v8108_v54 = vpop.f32.mrb[202].mxu1 }
 0x919   :  { %v8178_v52 = vadd.f32 %v8108_v54, %v18879_v14  ;;  %v11847_v41 = vpop.f32.mrb[203].mxu1 }
 0x91b   :  { %v18955_v34 = vadd.f32 %v18482_v7, %v8178_v52 }
 0x91c   :  { %v8113_v32 = vpop.f32.mrb[204].mxu1 }
 0x91d   :  { %v8179_v60 = vadd.f32 %v8113_v32, %v18883_v50  ;;  %v11850_v33 = vpop.f32.mrb[205].mxu1 }
 0x91f   :  { %v18959_v57 = vadd.f32 %v18491_v17, %v8179_v60  ;;  %v8775_v17 = vld [vmem:[%s19636_s2 + $0x8] sm:$0xff] }
 0x920   :  { %v8118_v0 = vpop.f32.mrb[206].mxu1  ;;  %10877 = vmatprep.mubr.msk.f32.mxu0 %vm8897_vm4, %v8775_v17 }
 0x921   :  { %v8180_v22 = vadd.f32 %v8118_v0, %v18887_v53  ;;  %v11853_v43 = vpop.f32.mrb[207].mxu1 }
 0x923   :  { %v18963_v42 = vadd.f32 %v18500_v59, %v8180_v22 }
 0x924   :  { %v8123_v6 = vpop.f32.mrb[208].mxu1 }
 0x925   :  { %v8181_v14 = vadd.f32 %v8123_v6, %v18891_v45  ;;  %v11856_v8 = vpop.f32.mrb[209].mxu1 }
 0x927   :  { %v18967_v7 = vadd.f32 %v18509_v18, %v8181_v14 }
 0x928   :  { %v8128_v23 = vpop.f32.mrb[210].mxu1 }
 0x929   :  { %v8182_v50 = vadd.f32 %v8128_v23, %v18895_v5  ;;  %v11859_v15 = vpop.f32.mrb[211].mxu1 }
 0x92b   :  { %v18975_v59 = vadd.f32 %v18518_v19, %v8182_v50 }
 0x92c   :  { %v8133_v53 = vpop.f32.mrb[212].mxu1 }
 0x92d   :  { %v8183_v45 = vadd.f32 %v8133_v53, %v18899_v29  ;;  %v11862_v62 = vpop.f32.mrb[213].mxu1 }
 0x92f   :  { %v18979_v18 = vadd.f32 %v18527_v30, %v8183_v45 }
 0x930   :  { %v8138_v49 = vpop.f32.mrb[214].mxu1 }
 0x931   :  { %v8184_v5 = vadd.f32 %v8138_v49, %v18903_v35  ;;  %v11865_v48 = vpop.f32.mrb[215].mxu1 }
 0x933   :  { %v18983_v47 = vadd.f32 %v18536_v37, %v8184_v5 }
 0x934   :  { %v8143_v63 = vpop.f32.mrb[216].mxu1 }
 0x935   :  { %v8185_v31 = vadd.f32 %v8143_v63, %v18907_v56  ;;  %v11868_v40 = vpop.f32.mrb[217].mxu1 }
 0x937   :  { %v18987_v19 = vadd.f32 %v18545_v61, %v8185_v31 }
 0x938   :  { %v8148_v39 = vpop.f32.mrb[218].mxu1 }
 0x939   :  { %v8186_v29 = vadd.f32 %v8148_v39, %v18911_v58  ;;  %v11871_v27 = vpop.f32.mrb[219].mxu1 }
 0x93b   :  { %v18991_v30 = vadd.f32 %v18554_v1, %v8186_v29 }
 0x93c   :  { %v8153_v9 = vpop.f32.mrb[220].mxu1 }
 0x93d   :  { %v8187_v35 = vadd.f32 %v8153_v9, %v18915_v51  ;;  %v11874_v44 = vpop.f32.mrb[221].mxu1 }
 0x93f   :  { %v18995_v37 = vadd.f32 %v18563_v55, %v8187_v35 }
 0x940   :  { %v8158_v4 = vpop.f32.mrb[222].mxu1 }
 0x941   :  { %v8188_v56 = vadd.f32 %v8158_v4, %v18919_v26  ;;  %v11877_v16 = vpop.f32.mrb[223].mxu1 }
 0x943   :  { %v18999_v61 = vadd.f32 %v18572_v10, %v8188_v56  ;;  %v19012_v10 = vld [vmem:[%s19641_s7] ss:$0 sm:$0xff] }
 0x944   :  { %v8163_v12 = vpop.f32.mrb[224].mxu1 }
 0x945   :  { %v8189_v58 = vadd.f32 %v8163_v12, %v18923_v21  ;;  %v11880_v54 = vpop.f32.mrb[225].mxu1 }
 0x947   :  { %v19003_v1 = vadd.f32 %v18581_v38, %v8189_v58 }
 0x948   :  { %v8168_v52 = vpop.f32.mrb[226].mxu1 }
 0x949   :  { %v8190_v51 = vadd.f32 %v8168_v52, %v18927_v2  ;;  %v11883_v41 = vpop.f32.mrb[227].mxu1 }
 0x94b   :  { %v19007_v55 = vadd.f32 %v18590_v24, %v8190_v51 }
 0x94c   :  { %v8596_v32 = vpop.f32.mrb[228].mxu1 }
 0x94d   :  { %v8690_v26 = vadd.f32 %v8596_v32, %v18931_v11  ;;  %v11959_v21 = vpop.f32.mrb[229].mxu1 }
 0x94f   :  { %v8716_v60 = vadd.f32 %v19012_v10, %v8690_v26 }
 0x950   :  { %v8601_v38 = vpop.f32.mrb[230].mxu1 }
 0x951   :  { %v8735_v33 = vmax.f32 %v8716_v60, 0.0  ;;  %v8691_v2 = vadd.f32 %v8601_v38, %v18935_v13  ;;  %v11962_v0 = vpop.f32.mrb[231].mxu1 }
 0x953   :  { %8755 = vst.msk [vmem:[#allocation4] sm:$0xff] %vm8754_vm5, %v8735_v33  ;;  %v8717_v24 = vadd.f32 %v19012_v10, %v8691_v2 }
 0x954   :  { %v8606_v22 = vpop.f32.mrb[232].mxu1 }
 0x955   :  { %v8736_v43 = vmax.f32 %v8717_v24, 0.0  ;;  %v8692_v6 = vadd.f32 %v8606_v22, %v18939_v3  ;;  %v11965_v14 = vpop.f32.mrb[233].mxu1 }
 0x957   :  { %8756 = vst.msk [vmem:[#allocation4 + $0x8] sm:$0xff] %vm8754_vm5, %v8736_v43  ;;  %v8718_v11 = vadd.f32 %v19012_v10, %v8692_v6 }
 0x958   :  { %v8611_v8 = vpop.f32.mrb[234].mxu1 }
 0x959   :  { %v8737_v23 = vmax.f32 %v8718_v11, 0.0  ;;  %v8693_v50 = vadd.f32 %v8611_v8, %v18943_v36  ;;  %v11968_v15 = vpop.f32.mrb[235].mxu1 }
 0x95a   :  { %v8788_v31 = vld [vmem:[#allocation4] sm:$0xff] }
 0x95b   :  { %8757 = vst.msk [vmem:[#allocation4 + $0x10] sm:$0xff] %vm8754_vm5, %v8737_v23  ;;  %v8719_v13 = vadd.f32 %v19012_v10, %v8693_v50 }
 0x95c   :  { %v8616_v17 = vpop.f32.mrb[236].mxu1 }
 0x95d   :  { %v8738_v53 = vmax.f32 %v8719_v13, 0.0  ;;  %v8694_v45 = vadd.f32 %v8616_v17, %v18947_v25  ;;  %v11971_v62 = vpop.f32.mrb[237].mxu1 }
 0x95e   :  { %v8789_v3 = vld [vmem:[#allocation4 + $0x8] sm:$0xff] }
 0x95f   :  { %v8806_v49 = vld [vmem:[#allocation4 + $0x1] sm:$0xff]  ;;  %8758 = vst.msk [vmem:[#allocation4 + $0x18] sm:$0xff] %vm8754_vm5, %v8738_v53  ;;  %v8720_v48 = vadd.f32 %v19012_v10, %v8694_v45 }
 0x960   :  { %v8842_v5 = vld [vmem:[#allocation4 + $0x7] sm:$0xff]  ;;  %v8621_v63 = vpop.f32.mrb[238].mxu1  ;;  %v8824_v29 = vmax.f32 %v8788_v31, %v8806_v49 }
 0x961   :  { %v8739_v36 = vmax.f32 %v8720_v48, 0.0  ;;  %v8695_v40 = vadd.f32 %v8621_v63, %v18951_v20  ;;  %v11974_v39 = vpop.f32.mrb[239].mxu1  ;;  %v8861_v27 = vmax.f32 %v8842_v5, %v8789_v3 }
 0x962   :  { %v8790_v9 = vld [vmem:[#allocation4 + $0x10] sm:$0xff] }
 0x963   :  { %v8807_v35 = vld [vmem:[#allocation4 + $0x9] sm:$0xff]  ;;  %8759 = vst.msk [vmem:[#allocation4 + $0x20] sm:$0xff] %vm8754_vm5, %v8739_v36  ;;  %v8721_v25 = vadd.f32 %v19012_v10, %v8695_v40  ;;  %v8879_v52 = vmax.f32 %v8824_v29, %v8861_v27 }
 0x964   :  { %v8843_v44 = vld [vmem:[#allocation4 + $0xf] sm:$0xff]  ;;  %v8825_v4 = vmax.f32 %v8789_v3, %v8807_v35  ;;  %v8626_v16 = vpop.f32.mrb[240].mxu1 }
 0x965   :  { %v8862_v56 = vmax.f32 %v8843_v44, %v8790_v9  ;;  %v8740_v12 = vmax.f32 %v8721_v25, 0.0  ;;  %v8696_v58 = vadd.f32 %v8626_v16, %v18955_v34  ;;  %v11977_v54 = vpop.f32.mrb[241].mxu1 }
 0x966   :  { %v8791_v20 = vld [vmem:[#allocation4 + $0x18] sm:$0xff] }
 0x967   :  { %v8880_v51 = vmax.f32 %v8825_v4, %v8862_v56  ;;  %v8808_v41 = vld [vmem:[#allocation4 + $0x11] sm:$0xff]  ;;  %8760 = vst.msk [vmem:[#allocation4 + $0x28] sm:$0xff] %vm8754_vm5, %v8740_v12  ;;  %v8722_v26 = vadd.f32 %v19012_v10, %v8696_v58 }
 0x968   :  { %v8844_v32 = vld [vmem:[#allocation4 + $0x17] sm:$0xff]  ;;  %v8631_v60 = vpop.f32.mrb[242].mxu1  ;;  %v8826_v0 = vmax.f32 %v8790_v9, %v8808_v41 }
 0x969   :  { %v12513_v21 = vpack.c.bf16 %v8880_v51, %v8879_v52  ;;  %v8741_v38 = vmax.f32 %v8722_v26, 0.0  ;;  %v8697_v33 = vadd.f32 %v8631_v60, %v18959_v57  ;;  %v11980_v2 = vpop.f32.mrb[243].mxu1  ;;  %v8863_v24 = vmax.f32 %v8844_v32, %v8791_v20 }
 0x96a   :  { %v8792_v34 = vld [vmem:[#allocation4 + $0x20] sm:$0xff] }
 0x96b   :  { %12514 = vmatpush1.bf16.msra.mxu0 %v12513_v21  ;;  %v8809_v22 = vld [vmem:[#allocation4 + $0x19] sm:$0xff]  ;;  %8761 = vst.msk [vmem:[#allocation4 + $0x30] sm:$0xff] %vm8754_vm5, %v8741_v38  ;;  %v8723_v6 = vadd.f32 %v19012_v10, %v8697_v33  ;;  %v8881_v15 = vmax.f32 %v8826_v0, %v8863_v24 }
 0x96c   :  { %12515 = vmatprep.subr.bf16.mxu0 %v19665_v46  ;;  %v8845_v43 = vld [vmem:[#allocation4 + $0x1f] sm:$0xff]  ;;  %v8827_v14 = vmax.f32 %v8791_v20, %v8809_v22  ;;  %v8636_v8 = vpop.f32.mrb[244].mxu1 }
 0x96d   :  { %v8864_v11 = vmax.f32 %v8845_v43, %v8792_v34  ;;  %v8742_v23 = vmax.f32 %v8723_v6, 0.0  ;;  %v8698_v50 = vadd.f32 %v8636_v8, %v18963_v42  ;;  %v11983_v57 = vpop.f32.mrb[245].mxu1 }
 0x96e   :  { %v8793_v17 = vld [vmem:[#allocation4 + $0x28] sm:$0xff] }
 0x96f   :  { %v8882_v13 = vmax.f32 %v8827_v14, %v8864_v11  ;;  %v8810_v53 = vld [vmem:[#allocation4 + $0x21] sm:$0xff]  ;;  %8762 = vst.msk [vmem:[#allocation4 + $0x38] sm:$0xff] %vm8754_vm5, %v8742_v23  ;;  %v8724_v62 = vadd.f32 %v19012_v10, %v8698_v50 }
 0x970   :  { %v8846_v45 = vld [vmem:[#allocation4 + $0x27] sm:$0xff]  ;;  %v8641_v49 = vpop.f32.mrb[246].mxu1  ;;  %v8828_v31 = vmax.f32 %v8792_v34, %v8810_v53 }
 0x971   :  { %v12516_v3 = vpack.c.bf16 %v8882_v13, %v8881_v15  ;;  %v8743_v5 = vmax.f32 %v8724_v62, 0.0  ;;  %v8699_v48 = vadd.f32 %v8641_v49, %v18967_v7  ;;  %v11986_v63 = vpop.f32.mrb[247].mxu1  ;;  %v8865_v36 = vmax.f32 %v8846_v45, %v8793_v17 }
 0x972   :  { %v8794_v42 = vld [vmem:[#allocation4 + $0x30] sm:$0xff] }
 0x973   :  { %12517 = vmatpush1.bf16.msra.mxu0 %v12516_v3  ;;  %v8811_v40 = vld [vmem:[#allocation4 + $0x29] sm:$0xff]  ;;  %8763 = vst.msk [vmem:[#allocation4 + $0x40] sm:$0xff] %vm8754_vm5, %v8743_v5  ;;  %v8725_v29 = vadd.f32 %v19012_v10, %v8699_v48  ;;  %v8883_v4 = vmax.f32 %v8828_v31, %v8865_v36 }
 0x974   :  { %12518 = vmatprep.subr.bf16.mxu0 %v19665_v46  ;;  %v8847_v39 = vld [vmem:[#allocation4 + $0x2f] sm:$0xff]  ;;  %v8829_v27 = vmax.f32 %v8793_v17, %v8811_v40  ;;  %v8646_v35 = vpop.f32.mrb[248].mxu1 }
 0x975   :  { %v8866_v9 = vmax.f32 %v8847_v39, %v8794_v42  ;;  %v8744_v44 = vmax.f32 %v8725_v29, 0.0  ;;  %v8700_v25 = vadd.f32 %v8646_v35, %v18975_v59  ;;  %v11989_v7 = vpop.f32.mrb[249].mxu1 }
 0x976   :  { %v8795_v16 = vld [vmem:[#allocation4 + $0x38] sm:$0xff] }
 0x977   :  { %v8884_v56 = vmax.f32 %v8829_v27, %v8866_v9  ;;  %v8812_v12 = vld [vmem:[#allocation4 + $0x31] sm:$0xff]  ;;  %8764 = vst.msk [vmem:[#allocation4 + $0x48] sm:$0xff] %vm8754_vm5, %v8744_v44  ;;  %v8726_v54 = vadd.f32 %v19012_v10, %v8700_v25 }
 0x978   :  { %v8848_v58 = vld [vmem:[#allocation4 + $0x37] sm:$0xff]  ;;  %v8651_v51 = vpop.f32.mrb[250].mxu1  ;;  %v8830_v26 = vmax.f32 %v8794_v42, %v8812_v12 }
 0x979   :  { %v12519_v52 = vpack.c.bf16 %v8884_v56, %v8883_v4  ;;  %v8745_v20 = vmax.f32 %v8726_v54, 0.0  ;;  %v8701_v41 = vadd.f32 %v8651_v51, %v18979_v18  ;;  %v11992_v32 = vpop.f32.mrb[251].mxu1  ;;  %v8867_v21 = vmax.f32 %v8848_v58, %v8795_v16 }
 0x97a   :  { %v8796_v59 = vld [vmem:[#allocation4 + $0x40] sm:$0xff] }
 0x97b   :  { %12520 = vmatpush1.bf16.msra.mxu0 %v12519_v52  ;;  %v8813_v60 = vld [vmem:[#allocation4 + $0x39] sm:$0xff]  ;;  %8765 = vst.msk [vmem:[#allocation4 + $0x50] sm:$0xff] %vm8754_vm5, %v8745_v20  ;;  %v8727_v33 = vadd.f32 %v19012_v10, %v8701_v41  ;;  %v8885_v43 = vmax.f32 %v8830_v26, %v8867_v21 }
 0x97c   :  { %12521 = vmatprep.subr.bf16.mxu0 %v19665_v46  ;;  %v8849_v38 = vld [vmem:[#allocation4 + $0x3f] sm:$0xff]  ;;  %v8831_v2 = vmax.f32 %v8795_v16, %v8813_v60  ;;  %v8656_v24 = vpop.f32.mrb[252].mxu1 }
 0x97d   :  { %v8868_v0 = vmax.f32 %v8849_v38, %v8796_v59  ;;  %v8746_v34 = vmax.f32 %v8727_v33, 0.0  ;;  %v8702_v22 = vadd.f32 %v8656_v24, %v18983_v47  ;;  %v11995_v18 = vpop.f32.mrb[253].mxu1 }
 0x97e   :  { %v8797_v14 = vld [vmem:[#allocation4 + $0x48] sm:$0xff] }
 0x97f   :  { %v8886_v6 = vmax.f32 %v8831_v2, %v8868_v0  ;;  %v8814_v11 = vld [vmem:[#allocation4 + $0x41] sm:$0xff]  ;;  %8766 = vst.msk [vmem:[#allocation4 + $0x58] sm:$0xff] %vm8754_vm5, %v8746_v34  ;;  %v8728_v23 = vadd.f32 %v19012_v10, %v8702_v22 }
 0x980   :  { %v8850_v8 = vld [vmem:[#allocation4 + $0x47] sm:$0xff]  ;;  %v8661_v57 = vpop.f32.mrb[254].mxu1  ;;  %v8832_v53 = vmax.f32 %v8796_v59, %v8814_v11 }
 0x981   :  { %v12522_v50 = vpack.c.bf16 %v8886_v6, %v8885_v43  ;;  %v8747_v15 = vmax.f32 %v8728_v23, 0.0  ;;  %v8703_v13 = vadd.f32 %v8661_v57, %v18987_v19  ;;  %v11998_v17 = vpop.f32.mrb[255].mxu1  ;;  %v8869_v45 = vmax.f32 %v8850_v8, %v8797_v14 }
 0x982   :  { %v8798_v47 = vld [vmem:[#allocation4 + $0x50] sm:$0xff] }
 0x983   :  { %12523 = vmatpush1.bf16.msra.mxu0 %v12522_v50  ;;  %v8815_v62 = vld [vmem:[#allocation4 + $0x49] sm:$0xff]  ;;  %8767 = vst.msk [vmem:[#allocation4 + $0x60] sm:$0xff] %vm8754_vm5, %v8747_v15  ;;  %v8729_v49 = vadd.f32 %v19012_v10, %v8703_v13  ;;  %v8887_v42 = vmax.f32 %v8832_v53, %v8869_v45 }
 0x984   :  { %12524 = vmatprep.subr.bf16.mxu0 %v19665_v46  ;;  %v8851_v3 = vld [vmem:[#allocation4 + $0x4f] sm:$0xff]  ;;  %v8833_v5 = vmax.f32 %v8797_v14, %v8815_v62  ;;  %v8666_v63 = vpop.f32.mrb[0].mxu1 }
 0x985   :  { %v8870_v48 = vmax.f32 %v8851_v3, %v8798_v47  ;;  %v8748_v31 = vmax.f32 %v8729_v49, 0.0  ;;  %v8704_v36 = vadd.f32 %v8666_v63, %v18991_v30  ;;  %v12001_v19 = vpop.f32.mrb[1].mxu1 }
 0x986   :  { %v8799_v39 = vld [vmem:[#allocation4 + $0x58] sm:$0xff] }
 0x987   :  { %v8888_v40 = vmax.f32 %v8833_v5, %v8870_v48  ;;  %v8816_v29 = vld [vmem:[#allocation4 + $0x51] sm:$0xff]  ;;  %8768 = vst.msk [vmem:[#allocation4 + $0x68] sm:$0xff] %vm8754_vm5, %v8748_v31  ;;  %v8730_v9 = vadd.f32 %v19012_v10, %v8704_v36 }
 0x988   :  { %v8852_v27 = vld [vmem:[#allocation4 + $0x57] sm:$0xff]  ;;  %v8671_v44 = vpop.f32.mrb[2].mxu1  ;;  %v8834_v56 = vmax.f32 %v8798_v47, %v8816_v29 }
 0x989   :  { %v12525_v35 = vpack.c.bf16 %v8888_v40, %v8887_v42  ;;  %v8749_v25 = vmax.f32 %v8730_v9, 0.0  ;;  %v8705_v7 = vadd.f32 %v8671_v44, %v18995_v37  ;;  %v12004_v4 = vpop.f32.mrb[3].mxu1  ;;  %v8871_v16 = vmax.f32 %v8852_v27, %v8799_v39 }
 0x98a   :  { %v8800_v30 = vld [vmem:[#allocation4 + $0x60] sm:$0xff] }
 0x98b   :  { %12526 = vmatpush1.bf16.msra.mxu0 %v12525_v35  ;;  %v8817_v12 = vld [vmem:[#allocation4 + $0x59] sm:$0xff]  ;;  %8769 = vst.msk [vmem:[#allocation4 + $0x70] sm:$0xff] %vm8754_vm5, %v8749_v25  ;;  %v8731_v54 = vadd.f32 %v19012_v10, %v8705_v7  ;;  %v8889_v26 = vmax.f32 %v8834_v56, %v8871_v16 }
 0x98c   :  { %12527 = vmatprep.subr.bf16.mxu0 %v19665_v46  ;;  %v8853_v58 = vld [vmem:[#allocation4 + $0x5f] sm:$0xff]  ;;  %v8835_v52 = vmax.f32 %v8799_v39, %v8817_v12  ;;  %v8676_v20 = vpop.f32.mrb[4].mxu1 }
 0x98d   :  { %v8872_v51 = vmax.f32 %v8853_v58, %v8800_v30  ;;  %v8750_v41 = vmax.f32 %v8731_v54, 0.0  ;;  %v8706_v32 = vadd.f32 %v8676_v20, %v18999_v61  ;;  %v12007_v37 = vpop.f32.mrb[5].mxu1  ;;  %v8774_v58 = vld [vmem:[%s19636_s2] sm:$0xff]  ;;  %v8777_v54 = vld [vmem:[%s19636_s2 + $0x18] sm:$0xff] }
 0x98e   :  { %v8801_v59 = vld [vmem:[#allocation4 + $0x68] sm:$0xff]  ;;  %v8778_v20 = vld [vmem:[%s19636_s2 + $0x20] sm:$0xff]  ;;  %v8783_v37 = vld [vmem:[%s19636_s2 + $0x48] sm:$0xff] }
 0x98f   :  { %v8890_v21 = vmax.f32 %v8835_v52, %v8872_v51  ;;  %v8818_v60 = vld [vmem:[#allocation4 + $0x61] sm:$0xff]  ;;  %8770 = vst.msk [vmem:[#allocation4 + $0x78] sm:$0xff] %vm8754_vm5, %v8750_v41  ;;  %v8732_v33 = vadd.f32 %v19012_v10, %v8706_v32  ;;  %v8781_v41 = vld [vmem:[%s19636_s2 + $0x38] sm:$0xff] }
 0x990   :  { %v8854_v38 = vld [vmem:[#allocation4 + $0x67] sm:$0xff]  ;;  %v8681_v0 = vpop.f32.mrb[6].mxu1  ;;  %v8836_v18 = vmax.f32 %v8800_v30, %v8818_v60 }
 0x991   :  { %v12528_v2 = vpack.c.bf16 %v8890_v21, %v8889_v26  ;;  %v8751_v24 = vmax.f32 %v8732_v33, 0.0  ;;  %v8707_v34 = vadd.f32 %v8681_v0, %v19003_v1  ;;  %v12010_v22 = vpop.f32.mrb[7].mxu1  ;;  %v8873_v43 = vmax.f32 %v8854_v38, %v8801_v59  ;;  %v8776_v52 = vld [vmem:[%s19636_s2 + $0x10] sm:$0xff]  ;;  %v8779_v51 = vld [vmem:[%s19636_s2 + $0x28] sm:$0xff]  ;;  %v8782_v26 = vld [vmem:[%s19636_s2 + $0x40] sm:$0xff] }
 0x992   :  { %v8802_v61 = vld [vmem:[#allocation4 + $0x70] sm:$0xff]  ;;  %v8780_v32 = vld [vmem:[%s19636_s2 + $0x30] sm:$0xff]  ;;  %v8787_v60 = vld [vmem:[%s19636_s2 + $0x68] sm:$0xff] }
 0x993   :  { %12529 = vmatpush1.bf16.msra.mxu0 %v12528_v2  ;;  %v8819_v6 = vld [vmem:[#allocation4 + $0x69] sm:$0xff]  ;;  %8771 = vst.msk [vmem:[#allocation4 + $0x80] sm:$0xff] %vm8754_vm5, %v8751_v24  ;;  %v8733_v11 = vadd.f32 %v19012_v10, %v8707_v34  ;;  %v8891_v13 = vmax.f32 %v8836_v18, %v8873_v43  ;;  %v8786_v38 = vld [vmem:[%s19636_s2 + $0x60] sm:$0xff]  ;;  %v9047_v2 = vld [vmem:[%s19642_s8 + $0x48] sm:$0xff] }
 0x994   :  { %12530 = vmatprep.subr.bf16.mxu0 %v19665_v46  ;;  %v8855_v14 = vld [vmem:[#allocation4 + $0x6f] sm:$0xff]  ;;  %v8837_v8 = vmax.f32 %v8801_v59, %v8819_v6  ;;  %v8686_v50 = vpop.f32.mrb[8].mxu1  ;;  %v9046_v33 = vld [vmem:[%s19642_s8 + $0x40] sm:$0xff]  ;;  %v9051_v43 = vld [vmem:[%s19642_s8 + $0x68] sm:$0xff] }
 0x995   :  { %v8874_v23 = vmax.f32 %v8855_v14, %v8802_v61  ;;  %v8752_v57 = vmax.f32 %v8733_v11, 0.0  ;;  %v8708_v15 = vadd.f32 %v8686_v50, %v19007_v55  ;;  %v12013_v1 = vpop.f32.mrb[9].mxu1  ;;  %v8785_v21 = vld [vmem:[%s19636_s2 + $0x58] sm:$0xff]  ;;  %v8784_v59 = vld [vmem:[%s19636_s2 + $0x50] sm:$0xff]  ;;  %v12539_v0 = vpack.c.bf16 %v9047_v2, %v9046_v33  ;;  %v9050_v18 = vld [vmem:[%s19642_s8 + $0x60] sm:$0xff] }
 0x996   :  { %v8803_v53 = vld [vmem:[#allocation4 + $0x78] sm:$0xff]  ;;  %v9048_v24 = vld [vmem:[%s19642_s8 + $0x50] sm:$0xff]  ;;  %v9049_v34 = vld [vmem:[%s19642_s8 + $0x58] sm:$0xff] }
 0x997   :  { %v8892_v17 = vmax.f32 %v8837_v8, %v8874_v23  ;;  %v8820_v45 = vld [vmem:[#allocation4 + $0x71] sm:$0xff]  ;;  %8772 = vst.msk [vmem:[#allocation4 + $0x88] sm:$0xff] %vm8754_vm5, %v8752_v57  ;;  %v8734_v62 = vadd.f32 %v19012_v10, %v8708_v15  ;;  %v12543_v22 = vpack.c.bf16 %v9049_v34, %v9048_v24  ;;  %v9052_v6 = vld [vmem:[%s19642_s8 + $0x70] sm:$0xff]  ;;  %v9033_v23 = vld [vmem:[%s19642_s8 + $0x8] sm:$0xff] }
 0x998   :  { %v8856_v47 = vld [vmem:[#allocation4 + $0x77] sm:$0xff]  ;;  %v8838_v5 = vmax.f32 %v8802_v61, %v8820_v45  ;;  %v12547_v61 = vpack.c.bf16 %v9051_v43, %v9050_v18  ;;  %v9420_v2 = vld [vmem:[%s19642_s8 + $0xc8] sm:$0xff]  ;;  %v9421_v34 = vld [vmem:[%s19642_s8 + $0xd0] sm:$0xff] }
 0x999   :  { %v12531_v3 = vpack.c.bf16 %v8892_v17, %v8891_v13  ;;  %v8753_v49 = vmax.f32 %v8734_v62, 0.0  ;;  %v8875_v48 = vmax.f32 %v8856_v47, %v8803_v53  ;;  %v9053_v14 = vld [vmem:[%s19642_s8 + $0x78] sm:$0xff]  ;;  %v9032_v8 = vld [vmem:[%s19642_s8] sm:$0xff]  ;;  %v9034_v62 = vld [vmem:[%s19642_s8 + $0x10] sm:$0xff] }
 0x99a   :  { %v8804_v63 = vld [vmem:[#allocation4 + $0x80] sm:$0xff]  ;;  %v12551_v11 = vpack.c.bf16 %v9053_v14, %v9052_v6  ;;  %v12555_v50 = vpack.c.bf16 %v9033_v23, %v9032_v8  ;;  %v9419_v33 = vld [vmem:[%s19642_s8 + $0xc0] sm:$0xff]  ;;  %v9425_v23 = vld [vmem:[%s19642_s8 + $0xf0] sm:$0xff] }
 0x99b   :  { %12532 = vmatpush1.bf16.msra.mxu0 %v12531_v3  ;;  %v8821_v31 = vld [vmem:[#allocation4 + $0x79] sm:$0xff]  ;;  %8773 = vst.msk [vmem:[#allocation4 + $0x90] sm:$0xff] %vm8754_vm5, %v8753_v49  ;;  %v8893_v42 = vmax.f32 %v8838_v5, %v8875_v48  ;;  %v9035_v3 = vld [vmem:[%s19642_s8 + $0x18] sm:$0xff]  ;;  %v12587_v24 = vpack.c.bf16 %v9420_v2, %v9419_v33 }
 0x99c   :  { %12533 = vmatprep.subr.bf16.mxu0 %v19665_v46  ;;  %v8857_v55 = vld [vmem:[#allocation4 + $0x7f] sm:$0xff]  ;;  %v8839_v36 = vmax.f32 %v8803_v53, %v8821_v31  ;;  %v12559_v5 = vpack.c.bf16 %v9035_v3, %v9034_v62  ;;  %v9555_v62 = vld [vmem:[%s19642_s8 + $0x118] sm:$0xff] }
 0x99d   :  { %v8876_v19 = vmax.f32 %v8857_v55, %v8804_v63  ;;  %v9036_v31 = vld [vmem:[%s19642_s8 + $0x20] sm:$0xff]  ;;  %v9037_v55 = vld [vmem:[%s19642_s8 + $0x28] sm:$0xff] }
 0x99e   :  { %v8805_v39 = vld [vmem:[#allocation4 + $0x88] sm:$0xff]  ;;  %v9424_v6 = vld [vmem:[%s19642_s8 + $0xe8] sm:$0xff]  ;;  %v9818_v33 = vld [vmem:[%s19642_s8 + $0x180] sm:$0xff] }
 0x99f   :  { %v8894_v40 = vmax.f32 %v8839_v36, %v8876_v19  ;;  %v8822_v29 = vld [vmem:[#allocation4 + $0x81] sm:$0xff]  ;;  %v12563_v19 = vpack.c.bf16 %v9037_v55, %v9036_v31 }
 0x9a0   :  { %v8858_v27 = vld [vmem:[#allocation4 + $0x87] sm:$0xff]  ;;  %v8840_v9 = vmax.f32 %v8804_v63, %v8822_v29  ;;  %v9039_v29 = vld [vmem:[%s19642_s8 + $0x38] sm:$0xff] }
 0x9a1   :  { %v12534_v10 = vpack.c.bf16 %v8894_v40, %v8893_v42  ;;  %v8877_v35 = vmax.f32 %v8858_v27, %v8805_v39  ;;  %v9819_v2 = vld [vmem:[%s19642_s8 + $0x188] sm:$0xff] }
 0x9a2   :  { %v8823_v44 = vld [vmem:[#allocation4 + $0x89] sm:$0xff] }
 0x9a3   :  { %12535 = vmatpush1.bf16.msra.mxu0 %v12534_v10  ;;  %v8859_v25 = vld [vmem:[#allocation4 + $0x8f] sm:$0xff]  ;;  %v8841_v4 = vmax.f32 %v8805_v39, %v8823_v44  ;;  %v8895_v16 = vmax.f32 %v8840_v9, %v8877_v35  ;;  %v9286_v44 = vld [vmem:[%s19642_s8 + $0x80] sm:$0xff] }
 0x9a4   :  { %12536 = vmatprep.subr.bf16.mxu0 %v19665_v46  ;;  %v8860_v7 = vld [vmem:[#allocation4 + $0x90] sm:$0xff]  ;;  %v9038_v39 = vld [vmem:[%s19642_s8 + $0x30] sm:$0xff] }
 0x9a5   :  { %v8878_v56 = vmax.f32 %v8859_v25, %v8860_v7  ;;  %v12567_v10 = vpack.c.bf16 %v9039_v29, %v9038_v39  ;;  %v9287_v25 = vld [vmem:[%s19642_s8 + $0x88] sm:$0xff] }
 0x9a7   :  { %v8896_v30 = vmax.f32 %v8841_v4, %v8878_v56 }
 0x9a9   :  { %v12537_v12 = vpack.c.bf16 %v8896_v30, %v8895_v16  ;;  %v12571_v16 = vpack.c.bf16 %v9287_v25, %v9286_v44  ;;  %v9288_v30 = vld [vmem:[%s19642_s8 + $0x90] sm:$0xff] }
 0x9ab   :  { %12538 = vmatpush1.bf16.msra.mxu0 %v12537_v12  ;;  %v9289_v12 = vld [vmem:[%s19642_s8 + $0x98] sm:$0xff] }
 0x9ac   :  { %12540 = vmatprep.subr.bf16.mxu0 %v12539_v0 }
 0x9ae   :  { %8984 = vmatmul.mubr.f32.vlgmr.msra.gmra.mrb[118].mxu0 %v8774_v58 }
 0x9af   :  { %10878 = vmatprep.mubr.msk.f32.mxu0 %vm8897_vm4, %v8777_v54  ;;  %12542 = vmatpush3.bf16.msra.mxu0 %v12539_v0  ;;  %v12575_v54 = vpack.c.bf16 %v9289_v12, %v9288_v30  ;;  %v9689_v12 = vld [vmem:[%s19642_s8 + $0x160] sm:$0xff] }
 0x9b0   :  { %12544 = vmatprep.subr.bf16.mxu0 %v12543_v22 }
 0x9b2   :  { %8989 = vmatmul.mubr.f32.gmra.mrb[120].mxu0 %v8776_v52 }
 0x9b3   :  { %10879 = vmatprep.mubr.msk.f32.mxu0 %vm8897_vm4, %v8779_v51  ;;  %12546 = vmatpush3.bf16.msra.mxu0 %v12543_v22  ;;  %v9290_v51 = vld [vmem:[%s19642_s8 + $0xa0] sm:$0xff]  ;;  %v9422_v22 = vld [vmem:[%s19642_s8 + $0xd8] sm:$0xff] }
 0x9b4   :  { %12548 = vmatprep.subr.bf16.mxu0 %v12547_v61  ;;  %v12591_v18 = vpack.c.bf16 %v9422_v22, %v9421_v34  ;;  %v9820_v34 = vld [vmem:[%s19642_s8 + $0x190] sm:$0xff]  ;;  %v9821_v22 = vld [vmem:[%s19642_s8 + $0x198] sm:$0xff] }
 0x9b6   :  { %8994 = vmatmul.mubr.f32.gmra.mrb[122].mxu0 %v8778_v20  ;;  %v9291_v20 = vld [vmem:[%s19642_s8 + $0xa8] sm:$0xff] }
 0x9b7   :  { %10880 = vmatprep.mubr.msk.f32.mxu0 %vm8897_vm4, %v8781_v41  ;;  %12550 = vmatpush3.bf16.msra.mxu0 %v12547_v61  ;;  %v9423_v61 = vld [vmem:[%s19642_s8 + $0xe0] sm:$0xff] }
 0x9b8   :  { %12552 = vmatprep.subr.bf16.mxu0 %v12551_v11 }
 0x9ba   :  { %8999 = vmatmul.mubr.f32.gmra.mrb[124].mxu0 %v8780_v32  ;;  %v12579_v32 = vpack.c.bf16 %v9291_v20, %v9290_v51 }
 0x9bb   :  { %10881 = vmatprep.mubr.msk.f32.mxu0 %vm8897_vm4, %v8783_v37  ;;  %12554 = vmatpush3.bf16.msra.mxu0 %v12551_v11  ;;  %v12595_v11 = vpack.c.bf16 %v9424_v6, %v9423_v61  ;;  %v9822_v6 = vld [vmem:[%s19642_s8 + $0x1a0] sm:$0xff] }
 0x9bc   :  { %12556 = vmatprep.subr.bf16.mxu0 %v12555_v50 }
 0x9be   :  { %9004 = vmatmul.mubr.f32.gmra.mrb[126].mxu0 %v8782_v26  ;;  %v9292_v26 = vld [vmem:[%s19642_s8 + $0xb0] sm:$0xff] }
 0x9bf   :  { %10882 = vmatprep.mubr.msk.f32.mxu0 %vm8897_vm4, %v8785_v21  ;;  %v9293_v21 = vld [vmem:[%s19642_s8 + $0xb8] sm:$0xff] }
 0x9c2   :  { %9009 = vmatmul.mubr.f32.gmra.mrb[128].mxu0 %v8784_v59 }
 0x9c3   :  { %10883 = vmatprep.mubr.msk.f32.mxu0 %vm8897_vm4, %v8787_v60  ;;  %v12583_v60 = vpack.c.bf16 %v9293_v21, %v9292_v26  ;;  %v9692_v26 = vld [vmem:[%s19642_s8 + $0x178] sm:$0xff] }
 0x9c6   :  { %9014 = vmatmul.mubr.f32.gmra.mrb[130].mxu0 %v8786_v38 }
 0xa81   :  { %v8985_v57 = vpop.f32.mrb[118].mxu0 }
 0xa82   :  { %9019 = vst.msk [vmem:[#allocation5] sm:$0xff] %vm8754_vm5, %v8985_v57  ;;  %v8987_v15 = vpop.f32.mrb[119].mxu0 }
 0xa85   :  { %v8990_v1 = vpop.f32.mrb[120].mxu0 }
 0xa86   :  { %9020 = vst.msk [vmem:[#allocation5 + $0x8] sm:$0xff] %vm8754_vm5, %v8990_v1  ;;  %v8992_v13 = vpop.f32.mrb[121].mxu0 }
 0xa87   :  { %v9552_v13 = vld [vmem:[%s19642_s8 + $0x100] sm:$0xff] }
 0xa89   :  { %v8995_v17 = vpop.f32.mrb[122].mxu0  ;;  %v9026_v58 = vld [vmem:[#allocation5] sm:$0xff] }
 0xa8a   :  { %9021 = vst.msk [vmem:[#allocation5 + $0x10] sm:$0xff] %vm8754_vm5, %v8995_v17  ;;  %v8997_v53 = vpop.f32.mrb[123].mxu0  ;;  %v9553_v17 = vld [vmem:[%s19642_s8 + $0x108] sm:$0xff] }
 0xa8d   :  { %v9000_v45 = vpop.f32.mrb[124].mxu0  ;;  %v9040_v47 = vld [vmem:[#allocation5 + $0x1] sm:$0xff] }
 0xa8e   :  { %9022 = vst.msk [vmem:[#allocation5 + $0x18] sm:$0xff] %vm8754_vm5, %v9000_v45  ;;  %v9002_v49 = vpop.f32.mrb[125].mxu0  ;;  %12030 = vmatprep.mubr.msk.f32.mxu0 %vm8754_vm5, %v9040_v47  ;;  %v19210_v52 = vld [vmem:[#allocation5 + $0x8] sm:$0xff]  ;;  %v12603_v45 = vpack.c.bf16 %v9553_v17, %v9552_v13  ;;  %v9554_v47 = vld [vmem:[%s19642_s8 + $0x110] sm:$0xff]  ;;  %v9825_v13 = vld [vmem:[%s19642_s8 + $0x1b8] sm:$0xff] }
 0xa8f   :  { %v9280_v0 = vld [vmem:[#allocation5 + $0x2] sm:$0xff]  ;;  %v12607_v3 = vpack.c.bf16 %v9555_v62, %v9554_v47 }
 0xa90   :  { %v9413_v53 = vld [vmem:[#allocation5 + $0x4] sm:$0xff] }
 0xa91   :  { %v9005_v48 = vpop.f32.mrb[126].mxu0  ;;  %v19165_v63 = vld [vmem:[#allocation5 + $0x9] sm:$0xff]  ;;  %v9951_v47 = vld [vmem:[%s19642_s8 + $0x1c0] sm:$0xff] }
 0xa92   :  { %9023 = vst.msk [vmem:[#allocation5 + $0x20] sm:$0xff] %vm8754_vm5, %v9005_v48  ;;  %v9007_v36 = vpop.f32.mrb[127].mxu0  ;;  %12031 = vmatmul.mubr.msk.f32.vlgmr.msra.gmra.mrb[132].mxu0 %vm8754_vm5, %v19165_v63  ;;  %v19220_v41 = vld [vmem:[#allocation5 + $0x10] sm:$0xff]  ;;  %v9557_v48 = vld [vmem:[%s19642_s8 + $0x128] sm:$0xff] }
 0xa93   :  { %12558 = vmatpush3.bf16.msra.mxu0 %v12555_v50  ;;  %v19252_v43 = vld [vmem:[#allocation5 + $0xa] sm:$0xff]  ;;  %v9426_v50 = vld [vmem:[%s19642_s8 + $0xf8] sm:$0xff] }
 0xa94   :  { %12560 = vmatprep.subr.bf16.mxu0 %v12559_v5  ;;  %v12599_v15 = vpack.c.bf16 %v9426_v50, %v9425_v23  ;;  %v9414_v49 = vld [vmem:[#allocation5 + $0xc] sm:$0xff] }
 0xa95   :  { %v9010_v42 = vpop.f32.mrb[128].mxu0  ;;  %v19176_v40 = vld [vmem:[#allocation5 + $0x11] sm:$0xff]  ;;  %v9546_v44 = vld [vmem:[#allocation5 + $0x5] sm:$0xff] }
 0xa96   :  { %9024 = vst.msk [vmem:[#allocation5 + $0x28] sm:$0xff] %vm8754_vm5, %v9010_v42  ;;  %v9012_v27 = vpop.f32.mrb[129].mxu0  ;;  %12033 = vmatprep.mubr.msk.f32.mxu0 %vm8754_vm5, %v19176_v40  ;;  %v19224_v37 = vld [vmem:[#allocation5 + $0x18] sm:$0xff]  ;;  %v9547_v30 = vld [vmem:[#allocation5 + $0xd] sm:$0xff] }
 0xa97   :  { %12562 = vmatpush3.bf16.msra.mxu0 %v12559_v5  ;;  %v19262_v14 = vld [vmem:[#allocation5 + $0x12] sm:$0xff]  ;;  %v9556_v5 = vld [vmem:[%s19642_s8 + $0x120] sm:$0xff]  ;;  %v9952_v62 = vld [vmem:[%s19642_s8 + $0x1c8] sm:$0xff] }
 0xa98   :  { %12564 = vmatprep.subr.bf16.mxu0 %v12563_v19  ;;  %v9415_v31 = vld [vmem:[#allocation5 + $0x14] sm:$0xff]  ;;  %v12611_v55 = vpack.c.bf16 %v9557_v48, %v9556_v5 }
 0xa99   :  { %v9015_v9 = vpop.f32.mrb[130].mxu0  ;;  %v19187_v35 = vld [vmem:[#allocation5 + $0x19] sm:$0xff]  ;;  %v9680_v61 = vld [vmem:[#allocation5 + $0xe] sm:$0xff] }
 0xa9a   :  { %9025 = vst.msk [vmem:[#allocation5 + $0x30] sm:$0xff] %vm8754_vm5, %v9015_v9  ;;  %12034 = vmatmul.mubr.msk.f32.gmra.mrb[134].mxu0 %vm8754_vm5, %v19187_v35  ;;  %v9017_v7 = vpop.f32.mrb[131].mxu0  ;;  %v19234_v59 = vld [vmem:[#allocation5 + $0x20] sm:$0xff]  ;;  %v9559_v42 = vld [vmem:[%s19642_s8 + $0x138] sm:$0xff]  ;;  %v9686_v9 = vld [vmem:[%s19642_s8 + $0x148] sm:$0xff] }
 0xa9b   :  { %12566 = vmatpush3.bf16.msra.mxu0 %v12563_v19  ;;  %v19266_v8 = vld [vmem:[#allocation5 + $0x1a] sm:$0xff]  ;;  %v9558_v19 = vld [vmem:[%s19642_s8 + $0x130] sm:$0xff] }
 0xa9c   :  { %12568 = vmatprep.subr.bf16.mxu0 %v12567_v10  ;;  %v9416_v36 = vld [vmem:[#allocation5 + $0x1c] sm:$0xff]  ;;  %v12615_v29 = vpack.c.bf16 %v9559_v42, %v9558_v19  ;;  %v9687_v7 = vld [vmem:[%s19642_s8 + $0x150] sm:$0xff] }
 0xa9d   :  { %v19198_v4 = vld [vmem:[#allocation5 + $0x21] sm:$0xff]  ;;  %v9045_v56 = vld [vmem:[#allocation5 + $0x29] sm:$0x3f]  ;;  %v9681_v23 = vld [vmem:[#allocation5 + $0x16] sm:$0xff] }
 0xa9e   :  { %12036 = vmatprep.mubr.msk.f32.mxu0 %vm8754_vm5, %v19198_v4  ;;  %v9031_v38 = vld [vmem:[#allocation5 + $0x28] sm:$0x3f]  ;;  %v9549_v20 = vld [vmem:[#allocation5 + $0x1d] sm:$0xff] }
 0xa9f   :  { %12037 = vmatmul.mubr.msk.f32.gmra.mrb[136].mxu0 %vm8754_vm5, %v9045_v56  ;;  %v19276_v57 = vld [vmem:[#allocation5 + $0x22] sm:$0xff]  ;;  %v9285_v1 = vld [vmem:[#allocation5 + $0x2a] sm:$0x3f]  ;;  %v9688_v56 = vld [vmem:[%s19642_s8 + $0x158] sm:$0xff] }
 0xaa0   :  { %12570 = vmatpush3.bf16.msra.mxu0 %v12567_v10  ;;  %12055 = vmatprep.mubr.msk.f32.mxu0 %vm8754_vm5, %v9026_v58  ;;  %v9417_v39 = vld [vmem:[#allocation5 + $0x24] sm:$0xff]  ;;  %v9954_v5 = vld [vmem:[%s19642_s8 + $0x1d8] sm:$0xff] }
 0xaa1   :  { %12572 = vmatprep.subr.bf16.mxu0 %v12571_v16  ;;  %v9418_v27 = vld [vmem:[#allocation5 + $0x2c] sm:$0x3f]  ;;  %v9685_v10 = vld [vmem:[%s19642_s8 + $0x140] sm:$0xff]  ;;  %v9958_v19 = vld [vmem:[%s19642_s8 + $0x1f8] sm:$0xff] }
 0xaa2   :  { %v12619_v25 = vpack.c.bf16 %v9686_v9, %v9685_v10  ;;  %v9690_v58 = vld [vmem:[%s19642_s8 + $0x168] sm:$0xff]  ;;  %v10087_v10 = vld [vmem:[%s19642_s8 + $0x218] sm:$0xff] }
 0xaa3   :  { %12056 = vmatmul.mubr.msk.f32.vlgmr.msra.gmra.mrb[132].mxu0 %vm8754_vm5, %v19210_v52  ;;  %v12627_v51 = vpack.c.bf16 %v9690_v58, %v9689_v12  ;;  %v9550_v21 = vld [vmem:[#allocation5 + $0x25] sm:$0xff] }
 0xaa4   :  { %12574 = vmatpush3.bf16.msra.mxu0 %v12571_v16  ;;  %12058 = vmatprep.mubr.msk.f32.mxu0 %vm8754_vm5, %v19220_v41  ;;  %v12623_v16 = vpack.c.bf16 %v9688_v56, %v9687_v7  ;;  %v9683_v17 = vld [vmem:[#allocation5 + $0x26] sm:$0xff]  ;;  %v10090_v7 = vld [vmem:[%s19642_s8 + $0x230] sm:$0xff]  ;;  %v10091_v56 = vld [vmem:[%s19642_s8 + $0x238] sm:$0xff] }
 0xaa5   :  { %12576 = vmatprep.subr.bf16.mxu0 %v12575_v54  ;;  %v9816_v42 = vld [vmem:[#allocation5 + $0x28] sm:$0xff] }
 0xaa7   :  { %12059 = vmatmul.mubr.msk.f32.gmra.mrb[134].mxu0 %vm8754_vm5, %v19224_v37 }
 0xaa8   :  { %12578 = vmatpush3.bf16.msra.mxu0 %v12575_v54  ;;  %12061 = vmatprep.mubr.msk.f32.mxu0 %vm8754_vm5, %v19234_v59  ;;  %v9548_v54 = vld [vmem:[#allocation5 + $0x15] sm:$0xff] }
 0xaa9   :  { %12580 = vmatprep.subr.bf16.mxu0 %v12579_v32 }
 0xaab   :  { %12062 = vmatmul.mubr.msk.f32.gmra.mrb[136].mxu0 %vm8754_vm5, %v9031_v38  ;;  %v9551_v38 = vld [vmem:[#allocation5 + $0x2d] sm:$0x3f] }
 0xaac   :  { %12582 = vmatpush3.bf16.msra.mxu0 %v12579_v32  ;;  %12080 = vmatprep.mubr.msk.f32.mxu0 %vm8754_vm5, %v9280_v0  ;;  %v9691_v32 = vld [vmem:[%s19642_s8 + $0x170] sm:$0xff]  ;;  %v9679_v0 = vld [vmem:[#allocation5 + $0x6] sm:$0xff] }
 0xaad   :  { %12584 = vmatprep.subr.bf16.mxu0 %v12583_v60 }
 0xab0   :  { %12586 = vmatpush3.bf16.msra.mxu0 %v12583_v60  ;;  %v12631_v60 = vpack.c.bf16 %v9692_v26, %v9691_v32 }
 0xab1   :  { %12588 = vmatprep.subr.bf16.mxu0 %v12587_v24 }
 0xab3   :  { %12081 = vmatmul.mubr.msk.f32.vlgmr.msra.gmra.mrb[132].mxu0 %vm8754_vm5, %v19252_v43 }
 0xab4   :  { %12083 = vmatprep.mubr.msk.f32.mxu0 %vm8754_vm5, %v19262_v14  ;;  %12590 = vmatpush3.bf16.msra.mxu0 %v12587_v24  ;;  %v12635_v24 = vpack.c.bf16 %v9819_v2, %v9818_v33 }
 0xab5   :  { %12592 = vmatprep.subr.bf16.mxu0 %v12591_v18 }
 0xab7   :  { %12084 = vmatmul.mubr.msk.f32.gmra.mrb[134].mxu0 %vm8754_vm5, %v19266_v8 }
 0xab8   :  { %12086 = vmatprep.mubr.msk.f32.mxu0 %vm8754_vm5, %v19276_v57  ;;  %12594 = vmatpush3.bf16.msra.mxu0 %v12591_v18  ;;  %v12639_v18 = vpack.c.bf16 %v9821_v22, %v9820_v34 }
 0xab9   :  { %12596 = vmatprep.subr.bf16.mxu0 %v12595_v11 }
 0xabb   :  { %12087 = vmatmul.mubr.msk.f32.gmra.mrb[136].mxu0 %vm8754_vm5, %v9285_v1  ;;  %v9824_v1 = vld [vmem:[%s19642_s8 + $0x1b0] sm:$0xff] }
 0xabc   :  { %12598 = vmatpush3.bf16.msra.mxu0 %v12595_v11  ;;  %12105 = vmatprep.mubr.msk.f32.mxu0 %vm8754_vm5, %v9413_v53  ;;  %v9823_v11 = vld [vmem:[%s19642_s8 + $0x1a8] sm:$0xff]  ;;  %v12647_v53 = vpack.c.bf16 %v9825_v13, %v9824_v1 }
 0xabd   :  { %12600 = vmatprep.subr.bf16.mxu0 %v12599_v15  ;;  %v12643_v50 = vpack.c.bf16 %v9823_v11, %v9822_v6 }
 0xac0   :  { %12602 = vmatpush3.bf16.msra.mxu0 %v12599_v15  ;;  %v9682_v15 = vld [vmem:[#allocation5 + $0x1e] sm:$0xff] }
 0xac1   :  { %12604 = vmatprep.subr.bf16.mxu0 %v12603_v45 }
 0xac3   :  { %12106 = vmatmul.mubr.msk.f32.vlgmr.msra.gmra.mrb[132].mxu0 %vm8754_vm5, %v9414_v49  ;;  %v9953_v49 = vld [vmem:[%s19642_s8 + $0x1d0] sm:$0xff] }
 0xac4   :  { %12108 = vmatprep.mubr.msk.f32.mxu0 %vm8754_vm5, %v9415_v31  ;;  %12606 = vmatpush3.bf16.msra.mxu0 %v12603_v45  ;;  %v9684_v45 = vld [vmem:[#allocation5 + $0x2e] sm:$0x3f]  ;;  %v12655_v48 = vpack.c.bf16 %v9954_v5, %v9953_v49  ;;  %v9955_v31 = vld [vmem:[%s19642_s8 + $0x1e0] sm:$0xff] }
 0xac5   :  { %12608 = vmatprep.subr.bf16.mxu0 %v12607_v3 }
 0xac7   :  { %12109 = vmatmul.mubr.msk.f32.gmra.mrb[134].mxu0 %vm8754_vm5, %v9416_v36  ;;  %v9957_v36 = vld [vmem:[%s19642_s8 + $0x1f0] sm:$0xff] }
 0xac8   :  { %12111 = vmatprep.mubr.msk.f32.mxu0 %vm8754_vm5, %v9417_v39  ;;  %12610 = vmatpush3.bf16.msra.mxu0 %v12607_v3  ;;  %v12651_v3 = vpack.c.bf16 %v9952_v62, %v9951_v47  ;;  %v10084_v39 = vld [vmem:[%s19642_s8 + $0x200] sm:$0xff] }
 0xac9   :  { %12612 = vmatprep.subr.bf16.mxu0 %v12611_v55 }
 0xacb   :  { %12112 = vmatmul.mubr.msk.f32.gmra.mrb[136].mxu0 %vm8754_vm5, %v9418_v27  ;;  %v10086_v27 = vld [vmem:[%s19642_s8 + $0x210] sm:$0xff] }
 0xacc   :  { %12614 = vmatpush3.bf16.msra.mxu0 %v12611_v55  ;;  %12130 = vmatprep.mubr.msk.f32.mxu0 %vm8754_vm5, %v9546_v44  ;;  %v12671_v9 = vpack.c.bf16 %v10087_v10, %v10086_v27  ;;  %v10088_v44 = vld [vmem:[%s19642_s8 + $0x220] sm:$0xff] }
 0xacd   :  { %12616 = vmatprep.subr.bf16.mxu0 %v12615_v29 }
 0xad0   :  { %12618 = vmatpush3.bf16.msra.mxu0 %v12615_v29  ;;  %v10085_v29 = vld [vmem:[%s19642_s8 + $0x208] sm:$0xff] }
 0xad1   :  { %12620 = vmatprep.subr.bf16.mxu0 %v12619_v25 }
 0xad3   :  { %12131 = vmatmul.mubr.msk.f32.vlgmr.msra.gmra.mrb[132].mxu0 %vm8754_vm5, %v9547_v30  ;;  %v10083_v30 = vld [vmem:[#allocation5 + $0x32] sm:$0x3f] }
 0xad4   :  { %12133 = vmatprep.mubr.msk.f32.mxu0 %vm8754_vm5, %v9548_v54  ;;  %12622 = vmatpush3.bf16.msra.mxu0 %v12619_v25 }
 0xad5   :  { %12624 = vmatprep.subr.bf16.mxu0 %v12623_v16 }
 0xad7   :  { %12134 = vmatmul.mubr.msk.f32.gmra.mrb[134].mxu0 %vm8754_vm5, %v9549_v20 }
 0xad8   :  { %12136 = vmatprep.mubr.msk.f32.mxu0 %vm8754_vm5, %v9550_v21  ;;  %12626 = vmatpush3.bf16.msra.mxu0 %v12623_v16  ;;  %v9949_v16 = vld [vmem:[#allocation5 + $0x29] sm:$0xff] }
 0xad9   :  { %12628 = vmatprep.subr.bf16.mxu0 %v12627_v51 }
 0xadb   :  { %12137 = vmatmul.mubr.msk.f32.gmra.mrb[136].mxu0 %vm8754_vm5, %v9551_v38 }
 0xadc   :  { %12630 = vmatpush3.bf16.msra.mxu0 %v12627_v51  ;;  %12155 = vmatprep.mubr.msk.f32.mxu0 %vm8754_vm5, %v9679_v0 }
 0xadd   :  { %12632 = vmatprep.subr.bf16.mxu0 %v12631_v60 }
 0xae0   :  { %12634 = vmatpush3.bf16.msra.mxu0 %v12631_v60 }
 0xae1   :  { %12636 = vmatprep.subr.bf16.mxu0 %v12635_v24 }
 0xae3   :  { %12156 = vmatmul.mubr.msk.f32.vlgmr.msra.gmra.mrb[132].mxu0 %vm8754_vm5, %v9680_v61 }
 0xae4   :  { %12158 = vmatprep.mubr.msk.f32.mxu0 %vm8754_vm5, %v9681_v23  ;;  %12638 = vmatpush3.bf16.msra.mxu0 %v12635_v24 }
 0xae5   :  { %12640 = vmatprep.subr.bf16.mxu0 %v12639_v18 }
 0xae7   :  { %12159 = vmatmul.mubr.msk.f32.gmra.mrb[134].mxu0 %vm8754_vm5, %v9682_v15 }
 0xae8   :  { %12161 = vmatprep.mubr.msk.f32.mxu0 %vm8754_vm5, %v9683_v17  ;;  %12642 = vmatpush3.bf16.msra.mxu0 %v12639_v18 }
 0xae9   :  { %12644 = vmatprep.subr.bf16.mxu0 %v12643_v50 }
 0xaeb   :  { %12162 = vmatmul.mubr.msk.f32.gmra.mrb[136].mxu0 %vm8754_vm5, %v9684_v45 }
 0xaec   :  { %12646 = vmatpush3.bf16.msra.mxu0 %v12643_v50  ;;  %12180 = vmatprep.mubr.msk.f32.mxu0 %vm8754_vm5, %v19210_v52  ;;  %v9956_v52 = vld [vmem:[%s19642_s8 + $0x1e8] sm:$0xff] }
 0xaed   :  { %12648 = vmatprep.subr.bf16.mxu0 %v12647_v53  ;;  %v12659_v55 = vpack.c.bf16 %v9956_v52, %v9955_v31 }
 0xaf0   :  { %12650 = vmatpush3.bf16.msra.mxu0 %v12647_v53 }
 0xaf1   :  { %12652 = vmatprep.subr.bf16.mxu0 %v12651_v3 }
 0xaf3   :  { %12181 = vmatmul.mubr.msk.f32.vlgmr.msra.gmra.mrb[132].mxu0 %vm8754_vm5, %v19220_v41  ;;  %v12663_v41 = vpack.c.bf16 %v9958_v19, %v9957_v36 }
 0xaf4   :  { %12183 = vmatprep.mubr.msk.f32.mxu0 %vm8754_vm5, %v19224_v37  ;;  %12654 = vmatpush3.bf16.msra.mxu0 %v12651_v3  ;;  %v9817_v37 = vld [vmem:[#allocation5 + $0x30] sm:$0x3f] }
 0xaf5   :  { %12656 = vmatprep.subr.bf16.mxu0 %v12655_v48 }
 0xaf7   :  { %12184 = vmatmul.mubr.msk.f32.gmra.mrb[134].mxu0 %vm8754_vm5, %v19234_v59  ;;  %v12667_v59 = vpack.c.bf16 %v10085_v29, %v10084_v39 }
 0xaf8   :  { %12186 = vmatprep.mubr.msk.f32.mxu0 %vm8754_vm5, %v9816_v42  ;;  %12658 = vmatpush3.bf16.msra.mxu0 %v12655_v48 }
 0xaf9   :  { %12660 = vmatprep.subr.bf16.mxu0 %v12659_v55 }
 0xafb   :  { %12187 = vmatmul.mubr.msk.f32.gmra.mrb[136].mxu0 %vm8754_vm5, %v9817_v37 }
 0xafc   :  { %12662 = vmatpush3.bf16.msra.mxu0 %v12659_v55  ;;  %12205 = vmatprep.mubr.msk.f32.mxu0 %vm8754_vm5, %v19165_v63  ;;  %v10089_v63 = vld [vmem:[%s19642_s8 + $0x228] sm:$0xff] }
 0xafd   :  { %12664 = vmatprep.subr.bf16.mxu0 %v12663_v41  ;;  %v12675_v25 = vpack.c.bf16 %v10089_v63, %v10088_v44 }
 0xb00   :  { %12666 = vmatpush3.bf16.msra.mxu0 %v12663_v41 }
 0xb01   :  { %12668 = vmatprep.subr.bf16.mxu0 %v12667_v59 }
 0xb03   :  { %12206 = vmatmul.mubr.msk.f32.vlgmr.msra.gmra.mrb[132].mxu0 %vm8754_vm5, %v19176_v40  ;;  %v12679_v40 = vpack.c.bf16 %v10091_v56, %v10090_v7 }
 0xb04   :  { %12208 = vmatprep.mubr.msk.f32.mxu0 %vm8754_vm5, %v19187_v35  ;;  %12670 = vmatpush3.bf16.msra.mxu0 %v12667_v59  ;;  %v9950_v35 = vld [vmem:[#allocation5 + $0x31] sm:$0x3f] }
 0xb05   :  { %12672 = vmatprep.subr.bf16.mxu0 %v12671_v9 }
 0xb07   :  { %12209 = vmatmul.mubr.msk.f32.gmra.mrb[134].mxu0 %vm8754_vm5, %v19198_v4  ;;  %v10082_v4 = vld [vmem:[#allocation5 + $0x2a] sm:$0xff] }
 0xb08   :  { %12211 = vmatprep.mubr.msk.f32.mxu0 %vm8754_vm5, %v9949_v16  ;;  %12674 = vmatpush3.bf16.msra.mxu0 %v12671_v9 }
 0xb09   :  { %12676 = vmatprep.subr.bf16.mxu0 %v12675_v25 }
 0xb0b   :  { %12212 = vmatmul.mubr.msk.f32.gmra.mrb[136].mxu0 %vm8754_vm5, %v9950_v35  ;;  %v10377_v35 = vld [vmem:[%s19644_s10 + $0x88] sm:$0xff] }
 0xb0c   :  { %12678 = vmatpush3.bf16.msra.mxu0 %v12675_v25  ;;  %12230 = vmatprep.mubr.msk.f32.mxu0 %vm8754_vm5, %v19252_v43  ;;  %v10938_v43 = vld [vmem:[%s19643_s9] ss:$0 sm:$0xff] }
 0xb0d   :  { %12680 = vmatprep.subr.bf16.mxu0 %v12679_v40 }
 0xb10   :  { %12682 = vmatpush3.bf16.msra.mxu0 %v12679_v40  ;;  %v10376_v40 = vld [vmem:[%s19644_s10 + $0x80] sm:$0xff] }
 0xb13   :  { %12231 = vmatmul.mubr.msk.f32.vlgmr.msra.gmra.mrb[132].mxu0 %vm8754_vm5, %v19262_v14 }
 0xb14   :  { %12233 = vmatprep.mubr.msk.f32.mxu0 %vm8754_vm5, %v19266_v8 }
 0xb17   :  { %12234 = vmatmul.mubr.msk.f32.gmra.mrb[134].mxu0 %vm8754_vm5, %v19276_v57 }
 0xb18   :  { %12236 = vmatprep.mubr.msk.f32.mxu0 %vm8754_vm5, %v10082_v4 }
 0xb1b   :  { %12237 = vmatmul.mubr.msk.f32.gmra.mrb[136].mxu0 %vm8754_vm5, %v10083_v30  ;;  %v10236_v30 = vld [vmem:[%s19637_s3] sm:$0xf] }
 0xbe6   :  { %v12232_v12 = vpop.f32.mrb[132].mxu0 }
 0xbe7   :  { %v10219_v58 = vadd.f32 %v12232_v12, %v10938_v43  ;;  %v10176_v54 = vpop.f32.mrb[133].mxu0  ;;  %v10378_v12 = vld [vmem:[%s19644_s10 + $0x90] sm:$0xff] }
 0xbe8   :  { %v10218_v14 = vadd.f32 %v10938_v43, %v10176_v54 }
 0xbe9   :  { %v10225_v51 = vmax.f32 %v10219_v58, 0.0  ;;  %v10379_v58 = vld [vmem:[%s19644_s10 + $0x98] sm:$0xff] }
 0xbea   :  { %v10224_v20 = vmax.f32 %v10218_v14, 0.0  ;;  %v12235_v8 = vpop.f32.mrb[134].mxu0  ;;  %v12697_v54 = vpack.c.bf16 %v10379_v58, %v10378_v12  ;;  %v10380_v14 = vld [vmem:[%s19644_s10 + $0xa0] sm:$0xff]  ;;  %v10551_v58 = vld [vmem:[%s19646_s12 + $0x50] sm:$0xff] }
 0xbeb   :  { %10231 = vst [vmem:[#allocation6 + $0x8] sm:$0xff] %v10225_v51  ;;  %v10221_v32 = vadd.f32 %v12235_v8, %v10938_v43  ;;  %v10186_v57 = vpop.f32.mrb[135].mxu0  ;;  %v10382_v8 = vld [vmem:[%s19644_s10 + $0xb0] sm:$0xff] }
 0xbec   :  { %10230 = vst [vmem:[#allocation6] sm:$0xff] %v10224_v20  ;;  %v10220_v26 = vadd.f32 %v10938_v43, %v10186_v57 }
 0xbed   :  { %v10227_v21 = vmax.f32 %v10221_v32, 0.0  ;;  %v10383_v32 = vld [vmem:[%s19644_s10 + $0xb8] sm:$0xff] }
 0xbee   :  { %v10226_v60 = vmax.f32 %v10220_v26, 0.0  ;;  %v12238_v38 = vpop.f32.mrb[136].mxu0  ;;  %v12703_v57 = vpack.c.bf16 %v10383_v32, %v10382_v8  ;;  %v10384_v26 = vld [vmem:[%s19644_s10 + $0xc0] sm:$0xff]  ;;  %v10555_v32 = vld [vmem:[%s19646_s12 + $0x70] sm:$0xff] }
 0xbef   :  { %10233 = vst [vmem:[#allocation6 + $0x18] sm:$0xff] %v10227_v21  ;;  %v10223_v33 = vadd.f32 %v12238_v38, %v10938_v43  ;;  %v10196_v2 = vpop.f32.mrb[137].mxu0  ;;  %v10386_v38 = vld [vmem:[%s19644_s10 + $0xd0] sm:$0xff] }
 0xbf0   :  { %10232 = vst [vmem:[#allocation6 + $0x10] sm:$0xff] %v10226_v60  ;;  %v10222_v0 = vadd.f32 %v10938_v43, %v10196_v2  ;;  %v12694_v43 = vpack.c.bf16 %v10377_v35, %v10376_v40  ;;  %v10547_v35 = vld [vmem:[%s19646_s12 + $0x30] sm:$0xff] }
 0xbf1   :  { %v10229_v24 = vmax.f32 %v10223_v33, 0.0  ;;  %v10387_v33 = vld [vmem:[%s19644_s10 + $0xd8] sm:$0xff] }
 0xbf2   :  { %v10228_v34 = vmax.f32 %v10222_v0, 0.0  ;;  %v12709_v2 = vpack.c.bf16 %v10387_v33, %v10386_v38  ;;  %v10388_v0 = vld [vmem:[%s19644_s10 + $0xe0] sm:$0xff]  ;;  %v10941_v33 = vld [vmem:[#allocation9] ss:$0 sm:$0xff] }
 0xbf3   :  { %10235 = vst [vmem:[#allocation6 + $0x28] sm:$0x3f] %v10229_v24  ;;  %v10243_v22 = vld [vmem:[#allocation6 + $0x1] sm:$0xff]  ;;  %v10389_v24 = vld [vmem:[%s19644_s10 + $0xe8] sm:$0xff] }
 0xbf4   :  { %v10255_v18 = vld [vmem:[#allocation6 + $0x4] sm:$0xff]  ;;  %10234 = vst [vmem:[#allocation6 + $0x20] sm:$0xff] %v10228_v34  ;;  %v10249_v6 = vmax.f32 %v10224_v20, %v10243_v22  ;;  %v12712_v22 = vpack.c.bf16 %v10389_v24, %v10388_v0 }
 0xbf5   :  { %v10261_v61 = vld [vmem:[#allocation6 + $0x5] sm:$0xff] }
 0xbf6   :  { %v10267_v11 = vmax.f32 %v10255_v18, %v10261_v61  ;;  %v10391_v18 = vld [vmem:[%s19644_s10 + $0xf8] sm:$0xff] }
 0xbf7   :  { %v10244_v23 = vld [vmem:[#allocation6 + $0x9] sm:$0xff]  ;;  %v10245_v17 = vld [vmem:[#allocation6 + $0x11] sm:$0xff] }
 0xbf8   :  { %v10256_v50 = vld [vmem:[#allocation6 + $0xc] sm:$0xff]  ;;  %v10250_v1 = vmax.f32 %v10225_v51, %v10244_v23  ;;  %v10257_v53 = vld [vmem:[#allocation6 + $0x14] sm:$0xff]  ;;  %v10273_v47 = vmax.f32 %v10249_v6, %v10267_v11  ;;  %v10251_v3 = vmax.f32 %v10226_v60, %v10245_v17 }
 0xbf9   :  { %v10262_v15 = vld [vmem:[#allocation6 + $0xd] sm:$0xff]  ;;  %v10263_v45 = vld [vmem:[#allocation6 + $0x15] sm:$0xff] }
 0xbfa   :  { %v10268_v13 = vmax.f32 %v10256_v50, %v10262_v15  ;;  %v10269_v49 = vmax.f32 %v10257_v53, %v10263_v45  ;;  %v10242_v5 = vld [vmem:[#allocation6 + $0x28] sm:$0x1]  ;;  %v10248_v48 = vld [vmem:[#allocation6 + $0x29] sm:$0x1]  ;;  %v10260_v31 = vld [vmem:[#allocation6 + $0x2c] sm:$0x1] }
 0xbfb   :  { %v10246_v52 = vld [vmem:[#allocation6 + $0x19] sm:$0xff]  ;;  %v10247_v37 = vld [vmem:[#allocation6 + $0x21] sm:$0xff]  ;;  %v10254_v39 = vmax.f32 %v10242_v5, %v10248_v48  ;;  %v10266_v10 = vld [vmem:[#allocation6 + $0x2d] sm:$0x1] }
 0xbfc   :  { %v10274_v62 = vmax.f32 %v10250_v1, %v10268_v13  ;;  %v10258_v55 = vld [vmem:[#allocation6 + $0x1c] sm:$0xff]  ;;  %v10252_v42 = vmax.f32 %v10227_v21, %v10246_v52  ;;  %v10259_v29 = vld [vmem:[#allocation6 + $0x24] sm:$0xff]  ;;  %v10253_v27 = vmax.f32 %v10228_v34, %v10247_v37  ;;  %v10275_v44 = vmax.f32 %v10251_v3, %v10269_v49  ;;  %v10381_v51 = vld [vmem:[%s19644_s10 + $0xa8] sm:$0xff] }
 0xbfd   :  { %v10264_v36 = vld [vmem:[#allocation6 + $0x1d] sm:$0xff]  ;;  %v10265_v59 = vld [vmem:[#allocation6 + $0x25] sm:$0xff]  ;;  %v10272_v25 = vmax.f32 %v10260_v31, %v10266_v10  ;;  %v12700_v20 = vpack.c.bf16 %v10381_v51, %v10380_v14  ;;  %v10385_v21 = vld [vmem:[%s19644_s10 + $0xc8] sm:$0xff] }
 0xbfe   :  { %v12684_v19 = vpack.c.bf16 %v10274_v62, %v10273_v47  ;;  %v10270_v41 = vmax.f32 %v10258_v55, %v10264_v36  ;;  %v10271_v9 = vmax.f32 %v10259_v29, %v10265_v59  ;;  %v12706_v60 = vpack.c.bf16 %v10385_v21, %v10384_v26  ;;  %v10390_v34 = vld [vmem:[%s19644_s10 + $0xf0] sm:$0xff]  ;;  %v10359_v23 = vld [vmem:[%s19644_s10] sm:$0xff]  ;;  %v10360_v50 = vld [vmem:[%s19644_s10 + $0x8] sm:$0xff] }
 0xbff   :  { %v10278_v16 = vmax.f32 %v10254_v39, %v10272_v25  ;;  %v12715_v61 = vpack.c.bf16 %v10391_v18, %v10390_v34  ;;  %v12718_v15 = vpack.c.bf16 %v10360_v50, %v10359_v23  ;;  %v10361_v1 = vld [vmem:[%s19644_s10 + $0x10] sm:$0xff]  ;;  %v10362_v13 = vld [vmem:[%s19644_s10 + $0x18] sm:$0xff]  ;;  %v10363_v45 = vld [vmem:[%s19644_s10 + $0x20] sm:$0xff] }
 0xc00   :  { %12685 = vmatpush3.bf16.msra.mxu1 %v12684_v19  ;;  %v10276_v63 = vmax.f32 %v10252_v42, %v10270_v41  ;;  %v10277_v56 = vmax.f32 %v10253_v27, %v10271_v9  ;;  %v12721_v53 = vpack.c.bf16 %v10362_v13, %v10361_v1  ;;  %v10364_v47 = vld [vmem:[%s19644_s10 + $0x28] sm:$0xff]  ;;  %v10365_v3 = vld [vmem:[%s19644_s10 + $0x30] sm:$0xff]  ;;  %v10366_v49 = vld [vmem:[%s19644_s10 + $0x38] sm:$0xff] }
 0xc01   :  { %12686 = vmatprep.subr.bf16.mxu1 %v19665_v46  ;;  %v12724_v62 = vpack.c.bf16 %v10364_v47, %v10363_v45  ;;  %v12727_v5 = vpack.c.bf16 %v10366_v49, %v10365_v3  ;;  %v10367_v48 = vld [vmem:[%s19644_s10 + $0x40] sm:$0xff]  ;;  %v10368_v31 = vld [vmem:[%s19644_s10 + $0x48] sm:$0xff]  ;;  %v10369_v55 = vld [vmem:[%s19644_s10 + $0x50] sm:$0xff] }
 0xc02   :  { %v12687_v7 = vpack.c.bf16 %v10276_v63, %v10275_v44  ;;  %v12690_v4 = vpack.c.bf16 %v10278_v16, %v10277_v56  ;;  %v12730_v52 = vpack.c.bf16 %v10368_v31, %v10367_v48  ;;  %v10370_v36 = vld [vmem:[%s19644_s10 + $0x58] sm:$0xff]  ;;  %v10371_v42 = vld [vmem:[%s19644_s10 + $0x60] sm:$0xff]  ;;  %v10372_v41 = vld [vmem:[%s19644_s10 + $0x68] sm:$0xff] }
 0xc03   :  { %v12733_v19 = vpack.c.bf16 %v10370_v36, %v10369_v55  ;;  %v12736_v37 = vpack.c.bf16 %v10372_v41, %v10371_v42  ;;  %v10373_v39 = vld [vmem:[%s19644_s10 + $0x70] sm:$0xff]  ;;  %v10374_v29 = vld [vmem:[%s19644_s10 + $0x78] sm:$0xff]  ;;  %v10541_v27 = vld [vmem:[%s19646_s12] sm:$0xff] }
 0xc04   :  { %12688 = vmatpush3.bf16.msra.mxu1 %v12687_v7  ;;  %v12739_v59 = vpack.c.bf16 %v10374_v29, %v10373_v39  ;;  %v10542_v10 = vld [vmem:[%s19646_s12 + $0x8] sm:$0xff]  ;;  %v10543_v44 = vld [vmem:[%s19646_s12 + $0x10] sm:$0xff]  ;;  %v10544_v63 = vld [vmem:[%s19646_s12 + $0x18] sm:$0xff] }
 0xc05   :  { %12689 = vmatprep.subr.bf16.mxu1 %v19665_v46  ;;  %v12742_v9 = vpack.c.bf16 %v10542_v10, %v10541_v27  ;;  %v12745_v7 = vpack.c.bf16 %v10544_v63, %v10543_v44  ;;  %v10545_v56 = vld [vmem:[%s19646_s12 + $0x20] sm:$0xff]  ;;  %v10546_v16 = vld [vmem:[%s19646_s12 + $0x28] sm:$0xff] }
 0xc06   :  { %v12748_v40 = vpack.c.bf16 %v10546_v16, %v10545_v56  ;;  %v10553_v51 = vld [vmem:[%s19646_s12 + $0x60] sm:$0xff] }
 0xc08   :  { %12692 = vmatpush3.bf16.msk.msra.mxu1 %vm12691_vm8, %v12690_v4 }
 0xc09   :  { %12693 = vmatprep.subr.bf16.mxu1 %v19665_v46 }
 0xc0b   :  { %12252 = vmatmul.mubr.msk.f32.vlgmr.msra.gmra.mrb[10].mxu1 %vm10279_vm9, %v10236_v30  ;;  %v10549_v30 = vld [vmem:[%s19646_s12 + $0x40] sm:$0xff] }
 0xc0c   :  { %12695 = vmatpush3.bf16.msra.mxu1 %v12694_v43  ;;  %12286 = vmatprep.mubr.msk.f32.mxu1 %vm13038_vm1, %v13039_v28  ;;  %v10550_v43 = vld [vmem:[%s19646_s12 + $0x48] sm:$0xff] }
 0xc0d   :  { %12696 = vmatprep.subr.bf16.mxu1 %v19665_v46  ;;  %v12754_v12 = vpack.c.bf16 %v10550_v43, %v10549_v30 }
 0xc10   :  { %12698 = vmatpush3.bf16.msra.mxu1 %v12697_v54  ;;  %v10552_v54 = vld [vmem:[%s19646_s12 + $0x58] sm:$0xff] }
 0xc11   :  { %12699 = vmatprep.subr.bf16.mxu1 %v19665_v46  ;;  %v12757_v14 = vpack.c.bf16 %v10552_v54, %v10551_v58 }
 0xc14   :  { %12701 = vmatpush3.bf16.msra.mxu1 %v12700_v20  ;;  %v10554_v20 = vld [vmem:[%s19646_s12 + $0x68] sm:$0xff] }
 0xc15   :  { %12702 = vmatprep.subr.bf16.mxu1 %v19665_v46  ;;  %v12760_v8 = vpack.c.bf16 %v10554_v20, %v10553_v51 }
 0xc18   :  { %12704 = vmatpush3.bf16.msra.mxu1 %v12703_v57  ;;  %v10556_v57 = vld [vmem:[%s19646_s12 + $0x78] sm:$0xff] }
 0xc19   :  { %12705 = vmatprep.subr.bf16.mxu1 %v19665_v46  ;;  %v12763_v26 = vpack.c.bf16 %v10556_v57, %v10555_v32 }
 0xc1c   :  { %12707 = vmatpush3.bf16.msra.mxu1 %v12706_v60 }
 0xc1d   :  { %12708 = vmatprep.subr.bf16.mxu1 %v19665_v46 }
 0xc20   :  { %12710 = vmatpush3.bf16.msra.mxu1 %v12709_v2 }
 0xc21   :  { %12711 = vmatprep.subr.bf16.mxu1 %v19665_v46 }
 0xc24   :  { %12713 = vmatpush3.bf16.msra.mxu1 %v12712_v22 }
 0xc25   :  { %12714 = vmatprep.subr.bf16.mxu1 %v19665_v46 }
 0xc28   :  { %12716 = vmatpush3.bf16.msra.mxu1 %v12715_v61 }
 0xc29   :  { %12717 = vmatprep.subr.bf16.mxu1 %v19665_v46 }
 0xcde   :  { %v10353_v6 = vpop.f32.mrb[10].mxu1 }
 0xcdf   :  { %10357 = vst [vmem:[#allocation7] sm:$0xf] %v10353_v6  ;;  %v12253_v11 = vpop.f32.mrb[11].mxu1  ;;  %v10943_v6 = vld [vmem:[#allocation13] ss:$0 sm:$0xff] }
 0xce6   :  { %v10375_v17 = vld [vmem:[#allocation7 + $0x2] sm:$0x3]  ;;  %v10358_v25 = vld [vmem:[#allocation7] sm:$0x3] }
 0xce7   :  { %12287 = vmatmul.mubr.f32.vlgmr.msra.gmra.mrb[12].mxu1 %v10375_v17 }
 0xce8   :  { %12719 = vmatpush3.bf16.msra.mxu1 %v12718_v15  ;;  %12321 = vmatprep.mubr.msk.f32.mxu1 %vm13038_vm1, %v13039_v28  ;;  %v10944_v15 = vld [vmem:[#allocation8] ss:$0 sm:$0xff] }
 0xce9   :  { %12720 = vmatprep.subr.bf16.mxu1 %v19665_v46 }
 0xcec   :  { %12722 = vmatpush3.bf16.msra.mxu1 %v12721_v53 }
 0xced   :  { %12723 = vmatprep.subr.bf16.mxu1 %v19665_v46 }
 0xcf0   :  { %12725 = vmatpush3.bf16.msra.mxu1 %v12724_v62 }
 0xcf1   :  { %12726 = vmatprep.subr.bf16.mxu1 %v19665_v46 }
 0xcf4   :  { %12728 = vmatpush3.bf16.msra.mxu1 %v12727_v5 }
 0xcf5   :  { %12729 = vmatprep.subr.bf16.mxu1 %v19665_v46 }
 0xcf8   :  { %12731 = vmatpush3.bf16.msra.mxu1 %v12730_v52 }
 0xcf9   :  { %12732 = vmatprep.subr.bf16.mxu1 %v19665_v46 }
 0xcfc   :  { %12734 = vmatpush3.bf16.msra.mxu1 %v12733_v19 }
 0xcfd   :  { %12735 = vmatprep.subr.bf16.mxu1 %v19665_v46 }
 0xd00   :  { %12737 = vmatpush3.bf16.msra.mxu1 %v12736_v37 }
 0xd01   :  { %12738 = vmatprep.subr.bf16.mxu1 %v19665_v46 }
 0xd04   :  { %12740 = vmatpush3.bf16.msra.mxu1 %v12739_v59 }
 0xd05   :  { %12741 = vmatprep.subr.bf16.mxu1 %v19665_v46 }
 0xd07   :  { %12322 = vmatmul.mubr.f32.vlgmr.msra.gmra.mrb[14].mxu1 %v10358_v25 }
 0xd08   :  { %12743 = vmatpush3.bf16.msra.mxu1 %v12742_v9  ;;  %12356 = vmatprep.mubr.msk.f32.mxu1 %vm13038_vm1, %v13039_v28  ;;  %v10548_v28 = vld [vmem:[%s19646_s12 + $0x38] sm:$0xff] }
 0xd09   :  { %12744 = vmatprep.subr.bf16.mxu1 %v19665_v46  ;;  %v12751_v4 = vpack.c.bf16 %v10548_v28, %v10547_v35 }
 0xd0c   :  { %12746 = vmatpush3.bf16.msra.mxu1 %v12745_v7 }
 0xd0d   :  { %12747 = vmatprep.subr.bf16.mxu1 %v19665_v46 }
 0xd10   :  { %12749 = vmatpush3.bf16.msra.mxu1 %v12748_v40 }
 0xd11   :  { %12750 = vmatprep.subr.bf16.mxu1 %v19665_v46 }
 0xd14   :  { %12752 = vmatpush3.bf16.msra.mxu1 %v12751_v4 }
 0xd15   :  { %12753 = vmatprep.subr.bf16.mxu1 %v19665_v46 }
 0xd18   :  { %12755 = vmatpush3.bf16.msra.mxu1 %v12754_v12 }
 0xd19   :  { %12756 = vmatprep.subr.bf16.mxu1 %v19665_v46 }
 0xd1c   :  { %12758 = vmatpush3.bf16.msra.mxu1 %v12757_v14 }
 0xd1d   :  { %12759 = vmatprep.subr.bf16.mxu1 %v19665_v46 }
 0xd20   :  { %12761 = vmatpush3.bf16.msra.mxu1 %v12760_v8 }
 0xd21   :  { %12762 = vmatprep.subr.bf16.mxu1 %v19665_v46  ;;  %v10942_v46 = vld [vmem:[#allocation11] ss:$0 sm:$0xff] }
 0xd24   :  { %12764 = vmatpush3.bf16.msra.mxu1 %v12763_v26 }
 0xdba   :  { %v10458_v21 = vpop.f32.mrb[12].mxu1 }
 0xdbb   :  { %v12288_v60 = vpop.f32.mrb[13].mxu1 }
 0xdda   :  { %v10528_v38 = vpop.f32.mrb[14].mxu1 }
 0xddb   :  { %v10529_v2 = vadd.f32 %v10528_v38, %v10458_v21  ;;  %v12323_v0 = vpop.f32.mrb[15].mxu1 }
 0xddd   :  { %v10539_v24 = vadd.f32 %v10941_v33, %v10529_v2 }
 0xddf   :  { %v10540_v34 = vmax.f32 %v10539_v24, 0.0 }
 0xde1   :  { %12357 = vmatmul.mubr.f32.vlgmr.msra.gmra.mrb[16].mxu1 %v10540_v34 }
 0xeb4   :  { %v10630_v22 = vpop.f32.mrb[16].mxu1 }
 0xeb5   :  { %v10631_v18 = vadd.f32 %v10942_v46, %v10630_v22  ;;  %v12358_v61 = vpop.f32.mrb[17].mxu1 }
 0xeb7   :  { %v10634_v11 = vmax.f32 %v10631_v18, 0.0 }
 0xeb9   :  { %v10642_v23 = vmul.f32 %v10943_v6, %v10634_v11 }
 0xebb   :  { %v10644_v50 = vsel %vm10643_vm10, %v10642_v23, 0.0 }
 0xebc   :  { %10645 = vadd.xlane.f32.xlu0 %v10644_v50 }
 0xf49   :  { %v10646_v1 = vpop.xlane.xlu0 %10645 }
 0xf4a   :  { %v10654_v13 = vadd.f32 %v10944_v15, %v10646_v1 }
 0xf4c   :  { %v10655_v17 = vand.u32 2147483647, %v10654_v13  ;;  %vm10659_vm12 = vcmp.ge.f32.partialorder %v10654_v13, 0.0 }
 0xf4e   :  { %v10656_v53 = vsub.f32 0.0, %v10655_v17 }
 0xf50   :  { %v10657_v45 = vmul.f32 1.442695, %v10656_v53 }
 0xf52   :  { %12907 = vpow2.f32 %v10657_v45 }
 0xf5c   :  { %v12908_v47 = vpop.eup %12907 }
 0xf5d   :  { %v10660_v62 = vadd.f32 1.0, %v12908_v47 }
 0xf5f   :  { %12909 = vrcp.f32 %v10660_v62 }
 0xf69   :  { %v12910_v3 = vpop.eup %12909 }
 0xf6a   :  { %v10663_v49 = vmul.f32 %v12910_v3, %v12908_v47 }
 0xf6c   :  { %v10664_v5 = vsel %vm10659_vm12, %v12910_v3, %v10663_v49 }
 0xf6d   :  { %10666 = vst.msk [vmem:[%s19650_s16] sm:$0x3] %vm10665_vm11, %v10664_v5 }
 0xf6e   :  { %10671 = vsyncpa [#allocation10], 1 }
 0xf6f   :  { %10672 = vsyncpa [#allocation12], 1 }

</bundles_post_ra>
